<compile_context>
chip_gen: v6e
topology: v6e:2x2x1
jax: 0.10.0
libtpu: 0.0.40
codegen_flags: <defaults>
</compile_context>

<pallas_src>
import numpy as np
import jax
import jax.numpy as jnp
from jax import lax
from jax.experimental import pallas as pl
from jax.experimental.pallas import tpu as pltpu

# ---------------------------------------------------------------------------
# Static geometry of the fused conv kernel
# ---------------------------------------------------------------------------
P = 11                # common flattened spatial row pitch (valid cols <= 10/9/7)
XROWS = 144           # conv1 input rows: 11*11 valid blocks + zero pad for overlap reads
G1, G2, G3 = 121, 104, 77   # GEMM row counts for the conv1 / conv2 / conv3 stages
CLASSES = [(0, 0), (0, 1), (1, 0), (1, 1)]   # conv1 output parity classes (pi, pj)


def _conv1_plan():
    """Static per-class list of (weight_stack_index, input_row_offset).
    Tap (di, dj) is skipped when its weight is identically zero
    (pi == 0 forces di == 0, pj == 0 forces dj == 0) -> 9 non-zero taps."""
    plan, k = [], 0
    for pi, pj in CLASSES:
        cls = []
        for di in range(2):
            for dj in range(2):
                if (pi == 1 or di == 0) and (pj == 1 or dj == 0):
                    cls.append((k, di * P + dj))
                    k += 1
        plan.append(cls)
    return plan


CONV1_PLAN = _conv1_plan()


# ---------------------------------------------------------------------------
# Fused conv1 -> conv2 -> conv3 kernel (one grid step = one image)
# ---------------------------------------------------------------------------
def _fused_conv_kernel(x_ref, w1_ref, w2_ref, w3_ref,
                       b1_ref, b2_ref, b3_ref, o_ref):
    def acc_dots(terms):
        acc = jnp.dot(terms[0][0], terms[0][1], preferred_element_type=jnp.float32)
        for a, b in terms[1:]:
            acc = acc + jnp.dot(a, b, preferred_element_type=jnp.float32)
        return acc

    # conv1 (8x8, stride 4, 4->32): 9 stride-1 GEMM taps over the factor-8
    # space-to-depth input (rows = 11-pitch blocks, 256 channels). One (121, 32)
    # buffer per output-parity class; row q = a*11 + b holds h1[2a+pi, 2b+pj].
    h1 = []
    for taps in CONV1_PLAN:
        acc = acc_dots([(x_ref[off:off + G1, :], w1_ref[t]) for t, off in taps])
        h1.append(jnp.maximum(acc + b1_ref[...], 0.0).astype(jnp.bfloat16))

    # conv2 (4x4, stride 2, 32->64): 16 stride-1 taps; tap (i, j) reads parity
    # class (i%2, j%2) of h1 at a contiguous row offset (i//2)*11 + (j//2).
    terms2 = []
    for i in range(4):
        for j in range(4):
            cidx = 2 * (i % 2) + (j % 2)
            off = (i // 2) * P + (j // 2)
            terms2.append((h1[cidx][off:off + G2, :], w2_ref[i * 4 + j]))
    h2 = jnp.maximum(acc_dots(terms2) + b2_ref[...], 0.0).astype(jnp.bfloat16)

    # conv3 (3x3, stride 1, 64->32): 9 contiguous-slice taps, 11-pitch rows.
    terms3 = [(h2[i * P + j:i * P + j + G3, :], w3_ref[i * 3 + j])
              for i in range(3) for j in range(3)]
    h3 = jnp.maximum(acc_dots(terms3) + b3_ref[...], 0.0)

    # Keep only the 7x7 valid positions (pitch 11 -> dense 7x7, NHWC (h, w, c)).
    for r in range(7):
        o_ref[7 * r:7 * r + 7, :] = h3[P * r:P * r + 7, :].astype(o_ref.dtype)


def fused_convs(xs, w1, w2, w3, b1, b2, b3):
    """xs: (B, 144, 256) bf16 space-to-depth input. Returns (B, 49, 32) bf16."""
    B = xs.shape[0]
    flops = 2 * B * (9 * G1 * 256 * 32 + 16 * G2 * 32 * 64 + 9 * G3 * 64 * 32)
    bytes_accessed = (B * (XROWS * 256 + 49 * 32) * 2
                      + (w1.size + w2.size + w3.size) * 2
                      + (b1.size + b2.size + b3.size) * 4)
    return pl.pallas_call(
        _fused_conv_kernel,
        out_shape=jax.ShapeDtypeStruct((B, 49, 32), jnp.bfloat16),
        grid=(B,),
        in_specs=[
            pl.BlockSpec((None, XROWS, 256), lambda b: (b, 0, 0)),   # per-image input
            pl.BlockSpec((9, 256, 32), lambda b: (0, 0, 0)),         # conv1 class-tap weights
            pl.BlockSpec((16, 32, 64), lambda b: (0, 0, 0)),         # conv2 tap weights
            pl.BlockSpec((9, 64, 32), lambda b: (0, 0, 0)),          # conv3 tap weights
            pl.BlockSpec((1, 32), lambda b: (0, 0)),                 # b1
            pl.BlockSpec((1, 64), lambda b: (0, 0)),                 # b2
            pl.BlockSpec((1, 32), lambda b: (0, 0)),                 # b3
        ],
        out_specs=pl.BlockSpec((None, 49, 32), lambda b: (b, 0, 0)),
        compiler_params=pltpu.CompilerParams(
            dimension_semantics=("parallel",),
            vmem_limit_bytes=32 * 1024 * 1024),
        cost_estimate=pl.CostEstimate(flops=flops, transcendentals=0,
                                      bytes_accessed=bytes_accessed),
    )(xs, w1, w2, w3, b1, b2, b3)


# ---------------------------------------------------------------------------
# Fused matmul + bias + ReLU kernel (FC layer)
# ---------------------------------------------------------------------------
def _mm_bias_relu_kernel(x_ref, w_ref, b_ref, o_ref):
    acc = jnp.dot(x_ref[...], w_ref[...], preferred_element_type=jnp.float32)
    o_ref[...] = jnp.maximum(acc + b_ref[...], 0.0).astype(o_ref.dtype)


def matmul_bias_relu(x, w, b, out_dtype=jnp.float32, tn=256):
    """relu(x @ w + b).  x:(M,K) bf16, w:(K,N) bf16, b:(N,) f32."""
    M, K = x.shape
    N = w.shape[1]
    tm = M if M <= 512 else 512           # fixed row tile, bounded VMEM at any batch
    tn = min(tn, N)
    grid = (pl.cdiv(M, tm), pl.cdiv(N, tn))
    cost = pl.CostEstimate(flops=2 * M * K * N, transcendentals=0,
                           bytes_accessed=(M * K + K * N) * 2 + M * N * 4)
    return pl.pallas_call(
        _mm_bias_relu_kernel,
        out_shape=jax.ShapeDtypeStruct((M, N), out_dtype),
        grid=grid,
        in_specs=[
            pl.BlockSpec((tm, K), lambda i, j: (i, 0)),
            pl.BlockSpec((K, tn), lambda i, j: (0, j)),
            pl.BlockSpec((1, tn), lambda i, j: (0, j)),
        ],
        out_specs=pl.BlockSpec((tm, tn), lambda i, j: (i, j)),
        compiler_params=pltpu.CompilerParams(
            dimension_semantics=("parallel", "parallel"),
            vmem_limit_bytes=32 * 1024 * 1024),
        cost_estimate=cost,
    )(x, w, b.reshape(1, N))


# ---------------------------------------------------------------------------
# Parameters (PyTorch layout) and one-time kernel-layout preparation
# ---------------------------------------------------------------------------
def init_params(key):
    # TODO(synk): the real PPOEncoder torch.load()s a downloaded PPO checkpoint;
    # here same-shape parameters are initialized deterministically instead.
    ks = jax.random.split(key, 4)

    def w(k, shape, fan_in):
        return jax.random.normal(k, shape, jnp.float32) * (1.0 / jnp.sqrt(fan_in))

    return {
        "c1_w": w(ks[0], (32, 4, 8, 8), 4 * 8 * 8),
        "c1_b": jnp.zeros((32,), jnp.float32),
        "c2_w": w(ks[1], (64, 32, 4, 4), 32 * 4 * 4),
        "c2_b": jnp.zeros((64,), jnp.float32),
        "c3_w": w(ks[2], (32, 64, 3, 3), 64 * 3 * 3),
        "c3_b": jnp.zeros((32,), jnp.float32),
        "fc_w": w(ks[3], (512, 32 * 7 * 7), 32 * 7 * 7),
        "fc_b": jnp.zeros((512,), jnp.float32),
    }


def _conv1_weight_stack(w1):
    """w1: (32, 4, 8, 8) float np, already scaled by 1/255. Returns (9, 256, 32):
    for class (pi,pj) and tap (di,dj), entry k = hb*32 + wb*4 + c maps to
    kernel position (ki, kj) = (8*di + hb - 4*pi, 8*dj + wb - 4*pj) when valid."""
    mats = []
    for pi, pj in CLASSES:
        for di in range(2):
            for dj in range(2):
                if not ((pi == 1 or di == 0) and (pj == 1 or dj == 0)):
                    continue
                m = np.zeros((8, 8, 4, 32), np.float32)
                for hb in range(8):
                    ki = 8 * di + hb - 4 * pi
                    if not (0 <= ki < 8):
                        continue
                    for wb in range(8):
                        kj = 8 * dj + wb - 4 * pj
                        if 0 <= kj < 8:
                            m[hb, wb] = w1[:, :, ki, kj].T     # (cin=4, cout=32)
                mats.append(m.reshape(256, 32))
    return np.stack(mats)


def prepare_params(p):
    """PyTorch-layout params -> kernel layout: /255 folded into conv1, conv
    weights rearranged into per-tap (K, Cout) GEMM matrices, FC columns permuted
    from NCHW- to NHWC-flatten order, GEMM operands cast to bf16."""
    w1 = np.asarray(p["c1_w"], np.float32) / 255.0
    w2 = np.asarray(p["c2_w"], np.float32)
    w3 = np.asarray(p["c3_w"], np.float32)
    c1 = _conv1_weight_stack(w1)                                        # (9, 256, 32)
    c2 = np.stack([w2[:, :, i, j].T for i in range(4) for j in range(4)])   # (16, 32, 64)
    c3 = np.stack([w3[:, :, i, j].T for i in range(3) for j in range(3)])   # (9, 64, 32)
    fc = (np.asarray(p["fc_w"], np.float32).reshape(512, 32, 7, 7)
          .transpose(2, 3, 1, 0)              # (h, w, c, out) = NHWC flatten order
          .reshape(32 * 7 * 7, 512))
    return {
        "c1_w": jnp.asarray(c1, jnp.bfloat16),
        "c1_b": jnp.asarray(p["c1_b"], jnp.float32).reshape(1, 32),
        "c2_w": jnp.asarray(c2, jnp.bfloat16),
        "c2_b": jnp.asarray(p["c2_b"], jnp.float32).reshape(1, 64),
        "c3_w": jnp.asarray(c3, jnp.bfloat16),
        "c3_b": jnp.asarray(p["c3_b"], jnp.float32).reshape(1, 32),
        "fc_w": jnp.asarray(fc, jnp.bfloat16),
        "fc_b": jnp.asarray(p["fc_b"], jnp.float32),
    }


# ---------------------------------------------------------------------------
# Forward pass
# ---------------------------------------------------------------------------
def _prep_input(x):
    """NCHW [0, 255] frames -> factor-8 space-to-depth, flattened to (B, 144, 256)
    bf16 (rows 121..143 are zero padding used only by out-of-range GEMM rows)."""
    B = x.shape[0]
    h = jnp.transpose(x, (0, 2, 3, 1))                        # (B, 84, 84, 4)
    h = jnp.pad(h, ((0, 0), (0, 4), (0, 4), (0, 0)))          # (B, 88, 88, 4)
    h = h.reshape(B, 11, 8, 11, 8, 4).transpose(0, 1, 3, 2, 4, 5)
    h = h.reshape(B, 121, 256)                                # channel = hb*32 + wb*4 + c
    h = jnp.pad(h, ((0, 0), (0, XROWS - 121), (0, 0)))
    return h.astype(jnp.bfloat16)


@jax.jit
def ppo_encoder_forward(prepped, x):
    """Returns the PPO actor feature vectors (B, 512) — the CNNBase hidden that
    ppo_model.act(...) exposes (value / action heads do not affect this output).
    x: NCHW frames with raw [0, 255] pixel scale (/255 is folded into conv1)."""
    xs = _prep_input(x)
    h3 = fused_convs(xs, prepped["c1_w"], prepped["c2_w"], prepped["c3_w"],
                     prepped["c1_b"], prepped["c2_b"], prepped["c3_b"])   # (B, 49, 32)
    B = h3.shape[0]
    x_fc = h3.reshape(B, 49 * 32)                                          # NHWC flatten
    return matmul_bias_relu(x_fc, prepped["fc_w"], prepped["fc_b"],
                            out_dtype=jnp.float32)                         # (B, 512)


# ---------------------------------------------------------------------------
# Pure-JAX f32 reference (PyTorch-layout params) for correctness checking
# ---------------------------------------------------------------------------
def _reference_forward(params, x):
    h = x.astype(jnp.float32) / 255.0

    def conv(h, w, b, s):
        y = lax.conv_general_dilated(h, w, (s, s), "VALID",
                                     dimension_numbers=("NCHW", "OIHW", "NCHW"),
                                     precision=lax.Precision.HIGHEST)
        return jnp.maximum(y + b[None, :, None, None], 0.0)

    h = conv(h, params["c1_w"], params["c1_b"], 4)
    h = conv(h, params["c2_w"], params["c2_b"], 2)
    h = conv(h, params["c3_w"], params["c3_b"], 1)
    h = h.reshape(h.shape[0], -1)
    return jnp.maximum(h @ params["fc_w"].T + params["fc_b"], 0.0)


if __name__ == "__main__":
    key = jax.random.PRNGKey(0)
    k_p, k_x = jax.random.split(key)
    params = init_params(k_p)
    prepped = prepare_params(params)

    # Atari frame-stacked observation, NCHW, values in [0, 255) as in PPO rollouts.
    x = jax.random.uniform(k_x, (2, 4, 84, 84), jnp.float32, 0.0, 255.0)

    feats = jax.block_until_ready(ppo_encoder_forward(prepped, x))
    assert feats.shape == (2, 512), feats.shape

    ref = _reference_forward(params, x)
    err = float(jnp.max(jnp.abs(feats - ref)))
    tol = 5e-2 * (1.0 + float(jnp.max(jnp.abs(ref))))   # bf16-matmul tolerance
    assert err < tol, (err, tol)

    print("KERNEL_OK")
</pallas_src>

<mosaic_0001>
module attributes {stable_mosaic.version = 11 : i64} {
  func.func @_fused_conv_kernel(%arg0: i32, %arg1: memref<1x144x256xbf16, #tpu.memory_space<vmem>>, %arg2: memref<9x256x32xbf16, #tpu.memory_space<vmem>>, %arg3: memref<16x32x64xbf16, #tpu.memory_space<vmem>>, %arg4: memref<9x64x32xbf16, #tpu.memory_space<vmem>>, %arg5: memref<1x32xf32, #tpu.memory_space<vmem>>, %arg6: memref<1x64xf32, #tpu.memory_space<vmem>>, %arg7: memref<1x32xf32, #tpu.memory_space<vmem>>, %arg8: memref<1x49x32xbf16, #tpu.memory_space<vmem>>) attributes {dimension_semantics = [#tpu.dimension_semantics<parallel>], iteration_bounds = array<i64: 2>, scalar_prefetch = 0 : i64, scratch_operands = 0 : i64, tpu.core_type = #tpu.core_type<tc>, window_params = [{transform_indices = @transform_0, window_bounds = array<i64: 1, 144, 256>}, {pipeline_mode = #tpu.pipeline_mode<synchronous>, transform_indices = @transform_1, window_bounds = array<i64: 9, 256, 32>}, {pipeline_mode = #tpu.pipeline_mode<synchronous>, transform_indices = @transform_2, window_bounds = array<i64: 16, 32, 64>}, {pipeline_mode = #tpu.pipeline_mode<synchronous>, transform_indices = @transform_3, window_bounds = array<i64: 9, 64, 32>}, {pipeline_mode = #tpu.pipeline_mode<synchronous>, transform_indices = @transform_4, window_bounds = array<i64: 1, 32>}, {pipeline_mode = #tpu.pipeline_mode<synchronous>, transform_indices = @transform_5, window_bounds = array<i64: 1, 64>}, {pipeline_mode = #tpu.pipeline_mode<synchronous>, transform_indices = @transform_6, window_bounds = array<i64: 1, 32>}, {transform_indices = @transform_7, window_bounds = array<i64: 1, 49, 32>}]} {
    %c0 = arith.constant 0 : index
    %c0_0 = arith.constant 0 : index
    %c0_1 = arith.constant 0 : index
    %0 = vector.load %arg1[%c0, %c0_0, %c0_1] : memref<1x144x256xbf16, #tpu.memory_space<vmem>>, vector<1x121x256xbf16>
    %1 = vector.shape_cast %0 : vector<1x121x256xbf16> to vector<121x256xbf16>
    %c0_2 = arith.constant 0 : index
    %c0_3 = arith.constant 0 : index
    %c0_4 = arith.constant 0 : index
    %2 = vector.load %arg2[%c0_2, %c0_3, %c0_4] : memref<9x256x32xbf16, #tpu.memory_space<vmem>>, vector<1x256x32xbf16>
    %3 = vector.shape_cast %2 : vector<1x256x32xbf16> to vector<256x32xbf16>
    %cst = arith.constant dense<0.000000e+00> : vector<121x32xf32>
    %4 = tpu.matmul %1, %3, %cst {dimension_numbers = #tpu.dot_dimension_numbers<[1], [0], [0], [1], [0, 0, 1, 1], [], []>} : vector<121x256xbf16>, vector<256x32xbf16>, vector<121x32xf32> -> vector<121x32xf32>
    %c0_5 = arith.constant 0 : index
    %c0_6 = arith.constant 0 : index
    %5 = vector.load %arg5[%c0_5, %c0_6] : memref<1x32xf32, #tpu.memory_space<vmem>>, vector<1x32xf32>
    %6 = vector.broadcast %5 : vector<1x32xf32> to vector<121x32xf32>
    %7 = arith.addf %4, %6 : vector<121x32xf32>
    %cst_7 = arith.constant 0.000000e+00 : f32
    %8 = vector.broadcast %cst_7 : f32 to vector<121x32xf32>
    %9 = arith.maximumf %7, %8 : vector<121x32xf32>
    %10 = arith.truncf %9 : vector<121x32xf32> to vector<121x32xbf16>
    %c0_8 = arith.constant 0 : index
    %c0_9 = arith.constant 0 : index
    %c0_10 = arith.constant 0 : index
    %11 = vector.load %arg1[%c0_8, %c0_9, %c0_10] : memref<1x144x256xbf16, #tpu.memory_space<vmem>>, vector<1x121x256xbf16>
    %12 = vector.shape_cast %11 : vector<1x121x256xbf16> to vector<121x256xbf16>
    %c1 = arith.constant 1 : index
    %c0_11 = arith.constant 0 : index
    %c0_12 = arith.constant 0 : index
    %13 = vector.load %arg2[%c1, %c0_11, %c0_12] : memref<9x256x32xbf16, #tpu.memory_space<vmem>>, vector<1x256x32xbf16>
    %14 = vector.shape_cast %13 : vector<1x256x32xbf16> to vector<256x32xbf16>
    %c0_13 = arith.constant 0 : index
    %c1_14 = arith.constant 1 : index
    %c0_15 = arith.constant 0 : index
    %15 = vector.load %arg1[%c0_13, %c1_14, %c0_15] : memref<1x144x256xbf16, #tpu.memory_space<vmem>>, vector<1x121x256xbf16>
    %16 = vector.shape_cast %15 : vector<1x121x256xbf16> to vector<121x256xbf16>
    %c2 = arith.constant 2 : index
    %c0_16 = arith.constant 0 : index
    %c0_17 = arith.constant 0 : index
    %17 = vector.load %arg2[%c2, %c0_16, %c0_17] : memref<9x256x32xbf16, #tpu.memory_space<vmem>>, vector<1x256x32xbf16>
    %18 = vector.shape_cast %17 : vector<1x256x32xbf16> to vector<256x32xbf16>
    %cst_18 = arith.constant dense<0.000000e+00> : vector<121x32xf32>
    %19 = tpu.matmul %12, %14, %cst_18 {dimension_numbers = #tpu.dot_dimension_numbers<[1], [0], [0], [1], [0, 0, 1, 1], [], []>} : vector<121x256xbf16>, vector<256x32xbf16>, vector<121x32xf32> -> vector<121x32xf32>
    %cst_19 = arith.constant dense<0.000000e+00> : vector<121x32xf32>
    %20 = tpu.matmul %16, %18, %cst_19 {dimension_numbers = #tpu.dot_dimension_numbers<[1], [0], [0], [1], [0, 0, 1, 1], [], []>} : vector<121x256xbf16>, vector<256x32xbf16>, vector<121x32xf32> -> vector<121x32xf32>
    %21 = arith.addf %19, %20 : vector<121x32xf32>
    %c0_20 = arith.constant 0 : index
    %c0_21 = arith.constant 0 : index
    %22 = vector.load %arg5[%c0_20, %c0_21] : memref<1x32xf32, #tpu.memory_space<vmem>>, vector<1x32xf32>
    %23 = vector.broadcast %22 : vector<1x32xf32> to vector<121x32xf32>
    %24 = arith.addf %21, %23 : vector<121x32xf32>
    %cst_22 = arith.constant 0.000000e+00 : f32
    %25 = vector.broadcast %cst_22 : f32 to vector<121x32xf32>
    %26 = arith.maximumf %24, %25 : vector<121x32xf32>
    %27 = arith.truncf %26 : vector<121x32xf32> to vector<121x32xbf16>
    %c0_23 = arith.constant 0 : index
    %c0_24 = arith.constant 0 : index
    %c0_25 = arith.constant 0 : index
    %28 = vector.load %arg1[%c0_23, %c0_24, %c0_25] : memref<1x144x256xbf16, #tpu.memory_space<vmem>>, vector<1x121x256xbf16>
    %29 = vector.shape_cast %28 : vector<1x121x256xbf16> to vector<121x256xbf16>
    %c3 = arith.constant 3 : index
    %c0_26 = arith.constant 0 : index
    %c0_27 = arith.constant 0 : index
    %30 = vector.load %arg2[%c3, %c0_26, %c0_27] : memref<9x256x32xbf16, #tpu.memory_space<vmem>>, vector<1x256x32xbf16>
    %31 = vector.shape_cast %30 : vector<1x256x32xbf16> to vector<256x32xbf16>
    %c0_28 = arith.constant 0 : index
    %c11 = arith.constant 11 : index
    %c0_29 = arith.constant 0 : index
    %32 = vector.load %arg1[%c0_28, %c11, %c0_29] : memref<1x144x256xbf16, #tpu.memory_space<vmem>>, vector<1x121x256xbf16>
    %33 = vector.shape_cast %32 : vector<1x121x256xbf16> to vector<121x256xbf16>
    %c4 = arith.constant 4 : index
    %c0_30 = arith.constant 0 : index
    %c0_31 = arith.constant 0 : index
    %34 = vector.load %arg2[%c4, %c0_30, %c0_31] : memref<9x256x32xbf16, #tpu.memory_space<vmem>>, vector<1x256x32xbf16>
    %35 = vector.shape_cast %34 : vector<1x256x32xbf16> to vector<256x32xbf16>
    %cst_32 = arith.constant dense<0.000000e+00> : vector<121x32xf32>
    %36 = tpu.matmul %29, %31, %cst_32 {dimension_numbers = #tpu.dot_dimension_numbers<[1], [0], [0], [1], [0, 0, 1, 1], [], []>} : vector<121x256xbf16>, vector<256x32xbf16>, vector<121x32xf32> -> vector<121x32xf32>
    %cst_33 = arith.constant dense<0.000000e+00> : vector<121x32xf32>
    %37 = tpu.matmul %33, %35, %cst_33 {dimension_numbers = #tpu.dot_dimension_numbers<[1], [0], [0], [1], [0, 0, 1, 1], [], []>} : vector<121x256xbf16>, vector<256x32xbf16>, vector<121x32xf32> -> vector<121x32xf32>
    %38 = arith.addf %36, %37 : vector<121x32xf32>
    %c0_34 = arith.constant 0 : index
    %c0_35 = arith.constant 0 : index
    %39 = vector.load %arg5[%c0_34, %c0_35] : memref<1x32xf32, #tpu.memory_space<vmem>>, vector<1x32xf32>
    %40 = vector.broadcast %39 : vector<1x32xf32> to vector<121x32xf32>
    %41 = arith.addf %38, %40 : vector<121x32xf32>
    %cst_36 = arith.constant 0.000000e+00 : f32
    %42 = vector.broadcast %cst_36 : f32 to vector<121x32xf32>
    %43 = arith.maximumf %41, %42 : vector<121x32xf32>
    %44 = arith.truncf %43 : vector<121x32xf32> to vector<121x32xbf16>
    %c0_37 = arith.constant 0 : index
    %c0_38 = arith.constant 0 : index
    %c0_39 = arith.constant 0 : index
    %45 = vector.load %arg1[%c0_37, %c0_38, %c0_39] : memref<1x144x256xbf16, #tpu.memory_space<vmem>>, vector<1x121x256xbf16>
    %46 = vector.shape_cast %45 : vector<1x121x256xbf16> to vector<121x256xbf16>
    %c5 = arith.constant 5 : index
    %c0_40 = arith.constant 0 : index
    %c0_41 = arith.constant 0 : index
    %47 = vector.load %arg2[%c5, %c0_40, %c0_41] : memref<9x256x32xbf16, #tpu.memory_space<vmem>>, vector<1x256x32xbf16>
    %48 = vector.shape_cast %47 : vector<1x256x32xbf16> to vector<256x32xbf16>
    %c0_42 = arith.constant 0 : index
    %c1_43 = arith.constant 1 : index
    %c0_44 = arith.constant 0 : index
    %49 = vector.load %arg1[%c0_42, %c1_43, %c0_44] : memref<1x144x256xbf16, #tpu.memory_space<vmem>>, vector<1x121x256xbf16>
    %50 = vector.shape_cast %49 : vector<1x121x256xbf16> to vector<121x256xbf16>
    %c6 = arith.constant 6 : index
    %c0_45 = arith.constant 0 : index
    %c0_46 = arith.constant 0 : index
    %51 = vector.load %arg2[%c6, %c0_45, %c0_46] : memref<9x256x32xbf16, #tpu.memory_space<vmem>>, vector<1x256x32xbf16>
    %52 = vector.shape_cast %51 : vector<1x256x32xbf16> to vector<256x32xbf16>
    %c0_47 = arith.constant 0 : index
    %c11_48 = arith.constant 11 : index
    %c0_49 = arith.constant 0 : index
    %53 = vector.load %arg1[%c0_47, %c11_48, %c0_49] : memref<1x144x256xbf16, #tpu.memory_space<vmem>>, vector<1x121x256xbf16>
    %54 = vector.shape_cast %53 : vector<1x121x256xbf16> to vector<121x256xbf16>
    %c7 = arith.constant 7 : index
    %c0_50 = arith.constant 0 : index
    %c0_51 = arith.constant 0 : index
    %55 = vector.load %arg2[%c7, %c0_50, %c0_51] : memref<9x256x32xbf16, #tpu.memory_space<vmem>>, vector<1x256x32xbf16>
    %56 = vector.shape_cast %55 : vector<1x256x32xbf16> to vector<256x32xbf16>
    %c0_52 = arith.constant 0 : index
    %c12 = arith.constant 12 : index
    %c0_53 = arith.constant 0 : index
    %57 = vector.load %arg1[%c0_52, %c12, %c0_53] : memref<1x144x256xbf16, #tpu.memory_space<vmem>>, vector<1x121x256xbf16>
    %58 = vector.shape_cast %57 : vector<1x121x256xbf16> to vector<121x256xbf16>
    %c8 = arith.constant 8 : index
    %c0_54 = arith.constant 0 : index
    %c0_55 = arith.constant 0 : index
    %59 = vector.load %arg2[%c8, %c0_54, %c0_55] : memref<9x256x32xbf16, #tpu.memory_space<vmem>>, vector<1x256x32xbf16>
    %60 = vector.shape_cast %59 : vector<1x256x32xbf16> to vector<256x32xbf16>
    %cst_56 = arith.constant dense<0.000000e+00> : vector<121x32xf32>
    %61 = tpu.matmul %46, %48, %cst_56 {dimension_numbers = #tpu.dot_dimension_numbers<[1], [0], [0], [1], [0, 0, 1, 1], [], []>} : vector<121x256xbf16>, vector<256x32xbf16>, vector<121x32xf32> -> vector<121x32xf32>
    %cst_57 = arith.constant dense<0.000000e+00> : vector<121x32xf32>
    %62 = tpu.matmul %50, %52, %cst_57 {dimension_numbers = #tpu.dot_dimension_numbers<[1], [0], [0], [1], [0, 0, 1, 1], [], []>} : vector<121x256xbf16>, vector<256x32xbf16>, vector<121x32xf32> -> vector<121x32xf32>
    %63 = arith.addf %61, %62 : vector<121x32xf32>
    %cst_58 = arith.constant dense<0.000000e+00> : vector<121x32xf32>
    %64 = tpu.matmul %54, %56, %cst_58 {dimension_numbers = #tpu.dot_dimension_numbers<[1], [0], [0], [1], [0, 0, 1, 1], [], []>} : vector<121x256xbf16>, vector<256x32xbf16>, vector<121x32xf32> -> vector<121x32xf32>
    %65 = arith.addf %63, %64 : vector<121x32xf32>
    %cst_59 = arith.constant dense<0.000000e+00> : vector<121x32xf32>
    %66 = tpu.matmul %58, %60, %cst_59 {dimension_numbers = #tpu.dot_dimension_numbers<[1], [0], [0], [1], [0, 0, 1, 1], [], []>} : vector<121x256xbf16>, vector<256x32xbf16>, vector<121x32xf32> -> vector<121x32xf32>
    %67 = arith.addf %65, %66 : vector<121x32xf32>
    %c0_60 = arith.constant 0 : index
    %c0_61 = arith.constant 0 : index
    %68 = vector.load %arg5[%c0_60, %c0_61] : memref<1x32xf32, #tpu.memory_space<vmem>>, vector<1x32xf32>
    %69 = vector.broadcast %68 : vector<1x32xf32> to vector<121x32xf32>
    %70 = arith.addf %67, %69 : vector<121x32xf32>
    %cst_62 = arith.constant 0.000000e+00 : f32
    %71 = vector.broadcast %cst_62 : f32 to vector<121x32xf32>
    %72 = arith.maximumf %70, %71 : vector<121x32xf32>
    %73 = arith.truncf %72 : vector<121x32xf32> to vector<121x32xbf16>
    %74 = vector.extract_strided_slice %10 {offsets = [0, 0], sizes = [104, 32], strides = [1, 1]} : vector<121x32xbf16> to vector<104x32xbf16>
    %c0_63 = arith.constant 0 : index
    %c0_64 = arith.constant 0 : index
    %c0_65 = arith.constant 0 : index
    %75 = vector.load %arg3[%c0_63, %c0_64, %c0_65] : memref<16x32x64xbf16, #tpu.memory_space<vmem>>, vector<1x32x64xbf16>
    %76 = vector.shape_cast %75 : vector<1x32x64xbf16> to vector<32x64xbf16>
    %77 = vector.extract_strided_slice %27 {offsets = [0, 0], sizes = [104, 32], strides = [1, 1]} : vector<121x32xbf16> to vector<104x32xbf16>
    %c1_66 = arith.constant 1 : index
    %c0_67 = arith.constant 0 : index
    %c0_68 = arith.constant 0 : index
    %78 = vector.load %arg3[%c1_66, %c0_67, %c0_68] : memref<16x32x64xbf16, #tpu.memory_space<vmem>>, vector<1x32x64xbf16>
    %79 = vector.shape_cast %78 : vector<1x32x64xbf16> to vector<32x64xbf16>
    %80 = vector.extract_strided_slice %10 {offsets = [1, 0], sizes = [104, 32], strides = [1, 1]} : vector<121x32xbf16> to vector<104x32xbf16>
    %c2_69 = arith.constant 2 : index
    %c0_70 = arith.constant 0 : index
    %c0_71 = arith.constant 0 : index
    %81 = vector.load %arg3[%c2_69, %c0_70, %c0_71] : memref<16x32x64xbf16, #tpu.memory_space<vmem>>, vector<1x32x64xbf16>
    %82 = vector.shape_cast %81 : vector<1x32x64xbf16> to vector<32x64xbf16>
    %83 = vector.extract_strided_slice %27 {offsets = [1, 0], sizes = [104, 32], strides = [1, 1]} : vector<121x32xbf16> to vector<104x32xbf16>
    %c3_72 = arith.constant 3 : index
    %c0_73 = arith.constant 0 : index
    %c0_74 = arith.constant 0 : index
    %84 = vector.load %arg3[%c3_72, %c0_73, %c0_74] : memref<16x32x64xbf16, #tpu.memory_space<vmem>>, vector<1x32x64xbf16>
    %85 = vector.shape_cast %84 : vector<1x32x64xbf16> to vector<32x64xbf16>
    %86 = vector.extract_strided_slice %44 {offsets = [0, 0], sizes = [104, 32], strides = [1, 1]} : vector<121x32xbf16> to vector<104x32xbf16>
    %c4_75 = arith.constant 4 : index
    %c0_76 = arith.constant 0 : index
    %c0_77 = arith.constant 0 : index
    %87 = vector.load %arg3[%c4_75, %c0_76, %c0_77] : memref<16x32x64xbf16, #tpu.memory_space<vmem>>, vector<1x32x64xbf16>
    %88 = vector.shape_cast %87 : vector<1x32x64xbf16> to vector<32x64xbf16>
    %89 = vector.extract_strided_slice %73 {offsets = [0, 0], sizes = [104, 32], strides = [1, 1]} : vector<121x32xbf16> to vector<104x32xbf16>
    %c5_78 = arith.constant 5 : index
    %c0_79 = arith.constant 0 : index
    %c0_80 = arith.constant 0 : index
    %90 = vector.load %arg3[%c5_78, %c0_79, %c0_80] : memref<16x32x64xbf16, #tpu.memory_space<vmem>>, vector<1x32x64xbf16>
    %91 = vector.shape_cast %90 : vector<1x32x64xbf16> to vector<32x64xbf16>
    %92 = vector.extract_strided_slice %44 {offsets = [1, 0], sizes = [104, 32], strides = [1, 1]} : vector<121x32xbf16> to vector<104x32xbf16>
    %c6_81 = arith.constant 6 : index
    %c0_82 = arith.constant 0 : index
    %c0_83 = arith.constant 0 : index
    %93 = vector.load %arg3[%c6_81, %c0_82, %c0_83] : memref<16x32x64xbf16, #tpu.memory_space<vmem>>, vector<1x32x64xbf16>
    %94 = vector.shape_cast %93 : vector<1x32x64xbf16> to vector<32x64xbf16>
    %95 = vector.extract_strided_slice %73 {offsets = [1, 0], sizes = [104, 32], strides = [1, 1]} : vector<121x32xbf16> to vector<104x32xbf16>
    %c7_84 = arith.constant 7 : index
    %c0_85 = arith.constant 0 : index
    %c0_86 = arith.constant 0 : index
    %96 = vector.load %arg3[%c7_84, %c0_85, %c0_86] : memref<16x32x64xbf16, #tpu.memory_space<vmem>>, vector<1x32x64xbf16>
    %97 = vector.shape_cast %96 : vector<1x32x64xbf16> to vector<32x64xbf16>
    %98 = vector.extract_strided_slice %10 {offsets = [11, 0], sizes = [104, 32], strides = [1, 1]} : vector<121x32xbf16> to vector<104x32xbf16>
    %c8_87 = arith.constant 8 : index
    %c0_88 = arith.constant 0 : index
    %c0_89 = arith.constant 0 : index
    %99 = vector.load %arg3[%c8_87, %c0_88, %c0_89] : memref<16x32x64xbf16, #tpu.memory_space<vmem>>, vector<1x32x64xbf16>
    %100 = vector.shape_cast %99 : vector<1x32x64xbf16> to vector<32x64xbf16>
    %101 = vector.extract_strided_slice %27 {offsets = [11, 0], sizes = [104, 32], strides = [1, 1]} : vector<121x32xbf16> to vector<104x32xbf16>
    %c9 = arith.constant 9 : index
    %c0_90 = arith.constant 0 : index
    %c0_91 = arith.constant 0 : index
    %102 = vector.load %arg3[%c9, %c0_90, %c0_91] : memref<16x32x64xbf16, #tpu.memory_space<vmem>>, vector<1x32x64xbf16>
    %103 = vector.shape_cast %102 : vector<1x32x64xbf16> to vector<32x64xbf16>
    %104 = vector.extract_strided_slice %10 {offsets = [12, 0], sizes = [104, 32], strides = [1, 1]} : vector<121x32xbf16> to vector<104x32xbf16>
    %c10 = arith.constant 10 : index
    %c0_92 = arith.constant 0 : index
    %c0_93 = arith.constant 0 : index
    %105 = vector.load %arg3[%c10, %c0_92, %c0_93] : memref<16x32x64xbf16, #tpu.memory_space<vmem>>, vector<1x32x64xbf16>
    %106 = vector.shape_cast %105 : vector<1x32x64xbf16> to vector<32x64xbf16>
    %107 = vector.extract_strided_slice %27 {offsets = [12, 0], sizes = [104, 32], strides = [1, 1]} : vector<121x32xbf16> to vector<104x32xbf16>
    %c11_94 = arith.constant 11 : index
    %c0_95 = arith.constant 0 : index
    %c0_96 = arith.constant 0 : index
    %108 = vector.load %arg3[%c11_94, %c0_95, %c0_96] : memref<16x32x64xbf16, #tpu.memory_space<vmem>>, vector<1x32x64xbf16>
    %109 = vector.shape_cast %108 : vector<1x32x64xbf16> to vector<32x64xbf16>
    %110 = vector.extract_strided_slice %44 {offsets = [11, 0], sizes = [104, 32], strides = [1, 1]} : vector<121x32xbf16> to vector<104x32xbf16>
    %c12_97 = arith.constant 12 : index
    %c0_98 = arith.constant 0 : index
    %c0_99 = arith.constant 0 : index
    %111 = vector.load %arg3[%c12_97, %c0_98, %c0_99] : memref<16x32x64xbf16, #tpu.memory_space<vmem>>, vector<1x32x64xbf16>
    %112 = vector.shape_cast %111 : vector<1x32x64xbf16> to vector<32x64xbf16>
    %113 = vector.extract_strided_slice %73 {offsets = [11, 0], sizes = [104, 32], strides = [1, 1]} : vector<121x32xbf16> to vector<104x32xbf16>
    %c13 = arith.constant 13 : index
    %c0_100 = arith.constant 0 : index
    %c0_101 = arith.constant 0 : index
    %114 = vector.load %arg3[%c13, %c0_100, %c0_101] : memref<16x32x64xbf16, #tpu.memory_space<vmem>>, vector<1x32x64xbf16>
    %115 = vector.shape_cast %114 : vector<1x32x64xbf16> to vector<32x64xbf16>
    %116 = vector.extract_strided_slice %44 {offsets = [12, 0], sizes = [104, 32], strides = [1, 1]} : vector<121x32xbf16> to vector<104x32xbf16>
    %c14 = arith.constant 14 : index
    %c0_102 = arith.constant 0 : index
    %c0_103 = arith.constant 0 : index
    %117 = vector.load %arg3[%c14, %c0_102, %c0_103] : memref<16x32x64xbf16, #tpu.memory_space<vmem>>, vector<1x32x64xbf16>
    %118 = vector.shape_cast %117 : vector<1x32x64xbf16> to vector<32x64xbf16>
    %119 = vector.extract_strided_slice %73 {offsets = [12, 0], sizes = [104, 32], strides = [1, 1]} : vector<121x32xbf16> to vector<104x32xbf16>
    %c15 = arith.constant 15 : index
    %c0_104 = arith.constant 0 : index
    %c0_105 = arith.constant 0 : index
    %120 = vector.load %arg3[%c15, %c0_104, %c0_105] : memref<16x32x64xbf16, #tpu.memory_space<vmem>>, vector<1x32x64xbf16>
    %121 = vector.shape_cast %120 : vector<1x32x64xbf16> to vector<32x64xbf16>
    %cst_106 = arith.constant dense<0.000000e+00> : vector<104x64xf32>
    %122 = tpu.matmul %74, %76, %cst_106 {dimension_numbers = #tpu.dot_dimension_numbers<[1], [0], [0], [1], [0, 0, 1, 1], [], []>} : vector<104x32xbf16>, vector<32x64xbf16>, vector<104x64xf32> -> vector<104x64xf32>
    %cst_107 = arith.constant dense<0.000000e+00> : vector<104x64xf32>
    %123 = tpu.matmul %77, %79, %cst_107 {dimension_numbers = #tpu.dot_dimension_numbers<[1], [0], [0], [1], [0, 0, 1, 1], [], []>} : vector<104x32xbf16>, vector<32x64xbf16>, vector<104x64xf32> -> vector<104x64xf32>
    %124 = arith.addf %122, %123 : vector<104x64xf32>
    %cst_108 = arith.constant dense<0.000000e+00> : vector<104x64xf32>
    %125 = tpu.matmul %80, %82, %cst_108 {dimension_numbers = #tpu.dot_dimension_numbers<[1], [0], [0], [1], [0, 0, 1, 1], [], []>} : vector<104x32xbf16>, vector<32x64xbf16>, vector<104x64xf32> -> vector<104x64xf32>
    %126 = arith.addf %124, %125 : vector<104x64xf32>
    %cst_109 = arith.constant dense<0.000000e+00> : vector<104x64xf32>
    %127 = tpu.matmul %83, %85, %cst_109 {dimension_numbers = #tpu.dot_dimension_numbers<[1], [0], [0], [1], [0, 0, 1, 1], [], []>} : vector<104x32xbf16>, vector<32x64xbf16>, vector<104x64xf32> -> vector<104x64xf32>
    %128 = arith.addf %126, %127 : vector<104x64xf32>
    %cst_110 = arith.constant dense<0.000000e+00> : vector<104x64xf32>
    %129 = tpu.matmul %86, %88, %cst_110 {dimension_numbers = #tpu.dot_dimension_numbers<[1], [0], [0], [1], [0, 0, 1, 1], [], []>} : vector<104x32xbf16>, vector<32x64xbf16>, vector<104x64xf32> -> vector<104x64xf32>
    %130 = arith.addf %128, %129 : vector<104x64xf32>
    %cst_111 = arith.constant dense<0.000000e+00> : vector<104x64xf32>
    %131 = tpu.matmul %89, %91, %cst_111 {dimension_numbers = #tpu.dot_dimension_numbers<[1], [0], [0], [1], [0, 0, 1, 1], [], []>} : vector<104x32xbf16>, vector<32x64xbf16>, vector<104x64xf32> -> vector<104x64xf32>
    %132 = arith.addf %130, %131 : vector<104x64xf32>
    %cst_112 = arith.constant dense<0.000000e+00> : vector<104x64xf32>
    %133 = tpu.matmul %92, %94, %cst_112 {dimension_numbers = #tpu.dot_dimension_numbers<[1], [0], [0], [1], [0, 0, 1, 1], [], []>} : vector<104x32xbf16>, vector<32x64xbf16>, vector<104x64xf32> -> vector<104x64xf32>
    %134 = arith.addf %132, %133 : vector<104x64xf32>
    %cst_113 = arith.constant dense<0.000000e+00> : vector<104x64xf32>
    %135 = tpu.matmul %95, %97, %cst_113 {dimension_numbers = #tpu.dot_dimension_numbers<[1], [0], [0], [1], [0, 0, 1, 1], [], []>} : vector<104x32xbf16>, vector<32x64xbf16>, vector<104x64xf32> -> vector<104x64xf32>
    %136 = arith.addf %134, %135 : vector<104x64xf32>
    %cst_114 = arith.constant dense<0.000000e+00> : vector<104x64xf32>
    %137 = tpu.matmul %98, %100, %cst_114 {dimension_numbers = #tpu.dot_dimension_numbers<[1], [0], [0], [1], [0, 0, 1, 1], [], []>} : vector<104x32xbf16>, vector<32x64xbf16>, vector<104x64xf32> -> vector<104x64xf32>
    %138 = arith.addf %136, %137 : vector<104x64xf32>
    %cst_115 = arith.constant dense<0.000000e+00> : vector<104x64xf32>
    %139 = tpu.matmul %101, %103, %cst_115 {dimension_numbers = #tpu.dot_dimension_numbers<[1], [0], [0], [1], [0, 0, 1, 1], [], []>} : vector<104x32xbf16>, vector<32x64xbf16>, vector<104x64xf32> -> vector<104x64xf32>
    %140 = arith.addf %138, %139 : vector<104x64xf32>
    %cst_116 = arith.constant dense<0.000000e+00> : vector<104x64xf32>
    %141 = tpu.matmul %104, %106, %cst_116 {dimension_numbers = #tpu.dot_dimension_numbers<[1], [0], [0], [1], [0, 0, 1, 1], [], []>} : vector<104x32xbf16>, vector<32x64xbf16>, vector<104x64xf32> -> vector<104x64xf32>
    %142 = arith.addf %140, %141 : vector<104x64xf32>
    %cst_117 = arith.constant dense<0.000000e+00> : vector<104x64xf32>
    %143 = tpu.matmul %107, %109, %cst_117 {dimension_numbers = #tpu.dot_dimension_numbers<[1], [0], [0], [1], [0, 0, 1, 1], [], []>} : vector<104x32xbf16>, vector<32x64xbf16>, vector<104x64xf32> -> vector<104x64xf32>
    %144 = arith.addf %142, %143 : vector<104x64xf32>
    %cst_118 = arith.constant dense<0.000000e+00> : vector<104x64xf32>
    %145 = tpu.matmul %110, %112, %cst_118 {dimension_numbers = #tpu.dot_dimension_numbers<[1], [0], [0], [1], [0, 0, 1, 1], [], []>} : vector<104x32xbf16>, vector<32x64xbf16>, vector<104x64xf32> -> vector<104x64xf32>
    %146 = arith.addf %144, %145 : vector<104x64xf32>
    %cst_119 = arith.constant dense<0.000000e+00> : vector<104x64xf32>
    %147 = tpu.matmul %113, %115, %cst_119 {dimension_numbers = #tpu.dot_dimension_numbers<[1], [0], [0], [1], [0, 0, 1, 1], [], []>} : vector<104x32xbf16>, vector<32x64xbf16>, vector<104x64xf32> -> vector<104x64xf32>
    %148 = arith.addf %146, %147 : vector<104x64xf32>
    %cst_120 = arith.constant dense<0.000000e+00> : vector<104x64xf32>
    %149 = tpu.matmul %116, %118, %cst_120 {dimension_numbers = #tpu.dot_dimension_numbers<[1], [0], [0], [1], [0, 0, 1, 1], [], []>} : vector<104x32xbf16>, vector<32x64xbf16>, vector<104x64xf32> -> vector<104x64xf32>
    %150 = arith.addf %148, %149 : vector<104x64xf32>
    %cst_121 = arith.constant dense<0.000000e+00> : vector<104x64xf32>
    %151 = tpu.matmul %119, %121, %cst_121 {dimension_numbers = #tpu.dot_dimension_numbers<[1], [0], [0], [1], [0, 0, 1, 1], [], []>} : vector<104x32xbf16>, vector<32x64xbf16>, vector<104x64xf32> -> vector<104x64xf32>
    %152 = arith.addf %150, %151 : vector<104x64xf32>
    %c0_122 = arith.constant 0 : index
    %c0_123 = arith.constant 0 : index
    %153 = vector.load %arg6[%c0_122, %c0_123] : memref<1x64xf32, #tpu.memory_space<vmem>>, vector<1x64xf32>
    %154 = vector.broadcast %153 : vector<1x64xf32> to vector<104x64xf32>
    %155 = arith.addf %152, %154 : vector<104x64xf32>
    %cst_124 = arith.constant 0.000000e+00 : f32
    %156 = vector.broadcast %cst_124 : f32 to vector<104x64xf32>
    %157 = arith.maximumf %155, %156 : vector<104x64xf32>
    %158 = arith.truncf %157 : vector<104x64xf32> to vector<104x64xbf16>
    %159 = vector.extract_strided_slice %158 {offsets = [0, 0], sizes = [77, 64], strides = [1, 1]} : vector<104x64xbf16> to vector<77x64xbf16>
    %c0_125 = arith.constant 0 : index
    %c0_126 = arith.constant 0 : index
    %c0_127 = arith.constant 0 : index
    %160 = vector.load %arg4[%c0_125, %c0_126, %c0_127] : memref<9x64x32xbf16, #tpu.memory_space<vmem>>, vector<1x64x32xbf16>
    %161 = vector.shape_cast %160 : vector<1x64x32xbf16> to vector<64x32xbf16>
    %162 = vector.extract_strided_slice %158 {offsets = [1, 0], sizes = [77, 64], strides = [1, 1]} : vector<104x64xbf16> to vector<77x64xbf16>
    %c1_128 = arith.constant 1 : index
    %c0_129 = arith.constant 0 : index
    %c0_130 = arith.constant 0 : index
    %163 = vector.load %arg4[%c1_128, %c0_129, %c0_130] : memref<9x64x32xbf16, #tpu.memory_space<vmem>>, vector<1x64x32xbf16>
    %164 = vector.shape_cast %163 : vector<1x64x32xbf16> to vector<64x32xbf16>
    %165 = vector.extract_strided_slice %158 {offsets = [2, 0], sizes = [77, 64], strides = [1, 1]} : vector<104x64xbf16> to vector<77x64xbf16>
    %c2_131 = arith.constant 2 : index
    %c0_132 = arith.constant 0 : index
    %c0_133 = arith.constant 0 : index
    %166 = vector.load %arg4[%c2_131, %c0_132, %c0_133] : memref<9x64x32xbf16, #tpu.memory_space<vmem>>, vector<1x64x32xbf16>
    %167 = vector.shape_cast %166 : vector<1x64x32xbf16> to vector<64x32xbf16>
    %168 = vector.extract_strided_slice %158 {offsets = [11, 0], sizes = [77, 64], strides = [1, 1]} : vector<104x64xbf16> to vector<77x64xbf16>
    %c3_134 = arith.constant 3 : index
    %c0_135 = arith.constant 0 : index
    %c0_136 = arith.constant 0 : index
    %169 = vector.load %arg4[%c3_134, %c0_135, %c0_136] : memref<9x64x32xbf16, #tpu.memory_space<vmem>>, vector<1x64x32xbf16>
    %170 = vector.shape_cast %169 : vector<1x64x32xbf16> to vector<64x32xbf16>
    %171 = vector.extract_strided_slice %158 {offsets = [12, 0], sizes = [77, 64], strides = [1, 1]} : vector<104x64xbf16> to vector<77x64xbf16>
    %c4_137 = arith.constant 4 : index
    %c0_138 = arith.constant 0 : index
    %c0_139 = arith.constant 0 : index
    %172 = vector.load %arg4[%c4_137, %c0_138, %c0_139] : memref<9x64x32xbf16, #tpu.memory_space<vmem>>, vector<1x64x32xbf16>
    %173 = vector.shape_cast %172 : vector<1x64x32xbf16> to vector<64x32xbf16>
    %174 = vector.extract_strided_slice %158 {offsets = [13, 0], sizes = [77, 64], strides = [1, 1]} : vector<104x64xbf16> to vector<77x64xbf16>
    %c5_140 = arith.constant 5 : index
    %c0_141 = arith.constant 0 : index
    %c0_142 = arith.constant 0 : index
    %175 = vector.load %arg4[%c5_140, %c0_141, %c0_142] : memref<9x64x32xbf16, #tpu.memory_space<vmem>>, vector<1x64x32xbf16>
    %176 = vector.shape_cast %175 : vector<1x64x32xbf16> to vector<64x32xbf16>
    %177 = vector.extract_strided_slice %158 {offsets = [22, 0], sizes = [77, 64], strides = [1, 1]} : vector<104x64xbf16> to vector<77x64xbf16>
    %c6_143 = arith.constant 6 : index
    %c0_144 = arith.constant 0 : index
    %c0_145 = arith.constant 0 : index
    %178 = vector.load %arg4[%c6_143, %c0_144, %c0_145] : memref<9x64x32xbf16, #tpu.memory_space<vmem>>, vector<1x64x32xbf16>
    %179 = vector.shape_cast %178 : vector<1x64x32xbf16> to vector<64x32xbf16>
    %180 = vector.extract_strided_slice %158 {offsets = [23, 0], sizes = [77, 64], strides = [1, 1]} : vector<104x64xbf16> to vector<77x64xbf16>
    %c7_146 = arith.constant 7 : index
    %c0_147 = arith.constant 0 : index
    %c0_148 = arith.constant 0 : index
    %181 = vector.load %arg4[%c7_146, %c0_147, %c0_148] : memref<9x64x32xbf16, #tpu.memory_space<vmem>>, vector<1x64x32xbf16>
    %182 = vector.shape_cast %181 : vector<1x64x32xbf16> to vector<64x32xbf16>
    %183 = vector.extract_strided_slice %158 {offsets = [24, 0], sizes = [77, 64], strides = [1, 1]} : vector<104x64xbf16> to vector<77x64xbf16>
    %c8_149 = arith.constant 8 : index
    %c0_150 = arith.constant 0 : index
    %c0_151 = arith.constant 0 : index
    %184 = vector.load %arg4[%c8_149, %c0_150, %c0_151] : memref<9x64x32xbf16, #tpu.memory_space<vmem>>, vector<1x64x32xbf16>
    %185 = vector.shape_cast %184 : vector<1x64x32xbf16> to vector<64x32xbf16>
    %cst_152 = arith.constant dense<0.000000e+00> : vector<77x32xf32>
    %186 = tpu.matmul %159, %161, %cst_152 {dimension_numbers = #tpu.dot_dimension_numbers<[1], [0], [0], [1], [0, 0, 1, 1], [], []>} : vector<77x64xbf16>, vector<64x32xbf16>, vector<77x32xf32> -> vector<77x32xf32>
    %cst_153 = arith.constant dense<0.000000e+00> : vector<77x32xf32>
    %187 = tpu.matmul %162, %164, %cst_153 {dimension_numbers = #tpu.dot_dimension_numbers<[1], [0], [0], [1], [0, 0, 1, 1], [], []>} : vector<77x64xbf16>, vector<64x32xbf16>, vector<77x32xf32> -> vector<77x32xf32>
    %188 = arith.addf %186, %187 : vector<77x32xf32>
    %cst_154 = arith.constant dense<0.000000e+00> : vector<77x32xf32>
    %189 = tpu.matmul %165, %167, %cst_154 {dimension_numbers = #tpu.dot_dimension_numbers<[1], [0], [0], [1], [0, 0, 1, 1], [], []>} : vector<77x64xbf16>, vector<64x32xbf16>, vector<77x32xf32> -> vector<77x32xf32>
    %190 = arith.addf %188, %189 : vector<77x32xf32>
    %cst_155 = arith.constant dense<0.000000e+00> : vector<77x32xf32>
    %191 = tpu.matmul %168, %170, %cst_155 {dimension_numbers = #tpu.dot_dimension_numbers<[1], [0], [0], [1], [0, 0, 1, 1], [], []>} : vector<77x64xbf16>, vector<64x32xbf16>, vector<77x32xf32> -> vector<77x32xf32>
    %192 = arith.addf %190, %191 : vector<77x32xf32>
    %cst_156 = arith.constant dense<0.000000e+00> : vector<77x32xf32>
    %193 = tpu.matmul %171, %173, %cst_156 {dimension_numbers = #tpu.dot_dimension_numbers<[1], [0], [0], [1], [0, 0, 1, 1], [], []>} : vector<77x64xbf16>, vector<64x32xbf16>, vector<77x32xf32> -> vector<77x32xf32>
    %194 = arith.addf %192, %193 : vector<77x32xf32>
    %cst_157 = arith.constant dense<0.000000e+00> : vector<77x32xf32>
    %195 = tpu.matmul %174, %176, %cst_157 {dimension_numbers = #tpu.dot_dimension_numbers<[1], [0], [0], [1], [0, 0, 1, 1], [], []>} : vector<77x64xbf16>, vector<64x32xbf16>, vector<77x32xf32> -> vector<77x32xf32>
    %196 = arith.addf %194, %195 : vector<77x32xf32>
    %cst_158 = arith.constant dense<0.000000e+00> : vector<77x32xf32>
    %197 = tpu.matmul %177, %179, %cst_158 {dimension_numbers = #tpu.dot_dimension_numbers<[1], [0], [0], [1], [0, 0, 1, 1], [], []>} : vector<77x64xbf16>, vector<64x32xbf16>, vector<77x32xf32> -> vector<77x32xf32>
    %198 = arith.addf %196, %197 : vector<77x32xf32>
    %cst_159 = arith.constant dense<0.000000e+00> : vector<77x32xf32>
    %199 = tpu.matmul %180, %182, %cst_159 {dimension_numbers = #tpu.dot_dimension_numbers<[1], [0], [0], [1], [0, 0, 1, 1], [], []>} : vector<77x64xbf16>, vector<64x32xbf16>, vector<77x32xf32> -> vector<77x32xf32>
    %200 = arith.addf %198, %199 : vector<77x32xf32>
    %cst_160 = arith.constant dense<0.000000e+00> : vector<77x32xf32>
    %201 = tpu.matmul %183, %185, %cst_160 {dimension_numbers = #tpu.dot_dimension_numbers<[1], [0], [0], [1], [0, 0, 1, 1], [], []>} : vector<77x64xbf16>, vector<64x32xbf16>, vector<77x32xf32> -> vector<77x32xf32>
    %202 = arith.addf %200, %201 : vector<77x32xf32>
    %c0_161 = arith.constant 0 : index
    %c0_162 = arith.constant 0 : index
    %203 = vector.load %arg7[%c0_161, %c0_162] : memref<1x32xf32, #tpu.memory_space<vmem>>, vector<1x32xf32>
    %204 = vector.broadcast %203 : vector<1x32xf32> to vector<77x32xf32>
    %205 = arith.addf %202, %204 : vector<77x32xf32>
    %cst_163 = arith.constant 0.000000e+00 : f32
    %206 = vector.broadcast %cst_163 : f32 to vector<77x32xf32>
    %207 = arith.maximumf %205, %206 : vector<77x32xf32>
    %208 = vector.extract_strided_slice %207 {offsets = [0, 0], sizes = [7, 32], strides = [1, 1]} : vector<77x32xf32> to vector<7x32xf32>
    %209 = arith.truncf %208 : vector<7x32xf32> to vector<7x32xbf16>
    %c0_164 = arith.constant 0 : index
    %c0_165 = arith.constant 0 : index
    %c0_166 = arith.constant 0 : index
    %210 = vector.load %arg8[%c0_164, %c0_165, %c0_166] : memref<1x49x32xbf16, #tpu.memory_space<vmem>>, vector<1x7x32xbf16>
    %211 = vector.shape_cast %210 : vector<1x7x32xbf16> to vector<7x32xbf16>
    %212 = vector.shape_cast %209 : vector<7x32xbf16> to vector<1x7x32xbf16>
    tpu.vector_store %arg8[%c0_164, %c0_165, %c0_166], %212 {strides = array<i32>} : memref<1x49x32xbf16, #tpu.memory_space<vmem>>, vector<1x7x32xbf16>,
    %213 = vector.extract_strided_slice %207 {offsets = [11, 0], sizes = [7, 32], strides = [1, 1]} : vector<77x32xf32> to vector<7x32xf32>
    %214 = arith.truncf %213 : vector<7x32xf32> to vector<7x32xbf16>
    %c0_167 = arith.constant 0 : index
    %c7_168 = arith.constant 7 : index
    %c0_169 = arith.constant 0 : index
    %215 = vector.load %arg8[%c0_167, %c7_168, %c0_169] : memref<1x49x32xbf16, #tpu.memory_space<vmem>>, vector<1x7x32xbf16>
    %216 = vector.shape_cast %215 : vector<1x7x32xbf16> to vector<7x32xbf16>
    %217 = vector.shape_cast %214 : vector<7x32xbf16> to vector<1x7x32xbf16>
    tpu.vector_store %arg8[%c0_167, %c7_168, %c0_169], %217 {strides = array<i32>} : memref<1x49x32xbf16, #tpu.memory_space<vmem>>, vector<1x7x32xbf16>,
    %218 = vector.extract_strided_slice %207 {offsets = [22, 0], sizes = [7, 32], strides = [1, 1]} : vector<77x32xf32> to vector<7x32xf32>
    %219 = arith.truncf %218 : vector<7x32xf32> to vector<7x32xbf16>
    %c0_170 = arith.constant 0 : index
    %c14_171 = arith.constant 14 : index
    %c0_172 = arith.constant 0 : index
    %220 = vector.load %arg8[%c0_170, %c14_171, %c0_172] : memref<1x49x32xbf16, #tpu.memory_space<vmem>>, vector<1x7x32xbf16>
    %221 = vector.shape_cast %220 : vector<1x7x32xbf16> to vector<7x32xbf16>
    %222 = vector.shape_cast %219 : vector<7x32xbf16> to vector<1x7x32xbf16>
    tpu.vector_store %arg8[%c0_170, %c14_171, %c0_172], %222 {strides = array<i32>} : memref<1x49x32xbf16, #tpu.memory_space<vmem>>, vector<1x7x32xbf16>,
    %223 = vector.extract_strided_slice %207 {offsets = [33, 0], sizes = [7, 32], strides = [1, 1]} : vector<77x32xf32> to vector<7x32xf32>
    %224 = arith.truncf %223 : vector<7x32xf32> to vector<7x32xbf16>
    %c0_173 = arith.constant 0 : index
    %c21 = arith.constant 21 : index
    %c0_174 = arith.constant 0 : index
    %225 = vector.load %arg8[%c0_173, %c21, %c0_174] : memref<1x49x32xbf16, #tpu.memory_space<vmem>>, vector<1x7x32xbf16>
    %226 = vector.shape_cast %225 : vector<1x7x32xbf16> to vector<7x32xbf16>
    %227 = vector.shape_cast %224 : vector<7x32xbf16> to vector<1x7x32xbf16>
    tpu.vector_store %arg8[%c0_173, %c21, %c0_174], %227 {strides = array<i32>} : memref<1x49x32xbf16, #tpu.memory_space<vmem>>, vector<1x7x32xbf16>,
    %228 = vector.extract_strided_slice %207 {offsets = [44, 0], sizes = [7, 32], strides = [1, 1]} : vector<77x32xf32> to vector<7x32xf32>
    %229 = arith.truncf %228 : vector<7x32xf32> to vector<7x32xbf16>
    %c0_175 = arith.constant 0 : index
    %c28 = arith.constant 28 : index
    %c0_176 = arith.constant 0 : index
    %230 = vector.load %arg8[%c0_175, %c28, %c0_176] : memref<1x49x32xbf16, #tpu.memory_space<vmem>>, vector<1x7x32xbf16>
    %231 = vector.shape_cast %230 : vector<1x7x32xbf16> to vector<7x32xbf16>
    %232 = vector.shape_cast %229 : vector<7x32xbf16> to vector<1x7x32xbf16>
    tpu.vector_store %arg8[%c0_175, %c28, %c0_176], %232 {strides = array<i32>} : memref<1x49x32xbf16, #tpu.memory_space<vmem>>, vector<1x7x32xbf16>,
    %233 = vector.extract_strided_slice %207 {offsets = [55, 0], sizes = [7, 32], strides = [1, 1]} : vector<77x32xf32> to vector<7x32xf32>
    %234 = arith.truncf %233 : vector<7x32xf32> to vector<7x32xbf16>
    %c0_177 = arith.constant 0 : index
    %c35 = arith.constant 35 : index
    %c0_178 = arith.constant 0 : index
    %235 = vector.load %arg8[%c0_177, %c35, %c0_178] : memref<1x49x32xbf16, #tpu.memory_space<vmem>>, vector<1x7x32xbf16>
    %236 = vector.shape_cast %235 : vector<1x7x32xbf16> to vector<7x32xbf16>
    %237 = vector.shape_cast %234 : vector<7x32xbf16> to vector<1x7x32xbf16>
    tpu.vector_store %arg8[%c0_177, %c35, %c0_178], %237 {strides = array<i32>} : memref<1x49x32xbf16, #tpu.memory_space<vmem>>, vector<1x7x32xbf16>,
    %238 = vector.extract_strided_slice %207 {offsets = [66, 0], sizes = [7, 32], strides = [1, 1]} : vector<77x32xf32> to vector<7x32xf32>
    %239 = arith.truncf %238 : vector<7x32xf32> to vector<7x32xbf16>
    %c0_179 = arith.constant 0 : index
    %c42 = arith.constant 42 : index
    %c0_180 = arith.constant 0 : index
    %240 = vector.load %arg8[%c0_179, %c42, %c0_180] : memref<1x49x32xbf16, #tpu.memory_space<vmem>>, vector<1x7x32xbf16>
    %241 = vector.shape_cast %240 : vector<1x7x32xbf16> to vector<7x32xbf16>
    %242 = vector.shape_cast %239 : vector<7x32xbf16> to vector<1x7x32xbf16>
    tpu.vector_store %arg8[%c0_179, %c42, %c0_180], %242 {strides = array<i32>} : memref<1x49x32xbf16, #tpu.memory_space<vmem>>, vector<1x7x32xbf16>,
    return
  }
  func.func @transform_0(%arg0: i32) -> (i32, i32, i32) {
    %c0_i32 = arith.constant 0 : i32
    %c0_i32_0 = arith.constant 0 : i32
    %c0_i32_1 = arith.constant 0 : i32
    return %arg0, %c0_i32, %c0_i32_0 : i32, i32, i32
  }
  func.func @transform_1(%arg0: i32) -> (i32, i32, i32) {
    %c0_i32 = arith.constant 0 : i32
    %c0_i32_0 = arith.constant 0 : i32
    %c0_i32_1 = arith.constant 0 : i32
    %c0_i32_2 = arith.constant 0 : i32
    return %c0_i32, %c0_i32_0, %c0_i32_1 : i32, i32, i32
  }
  func.func @transform_2(%arg0: i32) -> (i32, i32, i32) {
    %c0_i32 = arith.constant 0 : i32
    %c0_i32_0 = arith.constant 0 : i32
    %c0_i32_1 = arith.constant 0 : i32
    %c0_i32_2 = arith.constant 0 : i32
    return %c0_i32, %c0_i32_0, %c0_i32_1 : i32, i32, i32
  }
  func.func @transform_3(%arg0: i32) -> (i32, i32, i32) {
    %c0_i32 = arith.constant 0 : i32
    %c0_i32_0 = arith.constant 0 : i32
    %c0_i32_1 = arith.constant 0 : i32
    %c0_i32_2 = arith.constant 0 : i32
    return %c0_i32, %c0_i32_0, %c0_i32_1 : i32, i32, i32
  }
  func.func @transform_4(%arg0: i32) -> (i32, i32) {
    %c0_i32 = arith.constant 0 : i32
    %c0_i32_0 = arith.constant 0 : i32
    %c0_i32_1 = arith.constant 0 : i32
    return %c0_i32, %c0_i32_0 : i32, i32
  }
  func.func @transform_5(%arg0: i32) -> (i32, i32) {
    %c0_i32 = arith.constant 0 : i32
    %c0_i32_0 = arith.constant 0 : i32
    %c0_i32_1 = arith.constant 0 : i32
    return %c0_i32, %c0_i32_0 : i32, i32
  }
  func.func @transform_6(%arg0: i32) -> (i32, i32) {
    %c0_i32 = arith.constant 0 : i32
    %c0_i32_0 = arith.constant 0 : i32
    %c0_i32_1 = arith.constant 0 : i32
    return %c0_i32, %c0_i32_0 : i32, i32
  }
  func.func @transform_7(%arg0: i32) -> (i32, i32, i32) {
    %c0_i32 = arith.constant 0 : i32
    %c0_i32_0 = arith.constant 0 : i32
    %c0_i32_1 = arith.constant 0 : i32
    return %arg0, %c0_i32, %c0_i32_0 : i32, i32, i32
  }
}

module attributes {stable_mosaic.version = 11 : i64} {
  func.func @_mm_bias_relu_kernel(%arg0: i32, %arg1: i32, %arg2: memref<2x1568xbf16, #tpu.memory_space<vmem>>, %arg3: memref<1568x256xbf16, #tpu.memory_space<vmem>>, %arg4: memref<1x256xf32, #tpu.memory_space<vmem>>, %arg5: memref<2x256xf32, #tpu.memory_space<vmem>>) attributes {dimension_semantics = [#tpu.dimension_semantics<parallel>, #tpu.dimension_semantics<parallel>], iteration_bounds = array<i64: 1, 2>, scalar_prefetch = 0 : i64, scratch_operands = 0 : i64, tpu.core_type = #tpu.core_type<tc>, window_params = [{transform_indices = @transform_0, window_bounds = array<i64: 2, 1568>}, {transform_indices = @transform_1, window_bounds = array<i64: 1568, 256>}, {transform_indices = @transform_2, window_bounds = array<i64: 1, 256>}, {transform_indices = @transform_3, window_bounds = array<i64: 2, 256>}]} {
    %c0 = arith.constant 0 : index
    %c0_0 = arith.constant 0 : index
    %0 = vector.load %arg2[%c0, %c0_0] : memref<2x1568xbf16, #tpu.memory_space<vmem>>, vector<2x1568xbf16>
    %c0_1 = arith.constant 0 : index
    %c0_2 = arith.constant 0 : index
    %1 = vector.load %arg3[%c0_1, %c0_2] : memref<1568x256xbf16, #tpu.memory_space<vmem>>, vector<1568x256xbf16>
    %cst = arith.constant dense<0.000000e+00> : vector<2x256xf32>
    %2 = tpu.matmul %0, %1, %cst {dimension_numbers = #tpu.dot_dimension_numbers<[1], [0], [0], [1], [0, 0, 1, 1], [], []>} : vector<2x1568xbf16>, vector<1568x256xbf16>, vector<2x256xf32> -> vector<2x256xf32>
    %c0_3 = arith.constant 0 : index
    %c0_4 = arith.constant 0 : index
    %3 = vector.load %arg4[%c0_3, %c0_4] : memref<1x256xf32, #tpu.memory_space<vmem>>, vector<1x256xf32>
    %4 = vector.broadcast %3 : vector<1x256xf32> to vector<2x256xf32>
    %5 = arith.addf %2, %4 : vector<2x256xf32>
    %cst_5 = arith.constant 0.000000e+00 : f32
    %6 = vector.broadcast %cst_5 : f32 to vector<2x256xf32>
    %7 = arith.maximumf %5, %6 : vector<2x256xf32>
    %c0_6 = arith.constant 0 : index
    %c0_7 = arith.constant 0 : index
    %8 = vector.load %arg5[%c0_6, %c0_7] : memref<2x256xf32, #tpu.memory_space<vmem>>, vector<2x256xf32>
    tpu.vector_store %arg5[%c0_6, %c0_7], %7 {strides = array<i32>} : memref<2x256xf32, #tpu.memory_space<vmem>>, vector<2x256xf32>,
    return
  }
  func.func @transform_0(%arg0: i32, %arg1: i32) -> (i32, i32) {
    %c0_i32 = arith.constant 0 : i32
    %c0_i32_0 = arith.constant 0 : i32
    return %arg0, %c0_i32 : i32, i32
  }
  func.func @transform_1(%arg0: i32, %arg1: i32) -> (i32, i32) {
    %c0_i32 = arith.constant 0 : i32
    %c0_i32_0 = arith.constant 0 : i32
    return %c0_i32, %arg1 : i32, i32
  }
  func.func @transform_2(%arg0: i32, %arg1: i32) -> (i32, i32) {
    %c0_i32 = arith.constant 0 : i32
    %c0_i32_0 = arith.constant 0 : i32
    return %c0_i32, %arg1 : i32, i32
  }
  func.func @transform_3(%arg0: i32, %arg1: i32) -> (i32, i32) {
    %c0_i32 = arith.constant 0 : i32
    return %arg0, %arg1 : i32, i32
  }
}

</mosaic_0001>

<bundles_post_ra>
// kernel: ppo_encoder_forward.3
= control target key start
LH: loop header
LB: loop body
LE: loop exit
PB: predicated region body
PF: predicated region fallthrough
CT: control target
= control target key end

     0   :  { %8 = vsyncpa [#allocation4], 0  ;;  %s4179_s0 = inlined_call_operand.vmem [shape: bf16[2,1568], index: 0, kind: input, shape index: {}]   ;;  %s4180_s1 = inlined_call_operand.vmem [shape: bf16[1568,512], index: 1, kind: input, shape index: {}]   ;;  %s4181_s2 = inlined_call_operand.vmem [shape: f32[1,512], index: 2, kind: input, shape index: {}]   ;;  %s4182_s3 = inlined_call_operand.hbm [shape: f32[2,512], index: 3, kind: output, shape index: {}]  }
   0x1   :  { %10 = vsyncpa [#allocation4 + $0x1], 0  ;;  %s3423_s12 = smov 0   ;;  %s3425_s13 = smov 0  }
   0x2   :  { %s3427_s14 = smov 0   ;;  %s3429_s15 = smov 0  }
   0x3   :  { %s3431_s16 = smov 0   ;;  %s3433_s17 = smov 0  }
   0x4 LB: > { %s2752_s18 = sadd.s32 4294967295, %s3398_s17   ;;  %s2753_s19 = sadd.s32 4294967294, %s3398_s17   ;;  %s3398_s17 = sphi %s3433_s17, %s16_s17   ;;  %s3394_s16 = sphi %s3431_s16, %s4191_s16   ;;  %s3390_s15 = sphi %s3429_s15, %s4190_s15   ;;  %s3386_s14 = sphi %s3427_s14, %s4189_s14   ;;  %s3382_s13 = sphi %s3425_s13, %s4188_s13   ;;  %s3378_s12 = sphi %s3423_s12, %s4187_s12  }
   0x5   : > { %s25_s20 = sadd.s32 1, %s3394_s16  ;;  %s61_s21 = sadd.s32 1, %s3386_s14 }
   0x6   : > { %p26_p0 = scmp.ge.s32.totalorder %s25_s20, 2  ;;  %p68_p1 = scmp.ne.s32.totalorder %s3386_s14, %s3382_s13 }
   0x7   : > { %p69_p2 = scmp.eq.s32.totalorder %s3398_s17, 0  ;;  %p126_p3 = scmp.eq.s32.totalorder %s2752_s18, 1 }
   0x8   : > { %s4193_s20 = smov (%p26_p0, %s25_s20), 0  ;;  %p131_p6 = scmp.ne.s32.totalorder %s3382_s13, %s3378_s12 }
   0x9   : > { %p70_p4 = por %p69_p2, %p68_p1  ;;  %p3462_p5 = por %p126_p3, %p68_p1 }
   0xa   : > { %s58_s23 = ssub.s32 %s3394_s16, %s4193_s20  ;;  %p132_p8 = scmp.eq.s32.totalorder %s2753_s19, 1 }
   0xb   : > { %p59_p7 = scmp.eq.s32.totalorder %s58_s23, 0  ;;  %p4183_p10 = scmp.ge.s32.totalorder %s3398_s17, 2 }
   0xc   : > { %p3473_p9 = por %p132_p8, %p131_p6 }
   0xd   : > { %s3471_s24 = scalar_select %p59_p7, %s3386_s14, %s61_s21  }
   0xe   : > { %155 = sbr.rel (%p4183_p10) target bundleno = 121 (0x79), region = 20 }
  0x13   : > { %158 = sbr.rel (!%p70_p4) target bundleno = 121 (0x79), region = 24  ;;  %s160_s26 = sand.u32 (%p70_p4), 1, %s3386_s14  }
  0x14   : > { %s2965_s27 = sshll.u32 (%p70_p4), %s3394_s16, 3  ;;  %s2967_s28 = smul.u32 (%p70_p4), 1568, %s160_s26 }
  0x15   : > { %s3485_s4 = scalar_lea.vmem (%p70_p4), %s4180_s1, %s2965_s27 }
  0x16   : > { %v584_v0 = vld [vmem:[%s3485_s4] sm:$0xff] (%p70_p4)  ;;  %v586_v1 = vld [vmem:[%s3485_s4 + $0x10] sm:$0xff] (%p70_p4)  ;;  %s3493_s5 = scalar_lea.vmem (%p70_p4), [#allocation2], %s2967_s28 }
  0x17   : > { %v588_v2 = vld [vmem:[%s3485_s4 + $0x20] sm:$0xff] (%p70_p4)  ;;  %v590_v3 = vld [vmem:[%s3485_s4 + $0x30] sm:$0xff] (%p70_p4)  ;;  %585 = vst [vmem:[%s3493_s5] sm:$0xff] (%p70_p4), %v584_v0  ;;  %587 = vst [vmem:[%s3493_s5 + $0x8] sm:$0xff] (%p70_p4), %v586_v1 }
  0x18   : > { %v592_v4 = vld [vmem:[%s3485_s4 + $0x40] sm:$0xff]  ;;  %v594_v5 = vld [vmem:[%s3485_s4 + $0x50] sm:$0xff]  ;;  %589 = vst [vmem:[%s3493_s5 + $0x10] sm:$0xff] %v588_v2  ;;  %591 = vst [vmem:[%s3493_s5 + $0x18] sm:$0xff] %v590_v3 }
  0x19   : > { %593 = vst [vmem:[%s3493_s5 + $0x20] sm:$0xff] %v592_v4  ;;  %595 = vst [vmem:[%s3493_s5 + $0x28] sm:$0xff] %v594_v5  ;;  %v596_v6 = vld [vmem:[%s3485_s4 + $0x60] sm:$0xff]  ;;  %v598_v7 = vld [vmem:[%s3485_s4 + $0x70] sm:$0xff] }
  0x1a   : > { %v600_v8 = vld [vmem:[%s3485_s4 + $0x80] sm:$0xff]  ;;  %597 = vst [vmem:[%s3493_s5 + $0x30] sm:$0xff] %v596_v6  ;;  %599 = vst [vmem:[%s3493_s5 + $0x38] sm:$0xff] %v598_v7  ;;  %v602_v9 = vld [vmem:[%s3485_s4 + $0x90] sm:$0xff] }
  0x1b   : > { %601 = vst [vmem:[%s3493_s5 + $0x40] sm:$0xff] %v600_v8  ;;  %v604_v10 = vld [vmem:[%s3485_s4 + $0xa0] sm:$0xff]  ;;  %v606_v11 = vld [vmem:[%s3485_s4 + $0xb0] sm:$0xff]  ;;  %603 = vst [vmem:[%s3493_s5 + $0x48] sm:$0xff] %v602_v9 }
  0x1c   : > { %605 = vst [vmem:[%s3493_s5 + $0x50] sm:$0xff] %v604_v10  ;;  %607 = vst [vmem:[%s3493_s5 + $0x58] sm:$0xff] %v606_v11  ;;  %v608_v12 = vld [vmem:[%s3485_s4 + $0xc0] sm:$0xff]  ;;  %v610_v13 = vld [vmem:[%s3485_s4 + $0xd0] sm:$0xff] }
  0x1d   : > { %v612_v14 = vld [vmem:[%s3485_s4 + $0xe0] sm:$0xff]  ;;  %609 = vst [vmem:[%s3493_s5 + $0x60] sm:$0xff] %v608_v12  ;;  %611 = vst [vmem:[%s3493_s5 + $0x68] sm:$0xff] %v610_v13  ;;  %v614_v15 = vld [vmem:[%s3485_s4 + $0xf0] sm:$0xff] }
  0x1e   : > { %613 = vst [vmem:[%s3493_s5 + $0x70] sm:$0xff] %v612_v14  ;;  %v616_v16 = vld [vmem:[%s3485_s4 + $0x100] sm:$0xff]  ;;  %v618_v17 = vld [vmem:[%s3485_s4 + $0x110] sm:$0xff]  ;;  %615 = vst [vmem:[%s3493_s5 + $0x78] sm:$0xff] %v614_v15 }
  0x1f   : > { %617 = vst [vmem:[%s3493_s5 + $0x80] sm:$0xff] %v616_v16  ;;  %619 = vst [vmem:[%s3493_s5 + $0x88] sm:$0xff] %v618_v17  ;;  %v620_v18 = vld [vmem:[%s3485_s4 + $0x120] sm:$0xff]  ;;  %v622_v19 = vld [vmem:[%s3485_s4 + $0x130] sm:$0xff] }
  0x20   : > { %v624_v20 = vld [vmem:[%s3485_s4 + $0x140] sm:$0xff]  ;;  %621 = vst [vmem:[%s3493_s5 + $0x90] sm:$0xff] %v620_v18  ;;  %623 = vst [vmem:[%s3493_s5 + $0x98] sm:$0xff] %v622_v19  ;;  %v626_v21 = vld [vmem:[%s3485_s4 + $0x150] sm:$0xff] }
  0x21   : > { %625 = vst [vmem:[%s3493_s5 + $0xa0] sm:$0xff] %v624_v20  ;;  %v628_v22 = vld [vmem:[%s3485_s4 + $0x160] sm:$0xff]  ;;  %v630_v23 = vld [vmem:[%s3485_s4 + $0x170] sm:$0xff]  ;;  %627 = vst [vmem:[%s3493_s5 + $0xa8] sm:$0xff] %v626_v21 }
  0x22   : > { %629 = vst [vmem:[%s3493_s5 + $0xb0] sm:$0xff] %v628_v22  ;;  %631 = vst [vmem:[%s3493_s5 + $0xb8] sm:$0xff] %v630_v23  ;;  %v632_v24 = vld [vmem:[%s3485_s4 + $0x180] sm:$0xff]  ;;  %v634_v25 = vld [vmem:[%s3485_s4 + $0x190] sm:$0xff] }
  0x23   : > { %v636_v26 = vld [vmem:[%s3485_s4 + $0x1a0] sm:$0xff]  ;;  %633 = vst [vmem:[%s3493_s5 + $0xc0] sm:$0xff] %v632_v24  ;;  %635 = vst [vmem:[%s3493_s5 + $0xc8] sm:$0xff] %v634_v25  ;;  %v638_v27 = vld [vmem:[%s3485_s4 + $0x1b0] sm:$0xff] }
  0x24   : > { %637 = vst [vmem:[%s3493_s5 + $0xd0] sm:$0xff] %v636_v26  ;;  %v640_v28 = vld [vmem:[%s3485_s4 + $0x1c0] sm:$0xff]  ;;  %v642_v29 = vld [vmem:[%s3485_s4 + $0x1d0] sm:$0xff]  ;;  %639 = vst [vmem:[%s3493_s5 + $0xd8] sm:$0xff] %v638_v27 }
  0x25   : > { %641 = vst [vmem:[%s3493_s5 + $0xe0] sm:$0xff] %v640_v28  ;;  %643 = vst [vmem:[%s3493_s5 + $0xe8] sm:$0xff] %v642_v29  ;;  %v644_v30 = vld [vmem:[%s3485_s4 + $0x1e0] sm:$0xff]  ;;  %v646_v31 = vld [vmem:[%s3485_s4 + $0x1f0] sm:$0xff] }
  0x26   : > { %v648_v32 = vld [vmem:[%s3485_s4 + $0x200] sm:$0xff]  ;;  %645 = vst [vmem:[%s3493_s5 + $0xf0] sm:$0xff] %v644_v30  ;;  %647 = vst [vmem:[%s3493_s5 + $0xf8] sm:$0xff] %v646_v31  ;;  %v650_v33 = vld [vmem:[%s3485_s4 + $0x210] sm:$0xff] }
  0x27   : > { %649 = vst [vmem:[%s3493_s5 + $0x100] sm:$0xff] %v648_v32  ;;  %v652_v34 = vld [vmem:[%s3485_s4 + $0x220] sm:$0xff]  ;;  %v654_v35 = vld [vmem:[%s3485_s4 + $0x230] sm:$0xff]  ;;  %651 = vst [vmem:[%s3493_s5 + $0x108] sm:$0xff] %v650_v33 }
  0x28   : > { %653 = vst [vmem:[%s3493_s5 + $0x110] sm:$0xff] %v652_v34  ;;  %655 = vst [vmem:[%s3493_s5 + $0x118] sm:$0xff] %v654_v35  ;;  %v656_v36 = vld [vmem:[%s3485_s4 + $0x240] sm:$0xff]  ;;  %v658_v37 = vld [vmem:[%s3485_s4 + $0x250] sm:$0xff] }
  0x29   : > { %v660_v38 = vld [vmem:[%s3485_s4 + $0x260] sm:$0xff]  ;;  %657 = vst [vmem:[%s3493_s5 + $0x120] sm:$0xff] %v656_v36  ;;  %659 = vst [vmem:[%s3493_s5 + $0x128] sm:$0xff] %v658_v37  ;;  %v662_v39 = vld [vmem:[%s3485_s4 + $0x270] sm:$0xff] }
  0x2a   : > { %661 = vst [vmem:[%s3493_s5 + $0x130] sm:$0xff] %v660_v38  ;;  %v664_v40 = vld [vmem:[%s3485_s4 + $0x280] sm:$0xff]  ;;  %v666_v41 = vld [vmem:[%s3485_s4 + $0x290] sm:$0xff]  ;;  %663 = vst [vmem:[%s3493_s5 + $0x138] sm:$0xff] %v662_v39 }
  0x2b   : > { %665 = vst [vmem:[%s3493_s5 + $0x140] sm:$0xff] %v664_v40  ;;  %667 = vst [vmem:[%s3493_s5 + $0x148] sm:$0xff] %v666_v41  ;;  %v668_v42 = vld [vmem:[%s3485_s4 + $0x2a0] sm:$0xff]  ;;  %v670_v43 = vld [vmem:[%s3485_s4 + $0x2b0] sm:$0xff] }
  0x2c   : > { %v672_v44 = vld [vmem:[%s3485_s4 + $0x2c0] sm:$0xff]  ;;  %669 = vst [vmem:[%s3493_s5 + $0x150] sm:$0xff] %v668_v42  ;;  %671 = vst [vmem:[%s3493_s5 + $0x158] sm:$0xff] %v670_v43  ;;  %v674_v45 = vld [vmem:[%s3485_s4 + $0x2d0] sm:$0xff] }
  0x2d   : > { %673 = vst [vmem:[%s3493_s5 + $0x160] sm:$0xff] %v672_v44  ;;  %v676_v46 = vld [vmem:[%s3485_s4 + $0x2e0] sm:$0xff]  ;;  %v678_v47 = vld [vmem:[%s3485_s4 + $0x2f0] sm:$0xff]  ;;  %675 = vst [vmem:[%s3493_s5 + $0x168] sm:$0xff] %v674_v45 }
  0x2e   : > { %677 = vst [vmem:[%s3493_s5 + $0x170] sm:$0xff] %v676_v46  ;;  %679 = vst [vmem:[%s3493_s5 + $0x178] sm:$0xff] %v678_v47  ;;  %v680_v48 = vld [vmem:[%s3485_s4 + $0x300] sm:$0xff]  ;;  %v682_v49 = vld [vmem:[%s3485_s4 + $0x310] sm:$0xff] }
  0x2f   : > { %v684_v50 = vld [vmem:[%s3485_s4 + $0x320] sm:$0xff]  ;;  %681 = vst [vmem:[%s3493_s5 + $0x180] sm:$0xff] %v680_v48  ;;  %683 = vst [vmem:[%s3493_s5 + $0x188] sm:$0xff] %v682_v49  ;;  %v686_v51 = vld [vmem:[%s3485_s4 + $0x330] sm:$0xff] }
  0x30   : > { %685 = vst [vmem:[%s3493_s5 + $0x190] sm:$0xff] %v684_v50  ;;  %v688_v52 = vld [vmem:[%s3485_s4 + $0x340] sm:$0xff]  ;;  %v690_v53 = vld [vmem:[%s3485_s4 + $0x350] sm:$0xff]  ;;  %687 = vst [vmem:[%s3493_s5 + $0x198] sm:$0xff] %v686_v51 }
  0x31   : > { %689 = vst [vmem:[%s3493_s5 + $0x1a0] sm:$0xff] %v688_v52  ;;  %691 = vst [vmem:[%s3493_s5 + $0x1a8] sm:$0xff] %v690_v53  ;;  %v692_v54 = vld [vmem:[%s3485_s4 + $0x360] sm:$0xff]  ;;  %v694_v55 = vld [vmem:[%s3485_s4 + $0x370] sm:$0xff] }
  0x32   : > { %v696_v56 = vld [vmem:[%s3485_s4 + $0x380] sm:$0xff]  ;;  %693 = vst [vmem:[%s3493_s5 + $0x1b0] sm:$0xff] %v692_v54  ;;  %695 = vst [vmem:[%s3493_s5 + $0x1b8] sm:$0xff] %v694_v55  ;;  %v698_v57 = vld [vmem:[%s3485_s4 + $0x390] sm:$0xff] }
  0x33   : > { %697 = vst [vmem:[%s3493_s5 + $0x1c0] sm:$0xff] %v696_v56  ;;  %v700_v58 = vld [vmem:[%s3485_s4 + $0x3a0] sm:$0xff]  ;;  %v702_v59 = vld [vmem:[%s3485_s4 + $0x3b0] sm:$0xff]  ;;  %699 = vst [vmem:[%s3493_s5 + $0x1c8] sm:$0xff] %v698_v57 }
  0x34   : > { %701 = vst [vmem:[%s3493_s5 + $0x1d0] sm:$0xff] %v700_v58  ;;  %703 = vst [vmem:[%s3493_s5 + $0x1d8] sm:$0xff] %v702_v59  ;;  %v704_v60 = vld [vmem:[%s3485_s4 + $0x3c0] sm:$0xff]  ;;  %v706_v61 = vld [vmem:[%s3485_s4 + $0x3d0] sm:$0xff] }
  0x35   : > { %v708_v62 = vld [vmem:[%s3485_s4 + $0x3e0] sm:$0xff]  ;;  %705 = vst [vmem:[%s3493_s5 + $0x1e0] sm:$0xff] %v704_v60  ;;  %707 = vst [vmem:[%s3493_s5 + $0x1e8] sm:$0xff] %v706_v61  ;;  %v710_v63 = vld [vmem:[%s3485_s4 + $0x3f0] sm:$0xff] }
  0x36   : > { %709 = vst [vmem:[%s3493_s5 + $0x1f0] sm:$0xff] %v708_v62  ;;  %v712_v0 = vld [vmem:[%s3485_s4 + $0x400] sm:$0xff]  ;;  %v714_v1 = vld [vmem:[%s3485_s4 + $0x410] sm:$0xff]  ;;  %711 = vst [vmem:[%s3493_s5 + $0x1f8] sm:$0xff] %v710_v63 }
  0x37   : > { %713 = vst [vmem:[%s3493_s5 + $0x200] sm:$0xff] %v712_v0  ;;  %715 = vst [vmem:[%s3493_s5 + $0x208] sm:$0xff] %v714_v1  ;;  %v716_v2 = vld [vmem:[%s3485_s4 + $0x420] sm:$0xff]  ;;  %v718_v3 = vld [vmem:[%s3485_s4 + $0x430] sm:$0xff] }
  0x38   : > { %v720_v4 = vld [vmem:[%s3485_s4 + $0x440] sm:$0xff]  ;;  %717 = vst [vmem:[%s3493_s5 + $0x210] sm:$0xff] %v716_v2  ;;  %719 = vst [vmem:[%s3493_s5 + $0x218] sm:$0xff] %v718_v3  ;;  %v722_v5 = vld [vmem:[%s3485_s4 + $0x450] sm:$0xff] }
  0x39   : > { %721 = vst [vmem:[%s3493_s5 + $0x220] sm:$0xff] %v720_v4  ;;  %v724_v6 = vld [vmem:[%s3485_s4 + $0x460] sm:$0xff]  ;;  %v726_v7 = vld [vmem:[%s3485_s4 + $0x470] sm:$0xff]  ;;  %723 = vst [vmem:[%s3493_s5 + $0x228] sm:$0xff] %v722_v5 }
  0x3a   : > { %725 = vst [vmem:[%s3493_s5 + $0x230] sm:$0xff] %v724_v6  ;;  %727 = vst [vmem:[%s3493_s5 + $0x238] sm:$0xff] %v726_v7  ;;  %v728_v8 = vld [vmem:[%s3485_s4 + $0x480] sm:$0xff]  ;;  %v730_v9 = vld [vmem:[%s3485_s4 + $0x490] sm:$0xff] }
  0x3b   : > { %v732_v10 = vld [vmem:[%s3485_s4 + $0x4a0] sm:$0xff]  ;;  %729 = vst [vmem:[%s3493_s5 + $0x240] sm:$0xff] %v728_v8  ;;  %731 = vst [vmem:[%s3493_s5 + $0x248] sm:$0xff] %v730_v9  ;;  %v734_v11 = vld [vmem:[%s3485_s4 + $0x4b0] sm:$0xff] }
  0x3c   : > { %733 = vst [vmem:[%s3493_s5 + $0x250] sm:$0xff] %v732_v10  ;;  %v736_v12 = vld [vmem:[%s3485_s4 + $0x4c0] sm:$0xff]  ;;  %v738_v13 = vld [vmem:[%s3485_s4 + $0x4d0] sm:$0xff]  ;;  %735 = vst [vmem:[%s3493_s5 + $0x258] sm:$0xff] %v734_v11 }
  0x3d   : > { %737 = vst [vmem:[%s3493_s5 + $0x260] sm:$0xff] %v736_v12  ;;  %739 = vst [vmem:[%s3493_s5 + $0x268] sm:$0xff] %v738_v13  ;;  %v740_v14 = vld [vmem:[%s3485_s4 + $0x4e0] sm:$0xff]  ;;  %v742_v15 = vld [vmem:[%s3485_s4 + $0x4f0] sm:$0xff] }
  0x3e   : > { %v744_v16 = vld [vmem:[%s3485_s4 + $0x500] sm:$0xff]  ;;  %741 = vst [vmem:[%s3493_s5 + $0x270] sm:$0xff] %v740_v14  ;;  %743 = vst [vmem:[%s3493_s5 + $0x278] sm:$0xff] %v742_v15  ;;  %v746_v17 = vld [vmem:[%s3485_s4 + $0x510] sm:$0xff] }
  0x3f   : > { %745 = vst [vmem:[%s3493_s5 + $0x280] sm:$0xff] %v744_v16  ;;  %v748_v18 = vld [vmem:[%s3485_s4 + $0x520] sm:$0xff]  ;;  %v750_v19 = vld [vmem:[%s3485_s4 + $0x530] sm:$0xff]  ;;  %747 = vst [vmem:[%s3493_s5 + $0x288] sm:$0xff] %v746_v17 }
  0x40   : > { %749 = vst [vmem:[%s3493_s5 + $0x290] sm:$0xff] %v748_v18  ;;  %751 = vst [vmem:[%s3493_s5 + $0x298] sm:$0xff] %v750_v19  ;;  %v752_v20 = vld [vmem:[%s3485_s4 + $0x540] sm:$0xff]  ;;  %v754_v21 = vld [vmem:[%s3485_s4 + $0x550] sm:$0xff] }
  0x41   : > { %v756_v22 = vld [vmem:[%s3485_s4 + $0x560] sm:$0xff]  ;;  %753 = vst [vmem:[%s3493_s5 + $0x2a0] sm:$0xff] %v752_v20  ;;  %755 = vst [vmem:[%s3493_s5 + $0x2a8] sm:$0xff] %v754_v21  ;;  %v758_v23 = vld [vmem:[%s3485_s4 + $0x570] sm:$0xff] }
  0x42   : > { %757 = vst [vmem:[%s3493_s5 + $0x2b0] sm:$0xff] %v756_v22  ;;  %v760_v24 = vld [vmem:[%s3485_s4 + $0x580] sm:$0xff]  ;;  %v762_v25 = vld [vmem:[%s3485_s4 + $0x590] sm:$0xff]  ;;  %759 = vst [vmem:[%s3493_s5 + $0x2b8] sm:$0xff] %v758_v23 }
  0x43   : > { %761 = vst [vmem:[%s3493_s5 + $0x2c0] sm:$0xff] %v760_v24  ;;  %763 = vst [vmem:[%s3493_s5 + $0x2c8] sm:$0xff] %v762_v25  ;;  %v764_v26 = vld [vmem:[%s3485_s4 + $0x5a0] sm:$0xff]  ;;  %v766_v27 = vld [vmem:[%s3485_s4 + $0x5b0] sm:$0xff] }
  0x44   : > { %v768_v28 = vld [vmem:[%s3485_s4 + $0x5c0] sm:$0xff]  ;;  %765 = vst [vmem:[%s3493_s5 + $0x2d0] sm:$0xff] %v764_v26  ;;  %767 = vst [vmem:[%s3493_s5 + $0x2d8] sm:$0xff] %v766_v27  ;;  %v770_v29 = vld [vmem:[%s3485_s4 + $0x5d0] sm:$0xff] }
  0x45   : > { %769 = vst [vmem:[%s3493_s5 + $0x2e0] sm:$0xff] %v768_v28  ;;  %v772_v30 = vld [vmem:[%s3485_s4 + $0x5e0] sm:$0xff]  ;;  %v774_v31 = vld [vmem:[%s3485_s4 + $0x5f0] sm:$0xff]  ;;  %771 = vst [vmem:[%s3493_s5 + $0x2e8] sm:$0xff] %v770_v29 }
  0x46   : > { %773 = vst [vmem:[%s3493_s5 + $0x2f0] sm:$0xff] %v772_v30  ;;  %775 = vst [vmem:[%s3493_s5 + $0x2f8] sm:$0xff] %v774_v31  ;;  %v776_v32 = vld [vmem:[%s3485_s4 + $0x600] sm:$0xff]  ;;  %v778_v33 = vld [vmem:[%s3485_s4 + $0x610] sm:$0xff] }
  0x47   : > { %v780_v34 = vld [vmem:[%s3485_s4 + $0x620] sm:$0xff]  ;;  %777 = vst [vmem:[%s3493_s5 + $0x300] sm:$0xff] %v776_v32  ;;  %779 = vst [vmem:[%s3493_s5 + $0x308] sm:$0xff] %v778_v33  ;;  %v782_v35 = vld [vmem:[%s3485_s4 + $0x630] sm:$0xff] }
  0x48   : > { %781 = vst [vmem:[%s3493_s5 + $0x310] sm:$0xff] %v780_v34  ;;  %v784_v36 = vld [vmem:[%s3485_s4 + $0x640] sm:$0xff]  ;;  %v786_v37 = vld [vmem:[%s3485_s4 + $0x650] sm:$0xff]  ;;  %783 = vst [vmem:[%s3493_s5 + $0x318] sm:$0xff] %v782_v35 }
  0x49   : > { %785 = vst [vmem:[%s3493_s5 + $0x320] sm:$0xff] %v784_v36  ;;  %787 = vst [vmem:[%s3493_s5 + $0x328] sm:$0xff] %v786_v37  ;;  %v788_v38 = vld [vmem:[%s3485_s4 + $0x660] sm:$0xff]  ;;  %v790_v39 = vld [vmem:[%s3485_s4 + $0x670] sm:$0xff] }
  0x4a   : > { %v792_v40 = vld [vmem:[%s3485_s4 + $0x680] sm:$0xff]  ;;  %789 = vst [vmem:[%s3493_s5 + $0x330] sm:$0xff] %v788_v38  ;;  %791 = vst [vmem:[%s3493_s5 + $0x338] sm:$0xff] %v790_v39  ;;  %v794_v41 = vld [vmem:[%s3485_s4 + $0x690] sm:$0xff] }
  0x4b   : > { %793 = vst [vmem:[%s3493_s5 + $0x340] sm:$0xff] %v792_v40  ;;  %v796_v42 = vld [vmem:[%s3485_s4 + $0x6a0] sm:$0xff]  ;;  %v798_v43 = vld [vmem:[%s3485_s4 + $0x6b0] sm:$0xff]  ;;  %795 = vst [vmem:[%s3493_s5 + $0x348] sm:$0xff] %v794_v41 }
  0x4c   : > { %797 = vst [vmem:[%s3493_s5 + $0x350] sm:$0xff] %v796_v42  ;;  %799 = vst [vmem:[%s3493_s5 + $0x358] sm:$0xff] %v798_v43  ;;  %v800_v44 = vld [vmem:[%s3485_s4 + $0x6c0] sm:$0xff]  ;;  %v802_v45 = vld [vmem:[%s3485_s4 + $0x6d0] sm:$0xff] }
  0x4d   : > { %v804_v46 = vld [vmem:[%s3485_s4 + $0x6e0] sm:$0xff]  ;;  %801 = vst [vmem:[%s3493_s5 + $0x360] sm:$0xff] %v800_v44  ;;  %803 = vst [vmem:[%s3493_s5 + $0x368] sm:$0xff] %v802_v45  ;;  %v806_v47 = vld [vmem:[%s3485_s4 + $0x6f0] sm:$0xff] }
  0x4e   : > { %805 = vst [vmem:[%s3493_s5 + $0x370] sm:$0xff] %v804_v46  ;;  %v808_v48 = vld [vmem:[%s3485_s4 + $0x700] sm:$0xff]  ;;  %v810_v49 = vld [vmem:[%s3485_s4 + $0x710] sm:$0xff]  ;;  %807 = vst [vmem:[%s3493_s5 + $0x378] sm:$0xff] %v806_v47 }
  0x4f   : > { %809 = vst [vmem:[%s3493_s5 + $0x380] sm:$0xff] %v808_v48  ;;  %811 = vst [vmem:[%s3493_s5 + $0x388] sm:$0xff] %v810_v49  ;;  %v812_v50 = vld [vmem:[%s3485_s4 + $0x720] sm:$0xff]  ;;  %v814_v51 = vld [vmem:[%s3485_s4 + $0x730] sm:$0xff] }
  0x50   : > { %v816_v52 = vld [vmem:[%s3485_s4 + $0x740] sm:$0xff]  ;;  %813 = vst [vmem:[%s3493_s5 + $0x390] sm:$0xff] %v812_v50  ;;  %815 = vst [vmem:[%s3493_s5 + $0x398] sm:$0xff] %v814_v51  ;;  %v818_v53 = vld [vmem:[%s3485_s4 + $0x750] sm:$0xff] }
  0x51   : > { %817 = vst [vmem:[%s3493_s5 + $0x3a0] sm:$0xff] %v816_v52  ;;  %v820_v54 = vld [vmem:[%s3485_s4 + $0x760] sm:$0xff]  ;;  %v822_v55 = vld [vmem:[%s3485_s4 + $0x770] sm:$0xff]  ;;  %819 = vst [vmem:[%s3493_s5 + $0x3a8] sm:$0xff] %v818_v53 }
  0x52   : > { %821 = vst [vmem:[%s3493_s5 + $0x3b0] sm:$0xff] %v820_v54  ;;  %823 = vst [vmem:[%s3493_s5 + $0x3b8] sm:$0xff] %v822_v55  ;;  %v824_v56 = vld [vmem:[%s3485_s4 + $0x780] sm:$0xff]  ;;  %v826_v57 = vld [vmem:[%s3485_s4 + $0x790] sm:$0xff] }
  0x53   : > { %v828_v58 = vld [vmem:[%s3485_s4 + $0x7a0] sm:$0xff]  ;;  %825 = vst [vmem:[%s3493_s5 + $0x3c0] sm:$0xff] %v824_v56  ;;  %827 = vst [vmem:[%s3493_s5 + $0x3c8] sm:$0xff] %v826_v57  ;;  %v830_v59 = vld [vmem:[%s3485_s4 + $0x7b0] sm:$0xff] }
  0x54   : > { %829 = vst [vmem:[%s3493_s5 + $0x3d0] sm:$0xff] %v828_v58  ;;  %v832_v60 = vld [vmem:[%s3485_s4 + $0x7c0] sm:$0xff]  ;;  %v834_v61 = vld [vmem:[%s3485_s4 + $0x7d0] sm:$0xff]  ;;  %831 = vst [vmem:[%s3493_s5 + $0x3d8] sm:$0xff] %v830_v59 }
  0x55   : > { %833 = vst [vmem:[%s3493_s5 + $0x3e0] sm:$0xff] %v832_v60  ;;  %835 = vst [vmem:[%s3493_s5 + $0x3e8] sm:$0xff] %v834_v61  ;;  %v836_v62 = vld [vmem:[%s3485_s4 + $0x7e0] sm:$0xff]  ;;  %v838_v63 = vld [vmem:[%s3485_s4 + $0x7f0] sm:$0xff] }
  0x56   : > { %v840_v0 = vld [vmem:[%s3485_s4 + $0x800] sm:$0xff]  ;;  %837 = vst [vmem:[%s3493_s5 + $0x3f0] sm:$0xff] %v836_v62  ;;  %839 = vst [vmem:[%s3493_s5 + $0x3f8] sm:$0xff] %v838_v63  ;;  %v842_v1 = vld [vmem:[%s3485_s4 + $0x810] sm:$0xff] }
  0x57   : > { %841 = vst [vmem:[%s3493_s5 + $0x400] sm:$0xff] %v840_v0  ;;  %v844_v2 = vld [vmem:[%s3485_s4 + $0x820] sm:$0xff]  ;;  %v846_v3 = vld [vmem:[%s3485_s4 + $0x830] sm:$0xff]  ;;  %843 = vst [vmem:[%s3493_s5 + $0x408] sm:$0xff] %v842_v1 }
  0x58   : > { %845 = vst [vmem:[%s3493_s5 + $0x410] sm:$0xff] %v844_v2  ;;  %847 = vst [vmem:[%s3493_s5 + $0x418] sm:$0xff] %v846_v3  ;;  %v848_v4 = vld [vmem:[%s3485_s4 + $0x840] sm:$0xff]  ;;  %v850_v5 = vld [vmem:[%s3485_s4 + $0x850] sm:$0xff] }
  0x59   : > { %v852_v6 = vld [vmem:[%s3485_s4 + $0x860] sm:$0xff]  ;;  %849 = vst [vmem:[%s3493_s5 + $0x420] sm:$0xff] %v848_v4  ;;  %851 = vst [vmem:[%s3493_s5 + $0x428] sm:$0xff] %v850_v5  ;;  %v854_v7 = vld [vmem:[%s3485_s4 + $0x870] sm:$0xff] }
  0x5a   : > { %853 = vst [vmem:[%s3493_s5 + $0x430] sm:$0xff] %v852_v6  ;;  %v856_v8 = vld [vmem:[%s3485_s4 + $0x880] sm:$0xff]  ;;  %v858_v9 = vld [vmem:[%s3485_s4 + $0x890] sm:$0xff]  ;;  %855 = vst [vmem:[%s3493_s5 + $0x438] sm:$0xff] %v854_v7 }
  0x5b   : > { %857 = vst [vmem:[%s3493_s5 + $0x440] sm:$0xff] %v856_v8  ;;  %859 = vst [vmem:[%s3493_s5 + $0x448] sm:$0xff] %v858_v9  ;;  %v860_v10 = vld [vmem:[%s3485_s4 + $0x8a0] sm:$0xff]  ;;  %v862_v11 = vld [vmem:[%s3485_s4 + $0x8b0] sm:$0xff] }
  0x5c   : > { %v864_v12 = vld [vmem:[%s3485_s4 + $0x8c0] sm:$0xff]  ;;  %861 = vst [vmem:[%s3493_s5 + $0x450] sm:$0xff] %v860_v10  ;;  %863 = vst [vmem:[%s3493_s5 + $0x458] sm:$0xff] %v862_v11  ;;  %v866_v13 = vld [vmem:[%s3485_s4 + $0x8d0] sm:$0xff] }
  0x5d   : > { %865 = vst [vmem:[%s3493_s5 + $0x460] sm:$0xff] %v864_v12  ;;  %v868_v14 = vld [vmem:[%s3485_s4 + $0x8e0] sm:$0xff]  ;;  %v870_v15 = vld [vmem:[%s3485_s4 + $0x8f0] sm:$0xff]  ;;  %867 = vst [vmem:[%s3493_s5 + $0x468] sm:$0xff] %v866_v13 }
  0x5e   : > { %869 = vst [vmem:[%s3493_s5 + $0x470] sm:$0xff] %v868_v14  ;;  %871 = vst [vmem:[%s3493_s5 + $0x478] sm:$0xff] %v870_v15  ;;  %v872_v16 = vld [vmem:[%s3485_s4 + $0x900] sm:$0xff]  ;;  %v874_v17 = vld [vmem:[%s3485_s4 + $0x910] sm:$0xff] }
  0x5f   : > { %v876_v18 = vld [vmem:[%s3485_s4 + $0x920] sm:$0xff]  ;;  %873 = vst [vmem:[%s3493_s5 + $0x480] sm:$0xff] %v872_v16  ;;  %875 = vst [vmem:[%s3493_s5 + $0x488] sm:$0xff] %v874_v17  ;;  %v878_v19 = vld [vmem:[%s3485_s4 + $0x930] sm:$0xff] }
  0x60   : > { %877 = vst [vmem:[%s3493_s5 + $0x490] sm:$0xff] %v876_v18  ;;  %v880_v20 = vld [vmem:[%s3485_s4 + $0x940] sm:$0xff]  ;;  %v882_v21 = vld [vmem:[%s3485_s4 + $0x950] sm:$0xff]  ;;  %879 = vst [vmem:[%s3493_s5 + $0x498] sm:$0xff] %v878_v19 }
  0x61   : > { %881 = vst [vmem:[%s3493_s5 + $0x4a0] sm:$0xff] %v880_v20  ;;  %883 = vst [vmem:[%s3493_s5 + $0x4a8] sm:$0xff] %v882_v21  ;;  %v884_v22 = vld [vmem:[%s3485_s4 + $0x960] sm:$0xff]  ;;  %v886_v23 = vld [vmem:[%s3485_s4 + $0x970] sm:$0xff] }
  0x62   : > { %v888_v24 = vld [vmem:[%s3485_s4 + $0x980] sm:$0xff]  ;;  %885 = vst [vmem:[%s3493_s5 + $0x4b0] sm:$0xff] %v884_v22  ;;  %887 = vst [vmem:[%s3493_s5 + $0x4b8] sm:$0xff] %v886_v23  ;;  %v890_v25 = vld [vmem:[%s3485_s4 + $0x990] sm:$0xff] }
  0x63   : > { %889 = vst [vmem:[%s3493_s5 + $0x4c0] sm:$0xff] %v888_v24  ;;  %v892_v26 = vld [vmem:[%s3485_s4 + $0x9a0] sm:$0xff]  ;;  %v894_v27 = vld [vmem:[%s3485_s4 + $0x9b0] sm:$0xff]  ;;  %891 = vst [vmem:[%s3493_s5 + $0x4c8] sm:$0xff] %v890_v25 }
  0x64   : > { %893 = vst [vmem:[%s3493_s5 + $0x4d0] sm:$0xff] %v892_v26  ;;  %895 = vst [vmem:[%s3493_s5 + $0x4d8] sm:$0xff] %v894_v27  ;;  %v896_v28 = vld [vmem:[%s3485_s4 + $0x9c0] sm:$0xff]  ;;  %v898_v29 = vld [vmem:[%s3485_s4 + $0x9d0] sm:$0xff] }
  0x65   : > { %v900_v30 = vld [vmem:[%s3485_s4 + $0x9e0] sm:$0xff]  ;;  %897 = vst [vmem:[%s3493_s5 + $0x4e0] sm:$0xff] %v896_v28  ;;  %899 = vst [vmem:[%s3493_s5 + $0x4e8] sm:$0xff] %v898_v29  ;;  %v902_v31 = vld [vmem:[%s3485_s4 + $0x9f0] sm:$0xff] }
  0x66   : > { %901 = vst [vmem:[%s3493_s5 + $0x4f0] sm:$0xff] %v900_v30  ;;  %v904_v32 = vld [vmem:[%s3485_s4 + $0xa00] sm:$0xff]  ;;  %v906_v33 = vld [vmem:[%s3485_s4 + $0xa10] sm:$0xff]  ;;  %903 = vst [vmem:[%s3493_s5 + $0x4f8] sm:$0xff] %v902_v31 }
  0x67   : > { %905 = vst [vmem:[%s3493_s5 + $0x500] sm:$0xff] %v904_v32  ;;  %907 = vst [vmem:[%s3493_s5 + $0x508] sm:$0xff] %v906_v33  ;;  %v908_v34 = vld [vmem:[%s3485_s4 + $0xa20] sm:$0xff]  ;;  %v910_v35 = vld [vmem:[%s3485_s4 + $0xa30] sm:$0xff] }
  0x68   : > { %v912_v36 = vld [vmem:[%s3485_s4 + $0xa40] sm:$0xff]  ;;  %909 = vst [vmem:[%s3493_s5 + $0x510] sm:$0xff] %v908_v34  ;;  %911 = vst [vmem:[%s3493_s5 + $0x518] sm:$0xff] %v910_v35  ;;  %v914_v37 = vld [vmem:[%s3485_s4 + $0xa50] sm:$0xff] }
  0x69   : > { %913 = vst [vmem:[%s3493_s5 + $0x520] sm:$0xff] %v912_v36  ;;  %v916_v38 = vld [vmem:[%s3485_s4 + $0xa60] sm:$0xff]  ;;  %v918_v39 = vld [vmem:[%s3485_s4 + $0xa70] sm:$0xff]  ;;  %915 = vst [vmem:[%s3493_s5 + $0x528] sm:$0xff] %v914_v37 }
  0x6a   : > { %917 = vst [vmem:[%s3493_s5 + $0x530] sm:$0xff] %v916_v38  ;;  %919 = vst [vmem:[%s3493_s5 + $0x538] sm:$0xff] %v918_v39  ;;  %v920_v40 = vld [vmem:[%s3485_s4 + $0xa80] sm:$0xff]  ;;  %v922_v41 = vld [vmem:[%s3485_s4 + $0xa90] sm:$0xff] }
  0x6b   : > { %v924_v42 = vld [vmem:[%s3485_s4 + $0xaa0] sm:$0xff]  ;;  %921 = vst [vmem:[%s3493_s5 + $0x540] sm:$0xff] %v920_v40  ;;  %923 = vst [vmem:[%s3493_s5 + $0x548] sm:$0xff] %v922_v41  ;;  %v926_v43 = vld [vmem:[%s3485_s4 + $0xab0] sm:$0xff] }
  0x6c   : > { %925 = vst [vmem:[%s3493_s5 + $0x550] sm:$0xff] %v924_v42  ;;  %v928_v44 = vld [vmem:[%s3485_s4 + $0xac0] sm:$0xff]  ;;  %v930_v45 = vld [vmem:[%s3485_s4 + $0xad0] sm:$0xff]  ;;  %927 = vst [vmem:[%s3493_s5 + $0x558] sm:$0xff] %v926_v43 }
  0x6d   : > { %929 = vst [vmem:[%s3493_s5 + $0x560] sm:$0xff] %v928_v44  ;;  %931 = vst [vmem:[%s3493_s5 + $0x568] sm:$0xff] %v930_v45  ;;  %v932_v46 = vld [vmem:[%s3485_s4 + $0xae0] sm:$0xff]  ;;  %v934_v47 = vld [vmem:[%s3485_s4 + $0xaf0] sm:$0xff] }
  0x6e   : > { %v936_v48 = vld [vmem:[%s3485_s4 + $0xb00] sm:$0xff]  ;;  %933 = vst [vmem:[%s3493_s5 + $0x570] sm:$0xff] %v932_v46  ;;  %935 = vst [vmem:[%s3493_s5 + $0x578] sm:$0xff] %v934_v47  ;;  %v938_v49 = vld [vmem:[%s3485_s4 + $0xb10] sm:$0xff] }
  0x6f   : > { %937 = vst [vmem:[%s3493_s5 + $0x580] sm:$0xff] %v936_v48  ;;  %v940_v50 = vld [vmem:[%s3485_s4 + $0xb20] sm:$0xff]  ;;  %v942_v51 = vld [vmem:[%s3485_s4 + $0xb30] sm:$0xff]  ;;  %939 = vst [vmem:[%s3493_s5 + $0x588] sm:$0xff] %v938_v49 }
  0x70   : > { %941 = vst [vmem:[%s3493_s5 + $0x590] sm:$0xff] %v940_v50  ;;  %943 = vst [vmem:[%s3493_s5 + $0x598] sm:$0xff] %v942_v51  ;;  %v944_v52 = vld [vmem:[%s3485_s4 + $0xb40] sm:$0xff]  ;;  %v946_v53 = vld [vmem:[%s3485_s4 + $0xb50] sm:$0xff] }
  0x71   : > { %v948_v54 = vld [vmem:[%s3485_s4 + $0xb60] sm:$0xff]  ;;  %945 = vst [vmem:[%s3493_s5 + $0x5a0] sm:$0xff] %v944_v52  ;;  %947 = vst [vmem:[%s3493_s5 + $0x5a8] sm:$0xff] %v946_v53  ;;  %v950_v55 = vld [vmem:[%s3485_s4 + $0xb70] sm:$0xff] }
  0x72   : > { %949 = vst [vmem:[%s3493_s5 + $0x5b0] sm:$0xff] %v948_v54  ;;  %v952_v56 = vld [vmem:[%s3485_s4 + $0xb80] sm:$0xff]  ;;  %v954_v57 = vld [vmem:[%s3485_s4 + $0xb90] sm:$0xff]  ;;  %951 = vst [vmem:[%s3493_s5 + $0x5b8] sm:$0xff] %v950_v55 }
  0x73   : > { %953 = vst [vmem:[%s3493_s5 + $0x5c0] sm:$0xff] %v952_v56  ;;  %955 = vst [vmem:[%s3493_s5 + $0x5c8] sm:$0xff] %v954_v57  ;;  %v956_v58 = vld [vmem:[%s3485_s4 + $0xba0] sm:$0xff]  ;;  %v958_v59 = vld [vmem:[%s3485_s4 + $0xbb0] sm:$0xff] }
  0x74   : > { %v960_v60 = vld [vmem:[%s3485_s4 + $0xbc0] sm:$0xff]  ;;  %957 = vst [vmem:[%s3493_s5 + $0x5d0] sm:$0xff] %v956_v58  ;;  %959 = vst [vmem:[%s3493_s5 + $0x5d8] sm:$0xff] %v958_v59  ;;  %v962_v61 = vld [vmem:[%s3485_s4 + $0xbd0] sm:$0xff] }
  0x75   : > { %961 = vst [vmem:[%s3493_s5 + $0x5e0] sm:$0xff] %v960_v60  ;;  %v964_v62 = vld [vmem:[%s3485_s4 + $0xbe0] sm:$0xff]  ;;  %v966_v63 = vld [vmem:[%s3485_s4 + $0xbf0] sm:$0xff]  ;;  %963 = vst [vmem:[%s3493_s5 + $0x5e8] sm:$0xff] %v962_v61 }
  0x76   : > { %965 = vst [vmem:[%s3493_s5 + $0x5f0] sm:$0xff] %v964_v62  ;;  %967 = vst [vmem:[%s3493_s5 + $0x5f8] sm:$0xff] %v966_v63  ;;  %v968_v0 = vld [vmem:[%s3485_s4 + $0xc00] sm:$0xff]  ;;  %v970_v1 = vld [vmem:[%s3485_s4 + $0xc10] sm:$0xff] }
  0x77   : > { %v972_v2 = vld [vmem:[%s3485_s4 + $0xc20] sm:$0xff]  ;;  %969 = vst [vmem:[%s3493_s5 + $0x600] sm:$0xff] %v968_v0  ;;  %971 = vst [vmem:[%s3493_s5 + $0x608] sm:$0xff] %v970_v1  ;;  %v974_v3 = vld [vmem:[%s3485_s4 + $0xc30] sm:$0xff] }
  0x78   : > { %973 = vst [vmem:[%s3493_s5 + $0x610] sm:$0xff] %v972_v2  ;;  %975 = vst [vmem:[%s3493_s5 + $0x618] sm:$0xff] %v974_v3 }
  0x79 PF: > { %p2759_p11 = scmp.ge.s32.totalorder %s3398_s17, 1  ;;  %p988_p12 = scmp.lt.s32.totalorder %s3398_s17, 3 }
  0x7b   : > { %p989_p13 = pnand %p2759_p11, %p988_p12 }
  0x7c   : > { %s3884_s6 = sand.u32 (!%p989_p13), 1, %s3382_s13   ;;  %s2761_s19 = sshll.u32 (!%p989_p13), %s3390_s15, 1 }
  0x7d   : > { %992 = sbr.rel (%p989_p13) target bundleno = 545 (0x221), region = 66  ;;  %p1032_p0 = scmp.lt.s32.totalorder (!%p989_p13), %s2761_s19, 3 }
  0x7e   : > { %s2968_s7 = smul.u32 (!%p989_p13), 1568, %s3884_s6  ;;  %s2760_s27 = sshll.u32 (!%p989_p13), %s3884_s6, 2 }
  0x7f   : > { %s2966_s28 = sshll.u32 (!%p989_p13), %s3390_s15, 6  ;;  %s1025_s29 = scalar_lea.vmem (!%p989_p13), [#allocation3], %s2760_s27 }
  0x80   : > { %s3894_s10 = scalar_lea.vmem (!%p989_p13), [#allocation2], %s2968_s7  ;;  %s2652_s30 = sshll.u32 (!%p989_p13), %s1025_s29, 4  ;;  %s2653_s30 = int_to_ptr.vmem [resolvable:$true] %s2652_s30 }
  0x81   : > { %s2650_s7 = scalar_lea.hbm (!%p989_p13), %s4182_s3, %s2966_s28  ;;  %s2636_s8 = scalar_lea.sflag (!%p989_p13), [#allocation4], %s3884_s6 }
  0x82   : > { %v1238_v4 = vlaneseq  ;;  %v3400_v5 = vmov 1966171168   ;;  %v3892_v8 = vld [vmem:[%s4179_s0] sm:$0xff]  ;;  %v3026_v10 = vld [vmem:[%s3894_s10 + $0x74] ss:$8 sps:$4 sm:$0xff]   ;;  %vm2330_vm0 = vcmask 261120  }
  0x83   : > { %v1252_v6 = vunpack.c.l.s4 %v3400_v5  ;;  %v3028_v11 = vld [vmem:[%s3894_s10 + $0x70] ss:$8 sps:$4 sm:$0xff]   ;;  %2334 = vmatprep.subr.bf16.mxu0 %v3026_v10  ;;  %v3029_v13 = vld [vmem:[%s3894_s10 + $0x174] ss:$8 sps:$4 sm:$0xff]   ;;  %v3032_v15 = vld [vmem:[%s3894_s10 + $0x64] ss:$8 sps:$4 sm:$0xff]  }
  0x84   : > { %v3887_v7 = vshrl.u32 %v1238_v4, 7  ;;  %v3031_v14 = vld [vmem:[%s3894_s10 + $0x170] ss:$8 sps:$4 sm:$0xff]   ;;  %2335 = vmatpush1.bf16.msra.mxu0 %v3028_v11  ;;  %v3034_v16 = vld [vmem:[%s3894_s10 + $0x60] ss:$8 sps:$4 sm:$0xff]   ;;  %2375 = vmatprep.subr.bf16.mxu1 %v3029_v13  ;;  %v1250_v4 = vcombine.high %v3892_v8, %v3892_v8  ;;  %s4195_s19 = smov (!%p1032_p0, %s2761_s19), 3 }
  0x85   : > { %v1253_v9 = vunpack.c.0.s8 %v1252_v6  ;;  %v3035_v18 = vld [vmem:[%s3894_s10 + $0x164] ss:$8 sps:$4 sm:$0xff]   ;;  %2376 = vmatpush1.bf16.msra.mxu1 %v3031_v14  ;;  %2336 = vmatprep.subr.bf16.mxu0 %v3032_v15  ;;  %v3037_v19 = vld [vmem:[%s3894_s10 + $0x160] ss:$8 sps:$4 sm:$0xff]   ;;  %v3038_v21 = vld [vmem:[%s3894_s10 + $0x54] ss:$8 sps:$4 sm:$0xff]   ;;  %s1034_s26 = scalar_lea.vmem %s4181_s2, %s4195_s19 }
  0x86   : > { %2377 = vmatprep.subr.bf16.mxu1 %v3035_v18  ;;  %v3040_v22 = vld [vmem:[%s3894_s10 + $0x50] ss:$8 sps:$4 sm:$0xff]   ;;  %v3041_v23 = vld [vmem:[%s3894_s10 + $0x154] ss:$8 sps:$4 sm:$0xff]   ;;  %v3044_v25 = vld [vmem:[%s3894_s10 + $0x44] ss:$8 sps:$4 sm:$0xff]  }
  0x87   : > { %v3899_v12 = vsub.s32 %v1253_v9, %v3887_v7  ;;  %v3043_v26 = vld [vmem:[%s3894_s10 + $0x150] ss:$8 sps:$4 sm:$0xff]   ;;  %v3047_v28 = vld [vmem:[%s3894_s10 + $0x144] ss:$8 sps:$4 sm:$0xff]   ;;  %v3046_v29 = vld [vmem:[%s3894_s10 + $0x40] ss:$8 sps:$4 sm:$0xff]  }
  0x88   : > { %2337 = vmatpush1.bf16.msra.mxu0 %v3034_v16  ;;  %v3050_v30 = vld [vmem:[%s3894_s10 + $0x34] ss:$8 sps:$4 sm:$0xff]   ;;  %v3049_v31 = vld [vmem:[%s3894_s10 + $0x140] ss:$8 sps:$4 sm:$0xff]   ;;  %v3052_v33 = vld [vmem:[%s3894_s10 + $0x30] ss:$8 sps:$4 sm:$0xff]  }
  0x89   : > { %v3907_v17 = vrot.slane %v3892_v8, %v3899_v12  ;;  %2338 = vmatprep.subr.bf16.mxu0 %v3038_v21  ;;  %2378 = vmatpush1.bf16.msra.mxu1 %v3037_v19  ;;  %v3053_v32 = vld [vmem:[%s3894_s10 + $0x134] ss:$8 sps:$4 sm:$0xff]   ;;  %v3056_v34 = vld [vmem:[%s3894_s10 + $0x24] ss:$8 sps:$4 sm:$0xff]   ;;  %v3055_v35 = vld [vmem:[%s3894_s10 + $0x130] ss:$8 sps:$4 sm:$0xff]   ;;  %v3966_v11 = vrot.slane %v1250_v4, %v3899_v12 }
  0x8a   : > { %2379 = vmatprep.subr.bf16.mxu1 %v3041_v23  ;;  %v3059_v36 = vld [vmem:[%s3894_s10 + $0x124] ss:$8 sps:$4 sm:$0xff]   ;;  %v3058_v37 = vld [vmem:[%s3894_s10 + $0x20] ss:$8 sps:$4 sm:$0xff]   ;;  %v3062_v38 = vld [vmem:[%s3894_s10 + $0x14] ss:$8 sps:$4 sm:$0xff]  }
  0x8b   : > { %v1265_v20 = vcombine.high %v3907_v17, %v3907_v17  ;;  %v3061_v39 = vld [vmem:[%s3894_s10 + $0x120] ss:$8 sps:$4 sm:$0xff]   ;;  %v3065_v40 = vld [vmem:[%s3894_s10 + $0x114] ss:$8 sps:$4 sm:$0xff]   ;;  %v3064_v41 = vld [vmem:[%s3894_s10 + $0x10] ss:$8 sps:$4 sm:$0xff]   ;;  %v1266_v16 = vcombine.high %v3966_v11, %v3966_v11 }
  0x8c   : > { %2339 = vmatpush1.bf16.msra.mxu0 %v3040_v22  ;;  %v3068_v42 = vld [vmem:[%s3894_s10 + $0x4] ss:$8 sps:$4 sm:$0xff]   ;;  %v3067_v43 = vld [vmem:[%s3894_s10 + $0x110] ss:$8 sps:$4 sm:$0xff]   ;;  %v3070_v45 = vld [vmem:[%s3894_s10] ss:$8 sps:$4 sm:$0xff]  }
  0x8d   : > { %v1287_v24 = vrot.slane %v1265_v20, %v3899_v12  ;;  %2340 = vmatprep.subr.bf16.mxu0 %v3044_v25  ;;  %2380 = vmatpush1.bf16.msra.mxu1 %v3043_v26  ;;  %v3071_v44 = vld [vmem:[%s3894_s10 + $0x104] ss:$8 sps:$4 sm:$0xff]   ;;  %v3074_v46 = vld [vmem:[%s3894_s10 + $0xf4] ss:$8 sps:$4 sm:$0xff]   ;;  %v3073_v47 = vld [vmem:[%s3894_s10 + $0x100] ss:$8 sps:$4 sm:$0xff]   ;;  %v1273_v20 = vrot.slane %v3907_v17, %v3899_v12  ;;  %v1294_v23 = vrot.slane %v1266_v16, %v3899_v12 }
  0x8e   : > { %2381 = vmatprep.subr.bf16.mxu1 %v3047_v28  ;;  %v3077_v48 = vld [vmem:[%s3894_s10 + $0x1f4] ss:$8 sps:$4 sm:$0xff]   ;;  %v3076_v49 = vld [vmem:[%s3894_s10 + $0xf0] ss:$8 sps:$4 sm:$0xff]   ;;  %v3080_v50 = vld [vmem:[%s3894_s10 + $0xe4] ss:$8 sps:$4 sm:$0xff]  }
  0x8f   : > { %2366 = vmatprep.mubr.bf16.mxu0 %v1287_v24  ;;  %v1297_v27 = vcombine.high %v1287_v24, %v1287_v24  ;;  %v3079_v51 = vld [vmem:[%s3894_s10 + $0x1f0] ss:$8 sps:$4 sm:$0xff]   ;;  %v3083_v52 = vld [vmem:[%s3894_s10 + $0x1e4] ss:$8 sps:$4 sm:$0xff]   ;;  %v3082_v53 = vld [vmem:[%s3894_s10 + $0xe0] ss:$8 sps:$4 sm:$0xff]   ;;  %v1295_v26 = vcombine.high %v1273_v20, %v1273_v20  ;;  %v1298_v17 = vcombine.high %v1294_v23, %v1294_v23 }
  0x90   : > { %2341 = vmatpush1.bf16.msra.mxu0 %v3046_v29  ;;  %v3086_v54 = vld [vmem:[%s3894_s10 + $0xd4] ss:$8 sps:$4 sm:$0xff]   ;;  %v3085_v55 = vld [vmem:[%s3894_s10 + $0x1e0] ss:$8 sps:$4 sm:$0xff]   ;;  %v3088_v57 = vld [vmem:[%s3894_s10 + $0xd0] ss:$8 sps:$4 sm:$0xff]  }
  0x91   : > { %2407 = vmatprep.mubr.bf16.mxu1 %v1297_v27  ;;  %2342 = vmatprep.subr.bf16.mxu0 %v3050_v30  ;;  %v3089_v56 = vld [vmem:[%s3894_s10 + $0x1d4] ss:$8 sps:$4 sm:$0xff]   ;;  %v3092_v58 = vld [vmem:[%s3894_s10 + $0xc4] ss:$8 sps:$4 sm:$0xff]   ;;  %v3091_v59 = vld [vmem:[%s3894_s10 + $0x1d0] ss:$8 sps:$4 sm:$0xff]  }
  0x92   : > { %2382 = vmatpush1.bf16.msra.mxu1 %v3049_v31  ;;  %v3095_v60 = vld [vmem:[%s3894_s10 + $0x1c4] ss:$8 sps:$4 sm:$0xff]   ;;  %v3094_v61 = vld [vmem:[%s3894_s10 + $0xc0] ss:$8 sps:$4 sm:$0xff]   ;;  %v3098_v62 = vld [vmem:[%s3894_s10 + $0xb4] ss:$8 sps:$4 sm:$0xff]  }
  0x93   : > { %2383 = vmatprep.subr.bf16.mxu1 %v3053_v32  ;;  %v3097_v63 = vld [vmem:[%s3894_s10 + $0x1c0] ss:$8 sps:$4 sm:$0xff]   ;;  %v3101_v0 = vld [vmem:[%s3894_s10 + $0x1b4] ss:$8 sps:$4 sm:$0xff]   ;;  %v3100_v1 = vld [vmem:[%s3894_s10 + $0xb0] ss:$8 sps:$4 sm:$0xff]  }
  0x94   : > { %2343 = vmatpush1.bf16.msra.mxu0 %v3052_v33  ;;  %v3104_v2 = vld [vmem:[%s3894_s10 + $0xa4] ss:$8 sps:$4 sm:$0xff]   ;;  %v3103_v3 = vld [vmem:[%s3894_s10 + $0x1b0] ss:$8 sps:$4 sm:$0xff]   ;;  %v3106_v6 = vld [vmem:[%s3894_s10 + $0xa0] ss:$8 sps:$4 sm:$0xff]  }
  0x95   : > { %2344 = vmatprep.subr.bf16.mxu0 %v3056_v34  ;;  %v3107_v5 = vld [vmem:[%s3894_s10 + $0x1a4] ss:$8 sps:$4 sm:$0xff]   ;;  %v3110_v9 = vld [vmem:[%s3894_s10 + $0x94] ss:$8 sps:$4 sm:$0xff]   ;;  %v3109_v10 = vld [vmem:[%s3894_s10 + $0x1a0] ss:$8 sps:$4 sm:$0xff]  }
  0x96   : > { %2384 = vmatpush1.bf16.msra.mxu1 %v3055_v35  ;;  %v3113_v13 = vld [vmem:[%s3894_s10 + $0x194] ss:$8 sps:$4 sm:$0xff]   ;;  %v3112_v8 = vld [vmem:[%s3894_s10 + $0x90] ss:$8 sps:$4 sm:$0xff]   ;;  %v3116_v14 = vld [vmem:[%s3894_s10 + $0x84] ss:$8 sps:$4 sm:$0xff]  }
  0x97   : > { %2385 = vmatprep.subr.bf16.mxu1 %v3059_v36  ;;  %v3115_v15 = vld [vmem:[%s3894_s10 + $0x190] ss:$8 sps:$4 sm:$0xff]   ;;  %v3119_v18 = vld [vmem:[%s3894_s10 + $0x184] ss:$8 sps:$4 sm:$0xff]   ;;  %v3118_v19 = vld [vmem:[%s3894_s10 + $0x80] ss:$8 sps:$4 sm:$0xff]  }
  0x98   : > { %2345 = vmatpush1.bf16.msra.mxu0 %v3058_v37  ;;  %v3125_v21 = vld [vmem:[%s3894_s10 + $0x274] ss:$8 sps:$4 sm:$0xff]   ;;  %v3121_v22 = vld [vmem:[%s3894_s10 + $0x180] ss:$8 sps:$4 sm:$0xff]   ;;  %v3123_v25 = vld [vmem:[%s3894_s10 + $0x270] ss:$8 sps:$4 sm:$0xff]  }
  0x99   : > { %2346 = vmatprep.subr.bf16.mxu0 %v3062_v38  ;;  %v3128_v24 = vld [vmem:[%s3894_s10 + $0x374] ss:$8 sps:$4 sm:$0xff]   ;;  %v3131_v27 = vld [vmem:[%s3894_s10 + $0x264] ss:$8 sps:$4 sm:$0xff]   ;;  %v3126_v28 = vld [vmem:[%s3894_s10 + $0x370] ss:$8 sps:$4 sm:$0xff]  }
  0x9a   : > { %2386 = vmatpush1.bf16.msra.mxu1 %v3061_v39  ;;  %v3134_v29 = vld [vmem:[%s3894_s10 + $0x364] ss:$8 sps:$4 sm:$0xff]   ;;  %v3129_v30 = vld [vmem:[%s3894_s10 + $0x260] ss:$8 sps:$4 sm:$0xff]   ;;  %v3137_v31 = vld [vmem:[%s3894_s10 + $0x254] ss:$8 sps:$4 sm:$0xff]  }
  0x9b   : > { %2387 = vmatprep.subr.bf16.mxu1 %v3065_v40  ;;  %v3132_v32 = vld [vmem:[%s3894_s10 + $0x360] ss:$8 sps:$4 sm:$0xff]   ;;  %v3140_v33 = vld [vmem:[%s3894_s10 + $0x354] ss:$8 sps:$4 sm:$0xff]   ;;  %v3135_v34 = vld [vmem:[%s3894_s10 + $0x250] ss:$8 sps:$4 sm:$0xff]  }
  0x9c   : > { %2347 = vmatpush1.bf16.msra.mxu0 %v3064_v41  ;;  %v3143_v35 = vld [vmem:[%s3894_s10 + $0x244] ss:$8 sps:$4 sm:$0xff]   ;;  %v3138_v36 = vld [vmem:[%s3894_s10 + $0x350] ss:$8 sps:$4 sm:$0xff]   ;;  %v3141_v38 = vld [vmem:[%s3894_s10 + $0x240] ss:$8 sps:$4 sm:$0xff]  }
  0x9d   : > { %2348 = vmatprep.subr.bf16.mxu0 %v3068_v42  ;;  %v3146_v37 = vld [vmem:[%s3894_s10 + $0x344] ss:$8 sps:$4 sm:$0xff]   ;;  %v3149_v39 = vld [vmem:[%s3894_s10 + $0x234] ss:$8 sps:$4 sm:$0xff]   ;;  %v3144_v40 = vld [vmem:[%s3894_s10 + $0x340] ss:$8 sps:$4 sm:$0xff]  }
  0x9e   : > { %2388 = vmatpush1.bf16.msra.mxu1 %v3067_v43  ;;  %v3152_v41 = vld [vmem:[%s3894_s10 + $0x334] ss:$8 sps:$4 sm:$0xff]   ;;  %v3147_v42 = vld [vmem:[%s3894_s10 + $0x230] ss:$8 sps:$4 sm:$0xff]   ;;  %v3155_v43 = vld [vmem:[%s3894_s10 + $0x224] ss:$8 sps:$4 sm:$0xff]  }
  0x9f   : > { %2389 = vmatprep.subr.bf16.mxu1 %v3071_v44  ;;  %v3150_v44 = vld [vmem:[%s3894_s10 + $0x330] ss:$8 sps:$4 sm:$0xff]   ;;  %v3206_v16 = vld [vmem:[%s3894_s10 + $0x3a4] ss:$8 sps:$4 sm:$0xff]   ;;  %s3322_s9 = scalar_lea.vmem %s2653_s30, 64 }
  0xa0   : > { %2349 = vmatpush1.bf16.msra.mxu0 %v3070_v45  ;;  %v3158_v45 = vld [vmem:[%s3894_s10 + $0x324] ss:$8 sps:$4 sm:$0xff]   ;;  %v3186_v4 = vld [vmem:[%s3894_s10 + $0x3d0] ss:$8 sps:$4 sm:$0xff]   ;;  %p3323_p1 = scmp.ne.s32.totalorder %s2653_s30, %s3322_s9 }
  0xa1   : > { %2350 = vmatprep.subr.bf16.mxu0 %v3074_v46  ;;  %v3153_v46 = vld [vmem:[%s3894_s10 + $0x220] ss:$8 sps:$4 sm:$0xff]  }
  0xa2   : > { %2390 = vmatpush1.bf16.msra.mxu1 %v3073_v47  ;;  %v3161_v47 = vld [vmem:[%s3894_s10 + $0x214] ss:$8 sps:$4 sm:$0xff]   ;;  %p3324_p2 = pnand %p3323_p1, %p3462_p5 }
  0xa3   : > { %2391 = vmatprep.subr.bf16.mxu1 %v3077_v48  ;;  %v3156_v48 = vld [vmem:[%s3894_s10 + $0x320] ss:$8 sps:$4 sm:$0xff]  }
  0xa4   : > { %2351 = vmatpush2.bf16.msra.mxu0 %v3076_v49  ;;  %v3164_v49 = vld [vmem:[%s3894_s10 + $0x314] ss:$8 sps:$4 sm:$0xff]   ;;  %p3325_p3 = pneg %p3324_p2 }
  0xa5   : > { %2352 = vmatprep.subr.bf16.mxu0 %v3080_v50  ;;  %v3159_v50 = vld [vmem:[%s3894_s10 + $0x210] ss:$8 sps:$4 sm:$0xff]  }
  0xa6   : > { %2392 = vmatpush2.bf16.msra.mxu1 %v3079_v51  ;;  %v3167_v51 = vld [vmem:[%s3894_s10 + $0x204] ss:$8 sps:$4 sm:$0xff]  }
  0xa7   : > { %2393 = vmatprep.subr.bf16.mxu1 %v3083_v52  ;;  %v3162_v52 = vld [vmem:[%s3894_s10 + $0x310] ss:$8 sps:$4 sm:$0xff]  }
  0xa8   : > { %2353 = vmatpush2.bf16.msra.mxu0 %v3082_v53  ;;  %v3170_v53 = vld [vmem:[%s3894_s10 + $0x304] ss:$8 sps:$4 sm:$0xff]  }
  0xa9   : > { %2354 = vmatprep.subr.bf16.mxu0 %v3086_v54  ;;  %v3165_v54 = vld [vmem:[%s3894_s10 + $0x200] ss:$8 sps:$4 sm:$0xff]  }
  0xaa   : > { %2394 = vmatpush2.bf16.msra.mxu1 %v3085_v55  ;;  %v3173_v55 = vld [vmem:[%s3894_s10 + $0x2f4] ss:$8 sps:$4 sm:$0xff]  }
  0xab   : > { %2395 = vmatprep.subr.bf16.mxu1 %v3089_v56  ;;  %v3168_v56 = vld [vmem:[%s3894_s10 + $0x300] ss:$8 sps:$4 sm:$0xff]  }
  0xac   : > { %2355 = vmatpush2.bf16.msra.mxu0 %v3088_v57  ;;  %v3176_v57 = vld [vmem:[%s3894_s10 + $0x3f4] ss:$8 sps:$4 sm:$0xff]  }
  0xad   : > { %2356 = vmatprep.subr.bf16.mxu0 %v3092_v58  ;;  %v3171_v58 = vld [vmem:[%s3894_s10 + $0x2f0] ss:$8 sps:$4 sm:$0xff]  }
  0xae   : > { %2396 = vmatpush2.bf16.msra.mxu1 %v3091_v59  ;;  %v3179_v59 = vld [vmem:[%s3894_s10 + $0x2e4] ss:$8 sps:$4 sm:$0xff]  }
  0xaf   : > { %2397 = vmatprep.subr.bf16.mxu1 %v3095_v60  ;;  %v3174_v60 = vld [vmem:[%s3894_s10 + $0x3f0] ss:$8 sps:$4 sm:$0xff]  }
  0xb0   : > { %2357 = vmatpush2.bf16.msra.mxu0 %v3094_v61  ;;  %v3182_v61 = vld [vmem:[%s3894_s10 + $0x3e4] ss:$8 sps:$4 sm:$0xff]  }
  0xb1   : > { %2358 = vmatprep.subr.bf16.mxu0 %v3098_v62  ;;  %v3177_v62 = vld [vmem:[%s3894_s10 + $0x2e0] ss:$8 sps:$4 sm:$0xff]  }
  0xb2   : > { %2398 = vmatpush2.bf16.msra.mxu1 %v3097_v63  ;;  %v3185_v63 = vld [vmem:[%s3894_s10 + $0x2d4] ss:$8 sps:$4 sm:$0xff]  }
  0xb3   : > { %2399 = vmatprep.subr.bf16.mxu1 %v3101_v0  ;;  %v3180_v0 = vld [vmem:[%s3894_s10 + $0x3e0] ss:$8 sps:$4 sm:$0xff]  }
  0xb4   : > { %2359 = vmatpush2.bf16.msra.mxu0 %v3100_v1  ;;  %v3188_v1 = vld [vmem:[%s3894_s10 + $0x3d4] ss:$8 sps:$4 sm:$0xff]  }
  0xb5   : > { %2360 = vmatprep.subr.bf16.mxu0 %v3104_v2  ;;  %v3183_v2 = vld [vmem:[%s3894_s10 + $0x2d0] ss:$8 sps:$4 sm:$0xff]  }
  0xb6   : > { %2400 = vmatpush2.bf16.msra.mxu1 %v3103_v3  ;;  %v3191_v3 = vld [vmem:[%s3894_s10 + $0x2c4] ss:$8 sps:$4 sm:$0xff]  }
  0xb7   : > { %2401 = vmatprep.subr.bf16.mxu1 %v3107_v5  ;;  %v3194_v5 = vld [vmem:[%s3894_s10 + $0x3c4] ss:$8 sps:$4 sm:$0xff]  }
  0xb8   : > { %2361 = vmatpush2.bf16.msra.mxu0 %v3106_v6  ;;  %v3189_v6 = vld [vmem:[%s3894_s10 + $0x2c0] ss:$8 sps:$4 sm:$0xff]  }
  0xb9   : > { %2362 = vmatprep.subr.bf16.mxu0 %v3110_v9  ;;  %v3197_v9 = vld [vmem:[%s3894_s10 + $0x2b4] ss:$8 sps:$4 sm:$0xff]  }
  0xba   : > { %2402 = vmatpush2.bf16.msra.mxu1 %v3109_v10  ;;  %v3192_v10 = vld [vmem:[%s3894_s10 + $0x3c0] ss:$8 sps:$4 sm:$0xff]  }
  0xbb   : > { %2403 = vmatprep.subr.bf16.mxu1 %v3113_v13  ;;  %v3200_v13 = vld [vmem:[%s3894_s10 + $0x3b4] ss:$8 sps:$4 sm:$0xff]  }
  0xbc   : > { %2363 = vmatpush2.bf16.msra.mxu0 %v3112_v8  ;;  %v3195_v8 = vld [vmem:[%s3894_s10 + $0x2b0] ss:$8 sps:$4 sm:$0xff]  }
  0xbd   : > { %2364 = vmatprep.subr.bf16.mxu0 %v3116_v14  ;;  %v3203_v14 = vld [vmem:[%s3894_s10 + $0x2a4] ss:$8 sps:$4 sm:$0xff]  }
  0xbe   : > { %2404 = vmatpush2.bf16.msra.mxu1 %v3115_v15  ;;  %v3198_v15 = vld [vmem:[%s3894_s10 + $0x3b0] ss:$8 sps:$4 sm:$0xff]  }
  0xbf   : > { %2405 = vmatprep.subr.bf16.mxu1 %v3119_v18  ;;  %v3201_v18 = vld [vmem:[%s3894_s10 + $0x2a0] ss:$8 sps:$4 sm:$0xff]  }
  0xc0   : > { %2365 = vmatpush2.bf16.msra.mxu0 %v3118_v19  ;;  %v3209_v19 = vld [vmem:[%s3894_s10 + $0x294] ss:$8 sps:$4 sm:$0xff]  }
  0xc1   : > { %2416 = vmatprep.subr.bf16.mxu0 %v3125_v21  ;;  %v3212_v21 = vld [vmem:[%s3894_s10 + $0x394] ss:$8 sps:$4 sm:$0xff]  }
  0xc2   : > { %2406 = vmatpush2.bf16.msra.mxu1 %v3121_v22  ;;  %v3207_v22 = vld [vmem:[%s3894_s10 + $0x290] ss:$8 sps:$4 sm:$0xff]  }
  0xc3   : > { %2367 = vmatmul.mubr.bf16.vlgmr.msra.gmra.mxu0 %v1273_v20  ;;  %2457 = vmatprep.subr.bf16.mxu1 %v3128_v24  ;;  %v3204_v20 = vld [vmem:[%s3894_s10 + $0x3a0] ss:$8 sps:$4 sm:$0xff]   ;;  %v3210_v24 = vld [vmem:[%s3894_s10 + $0x390] ss:$8 sps:$4 sm:$0xff]  }
  0xc4   : > { %2417 = vmatpush1.bf16.msra.mxu0 %v3123_v25  ;;  %2448 = vmatprep.mubr.bf16.mxu0 %v1294_v23  ;;  %v3215_v23 = vld [vmem:[%s3894_s10 + $0x284] ss:$8 sps:$4 sm:$0xff]  }
  0xc5   : > { %2408 = vmatmul.mubr.bf16.vlgmr.msra.gmra.mxu1 %v1295_v26  ;;  %2418 = vmatprep.subr.bf16.mxu0 %v3131_v27  ;;  %v3218_v25 = vld [vmem:[%s3894_s10 + $0x384] ss:$8 sps:$4 sm:$0xff]   ;;  %v3213_v26 = vld [vmem:[%s3894_s10 + $0x280] ss:$8 sps:$4 sm:$0xff]   ;;  %v1280_v27 = vrot.slane %v3966_v11, %v3899_v12  ;;  %v3222_v11 = vld [vmem:[%s3894_s10 + $0x570] ss:$8 sps:$4 sm:$0xff]  }
  0xc6   : > { %2458 = vmatpush1.bf16.msra.mxu1 %v3126_v28  ;;  %2489 = vmatprep.mubr.bf16.mxu1 %v1298_v17  ;;  %v3221_v28 = vld [vmem:[%s3894_s10 + $0x474] ss:$8 sps:$4 sm:$0xff]   ;;  %v3216_v17 = vld [vmem:[%s3894_s10 + $0x380] ss:$8 sps:$4 sm:$0xff]  }
  0xc7   : > { %2459 = vmatprep.subr.bf16.mxu1 %v3134_v29  ;;  %v3224_v29 = vld [vmem:[%s3894_s10 + $0x574] ss:$8 sps:$4 sm:$0xff]  }
  0xc8   : > { %2419 = vmatpush1.bf16.msra.mxu0 %v3129_v30  ;;  %v3219_v30 = vld [vmem:[%s3894_s10 + $0x470] ss:$8 sps:$4 sm:$0xff]  }
  0xc9   : > { %2420 = vmatprep.subr.bf16.mxu0 %v3137_v31  ;;  %v3227_v31 = vld [vmem:[%s3894_s10 + $0x464] ss:$8 sps:$4 sm:$0xff]  }
  0xca   : > { %2460 = vmatpush1.bf16.msra.mxu1 %v3132_v32  ;;  %v1296_v32 = vcombine.high %v1280_v27, %v1280_v27 }
  0xcb   : > { %2461 = vmatprep.subr.bf16.mxu1 %v3140_v33  ;;  %v4053_v33 = vld [vmem:[%s4179_s0 + $0x8] sm:$0x1f] }
  0xcc   : > { %2421 = vmatpush1.bf16.msra.mxu0 %v3135_v34  ;;  %v4058_v34 = vrot.slane %v4053_v33, %v3899_v12 }
  0xcd   : > { %2422 = vmatprep.subr.bf16.mxu0 %v3143_v35  ;;  %v3230_v35 = vld [vmem:[%s3894_s10 + $0x564] ss:$8 sps:$4 sm:$0xff]  }
  0xce   : > { %2462 = vmatpush1.bf16.msra.mxu1 %v3138_v36  ;;  %v3225_v36 = vld [vmem:[%s3894_s10 + $0x460] ss:$8 sps:$4 sm:$0xff]  }
  0xcf   : > { %2463 = vmatprep.subr.bf16.mxu1 %v3146_v37  ;;  %v1314_v37 = vcombine.high %v4058_v34, %v4058_v34 }
  0xd0   : > { %2423 = vmatpush1.bf16.msra.mxu0 %v3141_v38  ;;  %v3233_v38 = vld [vmem:[%s3894_s10 + $0x454] ss:$8 sps:$4 sm:$0xff]  }
  0xd1   : > { %2424 = vmatprep.subr.bf16.mxu0 %v3149_v39  ;;  %v3228_v39 = vld [vmem:[%s3894_s10 + $0x560] ss:$8 sps:$4 sm:$0xff]  }
  0xd2   : > { %2464 = vmatpush1.bf16.msra.mxu1 %v3144_v40  ;;  %v1335_v40 = vrot.slane %v1314_v37, %v3899_v12  ;;  %v3318_v37 = vld [vmem:[%s3894_s10 + $0x614] ss:$8 sps:$4 sm:$0xff]  }
  0xd3   : > { %2465 = vmatprep.subr.bf16.mxu1 %v3152_v41  ;;  %v3236_v41 = vld [vmem:[%s3894_s10 + $0x554] ss:$8 sps:$4 sm:$0xff]  }
  0xd4   : > { %2425 = vmatpush1.bf16.msra.mxu0 %v3147_v42  ;;  %v3231_v42 = vld [vmem:[%s3894_s10 + $0x450] ss:$8 sps:$4 sm:$0xff]  }
  0xd5   : > { %2426 = vmatprep.subr.bf16.mxu0 %v3155_v43  ;;  %v1337_v43 = vcombine.high %v1335_v40, %v1335_v40 }
  0xd6   : > { %2466 = vmatpush1.bf16.msra.mxu1 %v3150_v44  ;;  %v3239_v44 = vld [vmem:[%s3894_s10 + $0x444] ss:$8 sps:$4 sm:$0xff]  }
  0xd7   : > { %2467 = vmatprep.subr.bf16.mxu1 %v3158_v45  ;;  %v3234_v45 = vld [vmem:[%s3894_s10 + $0x550] ss:$8 sps:$4 sm:$0xff]  }
  0xd8   : > { %2427 = vmatpush1.bf16.msra.mxu0 %v3153_v46  ;;  %v3242_v46 = vld [vmem:[%s3894_s10 + $0x544] ss:$8 sps:$4 sm:$0xff]  }
  0xd9   : > { %2428 = vmatprep.subr.bf16.mxu0 %v3161_v47  ;;  %v3237_v47 = vld [vmem:[%s3894_s10 + $0x440] ss:$8 sps:$4 sm:$0xff]  }
  0xda   : > { %2468 = vmatpush1.bf16.msra.mxu1 %v3156_v48  ;;  %v3245_v48 = vld [vmem:[%s3894_s10 + $0x434] ss:$8 sps:$4 sm:$0xff]  }
  0xdb   : > { %2469 = vmatprep.subr.bf16.mxu1 %v3164_v49  ;;  %v3240_v49 = vld [vmem:[%s3894_s10 + $0x540] ss:$8 sps:$4 sm:$0xff]  }
  0xdc   : > { %2429 = vmatpush1.bf16.msra.mxu0 %v3159_v50  ;;  %v3248_v50 = vld [vmem:[%s3894_s10 + $0x534] ss:$8 sps:$4 sm:$0xff]  }
  0xdd   : > { %2430 = vmatprep.subr.bf16.mxu0 %v3167_v51  ;;  %v3243_v51 = vld [vmem:[%s3894_s10 + $0x430] ss:$8 sps:$4 sm:$0xff]  }
  0xde   : > { %2470 = vmatpush1.bf16.msra.mxu1 %v3162_v52  ;;  %v3251_v52 = vld [vmem:[%s3894_s10 + $0x424] ss:$8 sps:$4 sm:$0xff]  }
  0xdf   : > { %2471 = vmatprep.subr.bf16.mxu1 %v3170_v53  ;;  %v3246_v53 = vld [vmem:[%s3894_s10 + $0x530] ss:$8 sps:$4 sm:$0xff]  }
  0xe0   : > { %2431 = vmatpush1.bf16.msra.mxu0 %v3165_v54  ;;  %v3254_v54 = vld [vmem:[%s3894_s10 + $0x524] ss:$8 sps:$4 sm:$0xff]  }
  0xe1   : > { %2432 = vmatprep.subr.bf16.mxu0 %v3173_v55  ;;  %v3249_v55 = vld [vmem:[%s3894_s10 + $0x420] ss:$8 sps:$4 sm:$0xff]  }
  0xe2   : > { %2472 = vmatpush1.bf16.msra.mxu1 %v3168_v56  ;;  %v3257_v56 = vld [vmem:[%s3894_s10 + $0x414] ss:$8 sps:$4 sm:$0xff]  }
  0xe3   : > { %2473 = vmatprep.subr.bf16.mxu1 %v3176_v57  ;;  %v3252_v57 = vld [vmem:[%s3894_s10 + $0x520] ss:$8 sps:$4 sm:$0xff]  }
  0xe4   : > { %2433 = vmatpush2.bf16.msra.mxu0 %v3171_v58  ;;  %v3260_v58 = vld [vmem:[%s3894_s10 + $0x514] ss:$8 sps:$4 sm:$0xff]  }
  0xe5   : > { %2434 = vmatprep.subr.bf16.mxu0 %v3179_v59  ;;  %v3255_v59 = vld [vmem:[%s3894_s10 + $0x410] ss:$8 sps:$4 sm:$0xff]  }
  0xe6   : > { %2474 = vmatpush2.bf16.msra.mxu1 %v3174_v60  ;;  %v3263_v60 = vld [vmem:[%s3894_s10 + $0x404] ss:$8 sps:$4 sm:$0xff]  }
  0xe7   : > { %2475 = vmatprep.subr.bf16.mxu1 %v3182_v61  ;;  %v3258_v61 = vld [vmem:[%s3894_s10 + $0x510] ss:$8 sps:$4 sm:$0xff]  }
  0xe8   : > { %2435 = vmatpush2.bf16.msra.mxu0 %v3177_v62  ;;  %v3266_v62 = vld [vmem:[%s3894_s10 + $0x504] ss:$8 sps:$4 sm:$0xff]  }
  0xe9   : > { %2436 = vmatprep.subr.bf16.mxu0 %v3185_v63  ;;  %v3261_v63 = vld [vmem:[%s3894_s10 + $0x400] ss:$8 sps:$4 sm:$0xff]  }
  0xea   : > { %2476 = vmatpush2.bf16.msra.mxu1 %v3180_v0  ;;  %v3269_v0 = vld [vmem:[%s3894_s10 + $0x4f4] ss:$8 sps:$4 sm:$0xff]  }
  0xeb   : > { %2477 = vmatprep.subr.bf16.mxu1 %v3188_v1  ;;  %v3264_v1 = vld [vmem:[%s3894_s10 + $0x500] ss:$8 sps:$4 sm:$0xff]  }
  0xec   : > { %2437 = vmatpush2.bf16.msra.mxu0 %v3183_v2  ;;  %v3272_v2 = vld [vmem:[%s3894_s10 + $0x5f4] ss:$8 sps:$4 sm:$0xff]  }
  0xed   : > { %2438 = vmatprep.subr.bf16.mxu0 %v3191_v3  ;;  %v3267_v3 = vld [vmem:[%s3894_s10 + $0x4f0] ss:$8 sps:$4 sm:$0xff]  }
  0xee   : > { %2478 = vmatpush2.bf16.msra.mxu1 %v3186_v4  ;;  %v3275_v4 = vld [vmem:[%s3894_s10 + $0x4e4] ss:$8 sps:$4 sm:$0xff]  }
  0xef   : > { %2479 = vmatprep.subr.bf16.mxu1 %v3194_v5  ;;  %v3270_v5 = vld [vmem:[%s3894_s10 + $0x5f0] ss:$8 sps:$4 sm:$0xff]  }
  0xf0   : > { %2439 = vmatpush2.bf16.msra.mxu0 %v3189_v6  ;;  %v3278_v6 = vld [vmem:[%s3894_s10 + $0x5e4] ss:$8 sps:$4 sm:$0xff]  }
  0xf1   : > { %2440 = vmatprep.subr.bf16.mxu0 %v3197_v9  ;;  %v3273_v9 = vld [vmem:[%s3894_s10 + $0x4e0] ss:$8 sps:$4 sm:$0xff]  }
  0xf2   : > { %2480 = vmatpush2.bf16.msra.mxu1 %v3192_v10  ;;  %v3281_v10 = vld [vmem:[%s3894_s10 + $0x4d4] ss:$8 sps:$4 sm:$0xff]  }
  0xf3   : > { %2481 = vmatprep.subr.bf16.mxu1 %v3200_v13  ;;  %v3276_v13 = vld [vmem:[%s3894_s10 + $0x5e0] ss:$8 sps:$4 sm:$0xff]  }
  0xf4   : > { %2441 = vmatpush2.bf16.msra.mxu0 %v3195_v8  ;;  %v3284_v8 = vld [vmem:[%s3894_s10 + $0x5d4] ss:$8 sps:$4 sm:$0xff]  }
  0xf5   : > { %2442 = vmatprep.subr.bf16.mxu0 %v3203_v14  ;;  %v3279_v14 = vld [vmem:[%s3894_s10 + $0x4d0] ss:$8 sps:$4 sm:$0xff]  }
  0xf6   : > { %2482 = vmatpush2.bf16.msra.mxu1 %v3198_v15  ;;  %v3287_v15 = vld [vmem:[%s3894_s10 + $0x4c4] ss:$8 sps:$4 sm:$0xff]  }
  0xf7   : > { %2483 = vmatprep.subr.bf16.mxu1 %v3206_v16  ;;  %v3282_v16 = vld [vmem:[%s3894_s10 + $0x5d0] ss:$8 sps:$4 sm:$0xff]  }
  0xf8   : > { %2443 = vmatpush2.bf16.msra.mxu0 %v3201_v18  ;;  %v3290_v18 = vld [vmem:[%s3894_s10 + $0x5c4] ss:$8 sps:$4 sm:$0xff]  }
  0xf9   : > { %2444 = vmatprep.subr.bf16.mxu0 %v3209_v19  ;;  %v3285_v19 = vld [vmem:[%s3894_s10 + $0x4c0] ss:$8 sps:$4 sm:$0xff]  }
  0xfa   : > { %2484 = vmatpush2.bf16.msra.mxu1 %v3204_v20  ;;  %v3293_v20 = vld [vmem:[%s3894_s10 + $0x4b4] ss:$8 sps:$4 sm:$0xff]  }
  0xfb   : > { %2485 = vmatprep.subr.bf16.mxu1 %v3212_v21  ;;  %v3288_v21 = vld [vmem:[%s3894_s10 + $0x5c0] ss:$8 sps:$4 sm:$0xff]  }
  0xfc   : > { %2445 = vmatpush2.bf16.msra.mxu0 %v3207_v22  ;;  %v3296_v22 = vld [vmem:[%s3894_s10 + $0x5b4] ss:$8 sps:$4 sm:$0xff]  }
  0xfd   : > { %2446 = vmatprep.subr.bf16.mxu0 %v3215_v23  ;;  %v3291_v23 = vld [vmem:[%s3894_s10 + $0x4b0] ss:$8 sps:$4 sm:$0xff]  }
  0xfe   : > { %2486 = vmatpush2.bf16.msra.mxu1 %v3210_v24  ;;  %v3299_v24 = vld [vmem:[%s3894_s10 + $0x4a4] ss:$8 sps:$4 sm:$0xff]  }
  0xff   : > { %2487 = vmatprep.subr.bf16.mxu1 %v3218_v25  ;;  %v3294_v25 = vld [vmem:[%s3894_s10 + $0x5b0] ss:$8 sps:$4 sm:$0xff]  }
 0x100   : > { %2447 = vmatpush2.bf16.msra.mxu0 %v3213_v26  ;;  %v3302_v26 = vld [vmem:[%s3894_s10 + $0x5a4] ss:$8 sps:$4 sm:$0xff]  }
 0x101   : > { %2498 = vmatprep.subr.bf16.mxu0 %v3221_v28  ;;  %v3305_v28 = vld [vmem:[%s3894_s10 + $0x494] ss:$8 sps:$4 sm:$0xff]  }
 0x102   : > { %2488 = vmatpush2.bf16.msra.mxu1 %v3216_v17  ;;  %v3300_v17 = vld [vmem:[%s3894_s10 + $0x5a0] ss:$8 sps:$4 sm:$0xff]  }
 0x103   : > { %2449 = vmatmul.mubr.bf16.vlgmr.msra.gmra.mxu0 %v1280_v27  ;;  %2539 = vmatprep.subr.bf16.mxu1 %v3224_v29  ;;  %v3297_v27 = vld [vmem:[%s3894_s10 + $0x4a0] ss:$8 sps:$4 sm:$0xff]   ;;  %v3308_v29 = vld [vmem:[%s3894_s10 + $0x594] ss:$8 sps:$4 sm:$0xff]  }
 0x104   : > { %2499 = vmatpush1.bf16.msra.mxu0 %v3219_v30  ;;  %2530 = vmatprep.mubr.bf16.mxu0 %v1335_v40  ;;  %v3303_v30 = vld [vmem:[%s3894_s10 + $0x490] ss:$8 sps:$4 sm:$0xff]  }
 0x105   : > { %2490 = vmatmul.mubr.bf16.vlgmr.msra.gmra.mxu1 %v1296_v32  ;;  %2500 = vmatprep.subr.bf16.mxu0 %v3227_v31  ;;  %v3311_v31 = vld [vmem:[%s3894_s10 + $0x484] ss:$8 sps:$4 sm:$0xff]   ;;  %v3306_v32 = vld [vmem:[%s3894_s10 + $0x590] ss:$8 sps:$4 sm:$0xff]  }
 0x106   : > { %2540 = vmatpush1.bf16.msra.mxu1 %v3222_v11  ;;  %2571 = vmatprep.mubr.bf16.mxu1 %v1337_v43  ;;  %v3314_v11 = vld [vmem:[%s3894_s10 + $0x584] ss:$8 sps:$4 sm:$0xff]   ;;  %v3316_v40 = vld [vmem:[%s3894_s10 + $0x610] ss:$8 sps:$4 sm:$0xff]  }
 0x107   : > { %2541 = vmatprep.subr.bf16.mxu1 %v3230_v35  ;;  %v3309_v35 = vld [vmem:[%s3894_s10 + $0x480] ss:$8 sps:$4 sm:$0xff]  }
 0x108   : > { %2501 = vmatpush1.bf16.msra.mxu0 %v3225_v36  ;;  %v1321_v36 = vrot.slane %v4058_v34, %v3899_v12  ;;  %v3401_v34 = vmov 0  }
 0x109   : > { %2502 = vmatprep.subr.bf16.mxu0 %v3233_v38  ;;  %v3312_v38 = vld [vmem:[%s3894_s10 + $0x580] ss:$8 sps:$4 sm:$0xff]  }
 0x10a   : > { %2542 = vmatpush1.bf16.msra.mxu1 %v3228_v39  ;;  %v1299_v39 = vcombine.high %v4053_v33, %v4053_v33  ;;  %v1240_v33 = vsub.s32 0, %v3887_v7 }
 0x10b   : > { %2543 = vmatprep.subr.bf16.mxu1 %v3236_v41  ;;  %v1336_v41 = vcombine.high %v1321_v36, %v1321_v36 }
 0x10c   : > { %2503 = vmatpush1.bf16.msra.mxu0 %v3231_v42  ;;  %v3321_v42 = vld [vmem:[%s3894_s10 + $0x604] ss:$8 sps:$4 sm:$0xff]   ;;  %v1313_v43 = vrot.slane %v1299_v39, %v3899_v12 }
 0x10d   : > { %2504 = vmatprep.subr.bf16.mxu0 %v3239_v44  ;;  %v3319_v44 = vld [vmem:[%s3894_s10 + $0x600] ss:$8 sps:$4 sm:$0xff]   ;;  %s3402_s10 = smov [#allocation3]  }
 0x10e   : > { %2544 = vmatpush1.bf16.msra.mxu1 %v3234_v45  ;;  %v1328_v45 = vrot.slane %v1313_v43, %v3899_v12  ;;  %s3326_s15 = sshll.u32 %s3402_s10, 4  ;;  %s3327_s15 = int_to_ptr.vmem [resolvable:$false] %s3326_s15 }
 0x10f   : > { %2545 = vmatprep.subr.bf16.mxu1 %v3242_v46  ;;  %v1236_v46 = vld [vmem:[%s1034_s26] sm:$0x3]  ;;  %s3328_s11 = scalar_lea.vmem %s3327_s15, 128  ;;  %p3329_p4 = scmp.lt.s32.totalorder %s2653_s30, %s3327_s15 }
 0x110   : > { %2505 = vmatpush1.bf16.msra.mxu0 %v3237_v47  ;;  %v1244_v47 = vsub.s32 1, %v3887_v7  ;;  %p3330_p6 = scmp.lt.s32.totalorder %s3328_s11, %s3322_s9 }
 0x111   : > { %2506 = vmatprep.subr.bf16.mxu0 %v3245_v48  ;;  %v1241_v48 = vrot.slane %v1236_v46, %v1240_v33 }
 0x112   : > { %2546 = vmatpush1.bf16.msra.mxu1 %v3240_v49  ;;  %v1245_v49 = vrot.slane %v1236_v46, %v1244_v47  ;;  %p3331_p7 = por %p3330_p6, %p3329_p4 }
 0x113   : > { %2547 = vmatprep.subr.bf16.mxu1 %v3248_v50 }
 0x114   : > { %2507 = vmatpush1.bf16.msra.mxu0 %v3243_v51  ;;  %p3332_p8 = pnand %p3331_p7, %p3325_p3 }
 0x115   : > { %2508 = vmatprep.subr.bf16.mxu0 %v3251_v52 }
 0x116   : > { %2548 = vmatpush1.bf16.msra.mxu1 %v3246_v53 }
 0x117   : > { %2549 = vmatprep.subr.bf16.mxu1 %v3254_v54 }
 0x118   : > { %2509 = vmatpush1.bf16.msra.mxu0 %v3249_v55 }
 0x119   : > { %2510 = vmatprep.subr.bf16.mxu0 %v3257_v56 }
 0x11a   : > { %2550 = vmatpush1.bf16.msra.mxu1 %v3252_v57 }
 0x11b   : > { %2551 = vmatprep.subr.bf16.mxu1 %v3260_v58 }
 0x11c   : > { %2511 = vmatpush1.bf16.msra.mxu0 %v3255_v59 }
 0x11d   : > { %2512 = vmatprep.subr.bf16.mxu0 %v3263_v60 }
 0x11e   : > { %2552 = vmatpush1.bf16.msra.mxu1 %v3258_v61 }
 0x11f   : > { %2553 = vmatprep.subr.bf16.mxu1 %v3266_v62 }
 0x120   : > { %2513 = vmatpush1.bf16.msra.mxu0 %v3261_v63 }
 0x121   : > { %2514 = vmatprep.subr.bf16.mxu0 %v3269_v0 }
 0x122   : > { %2554 = vmatpush1.bf16.msra.mxu1 %v3264_v1 }
 0x123   : > { %2555 = vmatprep.subr.bf16.mxu1 %v3272_v2 }
 0x124   : > { %2515 = vmatpush2.bf16.msra.mxu0 %v3267_v3 }
 0x125   : > { %2516 = vmatprep.subr.bf16.mxu0 %v3275_v4 }
 0x126   : > { %2556 = vmatpush2.bf16.msra.mxu1 %v3270_v5 }
 0x127   : > { %2557 = vmatprep.subr.bf16.mxu1 %v3278_v6 }
 0x128   : > { %2517 = vmatpush2.bf16.msra.mxu0 %v3273_v9 }
 0x129   : > { %2518 = vmatprep.subr.bf16.mxu0 %v3281_v10 }
 0x12a   : > { %2558 = vmatpush2.bf16.msra.mxu1 %v3276_v13 }
 0x12b   : > { %2559 = vmatprep.subr.bf16.mxu1 %v3284_v8 }
 0x12c   : > { %2519 = vmatpush2.bf16.msra.mxu0 %v3279_v14 }
 0x12d   : > { %2520 = vmatprep.subr.bf16.mxu0 %v3287_v15 }
 0x12e   : > { %2560 = vmatpush2.bf16.msra.mxu1 %v3282_v16 }
 0x12f   : > { %2561 = vmatprep.subr.bf16.mxu1 %v3290_v18 }
 0x130   : > { %2521 = vmatpush2.bf16.msra.mxu0 %v3285_v19 }
 0x131   : > { %2522 = vmatprep.subr.bf16.mxu0 %v3293_v20 }
 0x132   : > { %2562 = vmatpush2.bf16.msra.mxu1 %v3288_v21 }
 0x133   : > { %2563 = vmatprep.subr.bf16.mxu1 %v3296_v22 }
 0x134   : > { %2523 = vmatpush2.bf16.msra.mxu0 %v3291_v23 }
 0x135   : > { %2524 = vmatprep.subr.bf16.mxu0 %v3299_v24 }
 0x136   : > { %2564 = vmatpush2.bf16.msra.mxu1 %v3294_v25 }
 0x137   : > { %2565 = vmatprep.subr.bf16.mxu1 %v3302_v26 }
 0x138   : > { %2525 = vmatpush2.bf16.msra.mxu0 %v3297_v27 }
 0x139   : > { %2526 = vmatprep.subr.bf16.mxu0 %v3305_v28 }
 0x13a   : > { %2566 = vmatpush2.bf16.msra.mxu1 %v3300_v17 }
 0x13b   : > { %2567 = vmatprep.subr.bf16.mxu1 %v3308_v29 }
 0x13c   : > { %2527 = vmatpush2.bf16.msra.mxu0 %v3303_v30 }
 0x13d   : > { %2528 = vmatprep.subr.bf16.mxu0 %v3311_v31 }
 0x13e   : > { %2568 = vmatpush2.bf16.msra.mxu1 %v3306_v32 }
 0x13f   : > { %2569 = vmatprep.subr.bf16.mxu1 %v3314_v11 }
 0x140   : > { %2529 = vmatpush2.bf16.msra.mxu0 %v3309_v35 }
 0x141   : > { %2592 = vmatprep.subr.bf16.mxu0 %v3318_v37 }
 0x142   : > { %2570 = vmatpush2.bf16.msra.mxu1 %v3312_v38 }
 0x143   : > { %2531 = vmatmul.mubr.bf16.vlgmr.msra.gmra.mxu0 %v1321_v36 }
 0x144   : > { %2593 = vmatpush1.bf16.msra.mxu0 %v3316_v40  ;;  %2612 = vmatprep.mubr.bf16.mxu0 %v3401_v34 }
 0x145   : > { %2572 = vmatmul.mubr.bf16.vlgmr.msra.gmra.mxu1 %v1336_v41  ;;  %2594 = vmatprep.subr.bf16.mxu0 %v3321_v42 }
 0x148   : > { %2595 = vmatpush1.bf16.msra.mxu0 %v3319_v44 }
 0x14b   : > { %2958 = vmatmul.mubr.msk.bf16.vlgmr.msra.gmra.mxu0 %vm2330_vm0, %v1328_v45 }
 0x183   : > { %v2368_v50 = vpop.f32.mrf.mxu0 }
 0x184   : > { %v2369_v51 = vadd.f32 %v2368_v50, %v1241_v48 }
 0x185   : > { %v2370_v12 = vpop.f32.mrf.mxu0  ;;  %v2409_v52 = vpop.f32.mrf.mxu1 }
 0x186   : > { %v2371_v53 = vadd.f32 %v2370_v12, %v1245_v49  ;;  %v2410_v54 = vadd.f32 %v2409_v52, %v2369_v51 }
 0x187   : > { %v2372_v55 = vpop.f32.mrf.mxu0  ;;  %v2411_v56 = vpop.f32.mrf.mxu1 }
 0x188   : > { %v2412_v57 = vadd.f32 %v2411_v56, %v2371_v53 }
 0x189   : > { %v2373_v58 = vpop.f32.mrf.mxu0  ;;  %v2413_v59 = vpop.f32.mrf.mxu1 }
 0x18b   : > { %v2414_v60 = vpop.f32.mrf.mxu1 }
 0x1c3   : > { %v2450_v61 = vpop.f32.mrf.mxu0 }
 0x1c4   : > { %v2451_v62 = vadd.f32 %v2450_v61, %v2410_v54 }
 0x1c5   : > { %v2452_v63 = vpop.f32.mrf.mxu0  ;;  %v2491_v0 = vpop.f32.mrf.mxu1 }
 0x1c6   : > { %v2453_v1 = vadd.f32 %v2452_v63, %v2412_v57  ;;  %v2492_v7 = vadd.f32 %v2491_v0, %v2451_v62 }
 0x1c7   : > { %v2454_v2 = vpop.f32.mrf.mxu0  ;;  %v2493_v3 = vpop.f32.mrf.mxu1 }
 0x1c8   : > { %v2494_v4 = vadd.f32 %v2493_v3, %v2453_v1 }
 0x1c9   : > { %v2455_v5 = vpop.f32.mrf.mxu0  ;;  %v2495_v6 = vpop.f32.mrf.mxu1 }
 0x1cb   : > { %v2496_v9 = vpop.f32.mrf.mxu1 }
 0x203   : > { %v2532_v10 = vpop.f32.mrf.mxu0 }
 0x204   : > { %v2533_v14 = vadd.f32 %v2532_v10, %v2492_v7 }
 0x205   : > { %v2573_v13 = vpop.f32.mrf.mxu1  ;;  %v2534_v8 = vpop.f32.mrf.mxu0 }
 0x206   : > { %v2535_v18 = vadd.f32 %v2534_v8, %v2494_v4  ;;  %v2574_v21 = vadd.f32 %v2573_v13, %v2533_v14 }
 0x207   : > { %v2575_v15 = vpop.f32.mrf.mxu1  ;;  %v2536_v16 = vpop.f32.mrf.mxu0 }
 0x208   : > { %v2576_v24 = vadd.f32 %v2575_v15, %v2535_v18 }
 0x209   : > { %v2577_v19 = vpop.f32.mrf.mxu1  ;;  %v2537_v20 = vpop.f32.mrf.mxu0 }
 0x20b   : > { %v2578_v22 = vpop.f32.mrf.mxu1  ;;  %v2614_v23 = vpop.f32.mrf.mxu0 }
 0x20c   : > { %v2615_v25 = vadd.f32 %v2614_v23, %v2574_v21 }
 0x20d   : > { %v2616_v26 = vpop.f32.mrf.mxu0 }
 0x20e   : > { %v2617_v27 = vadd.f32 %v2616_v26, %v2576_v24  ;;  %v2621_v17 = vmax.f32 %v2615_v25, 0.0 }
 0x20f   : > { %v2618_v28 = vpop.f32.mrf.mxu0 }
 0x210   : > { %v2622_v29 = vmax.f32 %v2617_v27, 0.0 }
 0x211   : > { %v2619_v30 = vpop.f32.mrf.mxu0 }
 0x212   : > { %v2625_v31 = vcombine.low %v2621_v17, %v2622_v29 }
 0x214   : > { %2959 = vst.sshfl [vmem:[%s1025_s29] sm:$0x33 pattern:$0x76325410] %v2625_v31 }
 0x215   : > { %3335 = shalt.err (!%p3332_p8)
}
 0x216   : > { %s3336_s18 = scalar_lea.hbm %s2650_s7, 64  ;;  %s3340_s21 = scalar_lea.hbm %s4182_s3, 128 }
 0x217   : > { %p3337_p11 = scmp.ne.s32.totalorder %s2650_s7, %s3336_s18  ;;  %p3341_p0 = scmp.lt.s32.totalorder %s2650_s7, %s4182_s3 }
 0x218   : > { %p3342_p1 = scmp.lt.s32.totalorder %s3340_s21, %s3336_s18 }
 0x219   : > { %p3338_p12 = pnand %p3337_p11, %p3462_p5 }
 0x21a   : > { %p3343_p2 = por %p3342_p1, %p3341_p0 }
 0x21b   : > { %p3339_p13 = pneg %p3338_p12 }
 0x21d   : > { %p3344_p10 = pnand %p3343_p2, %p3339_p13 }
 0x21f   : > { %3347 = shalt.err (!%p3344_p10)
}
 0x220   : > { %2969 = dma.vmem_to_hbm [thread:$0]  (%p3462_p5), %s2653_s30, 64, %s2650_s7, %s2636_s8  }
 0x221 PF: > { %s2664_s27 = sand.u32 1, %s3378_s12   ;;  %p4186_p3 = scmp.ge.s32.totalorder %s3398_s17, 2 }
 0x222   : > { %s2665_s28 = scalar_lea.sflag [#allocation4], %s2664_s27 }
 0x223   : > { %p2972_p4 = pnand %p4186_p3, %p3473_p9 }
 0x225   : > { %p2973_p6 = pneg %p2972_p4 }
 0x227   : > { %3373 = dma.done.wait (%p2973_p6), %s2665_s28, 64  }
 0x228   : > { %3375 = vsyncadd (%p2973_p6), %s2665_s28, 4294967232  ;;  %s16_s17 = sadd.s32 1, %s3398_s17   ;;  %s4187_s12 = smov %s3382_s13 }
 0x229   : > { %p13_p7 = scmp.ge.s32.totalorder %s16_s17, 4   ;;  %s4188_s13 = smov %s3386_s14 }
 0x22a   : > { %s4189_s14 = smov %s3471_s24  ;;  %s4190_s15 = smov %s3394_s16 }
 0x22b   : > { %s4191_s16 = smov %s4193_s20  ;;  %15 = sbr.rel (!%p13_p7) target bundleno = 4 (0x4), region = 116 }
 0x230   :  { %2670 = vsyncpa [#allocation4], 1 }
 0x231   :  { %2672 = vsyncpa [#allocation4 + $0x1], 1 }

// kernel: ppo_encoder_forward.2
= control target key start
LH: loop header
LB: loop body
LE: loop exit
PB: predicated region body
PF: predicated region fallthrough
CT: control target
= control target key end

     0   :  { %s9923_s24 = smov 0   ;;  %s13402_s0 = inlined_call_operand.vmem [shape: bf16[2,144,256], index: 0, kind: input, shape index: {}]   ;;  %s13403_s1 = inlined_call_operand.vmem [shape: bf16[9,256,32], index: 1, kind: input, shape index: {}]   ;;  %s13404_s2 = inlined_call_operand.vmem [shape: bf16[16,32,64], index: 2, kind: input, shape index: {}]   ;;  %s13405_s3 = inlined_call_operand.vmem [shape: bf16[9,64,32], index: 3, kind: input, shape index: {}]   ;;  %s13406_s4 = inlined_call_operand.vmem [shape: f32[1,32], index: 4, kind: input, shape index: {}]   ;;  %s13407_s5 = inlined_call_operand.vmem [shape: f32[1,64], index: 5, kind: input, shape index: {}]   ;;  %s13408_s6 = inlined_call_operand.vmem [shape: f32[1,32], index: 6, kind: input, shape index: {}]   ;;  %s13409_s7 = inlined_call_operand.vmem [shape: bf16[2,49,32], index: 7, kind: output, shape index: {}]  }
   0x1 LB: > { %s7221_s25 = sadd.s32 4294967295, %s9879_s24   ;;  %p7225_p0 = scmp.ge.s32.totalorder %s9879_s24, 1  ;;  %s9879_s24 = sphi %s9923_s24, %s17_s24  }
   0x2   : > { %p237_p1 = scmp.lt.s32.totalorder %s9879_s24, 3 }
   0x4   : > { %p238_p2 = pnand %p7225_p0, %p237_p1 }
   0x6   : > { %241 = sbr.rel (%p238_p2) target bundleno = 1408 (0x580), region = 48 }
   0xb   : > { %v9618_v0 = vld [vmem:[%s13403_s1 + $0x78] sm:$0xff]   ;;  %v9622_v4 = vld [vmem:[%s13403_s1 + $0x70] sm:$0xff]   ;;  %v9626_v8 = vld [vmem:[%s13403_s1 + $0x68] sm:$0xff]   ;;  %p269_p3 = scmp.lt.s32.totalorder %s7221_s25, 1  ;;  %vm698_vm0 = vsmask.f32 7424 }
   0xc   : > { %v9619_v1 = vld [vmem:[%s13403_s1 + $0x38] sm:$0xff]   ;;  %8041 = vmatprep.subr.bf16.mxu0 %v9618_v0  ;;  %v9623_v5 = vld [vmem:[%s13403_s1 + $0x30] sm:$0xff]   ;;  %v9627_v9 = vld [vmem:[%s13403_s1 + $0x28] sm:$0xff]   ;;  %vm1413_vm1 = vsmask.f32 6400  ;;  %vm2737_vm3 = vcmask 1045504  }
   0xd   : > { %v9620_v2 = vld [vmem:[%s13403_s1 + $0x178] sm:$0xff]   ;;  %8042 = vmatpush3.bf16.msra.mxu0 %v9619_v1  ;;  %v9624_v6 = vld [vmem:[%s13403_s1 + $0x170] sm:$0xff]   ;;  %v9628_v10 = vld [vmem:[%s13403_s1 + $0x168] sm:$0xff]   ;;  %s13615_s25 = smov (!%p269_p3, %s7221_s25), 1  ;;  %vm4351_vm2 = vsmask.f32 2304 }
   0xe   : > { %v9621_v3 = vld [vmem:[%s13403_s1 + $0x138] sm:$0xff]   ;;  %8105 = vmatprep.subr.bf16.mxu1 %v9620_v2  ;;  %8043 = vmatprep.subr.bf16.mxu0 %v9622_v4  ;;  %v9625_v7 = vld [vmem:[%s13403_s1 + $0x130] sm:$0xff]   ;;  %v9629_v11 = vld [vmem:[%s13403_s1 + $0x128] sm:$0xff]   ;;  %s9606_s11 = smul.u32 144, %s13615_s25  ;;  %vm9882_vm4 = vmmov 0   ;;  %vm3124_vm5 = vcmask 261120  }
   0xf   : > { %8106 = vmatpush3.bf16.msra.mxu1 %v9621_v3  ;;  %v9630_v12 = vld [vmem:[%s13403_s1 + $0x60] sm:$0xff]   ;;  %v9634_v16 = vld [vmem:[%s13403_s1 + $0x58] sm:$0xff]   ;;  %v9638_v20 = vld [vmem:[%s13403_s1 + $0x50] sm:$0xff]   ;;  %vm4700_vm6 = vcmask 1041408   ;;  %vm5844_vm7 = vcmask 523264   ;;  %vm6045_vm8 = vcmask 1046528  }
  0x10   : > { %8107 = vmatprep.subr.bf16.mxu1 %v9624_v6  ;;  %v9631_v13 = vld [vmem:[%s13403_s1 + $0x20] sm:$0xff]   ;;  %v9635_v17 = vld [vmem:[%s13403_s1 + $0x18] sm:$0xff]   ;;  %v9639_v21 = vld [vmem:[%s13403_s1 + $0x10] sm:$0xff]   ;;  %s10028_s22 = scalar_lea.vmem %s13402_s0, %s9606_s11  ;;  %vm6461_vm9 = vsmask.f32 1280  ;;  %vm6608_vm10 = vcmask 1044480  }
  0x11   : > { %8044 = vmatpush3.bf16.msra.mxu0 %v9623_v5  ;;  %v9632_v14 = vld [vmem:[%s13403_s1 + $0x160] sm:$0xff]   ;;  %v9636_v18 = vld [vmem:[%s13403_s1 + $0x158] sm:$0xff]   ;;  %v9640_v22 = vld [vmem:[%s13403_s1 + $0x150] sm:$0xff]   ;;  %vm6893_vm11 = vcmask 1043456   ;;  %vm6742_vm12 = vsmask.f32 4352 }
  0x12   : > { %8045 = vmatprep.subr.bf16.mxu0 %v9626_v8  ;;  %v9633_v15 = vld [vmem:[%s13403_s1 + $0x120] sm:$0xff]   ;;  %v9637_v19 = vld [vmem:[%s13403_s1 + $0x118] sm:$0xff]   ;;  %v9641_v23 = vld [vmem:[%s13403_s1 + $0x110] sm:$0xff]   ;;  %s9607_s9 = smul.u32 28, %s13615_s25  ;;  %vm7055_vm13 = vcmask 257024  }
  0x13   : > { %8108 = vmatpush3.bf16.msra.mxu1 %v9625_v7  ;;  %v9642_v24 = vld [vmem:[%s13403_s1 + $0x48] sm:$0xff]   ;;  %v9646_v28 = vld [vmem:[%s13403_s1 + $0x40] sm:$0xff]   ;;  %v9653_v34 = vld [vmem:[%s13403_s1 + $0xf8] sm:$0xff]   ;;  %vm7056_vm14 = vsmask.f32 3328 }
  0x14   : > { %8109 = vmatprep.subr.bf16.mxu1 %v9628_v10  ;;  %v9643_v25 = vld [vmem:[%s13403_s1 + $0x8] sm:$0xff]   ;;  %v9647_v29 = vld [vmem:[%s13403_s1] sm:$0xff]   ;;  %v10050_v35 = vld [vmem:[%s10028_s22 + $0x10] sm:$0xff]  ;;  %s13332_s14 = scalar_lea.vmem %s13409_s7, %s9607_s9 }
  0x15   : > { %8046 = vmatpush3.bf16.msra.mxu0 %v9627_v9  ;;  %v9644_v26 = vld [vmem:[%s13403_s1 + $0x148] sm:$0xff]   ;;  %v9648_v30 = vld [vmem:[%s13403_s1 + $0x140] sm:$0xff]   ;;  %v10053_v36 = vld [vmem:[%s10028_s22 + $0x18] sm:$0xff] }
  0x16   : > { %8047 = vmatprep.subr.bf16.mxu0 %v9630_v12  ;;  %v9645_v27 = vld [vmem:[%s13403_s1 + $0x108] sm:$0xff]   ;;  %v9651_v32 = vld [vmem:[%s13403_s1 + $0x100] sm:$0xff]   ;;  %v10060_v39 = vcombine.high %v10050_v35, %v10053_v36  ;;  %v9655_v40 = vld [vmem:[%s13403_s1 + $0xb8] sm:$0xff]   ;;  %v10067_v41 = vcombine.low %v10050_v35, %v10053_v36 }
  0x17   : > { %8110 = vmatpush3.bf16.msra.mxu1 %v9629_v11  ;;  %v10037_v31 = vld [vmem:[%s10028_s22 + $0x4] ss:$8 sps:$4 sm:$0xff]   ;;  %v10044_v33 = vld [vmem:[%s10028_s22] ss:$8 sps:$4 sm:$0xff]   ;;  %v9657_v47 = vld [vmem:[%s13403_s1 + $0xf0] sm:$0xff]  }
  0x18   : > { %8111 = vmatprep.subr.bf16.mxu1 %v9632_v14  ;;  %543 = vmatprep.mubr.bf16.mxu0 %v10037_v31  ;;  %v712_v37 = vshrl.u32 %v10037_v31, 16  ;;  %v714_v38 = vshll.u32 %v10037_v31, 16  ;;  %v700_v42 = vshrl.u32 %v10044_v33, 16  ;;  %v702_v44 = vshll.u32 %v10044_v33, 16  ;;  %v10078_v48 = vld [vmem:[%s10028_s22 + $0x20] sm:$0xff]  ;;  %v10081_v49 = vld [vmem:[%s10028_s22 + $0x28] sm:$0xff]  ;;  %vm7057_vm15 = vmand %vm7055_vm13, %vm7056_vm14 }
  0x19   : > { %8048 = vmatpush3.bf16.msra.mxu0 %v9631_v13  ;;  %v719_v45 = vshll.u32 %v10060_v39, 16  ;;  %v707_v46 = vshll.u32 %v10067_v41, 16  ;;  %v731_v50 = vshrl.u32 %v10060_v39, 16  ;;  %v10086_v53 = vcombine.high %v10078_v48, %v10081_v49  ;;  %v9659_v54 = vld [vmem:[%s13403_s1 + $0xb0] sm:$0xff]   ;;  %v9661_v59 = vld [vmem:[%s13403_s1 + $0xe8] sm:$0xff]   ;;  %v10105_v0 = vld [vmem:[%s10028_s22 + $0x38] sm:$0xff] }
  0x1a   : > { %8049 = vmatprep.subr.bf16.mxu0 %v9634_v16  ;;  %v716_v43 = vrot.slane %v714_v38, 1  ;;  %v704_v52 = vrot.slane %v702_v44, 1  ;;  %v10093_v55 = vcombine.low %v10078_v48, %v10081_v49  ;;  %v723_v58 = vshrl.u32 %v10067_v41, 16  ;;  %v10102_v63 = vld [vmem:[%s10028_s22 + $0x30] sm:$0xff]  ;;  %v9663_v4 = vld [vmem:[%s13403_s1 + $0xa8] sm:$0xff]   ;;  %v9665_v8 = vld [vmem:[%s13403_s1 + $0xe0] sm:$0xff]  }
  0x1b   : > { %8112 = vmatpush3.bf16.msra.mxu1 %v9633_v15  ;;  %v721_v56 = vrot.slane %v719_v45, 1  ;;  %v709_v57 = vrot.slane %v707_v46, 1  ;;  %v735_v61 = vshll.u32 %v10086_v53, 16  ;;  %v10112_v3 = vcombine.high %v10102_v63, %v10105_v0  ;;  %v10129_v10 = vld [vmem:[%s10028_s22 + $0x40] sm:$0xff]  ;;  %v10132_v11 = vld [vmem:[%s10028_s22 + $0x48] sm:$0xff]  ;;  %v9676_v46 = vld [vmem:[%s13403_s1 + $0x230] sm:$0xff]  }
  0x1c   : > { %8113 = vmatprep.subr.bf16.mxu1 %v9636_v18  ;;  %v717_v51 = vor.u32 %v716_v43, %v712_v37  ;;  %v705_v60 = vor.u32 %v704_v52, %v700_v42  ;;  %v727_v62 = vshll.u32 %v10093_v55, 16  ;;  %v747_v7 = vshrl.u32 %v10086_v53, 16  ;;  %v9677_v42 = vld [vmem:[%s13403_s1 + $0xd0] sm:$0xff]  }
  0x1d   : > { %8050 = vmatpush3.bf16.msra.mxu0 %v9635_v17  ;;  %v733_v2 = vor.u32 %v731_v50, %v721_v56  ;;  %v737_v6 = vrot.slane %v735_v61, 1  ;;  %v751_v9 = vshll.u32 %v10112_v3, 16  ;;  %v725_v13 = vor.u32 %v723_v58, %v709_v57  ;;  %v9679_v50 = vld [vmem:[%s13403_s1 + $0x90] sm:$0xff]   ;;  %v9682_v61 = vld [vmem:[%s13403_s1 + $0x228] sm:$0xff]  }
  0x1e   : > { %8051 = vmatprep.subr.bf16.mxu0 %v9638_v20  ;;  %v10108_v1 = vsel %vm698_vm0, %v717_v51, %v721_v56  ;;  %v10119_v5 = vsel %vm698_vm0, %v705_v60, %v709_v57  ;;  %v729_v14 = vrot.slane %v727_v62, 1  ;;  %v10140_v15 = vcombine.low %v10102_v63, %v10105_v0  ;;  %v9669_v20 = vld [vmem:[%s13403_s1 + $0xd8] sm:$0xff]   ;;  %v10211_v56 = vld [vmem:[%s10028_s22 + $0x68] sm:$0xff]  ;;  %v9683_v62 = vld [vmem:[%s13403_s1 + $0x260] sm:$0xff]  }
  0x1f   : > { %8114 = vmatpush3.bf16.msra.mxu1 %v9637_v19  ;;  %969 = vmatprep.mubr.bf16.mxu1 %v10108_v1  ;;  %v10135_v12 = vsel %vm698_vm0, %v733_v2, %v737_v6  ;;  %v749_v16 = vor.u32 %v747_v7, %v737_v6  ;;  %v753_v17 = vrot.slane %v751_v9, 1  ;;  %v10145_v18 = vcombine.high %v10129_v10, %v10132_v11  ;;  %v9667_v19 = vld [vmem:[%s13403_s1 + $0xa0] sm:$0xff]   ;;  %v9681_v57 = vld [vmem:[%s13403_s1 + $0x268] sm:$0xff]  }
  0x20   : > { %8115 = vmatprep.subr.bf16.mxu1 %v9640_v22  ;;  %v10155_v22 = vsel %vm698_vm0, %v725_v13, %v729_v14  ;;  %vm7143_vm13 = vsmask.f32 7942  ;;  %vm7148_vm14 = vcmask 253952  }
  0x21   : > { %8052 = vmatpush3.bf16.msra.mxu0 %v9639_v21  ;;  %v739_v21 = vshrl.u32 %v10093_v55, 16 }
  0x22   : > { %8053 = vmatprep.subr.bf16.mxu0 %v9642_v24  ;;  %v763_v24 = vshrl.u32 %v10112_v3, 16 }
  0x23   : > { %8116 = vmatpush3.bf16.msra.mxu1 %v9641_v23  ;;  %v743_v23 = vshll.u32 %v10140_v15, 16  ;;  %v741_v37 = vor.u32 %v739_v21, %v729_v14 }
  0x24   : > { %8117 = vmatprep.subr.bf16.mxu1 %v9644_v26  ;;  %v10163_v26 = vld [vmem:[%s10028_s22 + $0x58] sm:$0xff]  ;;  %v765_v43 = vor.u32 %v763_v24, %v753_v17  ;;  %v10258_v24 = vld [vmem:[%s10028_s22 + $0x70] sm:$0xff] }
  0x25   : > { %8054 = vmatpush3.bf16.msra.mxu0 %v9643_v25  ;;  %v10160_v25 = vld [vmem:[%s10028_s22 + $0x50] sm:$0xff]  ;;  %v745_v38 = vrot.slane %v743_v23, 1 }
  0x26   : > { %8055 = vmatprep.subr.bf16.mxu0 %v9646_v28  ;;  %v10169_v28 = vsel %vm698_vm0, %v749_v16, %v753_v17  ;;  %v10194_v45 = vcombine.high %v10160_v25, %v10163_v26  ;;  %v10231_v2 = vcombine.low %v10160_v25, %v10163_v26  ;;  %v9687_v16 = vld [vmem:[%s13403_s1 + $0x88] sm:$0xff]   ;;  %v9689_v17 = vld [vmem:[%s13403_s1 + $0x258] sm:$0xff]  }
  0x27   : > { %8118 = vmatpush3.bf16.msra.mxu1 %v9645_v27  ;;  %v9673_v27 = vld [vmem:[%s13403_s1 + $0x278] sm:$0xff]   ;;  %v10204_v51 = vsel %vm698_vm0, %v741_v37, %v745_v38  ;;  %v9693_v37 = vld [vmem:[%s13403_s1 + $0xc0] sm:$0xff]  }
  0x28   : > { %8119 = vmatprep.subr.bf16.mxu1 %v9648_v30  ;;  %v9671_v30 = vld [vmem:[%s13403_s1 + $0x98] sm:$0xff]   ;;  %v783_v60 = vshll.u32 %v10194_v45, 16  ;;  %v795_v23 = vshrl.u32 %v10194_v45, 16 }
  0x29   : > { %8056 = vmatpush3.bf16.msra.mxu0 %v9647_v29  ;;  %v767_v29 = vshll.u32 %v10145_v18, 16 }
  0x2a   : > { %8169 = vmatprep.subr.bf16.mxu0 %v9653_v34  ;;  %v9675_v34 = vld [vmem:[%s13403_s1 + $0x270] sm:$0xff]   ;;  %v785_v13 = vrot.slane %v783_v60, 1 }
  0x2b   : > { %8120 = vmatpush3.bf16.msra.mxu1 %v9651_v32  ;;  %v9674_v32 = vld [vmem:[%s13403_s1 + $0x238] sm:$0xff]   ;;  %v769_v44 = vrot.slane %v767_v29, 1 }
  0x2c   : > { %544 = vmatmul.mubr.bf16.vlgmr.msra.gmra.mxu0 %v10044_v33  ;;  %8233 = vmatprep.subr.bf16.mxu1 %v9673_v27  ;;  %v295_v27 = vld [vmem:[%s10028_s22 + $0x78] sm:$0x11] }
  0x2d   : > { %8170 = vmatpush3.bf16.msra.mxu0 %v9655_v40  ;;  %551 = vmatprep.mubr.bf16.mxu0 %v10060_v39  ;;  %v10187_v40 = vcombine.low %v10129_v10, %v10132_v11  ;;  %v10217_v58 = vsel %vm698_vm0, %v765_v43, %v769_v44  ;;  %v9690_v29 = vld [vmem:[%s13403_s1 + $0x218] sm:$0xff]  }
  0x2e   : > { %8171 = vmatprep.subr.bf16.mxu0 %v9657_v47  ;;  %970 = vmatmul.mubr.bf16.vlgmr.msra.gmra.mxu1 %v10119_v5  ;;  %v755_v47 = vshrl.u32 %v10140_v15, 16 }
  0x2f   : > { %977 = vmatprep.mubr.bf16.mxu1 %v10135_v12  ;;  %8234 = vmatpush3.bf16.msra.mxu1 %v9674_v32  ;;  %v759_v52 = vshll.u32 %v10187_v40, 16 }
  0x30   : > { %8235 = vmatprep.subr.bf16.mxu1 %v9675_v34  ;;  %v757_v6 = vor.u32 %v755_v47, %v745_v38  ;;  %v9691_v34 = vld [vmem:[%s13403_s1 + $0x250] sm:$0xff]   ;;  %v9694_v38 = vld [vmem:[%s13403_s1 + $0x80] sm:$0xff]  }
  0x31   : > { %8172 = vmatpush3.bf16.msra.mxu0 %v9659_v54  ;;  %v10208_v54 = vld [vmem:[%s10028_s22 + $0x60] sm:$0xff]  ;;  %v761_v7 = vrot.slane %v759_v52, 1  ;;  %v9692_v52 = vld [vmem:[%s13403_s1 + $0x210] sm:$0xff]  }
  0x32   : > { %8173 = vmatprep.subr.bf16.mxu0 %v9661_v59  ;;  %v779_v59 = vshrl.u32 %v10145_v18, 16  ;;  %v10243_v14 = vcombine.high %v10208_v54, %v10211_v56 }
  0x33   : > { %8236 = vmatpush3.bf16.msra.mxu1 %v9676_v46  ;;  %v10254_v21 = vsel %vm698_vm0, %v757_v6, %v761_v7  ;;  %v797_v46 = vor.u32 %v795_v23, %v785_v13  ;;  %v9698_v23 = vld [vmem:[%s13403_s1 + $0x200] sm:$0xff]  }
  0x34   : > { %552 = vmatmul.mubr.bf16.gmra.mxu0 %v10067_v41  ;;  %8237 = vmatprep.subr.bf16.mxu1 %v9681_v57  ;;  %v781_v9 = vor.u32 %v779_v59, %v769_v44  ;;  %v799_v32 = vshll.u32 %v10243_v14, 16  ;;  %v10283_v44 = vcombine.low %v10208_v54, %v10211_v56  ;;  %v9695_v57 = vld [vmem:[%s13403_s1 + $0x248] sm:$0xff]   ;;  %v787_v59 = vshrl.u32 %v10231_v2, 16 }
  0x35   : > { %559 = vmatprep.mubr.bf16.mxu0 %v10086_v53  ;;  %8174 = vmatpush3.bf16.msra.mxu0 %v9663_v4  ;;  %v9685_v4 = vld [vmem:[%s13403_s1 + $0xc8] sm:$0xff]   ;;  %v811_v6 = vshrl.u32 %v10243_v14, 16 }
  0x36   : > { %8175 = vmatprep.subr.bf16.mxu0 %v9665_v8  ;;  %978 = vmatmul.mubr.bf16.gmra.mxu1 %v10155_v22  ;;  %v9684_v8 = vld [vmem:[%s13403_s1 + $0x220] sm:$0xff]   ;;  %v801_v47 = vrot.slane %v799_v32, 1  ;;  %v10326_v32 = vcombine.high %v10053_v36, %v10078_v48 }
  0x37   : > { %985 = vmatprep.mubr.bf16.mxu1 %v10169_v28  ;;  %8238 = vmatpush3.bf16.msra.mxu1 %v9682_v61  ;;  %v791_v61 = vshll.u32 %v10283_v44, 16 }
  0x38   : > { %8239 = vmatprep.subr.bf16.mxu1 %v9683_v62  ;;  %v9699_v62 = vld [vmem:[%s13403_s1 + $0x1f8] sm:$0xff]  }
  0x39   : > { %8176 = vmatpush3.bf16.msra.mxu0 %v9667_v19  ;;  %v771_v19 = vshrl.u32 %v10187_v40, 16 }
  0x3a   : > { %8177 = vmatprep.subr.bf16.mxu0 %v9669_v20  ;;  %v775_v20 = vshll.u32 %v10231_v2, 16 }
  0x3b   : > { %8240 = vmatpush3.bf16.msra.mxu1 %v9684_v8  ;;  %v9696_v8 = vld [vmem:[%s13403_s1 + $0x208] sm:$0xff]  }
  0x3c   : > { %560 = vmatmul.mubr.bf16.gmra.mxu0 %v10093_v55  ;;  %8241 = vmatprep.subr.bf16.mxu1 %v9689_v17  ;;  %v777_v43 = vrot.slane %v775_v20, 1  ;;  %v10318_v17 = vcombine.low %v10258_v24, %v295_v27 }
  0x3d   : > { %567 = vmatprep.mubr.bf16.mxu0 %v10112_v3  ;;  %8178 = vmatpush3.bf16.msra.mxu0 %v9671_v30  ;;  %v10265_v30 = vsel %vm698_vm0, %v781_v9, %v785_v13  ;;  %v9697_v9 = vld [vmem:[%s13403_s1 + $0x240] sm:$0xff]  }
  0x3e   : > { %8179 = vmatprep.subr.bf16.mxu0 %v9677_v42  ;;  %986 = vmatmul.mubr.bf16.gmra.mxu1 %v10204_v51  ;;  %v773_v42 = vor.u32 %v771_v19, %v761_v7  ;;  %v789_v13 = vor.u32 %v787_v59, %v777_v43  ;;  %v813_v19 = vor.u32 %v811_v6, %v801_v47  ;;  %v9721_v6 = vld [vmem:[%s13403_s1 + $0x378] sm:$0xff]  }
  0x3f   : > { %993 = vmatprep.mubr.bf16.mxu1 %v10217_v58  ;;  %8242 = vmatpush3.bf16.msra.mxu1 %v9690_v29  ;;  %v1300_v29 = vld [vmem:[%s10028_s22 + $0x8] sm:$0xee] }
  0x40   : > { %8243 = vmatprep.subr.bf16.mxu1 %v9691_v34  ;;  %v10296_v60 = vsel %vm698_vm0, %v773_v42, %v777_v43  ;;  %v7422_v42 = vcombine.high %v1300_v29, %v10050_v35  ;;  %v1440_v43 = vshrl.u32 %v10326_v32, 16 }
  0x41   : > { %8180 = vmatpush3.bf16.msra.mxu0 %v9679_v50  ;;  %v10286_v50 = vcombine.high %v10258_v24, %v295_v27  ;;  %v807_v27 = vshll.u32 %v10318_v17, 16 }
  0x42   : > { %8181 = vmatprep.subr.bf16.mxu0 %v9685_v4  ;;  %v10303_v4 = vsel %vm698_vm0, %v797_v46, %v801_v47  ;;  %v1435_v59 = vshll.u32 %v7422_v42, 16 }
  0x43   : > { %v815_v7 = vshll.u32 %v10286_v50, 16  ;;  %8244 = vmatpush3.bf16.msra.mxu1 %v9692_v52  ;;  %v809_v47 = vrot.slane %v807_v27, 1  ;;  %v822_v52 = vshrl.u32 %v10286_v50, 16 }
  0x44   : > { %568 = vmatmul.mubr.bf16.gmra.mxu0 %v10140_v15  ;;  %8245 = vmatprep.subr.bf16.mxu1 %v9695_v57  ;;  %v1432_v57 = vshrl.u32 %v7422_v42, 16 }
  0x45   : > { %575 = vmatprep.mubr.bf16.mxu0 %v10145_v18  ;;  %8182 = vmatpush3.bf16.msra.mxu0 %v9687_v16  ;;  %v793_v16 = vrot.slane %v791_v61, 1  ;;  %v817_v20 = vrot.slane %v815_v7, 1  ;;  %v1443_v61 = vshll.u32 %v10326_v32, 16  ;;  %v10353_v7 = vcombine.high %v10081_v49, %v10102_v63 }
  0x46   : > { %994 = vmatmul.mubr.bf16.gmra.mxu1 %v10254_v21  ;;  %8183 = vmatprep.subr.bf16.mxu0 %v9693_v37  ;;  %v803_v37 = vshrl.u32 %v10283_v44, 16 }
  0x47   : > { %1001 = vmatprep.mubr.bf16.mxu1 %v10265_v30  ;;  %8246 = vmatpush3.bf16.msra.mxu1 %v9696_v8  ;;  %v10329_v34 = vsel %vm698_vm0, %v789_v13, %v793_v16  ;;  %13452 = vst [vmem:[#allocation2_spill] sm:$0xff] %v10353_v7  ;;  %v7421_v13 = vcombine.low %v1300_v29, %v10050_v35 }
  0x48   : > { %8247 = vmatprep.subr.bf16.mxu1 %v9697_v9  ;;  %v805_v46 = vor.u32 %v803_v37, %v793_v16  ;;  %v10358_v9 = vor.u32 %v822_v52, %v817_v20  ;;  %v1442_v16 = vrot.slane %v1440_v43, 1  ;;  %v1458_v43 = vshrl.u32 %v10353_v7, 16  ;;  %v9704_v52 = vld [vmem:[%s13403_s1 + $0x1b8] sm:$0xff]  }
  0x49   : > { %8184 = vmatpush3.bf16.msra.mxu0 %v9694_v38  ;;  %v10334_v38 = vsel %vm698_vm0, %v813_v19, %v817_v20  ;;  %v1437_v19 = vrot.slane %v1435_v59, 2  ;;  %v1415_v35 = vshrl.u32 %v7421_v13, 16  ;;  %v1418_v20 = vshll.u32 %v7421_v13, 16 }
  0x4a   : > { %8297 = vmatprep.subr.bf16.mxu0 %v9699_v62  ;;  %v10346_v62 = vcombine.low %v10053_v36, %v10078_v48  ;;  %v10356_v8 = vsel %vm698_vm0, %v805_v46, %v809_v47  ;;  %v819_v36 = vshrl.u32 %v10318_v17, 16  ;;  %v1434_v48 = vrot.slane %v1432_v57, 1 }
  0x4b   : > { %8248 = vmatpush3.bf16.msra.mxu1 %v9698_v23  ;;  %v1445_v23 = vrot.slane %v1443_v61, 2  ;;  %v1461_v46 = vshll.u32 %v10353_v7, 16  ;;  %v1417_v13 = vrot.slane %v1415_v35, 1  ;;  %v10545_v7 = vcombine.low %v10211_v56, %v10258_v24 }
  0x4c   : > { %576 = vmatmul.mubr.bf16.gmra.mxu0 %v10187_v40  ;;  %8361 = vmatprep.subr.bf16.mxu1 %v9721_v6  ;;  %v1423_v37 = vshrl.u32 %v10346_v62, 16  ;;  %v1426_v27 = vshll.u32 %v10346_v62, 16  ;;  %v1438_v29 = vor.u32 %v1437_v19, %v1434_v48  ;;  %v10373_v59 = vor.u32 %v819_v36, %v809_v47 }
  0x4d   : > { %583 = vmatprep.mubr.bf16.mxu0 %v10194_v45  ;;  %v1446_v42 = vor.u32 %v1445_v23, %v1442_v16  ;;  %v10380_v6 = vcombine.low %v10081_v49, %v10102_v63  ;;  %v1420_v16 = vrot.slane %v1418_v20, 2  ;;  %v10384_v48 = vcombine.high %v10105_v0, %v10129_v10  ;;  %v9707_v49 = vld [vmem:[%s13403_s1 + $0x1b0] sm:$0xff]  }
  0x4e   : > { %1002 = vmatmul.mubr.bf16.gmra.mxu1 %v10296_v60  ;;  %v1425_v57 = vrot.slane %v1423_v37, 1  ;;  %v1428_v61 = vrot.slane %v1426_v27, 2  ;;  %v1460_v47 = vrot.slane %v1458_v43, 1  ;;  %v1463_v36 = vrot.slane %v1461_v46, 2 }
  0x4f   : > { %1009 = vmatprep.mubr.bf16.mxu1 %v10303_v4  ;;  %13453 = vst [vmem:[#allocation3_spill] sm:$0xff] %v10380_v6  ;;  %13454 = vst [vmem:[#allocation4_spill] sm:$0xff] %v10384_v48  ;;  %v10387_v19 = vsel %vm1413_vm1, %v1438_v29, %v1446_v42  ;;  %v1449_v63 = vshrl.u32 %v10380_v6, 16  ;;  %v1452_v23 = vshll.u32 %v10380_v6, 16  ;;  %v1421_v37 = vor.u32 %v1420_v16, %v1417_v13  ;;  %v9709_v29 = vld [vmem:[%s13403_s1 + $0x1e8] sm:$0xff]  }
  0x50   : > { %v1429_v27 = vor.u32 %v1428_v61, %v1425_v57  ;;  %v1476_v35 = vshrl.u32 %v10384_v48, 16  ;;  %v1479_v20 = vshll.u32 %v10384_v48, 16  ;;  %v10405_v43 = vcombine.low %v10105_v0, %v10129_v10  ;;  %v9711_v16 = vld [vmem:[%s13403_s1 + $0x1a8] sm:$0xff]   ;;  %v9713_v0 = vld [vmem:[%s13403_s1 + $0x1e0] sm:$0xff]   ;;  %v9722_v10 = vld [vmem:[%s13403_s1 + $0x338] sm:$0xff]  }
  0x51   : > { %v1451_v46 = vrot.slane %v1449_v63, 1  ;;  %v1454_v61 = vrot.slane %v1452_v23, 2  ;;  %v9715_v23 = vld [vmem:[%s13403_s1 + $0x1a0] sm:$0xff]   ;;  %v9743_v6 = vld [vmem:[%s13403_s1 + $0x348] sm:$0xff]  }
  0x52   : > { %13455 = vst [vmem:[#allocation5_spill] sm:$0xff] %v10405_v43  ;;  %v10412_v57 = vsel %vm1413_vm1, %v1421_v37, %v1429_v27  ;;  %v1481_v13 = vrot.slane %v1479_v20, 2  ;;  %v1470_v63 = vshll.u32 %v10405_v43, 16 }
  0x54   : > { %584 = vmatmul.mubr.bf16.gmra.mxu0 %v10231_v2 }
  0x55   : > { %591 = vmatprep.mubr.bf16.mxu0 %v10243_v14 }
  0x56   : > { %1010 = vmatmul.mubr.bf16.gmra.mxu1 %v10329_v34 }
  0x57   : > { %1017 = vmatprep.mubr.bf16.mxu1 %v10334_v38 }
  0x5c   : > { %592 = vmatmul.mubr.bf16.gmra.mxu0 %v10283_v44 }
  0x5d   : > { %599 = vmatprep.mubr.bf16.mxu0 %v10286_v50 }
  0x5e   : > { %1018 = vmatmul.mubr.bf16.gmra.mxu1 %v10356_v8 }
  0x5f   : > { %1025 = vmatprep.mubr.bf16.mxu1 %v10358_v9 }
  0x64   : > { %600 = vmatmul.mubr.bf16.gmra.mxu0 %v10318_v17 }
  0x65   : > { %1162 = vmatprep.mubr.bf16.mxu0 %v10037_v31  ;;  %v9705_v31 = vld [vmem:[%s13403_s1 + $0x1f0] sm:$0xff]  }
  0x66   : > { %1026 = vmatmul.mubr.bf16.gmra.mxu1 %v10373_v59 }
  0x67   : > { %1700 = vmatprep.mubr.bf16.mxu1 %v10387_v19 }
  0x6c   : > { %1163 = vmatmul.mubr.bf16.vlgmr.msra.gmra.mxu0 %v10044_v33  ;;  %v1464_v33 = vor.u32 %v1463_v36, %v1460_v47  ;;  %v1467_v36 = vshrl.u32 %v10405_v43, 16  ;;  %v9724_v43 = vld [vmem:[%s13403_s1 + $0x330] sm:$0xff]  }
  0x6d   : > { %8298 = vmatpush3.bf16.msra.mxu0 %v9704_v52  ;;  %1170 = vmatprep.mubr.bf16.mxu0 %v10060_v39  ;;  %v10409_v52 = vcombine.high %v10132_v11, %v10160_v25 }
  0x6e   : > { %8299 = vmatprep.subr.bf16.mxu0 %v9705_v31  ;;  %v1478_v31 = vrot.slane %v1476_v35, 1  ;;  %v10424_v47 = vsel %vm1413_vm1, %v1446_v42, %v1464_v33  ;;  %1701 = vmatmul.mubr.bf16.vlgmr.msra.gmra.mxu1 %v10412_v57  ;;  %v1455_v42 = vor.u32 %v1454_v61, %v1451_v46  ;;  %v9717_v35 = vld [vmem:[%s13403_s1 + $0x1d8] sm:$0xff]   ;;  %v1469_v48 = vrot.slane %v1467_v36, 1  ;;  %v9729_v61 = vld [vmem:[%s13403_s1 + $0x368] sm:$0xff]  }
  0x6f   : > { %13456 = vst [vmem:[#allocation6_spill] sm:$0xff] %v10409_v52  ;;  %1708 = vmatprep.mubr.bf16.mxu1 %v10424_v47  ;;  %v1494_v37 = vshrl.u32 %v10409_v52, 16  ;;  %8362 = vmatpush3.bf16.msra.mxu1 %v9722_v10  ;;  %v10448_v46 = vcombine.low %v10132_v11, %v10160_v25  ;;  %v9725_v11 = vld [vmem:[%s13403_s1 + $0x1d0] sm:$0xff]  }
  0x70   : > { %v1482_v20 = vor.u32 %v1481_v13, %v1478_v31  ;;  %v1472_v31 = vrot.slane %v1470_v63, 2  ;;  %v9719_v13 = vld [vmem:[%s13403_s1 + $0x198] sm:$0xff]   ;;  %v9731_v63 = vld [vmem:[%s13403_s1 + $0x360] sm:$0xff]  }
  0x71   : > { %8300 = vmatpush3.bf16.msra.mxu0 %v9707_v49  ;;  %v9723_v49 = vld [vmem:[%s13403_s1 + $0x370] sm:$0xff]   ;;  %13457 = vst [vmem:[#allocation7_spill] sm:$0xff] %v10448_v46  ;;  %v1496_v10 = vrot.slane %v1494_v37, 1 }
  0x72   : > { %8301 = vmatprep.subr.bf16.mxu0 %v9709_v29  ;;  %v1497_v29 = vshll.u32 %v10409_v52, 16  ;;  %8363 = vmatprep.subr.bf16.mxu1 %v9723_v49  ;;  %v10467_v25 = vsel %vm1413_vm1, %v1464_v33, %v1482_v20  ;;  %v1485_v49 = vshrl.u32 %v10448_v46, 16  ;;  %v1488_v33 = vshll.u32 %v10448_v46, 16  ;;  %v9733_v46 = vld [vmem:[%s13403_s1 + $0x1c8] sm:$0xff]  }
  0x73   : > { %8364 = vmatpush3.bf16.msra.mxu1 %v9724_v43  ;;  %v9727_v43 = vld [vmem:[%s13403_s1 + $0x190] sm:$0xff]  }
  0x74   : > { %1171 = vmatmul.mubr.bf16.gmra.mxu0 %v10067_v41  ;;  %v1499_v36 = vrot.slane %v1497_v29, 2  ;;  %8365 = vmatprep.subr.bf16.mxu1 %v9729_v61  ;;  %v1487_v52 = vrot.slane %v1485_v49, 1 }
  0x75   : > { %1178 = vmatprep.mubr.bf16.mxu0 %v10086_v53  ;;  %8302 = vmatpush3.bf16.msra.mxu0 %v9711_v16  ;;  %v10457_v16 = vsel %vm1413_vm1, %v1429_v27, %v1455_v42  ;;  %v9730_v27 = vld [vmem:[%s13403_s1 + $0x328] sm:$0xff]  }
  0x76   : > { %8303 = vmatprep.subr.bf16.mxu0 %v9713_v0  ;;  %v10461_v0 = vcombine.high %v10163_v26, %v10208_v54  ;;  %1709 = vmatmul.mubr.bf16.gmra.mxu1 %v10457_v16  ;;  %v1500_v29 = vor.u32 %v1499_v36, %v1496_v10  ;;  %v1490_v10 = vrot.slane %v1488_v33, 2  ;;  %v9741_v33 = vld [vmem:[%s13403_s1 + $0x1c0] sm:$0xff]  }
  0x77   : > { %1716 = vmatprep.mubr.bf16.mxu1 %v10467_v25  ;;  %8366 = vmatpush3.bf16.msra.mxu1 %v9730_v27 }
  0x78   : > { %13458 = vst [vmem:[#allocation8_spill] sm:$0xff] %v10461_v0  ;;  %v1512_v37 = vshrl.u32 %v10461_v0, 16  ;;  %v1515_v61 = vshll.u32 %v10461_v0, 16  ;;  %8367 = vmatprep.subr.bf16.mxu1 %v9731_v63 }
  0x79   : > { %8304 = vmatpush3.bf16.msra.mxu0 %v9715_v23  ;;  %v1473_v23 = vor.u32 %v1472_v31, %v1469_v48  ;;  %v10494_v48 = vcombine.low %v10163_v26, %v10208_v54  ;;  %v9737_v31 = vld [vmem:[%s13403_s1 + $0x358] sm:$0xff]   ;;  %v10507_v26 = vcombine.high %v10211_v56, %v10258_v24  ;;  %v9745_v56 = vld [vmem:[%s13403_s1 + $0x340] sm:$0xff]   ;;  %v1521_v24 = vshrl.u32 %v10545_v7, 16 }
  0x7a   : > { %8305 = vmatprep.subr.bf16.mxu0 %v9717_v35  ;;  %v9732_v35 = vld [vmem:[%s13403_s1 + $0x320] sm:$0xff]   ;;  %v1514_v27 = vrot.slane %v1512_v37, 1  ;;  %v9738_v54 = vld [vmem:[%s13403_s1 + $0x318] sm:$0xff]   ;;  %v1517_v49 = vrot.slane %v1515_v61, 2 }
  0x7b   : > { %13459 = vst [vmem:[#allocation9_spill] sm:$0xff] %v10494_v48  ;;  %v10503_v36 = vsel %vm1413_vm1, %v1455_v42, %v1473_v23  ;;  %13460 = vst [vmem:[#allocation10_spill] sm:$0xff] %v10507_v26  ;;  %8368 = vmatpush3.bf16.msra.mxu1 %v9732_v35  ;;  %v9739_v42 = vld [vmem:[%s13403_s1 + $0x350] sm:$0xff]   ;;  %v1503_v63 = vshrl.u32 %v10494_v48, 16  ;;  %v1315_v37 = vld [vmem:[%s10028_s22 + $0x80] sm:$0x33] }
  0x7c   : > { %1179 = vmatmul.mubr.bf16.gmra.mxu0 %v10093_v55  ;;  %8369 = vmatprep.subr.bf16.mxu1 %v9737_v31  ;;  %v9740_v35 = vld [vmem:[%s13403_s1 + $0x310] sm:$0xff]   ;;  %v1530_v61 = vshrl.u32 %v10507_v26, 16  ;;  %v9742_v31 = vld [vmem:[%s13403_s1 + $0x180] sm:$0xff]   ;;  %v1518_v0 = vor.u32 %v1517_v49, %v1514_v27 }
  0x7d   : > { %1186 = vmatprep.mubr.bf16.mxu0 %v10112_v3  ;;  %8306 = vmatpush3.bf16.msra.mxu0 %v9719_v13  ;;  %v9735_v13 = vld [vmem:[%s13403_s1 + $0x188] sm:$0xff]  }
  0x7e   : > { %8307 = vmatprep.subr.bf16.mxu0 %v9725_v11  ;;  %v10513_v11 = vsel %vm1413_vm1, %v1482_v20, %v1500_v29  ;;  %1717 = vmatmul.mubr.bf16.gmra.mxu1 %v10503_v36  ;;  %v1506_v20 = vshll.u32 %v10494_v48, 16  ;;  %v1533_v48 = vshll.u32 %v10507_v26, 16  ;;  %v10551_v26 = vsel %vm1413_vm1, %v1500_v29, %v1518_v0 }
  0x7f   : > { %1724 = vmatprep.mubr.bf16.mxu1 %v10513_v11  ;;  %8370 = vmatpush3.bf16.msra.mxu1 %v9738_v54  ;;  %v1532_v54 = vrot.slane %v1530_v61, 1  ;;  %v1524_v29 = vshll.u32 %v10545_v7, 16 }
  0x80   : > { %8371 = vmatprep.subr.bf16.mxu1 %v9739_v42  ;;  %v1535_v42 = vrot.slane %v1533_v48, 2 }
  0x81   : > { %8308 = vmatpush3.bf16.msra.mxu0 %v9727_v43  ;;  %v1314_v43 = vld [vmem:[%s10028_s22 + $0x78] sm:$0xff] }
  0x82   : > { %8309 = vmatprep.subr.bf16.mxu0 %v9733_v46  ;;  %v1491_v46 = vor.u32 %v1490_v10, %v1487_v52  ;;  %v9747_v52 = vld [vmem:[%s13403_s1 + $0x2f8] sm:$0xff]   ;;  %v1505_v10 = vrot.slane %v1503_v63, 1  ;;  %v7436_v49 = vcombine.high %v1314_v43, %v1315_v37  ;;  %v9744_v63 = vld [vmem:[%s13403_s1 + $0x308] sm:$0xff]  }
  0x83   : > { %8372 = vmatpush3.bf16.msra.mxu1 %v9740_v35  ;;  %v9757_v35 = vld [vmem:[%s13403_s1 + $0x3f8] sm:$0xff]  }
  0x84   : > { %1187 = vmatmul.mubr.bf16.gmra.mxu0 %v10140_v15  ;;  %v10548_v27 = vsel %vm1413_vm1, %v1473_v23, %v1491_v46  ;;  %8373 = vmatprep.subr.bf16.mxu1 %v9743_v6  ;;  %v1548_v48 = vshrl.u32 %v7436_v49, 16  ;;  %v1536_v6 = vor.u32 %v1535_v42, %v1532_v54 }
  0x85   : > { %1194 = vmatprep.mubr.bf16.mxu0 %v10145_v18  ;;  %8310 = vmatpush3.bf16.msra.mxu0 %v9735_v13  ;;  %v1508_v13 = vrot.slane %v1506_v20, 2  ;;  %v9746_v20 = vld [vmem:[%s13403_s1 + $0x300] sm:$0xff]  }
  0x86   : > { %8311 = vmatprep.subr.bf16.mxu0 %v9741_v33  ;;  %1725 = vmatmul.mubr.bf16.gmra.mxu1 %v10548_v27  ;;  %v1551_v33 = vshll.u32 %v7436_v49, 16  ;;  %v1550_v54 = vrot.slane %v1548_v48, 1  ;;  %v10604_v48 = vld [vmem:[%s10028_s22 + $0x4] ss:$8 sps:$4 sm:$0xff]  }
  0x87   : > { %1732 = vmatprep.mubr.bf16.mxu1 %v10551_v26  ;;  %v1509_v23 = vor.u32 %v1508_v13, %v1505_v10  ;;  %8374 = vmatpush3.bf16.msra.mxu1 %v9744_v63  ;;  %v7435_v10 = vcombine.low %v1314_v43, %v1315_v37  ;;  %v10575_v13 = vsel %vm1413_vm1, %v1518_v0, %v1536_v6 }
  0x88   : > { %8375 = vmatprep.subr.bf16.mxu1 %v9745_v56  ;;  %v1553_v49 = vrot.slane %v1551_v33, 2  ;;  %v9749_v33 = vld [vmem:[%s13403_s1 + $0x2f0] sm:$0xff]  }
  0x89   : > { %8312 = vmatpush3.bf16.msra.mxu0 %v9742_v31  ;;  %v10572_v61 = vsel %vm1413_vm1, %v1491_v46, %v1509_v23  ;;  %v1523_v31 = vrot.slane %v1521_v24, 1  ;;  %v1539_v46 = vshrl.u32 %v7435_v10, 16  ;;  %v1542_v63 = vshll.u32 %v7435_v10, 16  ;;  %v9758_v10 = vld [vmem:[%s13403_s1 + $0x3b8] sm:$0xff]  }
  0x8a   : > { %8425 = vmatprep.subr.bf16.mxu0 %v9747_v52  ;;  %v1526_v52 = vrot.slane %v1524_v29, 2  ;;  %v10581_v43 = vor.u32 %v1553_v49, %v1550_v54  ;;  %v9759_v54 = vld [vmem:[%s13403_s1 + $0x3f0] sm:$0xff]   ;;  %v9754_v49 = vld [vmem:[%s13403_s1 + $0x2a0] sm:$0xff]  }
  0x8b   : > { %8376 = vmatpush3.bf16.msra.mxu1 %v9746_v20  ;;  %v1541_v37 = vrot.slane %v1539_v46, 1  ;;  %v1544_v56 = vrot.slane %v1542_v63, 2  ;;  %v9750_v20 = vld [vmem:[%s13403_s1 + $0x2b0] sm:$0xff]   ;;  %v9763_v46 = vld [vmem:[%s13403_s1 + $0x3e8] sm:$0xff]  }
  0x8c   : > { %1195 = vmatmul.mubr.bf16.gmra.mxu0 %v10187_v40  ;;  %8489 = vmatprep.subr.bf16.mxu1 %v9757_v35  ;;  %v1527_v42 = vor.u32 %v1526_v52, %v1523_v31  ;;  %v10588_v24 = vsel %vm1413_vm1, %v1536_v6, %v10581_v43  ;;  %v9748_v6 = vld [vmem:[%s13403_s1 + $0x2b8] sm:$0xff]   ;;  %v10618_v35 = vld [vmem:[%s10028_s22] ss:$8 sps:$4 sm:$0xff]  }
  0x8d   : > { %1202 = vmatprep.mubr.bf16.mxu0 %v10194_v45  ;;  %v10593_v29 = vor.u32 %v1544_v56, %v1541_v37  ;;  %v9751_v31 = vld [vmem:[%s13403_s1 + $0x2e8] sm:$0xff]   ;;  %v9761_v37 = vld [vmem:[%s13403_s1 + $0x2d0] sm:$0xff]   ;;  %v9765_v56 = vld [vmem:[%s13403_s1 + $0x3e0] sm:$0xff]  }
  0x8e   : > { %1733 = vmatmul.mubr.bf16.gmra.mxu1 %v10572_v61  ;;  %v10584_v0 = vsel %vm1413_vm1, %v1509_v23, %v1527_v42  ;;  %v9752_v52 = vld [vmem:[%s13403_s1 + $0x2a8] sm:$0xff]  }
  0x8f   : > { %1740 = vmatprep.mubr.bf16.mxu1 %v10575_v13  ;;  %v10598_v23 = vsel %vm1413_vm1, %v1527_v42, %v10593_v29  ;;  %v9755_v42 = vld [vmem:[%s13403_s1 + $0x2d8] sm:$0xff]   ;;  %v9764_v63 = vld [vmem:[%s13403_s1 + $0x3a8] sm:$0xff]   ;;  %vm7076_vm1 = vsmask.f32 7950 }
  0x94   : > { %1203 = vmatmul.mubr.bf16.gmra.mxu0 %v10231_v2 }
  0x95   : > { %1210 = vmatprep.mubr.bf16.mxu0 %v10243_v14 }
  0x96   : > { %1741 = vmatmul.mubr.bf16.gmra.mxu1 %v10584_v0 }
  0x97   : > { %1748 = vmatprep.mubr.bf16.mxu1 %v10588_v24 }
  0x9c   : > { %1211 = vmatmul.mubr.bf16.gmra.mxu0 %v10283_v44 }
  0x9d   : > { %1218 = vmatprep.mubr.bf16.mxu0 %v10286_v50 }
  0x9e   : > { %1749 = vmatmul.mubr.bf16.gmra.mxu1 %v10598_v23 }
  0x9f   : > { %1756 = vmatprep.mubr.bf16.mxu1 %v10581_v43 }
  0xa4   : > { %1219 = vmatmul.mubr.bf16.gmra.mxu0 %v10318_v17 }
  0xa5   : > { %1893 = vmatprep.mubr.bf16.mxu0 %v10604_v48 }
  0xa6   : > { %1757 = vmatmul.mubr.bf16.gmra.mxu1 %v10593_v29 }
  0xa7   : > { %2260 = vmatprep.mubr.bf16.mxu1 %v10108_v1  ;;  %v9753_v1 = vld [vmem:[%s13403_s1 + $0x2e0] sm:$0xff]  }
  0xac   : > { %1894 = vmatmul.mubr.bf16.vlgmr.msra.gmra.mxu0 %v10618_v35 }
  0xad   : > { %8426 = vmatpush3.bf16.msra.mxu0 %v9748_v6  ;;  %1901 = vmatprep.mubr.bf16.mxu0 %v10060_v39  ;;  %v9762_v6 = vld [vmem:[%s13403_s1 + $0x290] sm:$0xff]  }
  0xae   : > { %8427 = vmatprep.subr.bf16.mxu0 %v9749_v33  ;;  %2261 = vmatmul.mubr.bf16.vlgmr.msra.gmra.mxu1 %v10119_v5  ;;  %v9760_v5 = vld [vmem:[%s13403_s1 + $0x3b0] sm:$0xff]   ;;  %v9766_v33 = vld [vmem:[%s13403_s1 + $0x3a0] sm:$0xff]  }
  0xaf   : > { %2268 = vmatprep.mubr.bf16.mxu1 %v10135_v12  ;;  %8490 = vmatpush3.bf16.msra.mxu1 %v9758_v10  ;;  %v9756_v12 = vld [vmem:[%s13403_s1 + $0x298] sm:$0xff]   ;;  %v9773_v10 = vld [vmem:[%s13403_s1 + $0x2c0] sm:$0xff]  }
  0xb0   : > { %8491 = vmatprep.subr.bf16.mxu1 %v9759_v54  ;;  %v9774_v54 = vld [vmem:[%s13403_s1 + $0x280] sm:$0xff]  }
  0xb1   : > { %8428 = vmatpush3.bf16.msra.mxu0 %v9750_v20  ;;  %v9769_v20 = vld [vmem:[%s13403_s1 + $0x3d8] sm:$0xff]  }
  0xb2   : > { %8429 = vmatprep.subr.bf16.mxu0 %v9751_v31  ;;  %v9768_v31 = vld [vmem:[%s13403_s1 + $0x288] sm:$0xff]  }
  0xb3   : > { %8492 = vmatpush3.bf16.msra.mxu1 %v9760_v5  ;;  %v9778_v5 = vld [vmem:[%s13403_s1 + $0x380] sm:$0xff]  }
  0xb4   : > { %1902 = vmatmul.mubr.bf16.gmra.mxu0 %v10067_v41  ;;  %8493 = vmatprep.subr.bf16.mxu1 %v9763_v46  ;;  %v13434_v46 = vmov 0.0  }
  0xb5   : > { %1909 = vmatprep.mubr.bf16.mxu0 %v10086_v53  ;;  %8430 = vmatpush3.bf16.msra.mxu0 %v9752_v52  ;;  %v9771_v52 = vld [vmem:[%s13403_s1 + $0x3d0] sm:$0xff]  }
  0xb6   : > { %8431 = vmatprep.subr.bf16.mxu0 %v9753_v1  ;;  %2269 = vmatmul.mubr.bf16.gmra.mxu1 %v10155_v22  ;;  %v9767_v22 = vld [vmem:[%s13403_s1 + $0x2c8] sm:$0xff]   ;;  %v9772_v1 = vld [vmem:[%s13403_s1 + $0x390] sm:$0xff]  }
  0xb7   : > { %2276 = vmatprep.mubr.bf16.mxu1 %v10169_v28  ;;  %8494 = vmatpush3.bf16.msra.mxu1 %v9764_v63  ;;  %v9770_v28 = vld [vmem:[%s13403_s1 + $0x398] sm:$0xff]   ;;  %v9785_v63 = vld [vmem:[%s13403_s1 + $0x460] sm:$0xff]  }
  0xb8   : > { %8495 = vmatprep.subr.bf16.mxu1 %v9765_v56 }
  0xb9   : > { %8432 = vmatpush3.bf16.msra.mxu0 %v9754_v49  ;;  %v9779_v49 = vld [vmem:[%s13403_s1 + $0x478] sm:$0xff]  }
  0xba   : > { %8433 = vmatprep.subr.bf16.mxu0 %v9755_v42  ;;  %v9776_v42 = vld [vmem:[%s13403_s1 + $0x388] sm:$0xff]  }
  0xbb   : > { %8496 = vmatpush3.bf16.msra.mxu1 %v9766_v33 }
  0xbc   : > { %1910 = vmatmul.mubr.bf16.gmra.mxu0 %v10093_v55  ;;  %8497 = vmatprep.subr.bf16.mxu1 %v9769_v20  ;;  %v9786_v20 = vld [vmem:[%s13403_s1 + $0x420] sm:$0xff]  }
  0xbd   : > { %1917 = vmatprep.mubr.bf16.mxu0 %v10112_v3  ;;  %8434 = vmatpush3.bf16.msra.mxu0 %v9756_v12 }
  0xbe   : > { %8435 = vmatprep.subr.bf16.mxu0 %v9761_v37  ;;  %2277 = vmatmul.mubr.bf16.gmra.mxu1 %v10204_v51  ;;  %v9775_v51 = vld [vmem:[%s13403_s1 + $0x3c8] sm:$0xff]  }
  0xbf   : > { %2284 = vmatprep.mubr.bf16.mxu1 %v10217_v58  ;;  %8498 = vmatpush3.bf16.msra.mxu1 %v9770_v28  ;;  %v9777_v58 = vld [vmem:[%s13403_s1 + $0x3c0] sm:$0xff]  }
  0xc0   : > { %8499 = vmatprep.subr.bf16.mxu1 %v9771_v52 }
  0xc1   : > { %8436 = vmatpush3.bf16.msra.mxu0 %v9762_v6 }
  0xc2   : > { %8437 = vmatprep.subr.bf16.mxu0 %v9767_v22 }
  0xc3   : > { %8500 = vmatpush3.bf16.msra.mxu1 %v9772_v1 }
  0xc4   : > { %1918 = vmatmul.mubr.bf16.gmra.mxu0 %v10140_v15  ;;  %8501 = vmatprep.subr.bf16.mxu1 %v9775_v51  ;;  %v9788_v51 = vld [vmem:[%s13403_s1 + $0x418] sm:$0xff]  }
  0xc5   : > { %1925 = vmatprep.mubr.bf16.mxu0 %v10145_v18  ;;  %8438 = vmatpush3.bf16.msra.mxu0 %v9768_v31 }
  0xc6   : > { %8439 = vmatprep.subr.bf16.mxu0 %v9773_v10  ;;  %2285 = vmatmul.mubr.bf16.gmra.mxu1 %v10254_v21  ;;  %v9780_v21 = vld [vmem:[%s13403_s1 + $0x438] sm:$0xff]  }
  0xc7   : > { %2292 = vmatprep.mubr.bf16.mxu1 %v10265_v30  ;;  %8502 = vmatpush3.bf16.msra.mxu1 %v9776_v42  ;;  %v9781_v30 = vld [vmem:[%s13403_s1 + $0x470] sm:$0xff]  }
  0xc8   : > { %8503 = vmatprep.subr.bf16.mxu1 %v9777_v58  ;;  %v9789_v58 = vld [vmem:[%s13403_s1 + $0x450] sm:$0xff]  }
  0xc9   : > { %8440 = vmatpush3.bf16.msra.mxu0 %v9774_v54 }
  0xca   : > { %8553 = vmatprep.subr.bf16.mxu0 %v9779_v49 }
  0xcb   : > { %8504 = vmatpush3.bf16.msra.mxu1 %v9778_v5 }
  0xcc   : > { %1926 = vmatmul.mubr.bf16.gmra.mxu0 %v10187_v40  ;;  %8842 = vmatprep.subr.bf16.mxu1 %v13434_v46 }
  0xcd   : > { %1933 = vmatprep.mubr.bf16.mxu0 %v10194_v45 }
  0xce   : > { %2293 = vmatmul.mubr.bf16.gmra.mxu1 %v10296_v60 }
  0xcf   : > { %2300 = vmatprep.mubr.bf16.mxu1 %v10303_v4  ;;  %v9782_v4 = vld [vmem:[%s13403_s1 + $0x430] sm:$0xff]  }
  0xd4   : > { %1934 = vmatmul.mubr.bf16.gmra.mxu0 %v10231_v2 }
  0xd5   : > { %1941 = vmatprep.mubr.bf16.mxu0 %v10243_v14 }
  0xd6   : > { %2301 = vmatmul.mubr.bf16.gmra.mxu1 %v10329_v34 }
  0xd7   : > { %2308 = vmatprep.mubr.bf16.mxu1 %v10334_v38  ;;  %v9783_v38 = vld [vmem:[%s13403_s1 + $0x468] sm:$0xff]  }
  0xdc   : > { %1942 = vmatmul.mubr.bf16.gmra.mxu0 %v10283_v44 }
  0xdd   : > { %1949 = vmatprep.mubr.bf16.mxu0 %v10286_v50 }
  0xde   : > { %2309 = vmatmul.mubr.bf16.gmra.mxu1 %v10356_v8 }
  0xdf   : > { %2316 = vmatprep.mubr.bf16.mxu1 %v10358_v9  ;;  %v10755_v9 = vld [vmem:[%s13406_s4] ss:$0 sm:$0xff] }
  0xe4   : > { %1950 = vmatmul.mubr.bf16.gmra.mxu0 %v10318_v17 }
  0xe5   : > { %2453 = vmatprep.mubr.bf16.mxu0 %v10604_v48  ;;  %v9784_v48 = vld [vmem:[%s13403_s1 + $0x428] sm:$0xff]  }
  0xe6   : > { %2317 = vmatmul.mubr.bf16.gmra.mxu1 %v10373_v59 }
  0xe7   : > { %2646 = vmatprep.mubr.bf16.mxu1 %v10387_v19 }
  0xec   : > { %v8057_v60 = vpop.f32.mrf.mxu0  ;;  %2454 = vmatmul.mubr.bf16.vlgmr.msra.gmra.mxu0 %v10618_v35 }
  0xed   : > { %8554 = vmatpush3.bf16.msra.mxu0 %v9780_v21  ;;  %2461 = vmatprep.mubr.bf16.mxu0 %v10060_v39  ;;  %v9791_v39 = vld [vmem:[%s13404_s2 + $0x18] sm:$0xff]  }
  0xee   : > { %v8058_v34 = vpop.f32.mrf.mxu0  ;;  %8555 = vmatprep.subr.bf16.mxu0 %v9781_v30  ;;  %v10767_v37 = vpop.f32.mrf.mxu1  ;;  %2647 = vmatmul.mubr.bf16.vlgmr.msra.gmra.mxu1 %v10412_v57  ;;  %v9798_v57 = vld [vmem:[%s13404_s2 + $0x10] sm:$0xff]  }
  0xef   : > { %v8059_v8 = vadd.f32 %v8058_v34, %v8057_v60  ;;  %2654 = vmatprep.mubr.bf16.mxu1 %v10424_v47  ;;  %8843 = vmatpush3.bf16.msra.mxu1 %v9791_v39 }
  0xf0   : > { %v8060_v59 = vpop.f32.mrf.mxu0  ;;  %v10774_v33 = vpop.f32.mrf.mxu1  ;;  %8844 = vmatprep.subr.bf16.mxu1 %v13434_v46 }
  0xf1   : > { %8556 = vmatpush3.bf16.msra.mxu0 %v9782_v4  ;;  %v546_v35 = vadd.f32 %v8059_v8, %v10755_v9 }
  0xf2   : > { %v8061_v19 = vpop.f32.mrf.mxu0  ;;  %8557 = vmatprep.subr.bf16.mxu0 %v9783_v38  ;;  %v10786_v47 = vpop.f32.mrf.mxu1 }
  0xf3   : > { %v8062_v12 = vadd.f32 %v8061_v19, %v8060_v59  ;;  %8845 = vmatpush3.bf16.msra.mxu1 %v9798_v57  ;;  %v9792_v19 = vld [vmem:[%s13403_s1 + $0x448] sm:$0xff]   ;;  %v9794_v57 = vld [vmem:[%s13403_s1 + $0x440] sm:$0xff]  }
  0xf4   : > { %v8063_v56 = vpop.f32.mrf.mxu0  ;;  %2462 = vmatmul.mubr.bf16.gmra.mxu0 %v10067_v41  ;;  %v608_v41 = vmax.f32 %v546_v35, 0.0  ;;  %v10790_v1 = vpop.f32.mrf.mxu1  ;;  %8874 = vmatprep.subr.bf16.mxu1 %v13434_v46 }
  0xf5   : > { %v549_v6 = vadd.f32 %v8062_v12, %v10755_v9  ;;  %2469 = vmatprep.mubr.bf16.mxu0 %v10086_v53  ;;  %8558 = vmatpush3.bf16.msra.mxu0 %v9784_v48  ;;  %v9787_v53 = vld [vmem:[%s13403_s1 + $0x458] sm:$0xff]  }
  0xf6   : > { %v8064_v22 = vpop.f32.mrf.mxu0  ;;  %8559 = vmatprep.subr.bf16.mxu0 %v9785_v63  ;;  %v10802_v21 = vpop.f32.mrf.mxu1  ;;  %2655 = vmatmul.mubr.bf16.gmra.mxu1 %v10457_v16 }
  0xf7   : > { %v609_v31 = vmax.f32 %v549_v6, 0.0  ;;  %v8065_v28 = vadd.f32 %v8064_v22, %v8063_v56  ;;  %2662 = vmatprep.mubr.bf16.mxu1 %v10467_v25  ;;  %v9793_v6 = vld [vmem:[%s13403_s1 + $0x408] sm:$0xff]  }
  0xf8   : > { %v8066_v52 = vpop.f32.mrf.mxu0  ;;  %v10812_v38 = vpop.f32.mrf.mxu1 }
  0xf9   : > { %v10788_v10 = vpack.c.bf16 %v609_v31, %v608_v41  ;;  %8560 = vmatpush3.bf16.msra.mxu0 %v9786_v20  ;;  %v554_v5 = vadd.f32 %v8065_v28, %v10755_v9 }
  0xfa   : > { %v8067_v54 = vpop.f32.mrf.mxu0  ;;  %8561 = vmatprep.subr.bf16.mxu0 %v9787_v53 }
  0xfb   : > { %13461 = vst [vmem:[#allocation11_spill] sm:$0xff] %v10788_v10  ;;  %v13428_v49 = vshrl.u32 %v10788_v10, 16  ;;  %v13432_v42 = vshll.u32 %v10788_v10, 16  ;;  %v8068_v30 = vadd.f32 %v8067_v54, %v8066_v52  ;;  %v610_v25 = vmax.f32 %v554_v5, 0.0 }
  0xfc   : > { %v8069_v60 = vpop.f32.mrf.mxu0  ;;  %2470 = vmatmul.mubr.bf16.gmra.mxu0 %v10093_v55  ;;  %v9790_v55 = vld [vmem:[%s13403_s1 + $0x410] sm:$0xff]  }
  0xfd   : > { %v4352_v4 = vrot.slane %v13428_v49, 5  ;;  %v4353_v34 = vrot.slane %v13432_v42, 6  ;;  %2477 = vmatprep.mubr.bf16.mxu0 %v10112_v3  ;;  %v557_v8 = vadd.f32 %v8068_v30, %v10755_v9  ;;  %8562 = vmatpush3.bf16.msra.mxu0 %v9788_v51  ;;  %v10821_v3 = vpop.f32.mrf.mxu1 }
  0xfe   : > { %v8070_v59 = vpop.f32.mrf.mxu0  ;;  %8563 = vmatprep.subr.bf16.mxu0 %v9789_v58  ;;  %2663 = vmatmul.mubr.bf16.gmra.mxu1 %v10503_v36  ;;  %v9795_v36 = vld [vmem:[%s13403_s1 + $0x400] sm:$0xff]  }
  0xff   : > { %v8071_v16 = vadd.f32 %v8070_v59, %v8069_v60  ;;  %v4354_v48 = vor.u32 %v4353_v34, %v4352_v4  ;;  %v611_v39 = vmax.f32 %v557_v8, 0.0  ;;  %v10825_v63 = vpop.f32.mrf.mxu1  ;;  %2670 = vmatprep.mubr.bf16.mxu1 %v10513_v11 }
 0x100   : > { %v8072_v35 = vpop.f32.mrf.mxu0 }
 0x101   : > { %v10823_v12 = vpack.c.bf16 %v611_v39, %v610_v25  ;;  %8564 = vmatpush3.bf16.msra.mxu0 %v9790_v55  ;;  %v562_v22 = vadd.f32 %v8071_v16, %v10755_v9  ;;  %v10835_v31 = vpop.f32.mrf.mxu1 }
 0x102   : > { %v8073_v56 = vpop.f32.mrf.mxu0  ;;  %8565 = vmatprep.subr.bf16.mxu0 %v9792_v19 }
 0x103   : > { %13462 = vst [vmem:[#allocation12_spill] sm:$0xff] %v10823_v12  ;;  %v8074_v20 = vadd.f32 %v8073_v56, %v8072_v35  ;;  %v13431_v41 = vshll.u32 %v10823_v12, 16  ;;  %v13425_v53 = vshrl.u32 %v10823_v12, 16  ;;  %v10845_v51 = vpop.f32.mrf.mxu1  ;;  %v612_v5 = vmax.f32 %v562_v22, 0.0 }
 0x104   : > { %v8075_v28 = vpop.f32.mrf.mxu0  ;;  %2478 = vmatmul.mubr.bf16.gmra.mxu0 %v10140_v15 }
 0x105   : > { %v565_v52 = vadd.f32 %v8074_v20, %v10755_v9  ;;  %2485 = vmatprep.mubr.bf16.mxu0 %v10145_v18  ;;  %v4356_v54 = vrot.slane %v13431_v41, 6  ;;  %8566 = vmatpush3.bf16.msra.mxu0 %v9793_v6  ;;  %v4355_v15 = vrot.slane %v13425_v53, 5  ;;  %v10852_v18 = vpop.f32.mrf.mxu1 }
 0x106   : > { %v8076_v58 = vpop.f32.mrf.mxu0  ;;  %8567 = vmatprep.subr.bf16.mxu0 %v9794_v57  ;;  %2671 = vmatmul.mubr.bf16.gmra.mxu1 %v10548_v27 }
 0x107   : > { %v613_v30 = vmax.f32 %v565_v52, 0.0  ;;  %v8077_v60 = vadd.f32 %v8076_v58, %v8075_v28  ;;  %v4357_v4 = vor.u32 %v4356_v54, %v4355_v15  ;;  %v10856_v8 = vpop.f32.mrf.mxu1  ;;  %2678 = vmatprep.mubr.bf16.mxu1 %v10551_v26 }
 0x108   : > { %v8078_v11 = vpop.f32.mrf.mxu0 }
 0x109   : > { %v10854_v34 = vpack.c.bf16 %v613_v30, %v612_v5  ;;  %8568 = vmatpush3.bf16.msra.mxu0 %v9795_v36  ;;  %v10859_v55 = vsel %vm4351_vm2, %v4354_v48, %v4357_v4  ;;  %v570_v16 = vadd.f32 %v8077_v60, %v10755_v9  ;;  %v10864_v39 = vpop.f32.mrf.mxu1 }
 0x10a   : > { %v8079_v59 = vpop.f32.mrf.mxu0  ;;  %13464 = vst [vmem:[#allocation14_spill] sm:$0xff] %v10859_v55  ;;  %8906 = vmatprep.subr.bf16.mxu0 %v13434_v46 }
 0x10b   : > { %13463 = vst [vmem:[#allocation13_spill] sm:$0xff] %v10854_v34  ;;  %v8080_v19 = vadd.f32 %v8079_v59, %v8078_v11  ;;  %v13427_v25 = vshll.u32 %v10854_v34, 16  ;;  %v13422_v56 = vshrl.u32 %v10854_v34, 16  ;;  %v10874_v22 = vpop.f32.mrf.mxu1  ;;  %v614_v57 = vmax.f32 %v570_v16, 0.0 }
 0x10c   : > { %v8081_v35 = vpop.f32.mrf.mxu0  ;;  %2486 = vmatmul.mubr.bf16.gmra.mxu0 %v10187_v40 }
 0x10d   : > { %v573_v6 = vadd.f32 %v8080_v19, %v10755_v9  ;;  %2493 = vmatprep.mubr.bf16.mxu0 %v10194_v45  ;;  %v4360_v48 = vrot.slane %v13427_v25, 6  ;;  %v4359_v27 = vrot.slane %v13422_v56, 5  ;;  %v10878_v52 = vpop.f32.mrf.mxu1 }
 0x10e   : > { %v8082_v20 = vpop.f32.mrf.mxu0  ;;  %2679 = vmatmul.mubr.bf16.gmra.mxu1 %v10572_v61 }
 0x10f   : > { %v615_v28 = vmax.f32 %v573_v6, 0.0  ;;  %v8083_v40 = vadd.f32 %v8082_v20, %v8081_v35  ;;  %v4361_v58 = vor.u32 %v4360_v48, %v4359_v27  ;;  %v10882_v26 = vpop.f32.mrf.mxu1  ;;  %2686 = vmatprep.mubr.bf16.mxu1 %v10575_v13  ;;  %v2097_v27 = vld [vmem:[%s10028_s22 + $0x8] sm:$0xcc] }
 0x110   : > { %v8084_v54 = vpop.f32.mrf.mxu0 }
 0x111   : > { %v10880_v36 = vpack.c.bf16 %v615_v28, %v614_v57  ;;  %v10885_v15 = vsel %vm4351_vm2, %v4357_v4, %v4361_v58  ;;  %v578_v5 = vadd.f32 %v8083_v40, %v10755_v9  ;;  %v10889_v11 = vpop.f32.mrf.mxu1 }
 0x112   : > { %v8085_v45 = vpop.f32.mrf.mxu0  ;;  %13466 = vst [vmem:[#allocation16_spill] sm:$0xff] %v10885_v15 }
 0x113   : > { %13465 = vst [vmem:[#allocation15_spill] sm:$0xff] %v10880_v36  ;;  %v8086_v30 = vadd.f32 %v8085_v45, %v8084_v54  ;;  %v13424_v60 = vshll.u32 %v10880_v36, 16  ;;  %v13423_v16 = vshrl.u32 %v10880_v36, 16  ;;  %v10899_v35 = vpop.f32.mrf.mxu1  ;;  %v616_v48 = vmax.f32 %v578_v5, 0.0  ;;  %v9869_v45 = vld [vmem:[%s10028_s22 + $0x10] sm:$0xff] }
 0x114   : > { %v8087_v59 = vpop.f32.mrf.mxu0  ;;  %2494 = vmatmul.mubr.bf16.gmra.mxu0 %v10231_v2 }
 0x115   : > { %v581_v19 = vadd.f32 %v8086_v30, %v10755_v9  ;;  %2501 = vmatprep.mubr.bf16.mxu0 %v10243_v14  ;;  %v4364_v4 = vrot.slane %v13424_v60, 6  ;;  %v4363_v61 = vrot.slane %v13423_v16, 5  ;;  %v10904_v57 = vpop.f32.mrf.mxu1  ;;  %v7646_v30 = vcombine.high %v2097_v27, %v9869_v45 }
 0x116   : > { %v8088_v6 = vpop.f32.mrf.mxu0  ;;  %2687 = vmatmul.mubr.bf16.gmra.mxu1 %v10584_v0  ;;  %v2742_v0 = vrot.slane %v10326_v32, 2 }
 0x117   : > { %v617_v2 = vmax.f32 %v581_v19, 0.0  ;;  %v8089_v20 = vadd.f32 %v8088_v6, %v8087_v59  ;;  %v4365_v13 = vor.u32 %v4364_v4, %v4363_v61  ;;  %v10908_v14 = vpop.f32.mrf.mxu1  ;;  %2694 = vmatprep.mubr.bf16.mxu1 %v10588_v24 }
 0x118   : > { %v8090_v28 = vpop.f32.mrf.mxu0 }
 0x119   : > { %v10906_v40 = vpack.c.bf16 %v617_v2, %v616_v48  ;;  %v10912_v56 = vsel %vm4351_vm2, %v4361_v58, %v4365_v13  ;;  %v586_v16 = vadd.f32 %v8089_v20, %v10755_v9  ;;  %v10916_v19 = vpop.f32.mrf.mxu1  ;;  %v2741_v20 = vrot.slane %v7646_v30, 2 }
 0x11a   : > { %v8091_v54 = vpop.f32.mrf.mxu0  ;;  %13468 = vst [vmem:[#allocation18_spill] sm:$0xff] %v10912_v56 }
 0x11b   : > { %13467 = vst [vmem:[#allocation17_spill] sm:$0xff] %v10906_v40  ;;  %v8092_v5 = vadd.f32 %v8091_v54, %v8090_v28  ;;  %v13426_v59 = vshll.u32 %v10906_v40, 16  ;;  %v13429_v6 = vshrl.u32 %v10906_v40, 16  ;;  %v10926_v48 = vpop.f32.mrf.mxu1  ;;  %v618_v28 = vmax.f32 %v586_v16, 0.0 }
 0x11c   : > { %v8093_v4 = vpop.f32.mrf.mxu0  ;;  %2502 = vmatmul.mubr.bf16.gmra.mxu0 %v10283_v44  ;;  %v2743_v30 = vsel %vm2737_vm3, %v2741_v20, %v2742_v0 }
 0x11d   : > { %v589_v61 = vadd.f32 %v8092_v5, %v10755_v9  ;;  %2509 = vmatprep.mubr.bf16.mxu0 %v10286_v50  ;;  %v4368_v58 = vrot.slane %v13426_v59, 6  ;;  %v4367_v44 = vrot.slane %v13429_v6, 5  ;;  %v10931_v5 = vpop.f32.mrf.mxu1  ;;  %v7645_v59 = vcombine.low %v2097_v27, %v9869_v45 }
 0x11e   : > { %v8094_v2 = vpop.f32.mrf.mxu0  ;;  %2695 = vmatmul.mubr.bf16.gmra.mxu1 %v10598_v23  ;;  %v13471_v23 = vld [vmem:[#allocation2_spill] sm:$0xff] }
 0x11f   : > { %v619_v54 = vmax.f32 %v589_v61, 0.0  ;;  %v8095_v60 = vadd.f32 %v8094_v2, %v8093_v4  ;;  %v4369_v50 = vor.u32 %v4368_v58, %v4367_v44  ;;  %v10935_v25 = vpop.f32.mrf.mxu1  ;;  %2702 = vmatprep.mubr.bf16.mxu1 %v10581_v43 }
 0x120   : > { %v8096_v24 = vpop.f32.mrf.mxu0 }
 0x121   : > { %v10933_v53 = vpack.c.bf16 %v619_v54, %v618_v28  ;;  %v10939_v32 = vsel %vm4351_vm2, %v4365_v13, %v4369_v50  ;;  %v594_v16 = vadd.f32 %v8095_v60, %v10755_v9  ;;  %v10943_v2 = vpop.f32.mrf.mxu1  ;;  %v2738_v13 = vrot.slane %v7645_v59, 2 }
 0x122   : > { %v8097_v49 = vpop.f32.mrf.mxu0  ;;  %13470 = vst [vmem:[#allocation20_spill] sm:$0xff] %v10939_v32  ;;  %v2739_v60 = vrot.slane %v10346_v62, 2  ;;  %v2746_v28 = vrot.slane %v13471_v23, 2  ;;  %v9802_v23 = vld [vmem:[%s13404_s2 + $0x28] sm:$0xff]  }
 0x123   : > { %13469 = vst [vmem:[#allocation19_spill] sm:$0xff] %v10933_v53  ;;  %v8098_v61 = vadd.f32 %v8097_v49, %v8096_v24  ;;  %v13430_v4 = vshll.u32 %v10933_v53, 16  ;;  %v13433_v27 = vshrl.u32 %v10933_v53, 16  ;;  %v10953_v20 = vpop.f32.mrf.mxu1  ;;  %v620_v54 = vmax.f32 %v594_v16, 0.0 }
 0x124   : > { %v8099_v58 = vpop.f32.mrf.mxu0  ;;  %2510 = vmatmul.mubr.bf16.gmra.mxu0 %v10318_v17  ;;  %v2740_v62 = vsel %vm2737_vm3, %v2738_v13, %v2739_v60  ;;  %v2747_v42 = vsel %vm2737_vm3, %v2742_v0, %v2746_v28 }
 0x125   : > { %v597_v45 = vadd.f32 %v8098_v61, %v10755_v9  ;;  %2912 = vmatprep.mubr.bf16.mxu0 %v2743_v30  ;;  %v4372_v49 = vrot.slane %v13430_v4, 6  ;;  %v4371_v17 = vrot.slane %v13433_v27, 5  ;;  %v10958_v6 = vpop.f32.mrf.mxu1 }
 0x126   : > { %v8100_v44 = vpop.f32.mrf.mxu0  ;;  %2703 = vmatmul.mubr.bf16.gmra.mxu1 %v10593_v29 }
 0x127   : > { %v621_v24 = vmax.f32 %v597_v45, 0.0  ;;  %v8101_v61 = vadd.f32 %v8100_v44, %v8099_v58  ;;  %v4373_v59 = vor.u32 %v4372_v49, %v4371_v17  ;;  %v10963_v4 = vpop.f32.mrf.mxu1  ;;  %8846 = vmatprep.mubr.msk.bf16.mxu1 %vm9882_vm4, %v13434_v46 }
 0x128   : > { %v8102_v43 = vpop.f32.mrf.mxu0 }
 0x129   : > { %v10960_v30 = vpack.c.bf16 %v621_v24, %v620_v54  ;;  %v10970_v16 = vsel %vm4351_vm2, %v4369_v50, %v4373_v59  ;;  %v602_v58 = vadd.f32 %v8101_v61, %v10755_v9  ;;  %v8163_v44 = vpop.f32.mrf.mxu1  ;;  %v13474_v54 = vld [vmem:[#allocation3_spill] sm:$0xff] }
 0x12a   : > { %v8103_v41 = vpop.f32.mrf.mxu0  ;;  %13473 = vst [vmem:[#allocation21_spill] sm:$0xff] %v10970_v16  ;;  %v2744_v24 = vrot.slane %v13474_v54, 2  ;;  %v13476_v16 = vmov 0.0  }
 0x12b   : > { %13472 = vst [vmem:[#allocation2_spill] sm:$0xff] %v10960_v30  ;;  %v8104_v45 = vadd.f32 %v8103_v41, %v8102_v43  ;;  %v13436_v49 = vshll.u32 %v10960_v30, 16  ;;  %v13439_v17 = vshrl.u32 %v10960_v30, 16  ;;  %v8164_v50 = vpop.f32.mrf.mxu1  ;;  %v13475_v43 = vld [vmem:[#allocation4_spill] sm:$0xff] }
 0x12c   : > { %v8185_v13 = vpop.f32.mrf.mxu0  ;;  %2913 = vmatmul.mubr.bf16.vlgmr.msra.gmra.mxu0 %v2740_v62  ;;  %v2750_v29 = vrot.slane %v13475_v43, 2  ;;  %v9803_v62 = vld [vmem:[%s13404_s2 + $0x20] sm:$0xff]   ;;  %v10988_v54 = vadd.f32 %v8164_v50, %v8163_v44  ;;  %v2745_v15 = vsel %vm2737_vm3, %v2739_v60, %v2744_v24 }
 0x12d   : > { %v605_v0 = vadd.f32 %v8104_v45, %v10755_v9  ;;  %2920 = vmatprep.mubr.bf16.mxu0 %v2747_v42  ;;  %v4376_v41 = vrot.slane %v13436_v49, 6  ;;  %8907 = vmatpush3.bf16.msra.mxu0 %v9802_v23  ;;  %v4375_v42 = vrot.slane %v13439_v17, 5  ;;  %v622_v45 = vmax.f32 %v602_v58, 0.0  ;;  %v8166_v32 = vpop.f32.mrf.mxu1 }
 0x12e   : > { %v8186_v61 = vpop.f32.mrf.mxu0  ;;  %8908 = vmatprep.subr.bf16.mxu0 %v13476_v16  ;;  %v8123_v49 = vadd.f32 %v10774_v33, %v10767_v37  ;;  %v2751_v58 = vsel %vm2737_vm3, %v2746_v28, %v2750_v29 }
 0x12f   : > { %v623_v27 = vmax.f32 %v605_v0, 0.0  ;;  %v8187_v46 = vadd.f32 %v8186_v61, %v8185_v13  ;;  %v4377_v23 = vor.u32 %v4376_v41, %v4375_v42  ;;  %v8167_v55 = vpop.f32.mrf.mxu1 }
 0x130   : > { %v8188_v43 = vpop.f32.mrf.mxu0  ;;  %v11002_v33 = vadd.f32 %v8167_v55, %v8166_v32  ;;  %v13480_v32 = vld [vmem:[#allocation6_spill] sm:$0xff] }
 0x131   : > { %v10993_v56 = vpack.c.bf16 %v623_v27, %v622_v45  ;;  %v1165_v30 = vadd.f32 %v8187_v46, %v8123_v49  ;;  %8909 = vmatpush3.bf16.msra.mxu0 %v9803_v62  ;;  %v10998_v44 = vsel %vm4351_vm2, %v4373_v59, %v4377_v23  ;;  %v8126_v27 = vadd.f32 %v10790_v1, %v10786_v47  ;;  %v8249_v60 = vpop.f32.mrf.mxu1  ;;  %v13479_v59 = vld [vmem:[#allocation5_spill] sm:$0xff] }
 0x132   : > { %v8189_v17 = vpop.f32.mrf.mxu0  ;;  %13478 = vst [vmem:[#allocation4_spill] sm:$0xff] %v10998_v44  ;;  %8970 = vmatprep.subr.bf16.mxu0 %v13476_v16  ;;  %v2748_v41 = vrot.slane %v13479_v59, 2  ;;  %v2754_v42 = vrot.slane %v13480_v32, 2  ;;  %v8129_v45 = vadd.f32 %v10812_v38, %v10802_v21  ;;  %v8132_v38 = vadd.f32 %v10825_v63, %v10821_v3  ;;  %v9814_v44 = vld [vmem:[%s13404_s2 + $0x88] sm:$0xff]  }
 0x133   : > { %13477 = vst [vmem:[#allocation3_spill] sm:$0xff] %v10993_v56  ;;  %v4380_v13 = vshrl.u32 %v10993_v56, 16  ;;  %v4383_v37 = vshll.u32 %v10993_v56, 16  ;;  %v8190_v46 = vadd.f32 %v8189_v17, %v8188_v43  ;;  %v1227_v50 = vadd.f32 %v10755_v9, %v1165_v30  ;;  %v8250_v61 = vpop.f32.mrf.mxu1 }
 0x134   : > { %v8191_v49 = vpop.f32.mrf.mxu0  ;;  %2921 = vmatmul.mubr.bf16.gmra.mxu0 %v2745_v15  ;;  %v11012_v47 = vadd.f32 %v8250_v61, %v8249_v60  ;;  %v2755_v21 = vsel %vm2737_vm3, %v2750_v29, %v2754_v42  ;;  %v13482_v29 = vld [vmem:[#allocation7_spill] sm:$0xff]  ;;  %v8135_v3 = vadd.f32 %v10845_v51, %v10835_v31  ;;  %v9804_v31 = vld [vmem:[%s13404_s2] sm:$0xff]  }
 0x135   : > { %v4382_v28 = vrot.slane %v4380_v13, 5  ;;  %v4385_v0 = vrot.slane %v4383_v37, 6  ;;  %2928 = vmatprep.mubr.bf16.mxu0 %v2751_v58  ;;  %v1168_v62 = vadd.f32 %v8190_v46, %v8126_v27  ;;  %v8252_v43 = vpop.f32.mrf.mxu1  ;;  %v2749_v37 = vsel %vm2737_vm3, %v2744_v24, %v2748_v41  ;;  %v9799_v24 = vld [vmem:[%s13404_s2 + $0x8] sm:$0xff]  }
 0x136   : > { %v8192_v55 = vpop.f32.mrf.mxu0  ;;  %v1243_v27 = vmax.f32 %v1227_v50, 0.0 }
 0x137   : > { %v8193_v1 = vadd.f32 %v8192_v55, %v8191_v49  ;;  %v4386_v17 = vor.u32 %v4385_v0, %v4382_v28  ;;  %v1228_v15 = vadd.f32 %v10755_v9, %v1168_v62  ;;  %v8253_v59 = vpop.f32.mrf.mxu1  ;;  %v2752_v62 = vrot.slane %v13482_v29, 2 }
 0x138   : > { %v8194_v58 = vpop.f32.mrf.mxu0  ;;  %v11022_v60 = vadd.f32 %v8253_v59, %v8252_v43 }
 0x139   : > { %v1173_v13 = vadd.f32 %v8193_v1, %v8129_v45  ;;  %v11017_v30 = vsel %vm4351_vm2, %v4377_v23, %v4386_v17  ;;  %v1244_v46 = vmax.f32 %v1228_v15, 0.0  ;;  %v8255_v23 = vpop.f32.mrf.mxu1  ;;  %v13483_v17 = vld [vmem:[#allocation8_spill] sm:$0xff] }
 0x13a   : > { %13481 = vst [vmem:[#allocation5_spill] sm:$0xff] %v11017_v30  ;;  %v8195_v32 = vpop.f32.mrf.mxu0  ;;  %v13440_v15 = vrot.slane %v13483_v17, 2 }
 0x13b   : > { %v8196_v49 = vadd.f32 %v8195_v32, %v8194_v58  ;;  %v11027_v28 = vpack.c.bf16 %v1244_v46, %v1243_v27  ;;  %v1229_v50 = vadd.f32 %v10755_v9, %v1173_v13  ;;  %v8256_v45 = vpop.f32.mrf.mxu1  ;;  %v13484_v27 = vld [vmem:[#allocation9_spill] sm:$0xff] }
 0x13c   : > { %v8197_v0 = vpop.f32.mrf.mxu0  ;;  %2929 = vmatmul.mubr.bf16.gmra.mxu0 %v2749_v37  ;;  %v11038_v43 = vadd.f32 %v8256_v45, %v8255_v23  ;;  %v2753_v23 = vsel %vm2737_vm3, %v2748_v41, %v2752_v62 }
 0x13d   : > { %v1176_v61 = vadd.f32 %v8196_v49, %v8132_v38  ;;  %2936 = vmatprep.mubr.bf16.mxu0 %v2755_v21  ;;  %v3537_v63 = vshrl.u32 %v11027_v28, 16  ;;  %v3539_v55 = vshll.u32 %v11027_v28, 16  ;;  %8847 = vmatmul.mubr.msk.bf16.vlgmr.msra.gmra.mxu1 %vm3124_vm5, %v11027_v28  ;;  %v8258_v51 = vpop.f32.mrf.mxu1  ;;  %v1245_v21 = vmax.f32 %v1229_v50, 0.0 }
 0x13e   : > { %v8198_v1 = vpop.f32.mrf.mxu0  ;;  %8850 = vmatprep.mubr.msk.bf16.mxu1 %vm9882_vm4, %v13476_v16  ;;  %8875 = vmatpush3.bf16.msra.mxu1 %v9799_v24 }
 0x13f   : > { %v1230_v58 = vadd.f32 %v10755_v9, %v1176_v61  ;;  %v8199_v13 = vadd.f32 %v8198_v1, %v8197_v0  ;;  %8876 = vmatprep.subr.bf16.mxu1 %v13476_v16  ;;  %v11048_v59 = vrot.slane %v3537_v63, 5  ;;  %v11050_v32 = vrot.slane %v3539_v55, 6  ;;  %v8259_v24 = vpop.f32.mrf.mxu1 }
 0x140   : > { %v8200_v37 = vpop.f32.mrf.mxu0  ;;  %v2759_v61 = vsel %vm2737_vm3, %v2754_v42, %v13440_v15  ;;  %v3541_v29 = vrot.slane %v3539_v55, 1  ;;  %v8138_v1 = vadd.f32 %v10856_v8, %v10852_v18  ;;  %v11062_v50 = vadd.f32 %v8259_v24, %v8258_v51  ;;  %v13486_v55 = vld [vmem:[#allocation10_spill] sm:$0xff] }
 0x141   : > { %v1246_v38 = vmax.f32 %v1230_v58, 0.0  ;;  %v1181_v49 = vadd.f32 %v8199_v13, %v8135_v3  ;;  %v4524_v45 = vor.u32 %v11050_v32, %v11048_v59  ;;  %v8261_v41 = vpop.f32.mrf.mxu1  ;;  %v13485_v13 = vrot.slane %v13484_v27, 2 }
 0x142   : > { %v8201_v0 = vpop.f32.mrf.mxu0  ;;  %8877 = vmatpush3.bf16.msra.mxu1 %v9804_v31  ;;  %v13442_v15 = vrot.slane %v13486_v55, 2  ;;  %v3542_v32 = vor.u32 %v3541_v29, %v3537_v63  ;;  %v9870_v63 = vld [vmem:[%s10028_s22 + $0x78] sm:$0xff] }
 0x143   : > { %v11060_v46 = vpack.c.bf16 %v1246_v38, %v1245_v21  ;;  %v8202_v3 = vadd.f32 %v8201_v0, %v8200_v37  ;;  %v2757_v42 = vsel %vm2737_vm3, %v2752_v62, %v13485_v13  ;;  %8938 = vmatprep.subr.bf16.mxu1 %v13476_v16  ;;  %v1231_v8 = vadd.f32 %v10755_v9, %v1181_v49  ;;  %v8262_v59 = vpop.f32.mrf.mxu1 }
 0x144   : > { %v8203_v58 = vpop.f32.mrf.mxu0  ;;  %2937 = vmatmul.mubr.bf16.gmra.mxu0 %v2753_v23  ;;  %v8141_v37 = vadd.f32 %v10874_v22, %v10864_v39  ;;  %v4858_v21 = vrot.slane %v11027_v28, 6  ;;  %v11078_v23 = vadd.f32 %v8262_v59, %v8261_v41  ;;  %v11084_v39 = vld [vmem:[%s10028_s22 + $0x80] sm:$0x77]  ;;  %v13488_v59 = vrot.slane %v13483_v17, 2 }
 0x145   : > { %v3543_v18 = vshll.u32 %v11060_v46, 16  ;;  %v1184_v51 = vadd.f32 %v8202_v3, %v8138_v1  ;;  %2944 = vmatprep.mubr.bf16.mxu0 %v2759_v61  ;;  %v3547_v31 = vshrl.u32 %v11060_v46, 16  ;;  %8851 = vmatmul.mubr.msk.bf16.gmra.mxu1 %vm3124_vm5, %v11060_v46  ;;  %v4859_v38 = vrot.slane %v11060_v46, 6  ;;  %v8264_v0 = vpop.f32.mrf.mxu1 }
 0x146   : > { %v8204_v62 = vpop.f32.mrf.mxu0  ;;  %8854 = vmatprep.mubr.msk.bf16.mxu1 %vm9882_vm4, %v13476_v16  ;;  %v1247_v1 = vmax.f32 %v1231_v8, 0.0  ;;  %v8144_v8 = vadd.f32 %v10882_v26, %v10878_v52  ;;  %v13490_v17 = vrot.slane %v13484_v27, 2 }
 0x147   : > { %v1232_v49 = vadd.f32 %v10755_v9, %v1184_v51  ;;  %v8205_v24 = vadd.f32 %v8204_v62, %v8203_v58  ;;  %v3545_v22 = vrot.slane %v3543_v18, 1  ;;  %v4525_v29 = vrot.slane %v3547_v31, 5  ;;  %v8265_v13 = vpop.f32.mrf.mxu1 }
 0x148   : > { %v8206_v61 = vpop.f32.mrf.mxu0  ;;  %v4526_v28 = vrot.slane %v3543_v18, 6  ;;  %v11088_v46 = vsel %vm4700_vm6, %v4858_v21, %v4859_v38  ;;  %v2763_v62 = vsel %vm2737_vm3, %v13488_v59, %v13442_v15  ;;  %v7648_v18 = vcombine.high %v9870_v63, %v11084_v39 }
 0x149   : > { %13487 = vst [vmem:[#allocation6_spill] sm:$0xff] %v11088_v46  ;;  %v1248_v3 = vmax.f32 %v1232_v49, 0.0  ;;  %v1189_v41 = vadd.f32 %v8205_v24, %v8141_v37  ;;  %v11091_v58 = vsel %vm698_vm0, %v3542_v32, %v3545_v22  ;;  %v11104_v37 = vadd.f32 %v8265_v13, %v8264_v0  ;;  %v8267_v49 = vpop.f32.mrf.mxu1 }
 0x14a   : > { %v8207_v51 = vpop.f32.mrf.mxu0  ;;  %v4527_v56 = vor.u32 %v4526_v28, %v4525_v29  ;;  %v13489_v46 = vrot.slane %v10545_v7, 2  ;;  %v11121_v28 = vrot.slane %v7648_v18, 2 }
 0x14b   : > { %v11102_v21 = vpack.c.bf16 %v1248_v3, %v1247_v1  ;;  %v8208_v32 = vadd.f32 %v8207_v51, %v8206_v61  ;;  %v1233_v29 = vadd.f32 %v10755_v9, %v1189_v41  ;;  %v8268_v61 = vpop.f32.mrf.mxu1  ;;  %v7647_v51 = vcombine.low %v9870_v63, %v11084_v39 }
 0x14c   : > { %v8209_v24 = vpop.f32.mrf.mxu0  ;;  %2945 = vmatmul.mubr.bf16.gmra.mxu0 %v2757_v42  ;;  %v2761_v59 = vsel %vm2737_vm3, %v13490_v17, %v13489_v46  ;;  %v11112_v15 = vsel %vm4351_vm2, %v4524_v45, %v4527_v56  ;;  %v8147_v42 = vadd.f32 %v10899_v35, %v10889_v11  ;;  %v3549_v45 = vor.u32 %v3547_v31, %v3545_v22 }
 0x14d   : > { %13491 = vst [vmem:[#allocation7_spill] sm:$0xff] %v11112_v15  ;;  %v1192_v52 = vadd.f32 %v8208_v32, %v8144_v8  ;;  %2952 = vmatprep.mubr.bf16.mxu0 %v2763_v62  ;;  %v3550_v26 = vshll.u32 %v11102_v21, 16  ;;  %v3554_v0 = vshrl.u32 %v11102_v21, 16  ;;  %8855 = vmatmul.mubr.msk.bf16.gmra.mxu1 %vm3124_vm5, %v11102_v21  ;;  %v4861_v46 = vrot.slane %v11102_v21, 6  ;;  %v8270_v11 = vpop.f32.mrf.mxu1 }
 0x14e   : > { %v8210_v27 = vpop.f32.mrf.mxu0  ;;  %v11124_v1 = vadd.f32 %v8268_v61, %v8267_v49  ;;  %8858 = vmatprep.mubr.msk.bf16.mxu1 %vm9882_vm4, %v13476_v16  ;;  %v1249_v31 = vmax.f32 %v1233_v29, 0.0  ;;  %v13493_v17 = vrot.slane %v13486_v55, 2  ;;  %v8150_v39 = vadd.f32 %v10908_v14, %v10904_v57 }
 0x14f   : > { %v1234_v3 = vadd.f32 %v10755_v9, %v1192_v52  ;;  %v8211_v41 = vadd.f32 %v8210_v27, %v8209_v24  ;;  %v3552_v13 = vrot.slane %v3550_v26, 1  ;;  %v4529_v62 = vrot.slane %v3554_v0, 5  ;;  %v8271_v49 = vpop.f32.mrf.mxu1 }
 0x150   : > { %v8212_v35 = vpop.f32.mrf.mxu0  ;;  %v4530_v8 = vrot.slane %v3550_v26, 6  ;;  %v11131_v18 = vsel %vm4700_vm6, %v4859_v38, %v4861_v46  ;;  %v2767_v52 = vsel %vm2737_vm3, %v13493_v17, %v11121_v28  ;;  %v11144_v38 = vadd.f32 %v8271_v49, %v8270_v11 }
 0x151   : > { %13492 = vst [vmem:[#allocation8_spill] sm:$0xff] %v11131_v18  ;;  %v1250_v22 = vmax.f32 %v1234_v3, 0.0  ;;  %v1197_v21 = vadd.f32 %v8211_v41, %v8147_v42  ;;  %v11134_v32 = vsel %vm698_vm0, %v3549_v45, %v3552_v13  ;;  %v8273_v26 = vpop.f32.mrf.mxu1  ;;  %v11146_v27 = vrot.slane %v7647_v51, 2 }
 0x152   : > { %v8213_v24 = vpop.f32.mrf.mxu0  ;;  %v4531_v61 = vor.u32 %v4530_v8, %v4529_v62  ;;  %v8153_v14 = vadd.f32 %v10926_v48, %v10916_v19  ;;  %v13495_v19 = vrot.slane %v10545_v7, 2 }
 0x153   : > { %v11142_v63 = vpack.c.bf16 %v1250_v22, %v1249_v31  ;;  %v8214_v29 = vadd.f32 %v8213_v24, %v8212_v35  ;;  %v1235_v55 = vadd.f32 %v10755_v9, %v1197_v21  ;;  %v8274_v11 = vpop.f32.mrf.mxu1  ;;  %v3556_v35 = vor.u32 %v3554_v0, %v3552_v13 }
 0x154   : > { %v8215_v42 = vpop.f32.mrf.mxu0  ;;  %2953 = vmatmul.mubr.bf16.gmra.mxu0 %v2761_v59  ;;  %v11149_v45 = vsel %vm4351_vm2, %v4527_v56, %v4531_v61  ;;  %v11159_v51 = vadd.f32 %v8274_v11, %v8273_v26  ;;  %v2765_v48 = vsel %vm2737_vm3, %v13495_v19, %v11146_v27  ;;  %vm7067_vm3 = vcmask 1045508  }
 0x155   : > { %13494 = vst [vmem:[#allocation9_spill] sm:$0xff] %v11149_v45  ;;  %v1200_v3 = vadd.f32 %v8214_v29, %v8150_v39  ;;  %2960 = vmatprep.mubr.bf16.mxu0 %v2767_v52  ;;  %v3557_v41 = vshll.u32 %v11142_v63, 16  ;;  %v3561_v57 = vshrl.u32 %v11142_v63, 16  ;;  %8859 = vmatmul.mubr.msk.bf16.gmra.mxu1 %vm3124_vm5, %v11142_v63  ;;  %v4863_v56 = vrot.slane %v11142_v63, 6  ;;  %v8276_v22 = vpop.f32.mrf.mxu1 }
 0x156   : > { %v8216_v59 = vpop.f32.mrf.mxu0  ;;  %8862 = vmatprep.mubr.msk.bf16.mxu1 %vm9882_vm4, %v13476_v16  ;;  %v1251_v24 = vmax.f32 %v1235_v55, 0.0 }
 0x157   : > { %v1236_v62 = vadd.f32 %v10755_v9, %v1200_v3  ;;  %v8217_v8 = vadd.f32 %v8216_v59, %v8215_v42  ;;  %v3559_v31 = vrot.slane %v3557_v41, 1  ;;  %v4533_v49 = vrot.slane %v3561_v57, 5  ;;  %v8277_v63 = vpop.f32.mrf.mxu1 }
 0x158   : > { %v8218_v21 = vpop.f32.mrf.mxu0  ;;  %v4534_v0 = vrot.slane %v3557_v41, 6  ;;  %v11169_v13 = vsel %vm4700_vm6, %v4861_v46, %v4863_v56  ;;  %v8156_v42 = vadd.f32 %v10935_v25, %v10931_v5  ;;  %v11178_v3 = vadd.f32 %v8277_v63, %v8276_v22 }
 0x159   : > { %13496 = vst [vmem:[#allocation10_spill] sm:$0xff] %v11169_v13  ;;  %v1252_v17 = vmax.f32 %v1236_v62, 0.0  ;;  %v1205_v52 = vadd.f32 %v8217_v8, %v8153_v14  ;;  %v11172_v39 = vsel %vm698_vm0, %v3556_v35, %v3559_v31  ;;  %v8279_v11 = vpop.f32.mrf.mxu1  ;;  %v8159_v5 = vadd.f32 %v10953_v20, %v10943_v2 }
 0x15a   : > { %v8219_v29 = vpop.f32.mrf.mxu0  ;;  %v4535_v26 = vor.u32 %v4534_v0, %v4533_v49  ;;  %v3563_v22 = vor.u32 %v3561_v57, %v3559_v31 }
 0x15b   : > { %v11176_v7 = vpack.c.bf16 %v1252_v17, %v1251_v24  ;;  %v8220_v41 = vadd.f32 %v8219_v29, %v8218_v21  ;;  %v1237_v14 = vadd.f32 %v10755_v9, %v1205_v52  ;;  %v8280_v62 = vpop.f32.mrf.mxu1 }
 0x15c   : > { %v8221_v46 = vpop.f32.mrf.mxu0  ;;  %2961 = vmatmul.mubr.bf16.gmra.mxu0 %v2765_v48  ;;  %v11181_v55 = vsel %vm4351_vm2, %v4531_v61, %v4535_v26  ;;  %v11192_v21 = vadd.f32 %v8280_v62, %v8279_v11 }
 0x15d   : > { %13497 = vst [vmem:[#allocation22_spill] sm:$0xff] %v11181_v55  ;;  %v1208_v59 = vadd.f32 %v8220_v41, %v8156_v42  ;;  %2968 = vmatprep.mubr.bf16.mxu0 %v11121_v28  ;;  %v3564_v35 = vshll.u32 %v11176_v7, 16  ;;  %v3568_v25 = vshrl.u32 %v11176_v7, 16  ;;  %8863 = vmatmul.mubr.msk.bf16.gmra.mxu1 %vm3124_vm5, %v11176_v7  ;;  %v4865_v61 = vrot.slane %v11176_v7, 6  ;;  %v8282_v49 = vpop.f32.mrf.mxu1 }
 0x15e   : > { %v8222_v8 = vpop.f32.mrf.mxu0  ;;  %8866 = vmatprep.mubr.msk.bf16.mxu1 %vm9882_vm4, %v13476_v16  ;;  %v1253_v17 = vmax.f32 %v1237_v14, 0.0  ;;  %v8162_v7 = vadd.f32 %v10963_v4, %v10958_v6 }
 0x15f   : > { %v1238_v19 = vadd.f32 %v10755_v9, %v1208_v59  ;;  %v8223_v28 = vadd.f32 %v8222_v8, %v8221_v46  ;;  %v3566_v48 = vrot.slane %v3564_v35, 1  ;;  %v4537_v2 = vrot.slane %v3568_v25, 5  ;;  %v8283_v63 = vpop.f32.mrf.mxu1 }
 0x160   : > { %v8224_v0 = vpop.f32.mrf.mxu0  ;;  %v4538_v20 = vrot.slane %v3564_v35, 6  ;;  %v11198_v24 = vsel %vm4700_vm6, %v4863_v56, %v4865_v61  ;;  %v11207_v11 = vadd.f32 %v8283_v63, %v8282_v49  ;;  %v13499_v56 = vshll.u32 %v10788_v10, 16 }
 0x161   : > { %13498 = vst [vmem:[#allocation23_spill] sm:$0xff] %v11198_v24  ;;  %v1254_v57 = vmax.f32 %v1238_v19, 0.0  ;;  %v1213_v31 = vadd.f32 %v8223_v28, %v8159_v5  ;;  %v11201_v52 = vsel %vm698_vm0, %v3563_v22, %v3566_v48  ;;  %v8285_v14 = vpop.f32.mrf.mxu1  ;;  %v13502_v63 = vshrl.u32 %v10788_v10, 16 }
 0x162   : > { %v8225_v29 = vpop.f32.mrf.mxu0  ;;  %v4539_v42 = vor.u32 %v4538_v20, %v4537_v2  ;;  %v3359_v59 = vrot.slane %v13499_v56, 1 }
 0x163   : > { %v11205_v41 = vpack.c.bf16 %v1254_v57, %v1253_v17  ;;  %v8226_v46 = vadd.f32 %v8225_v29, %v8224_v0  ;;  %v1239_v62 = vadd.f32 %v10755_v9, %v1213_v31  ;;  %v8286_v22 = vpop.f32.mrf.mxu1 }
 0x164   : > { %v8227_v35 = vpop.f32.mrf.mxu0  ;;  %2969 = vmatmul.mubr.bf16.gmra.mxu0 %v11146_v27  ;;  %v11213_v5 = vsel %vm4351_vm2, %v4535_v26, %v4539_v42  ;;  %v13501_v27 = vshll.u32 %v10823_v12, 16  ;;  %v3570_v26 = vor.u32 %v3568_v25, %v3566_v48  ;;  %v11225_v0 = vadd.f32 %v8286_v22, %v8285_v14 }
 0x165   : > { %13500 = vst [vmem:[#allocation24_spill] sm:$0xff] %v11213_v5  ;;  %v1216_v8 = vadd.f32 %v8226_v46, %v8162_v7  ;;  %8910 = vmatprep.mubr.msk.bf16.mxu0 %vm9882_vm4, %v13476_v16  ;;  %v3571_v6 = vshll.u32 %v11205_v41, 16  ;;  %v3575_v4 = vshrl.u32 %v11205_v41, 16  ;;  %8867 = vmatmul.mubr.msk.bf16.gmra.mxu1 %vm3124_vm5, %v11205_v41  ;;  %v4867_v49 = vrot.slane %v11205_v41, 6  ;;  %v8288_v57 = vpop.f32.mrf.mxu1 }
 0x166   : > { %v8228_v19 = vpop.f32.mrf.mxu0  ;;  %v3363_v28 = vrot.slane %v13501_v27, 1  ;;  %8870 = vmatprep.mubr.msk.bf16.mxu1 %vm9882_vm4, %v13476_v16  ;;  %v3360_v29 = vor.u32 %v3359_v59, %v13502_v63  ;;  %v1255_v48 = vmax.f32 %v1239_v62, 0.0 }
 0x167   : > { %v1240_v2 = vadd.f32 %v10755_v9, %v1216_v8  ;;  %v8229_v20 = vadd.f32 %v8228_v19, %v8227_v35  ;;  %v3573_v17 = vrot.slane %v3571_v6, 1  ;;  %v4541_v7 = vrot.slane %v3575_v4, 5  ;;  %v9806_v9 = vld [vmem:[%s13404_s2 + $0x48] sm:$0xff]   ;;  %v8289_v35 = vpop.f32.mrf.mxu1 }
 0x168   : > { %v8230_v31 = vpop.f32.mrf.mxu0  ;;  %v4542_v46 = vrot.slane %v3571_v6, 6  ;;  %v11233_v25 = vsel %vm4700_vm6, %v4865_v61, %v4867_v49  ;;  %v11244_v6 = vadd.f32 %v8289_v35, %v8288_v57  ;;  %v3364_v62 = vsel %vm698_vm0, %v3360_v29, %v3363_v28  ;;  %v9807_v57 = vld [vmem:[%s13404_s2 + $0x40] sm:$0xff]  }
 0x169   : > { %13503 = vst [vmem:[#allocation25_spill] sm:$0xff] %v11233_v25  ;;  %v1256_v41 = vmax.f32 %v1240_v2, 0.0  ;;  %v1221_v56 = vadd.f32 %v8229_v20, %v10988_v54  ;;  %v11240_v14 = vsel %vm698_vm0, %v3570_v26, %v3573_v17  ;;  %v8291_v19 = vpop.f32.mrf.mxu1  ;;  %v11254_v26 = vld [vmem:[%s13406_s4] ss:$0 sm:$0xff] }
 0x16a   : > { %v8231_v8 = vpop.f32.mrf.mxu0  ;;  %v4543_v22 = vor.u32 %v4542_v46, %v4541_v7  ;;  %v13505_v7 = vshll.u32 %v10854_v34, 16  ;;  %v3577_v46 = vor.u32 %v3575_v4, %v3573_v17 }
 0x16b   : > { %v11242_v59 = vpack.c.bf16 %v1256_v41, %v1255_v48  ;;  %v8232_v61 = vadd.f32 %v8231_v8, %v8230_v31  ;;  %v1241_v2 = vadd.f32 %v11254_v26, %v1221_v56  ;;  %v8292_v63 = vpop.f32.mrf.mxu1 }
 0x16c   : > { %v8313_v27 = vpop.f32.mrf.mxu0  ;;  %8911 = vmatmul.mubr.msk.bf16.vlgmr.msra.gmra.mxu0 %vm3124_vm5, %v3364_v62  ;;  %v11249_v54 = vsel %vm4351_vm2, %v4539_v42, %v4543_v22  ;;  %v11271_v41 = vadd.f32 %v8292_v63, %v8291_v19  ;;  %v13506_v62 = vshrl.u32 %v10823_v12, 16 }
 0x16d   : > { %13504 = vst [vmem:[#allocation26_spill] sm:$0xff] %v11249_v54  ;;  %v1224_v20 = vadd.f32 %v8232_v61, %v11002_v33  ;;  %8914 = vmatprep.mubr.msk.bf16.mxu0 %vm9882_vm4, %v13476_v16  ;;  %8971 = vmatpush3.bf16.msra.mxu0 %v9806_v9  ;;  %v3578_v42 = vshll.u32 %v11242_v59, 16  ;;  %v13443_v31 = vshrl.u32 %v11242_v59, 16  ;;  %v3370_v33 = vrot.slane %v13505_v7, 1  ;;  %v8294_v8 = vpop.f32.mrf.mxu1 }
 0x16e   : > { %8871 = vmatmul.mubr.msk.bf16.gmra.mxu1 %vm3124_vm5, %v11242_v59  ;;  %v8314_v29 = vpop.f32.mrf.mxu0  ;;  %8972 = vmatprep.subr.bf16.mxu0 %v13476_v16  ;;  %v4869_v48 = vrot.slane %v11242_v59, 6  ;;  %v3367_v7 = vor.u32 %v13506_v62, %v3363_v28  ;;  %v1257_v63 = vmax.f32 %v1241_v2, 0.0 }
 0x16f   : > { %v1242_v56 = vadd.f32 %v11254_v26, %v1224_v20  ;;  %v8315_v9 = vadd.f32 %v8314_v29, %v8313_v27  ;;  %8878 = vmatprep.mubr.msk.bf16.mxu1 %vm9882_vm4, %v13476_v16  ;;  %v11276_v35 = vrot.slane %v3578_v42, 1  ;;  %v4545_v4 = vrot.slane %v13443_v31, 5  ;;  %v8295_v25 = vpop.f32.mrf.mxu1 }
 0x170   : > { %v8316_v61 = vpop.f32.mrf.mxu0  ;;  %v4546_v17 = vrot.slane %v3578_v42, 6  ;;  %v11283_v19 = vsel %vm4700_vm6, %v4867_v49, %v4869_v48  ;;  %v11291_v31 = vadd.f32 %v8295_v25, %v8294_v8  ;;  %v3371_v49 = vsel %vm698_vm0, %v3367_v7, %v3370_v33 }
 0x171   : > { %13507 = vst [vmem:[#allocation27_spill] sm:$0xff] %v11283_v19  ;;  %v1258_v20 = vmax.f32 %v1242_v56, 0.0  ;;  %v1896_v27 = vadd.f32 %v8315_v9, %v11012_v47  ;;  %8973 = vmatpush3.bf16.msra.mxu0 %v9807_v57  ;;  %v11288_v29 = vsel %vm698_vm0, %v3577_v46, %v11276_v35  ;;  %v9805_v47 = vld [vmem:[%s13404_s2 + $0x38] sm:$0xff]   ;;  %v8377_v2 = vpop.f32.mrf.mxu1  ;;  %v13509_v7 = vshll.u32 %v10880_v36, 16 }
 0x172   : > { %v8317_v24 = vpop.f32.mrf.mxu0  ;;  %9034 = vmatprep.subr.bf16.mxu0 %v13476_v16  ;;  %v4547_v28 = vor.u32 %v4546_v17, %v4545_v4 }
 0x173   : > { %v1266_v62 = vpack.c.bf16 %v1258_v20, %v1257_v63  ;;  %v8318_v42 = vadd.f32 %v8317_v24, %v8316_v61  ;;  %v1958_v56 = vadd.f32 %v11254_v26, %v1896_v27  ;;  %v8378_v8 = vpop.f32.mrf.mxu1  ;;  %v3377_v4 = vrot.slane %v13509_v7, 1 }
 0x174   : > { %v8319_v57 = vpop.f32.mrf.mxu0  ;;  %8915 = vmatmul.mubr.msk.bf16.gmra.mxu0 %vm3124_vm5, %v3371_v49  ;;  %v11299_v46 = vsel %vm4351_vm2, %v4543_v22, %v4547_v28  ;;  %v11309_v22 = vadd.f32 %v8378_v8, %v8377_v2  ;;  %v13511_v8 = vshrl.u32 %v10854_v34, 16 }
 0x175   : > { %13508 = vst [vmem:[#allocation28_spill] sm:$0xff] %v11299_v46  ;;  %v1899_v9 = vadd.f32 %v8318_v42, %v11022_v60  ;;  %8918 = vmatprep.mubr.msk.bf16.mxu0 %vm9882_vm4, %v13476_v16  ;;  %v4550_v24 = vshrl.u32 %v1266_v62, 16  ;;  %v4553_v25 = vshll.u32 %v1266_v62, 16  ;;  %v4871_v17 = vrot.slane %v1266_v62, 6  ;;  %v9808_v60 = vld [vmem:[%s13404_s2 + $0x30] sm:$0xff]   ;;  %v8380_v42 = vpop.f32.mrf.mxu1 }
 0x176   : > { %8879 = vmatmul.mubr.msk.bf16.vlgmr.msra.gmra.mxu1 %vm3124_vm5, %v10788_v10  ;;  %v8320_v61 = vpop.f32.mrf.mxu0  ;;  %v1974_v2 = vmax.f32 %v1958_v56, 0.0 }
 0x177   : > { %v1959_v63 = vadd.f32 %v11254_v26, %v1899_v9  ;;  %v8321_v20 = vadd.f32 %v8320_v61, %v8319_v57  ;;  %8882 = vmatprep.mubr.msk.bf16.mxu1 %vm9882_vm4, %v13476_v16  ;;  %8939 = vmatpush3.bf16.msra.mxu1 %v9805_v47  ;;  %v4552_v27 = vrot.slane %v4550_v24, 5  ;;  %v4555_v7 = vrot.slane %v4553_v25, 6  ;;  %v8381_v61 = vpop.f32.mrf.mxu1 }
 0x178   : > { %v8322_v49 = vpop.f32.mrf.mxu0  ;;  %8940 = vmatprep.subr.bf16.mxu1 %v13476_v16  ;;  %v11319_v62 = vsel %vm4700_vm6, %v4869_v48, %v4871_v17  ;;  %v3374_v47 = vor.u32 %v13511_v8, %v3370_v33  ;;  %v11326_v24 = vadd.f32 %v8381_v61, %v8380_v42  ;;  %v13513_v42 = vshll.u32 %v10906_v40, 16 }
 0x179   : > { %13510 = vst [vmem:[#allocation29_spill] sm:$0xff] %v11319_v62  ;;  %v1975_v9 = vmax.f32 %v1959_v63, 0.0  ;;  %v1904_v57 = vadd.f32 %v8321_v20, %v11038_v43  ;;  %v4556_v13 = vor.u32 %v4555_v7, %v4552_v27  ;;  %v8383_v48 = vpop.f32.mrf.mxu1 }
 0x17a   : > { %v8323_v19 = vpop.f32.mrf.mxu0  ;;  %v3378_v25 = vsel %vm698_vm0, %v3374_v47, %v3377_v4  ;;  %v13514_v47 = vshrl.u32 %v10880_v36, 16 }
 0x17b   : > { %v11324_v18 = vpack.c.bf16 %v1975_v9, %v1974_v2  ;;  %v8324_v46 = vadd.f32 %v8323_v19, %v8322_v49  ;;  %8941 = vmatpush3.bf16.msra.mxu1 %v9808_v60  ;;  %v11332_v43 = vsel %vm4351_vm2, %v4547_v28, %v4556_v13  ;;  %v1960_v63 = vadd.f32 %v11254_v26, %v1904_v57  ;;  %v8384_v20 = vpop.f32.mrf.mxu1 }
 0x17c   : > { %v8325_v17 = vpop.f32.mrf.mxu0  ;;  %8919 = vmatmul.mubr.msk.bf16.gmra.mxu0 %vm3124_vm5, %v3378_v25  ;;  %9002 = vmatprep.subr.bf16.mxu1 %v13476_v16  ;;  %13512 = vst [vmem:[#allocation30_spill] sm:$0xff] %v11332_v43  ;;  %v11342_v27 = vadd.f32 %v8384_v20, %v8383_v48  ;;  %v3384_v49 = vrot.slane %v13513_v42, 1  ;;  %v3381_v61 = vor.u32 %v13514_v47, %v3377_v4 }
 0x17d   : > { %v3987_v33 = vshrl.u32 %v11324_v18, 16  ;;  %v3989_v56 = vshll.u32 %v11324_v18, 16  ;;  %v1907_v19 = vadd.f32 %v8324_v46, %v11062_v50  ;;  %8922 = vmatprep.mubr.msk.bf16.mxu0 %vm9882_vm4, %v13476_v16  ;;  %v8386_v50 = vpop.f32.mrf.mxu1  ;;  %v1976_v9 = vmax.f32 %v1960_v63, 0.0 }
 0x17e   : > { %8883 = vmatmul.mubr.msk.bf16.gmra.mxu1 %vm3124_vm5, %v10823_v12  ;;  %v8326_v60 = vpop.f32.mrf.mxu0  ;;  %v3385_v62 = vsel %vm698_vm0, %v3381_v61, %v3384_v49 }
 0x17f   : > { %v1961_v13 = vadd.f32 %v11254_v26, %v1907_v19  ;;  %v8327_v28 = vadd.f32 %v8326_v60, %v8325_v17  ;;  %8886 = vmatprep.mubr.msk.bf16.mxu1 %vm9882_vm4, %v13476_v16  ;;  %v5007_v7 = vrot.slane %v3987_v33, 5  ;;  %v5008_v2 = vrot.slane %v3989_v56, 6  ;;  %v8387_v25 = vpop.f32.mrf.mxu1 }
 0x180   : > { %v8328_v46 = vpop.f32.mrf.mxu0  ;;  %v3991_v17 = vrot.slane %v3989_v56, 1  ;;  %v11354_v60 = vadd.f32 %v8387_v25, %v8386_v50  ;;  %v13515_v50 = vshll.u32 %v10933_v53, 16  ;;  %v13516_v25 = vshrl.u32 %v10906_v40, 16 }
 0x181   : > { %v1977_v57 = vmax.f32 %v1961_v13, 0.0  ;;  %v1912_v8 = vadd.f32 %v8327_v28, %v11078_v23  ;;  %v5009_v19 = vor.u32 %v5008_v2, %v5007_v7  ;;  %v8389_v43 = vpop.f32.mrf.mxu1  ;;  %v5355_v7 = vrot.slane %v11324_v18, 6 }
 0x182   : > { %v8329_v48 = vpop.f32.mrf.mxu0 }
 0x183   : > { %v11352_v20 = vpack.c.bf16 %v1977_v57, %v1976_v9  ;;  %v8330_v42 = vadd.f32 %v8329_v48, %v8328_v46  ;;  %v1962_v63 = vadd.f32 %v11254_v26, %v1912_v8  ;;  %v8390_v13 = vpop.f32.mrf.mxu1  ;;  %v3391_v46 = vrot.slane %v13515_v50, 1 }
 0x184   : > { %v8331_v54 = vpop.f32.mrf.mxu0  ;;  %8923 = vmatmul.mubr.msk.bf16.gmra.mxu0 %vm3124_vm5, %v3385_v62  ;;  %v3992_v62 = vor.u32 %v3991_v17, %v3987_v33  ;;  %v11370_v9 = vadd.f32 %v8390_v13, %v8389_v43  ;;  %v3388_v48 = vor.u32 %v13516_v25, %v3384_v49 }
 0x185   : > { %v3993_v23 = vshll.u32 %v11352_v20, 16  ;;  %v1915_v4 = vadd.f32 %v8330_v42, %v11104_v37  ;;  %8926 = vmatprep.mubr.msk.bf16.mxu0 %vm9882_vm4, %v13476_v16  ;;  %v3997_v56 = vshrl.u32 %v11352_v20, 16  ;;  %v5356_v2 = vrot.slane %v11352_v20, 6  ;;  %v8392_v47 = vpop.f32.mrf.mxu1 }
 0x186   : > { %8887 = vmatmul.mubr.msk.bf16.gmra.mxu1 %vm3124_vm5, %v10854_v34  ;;  %v8332_v28 = vpop.f32.mrf.mxu0  ;;  %v1978_v50 = vmax.f32 %v1962_v63, 0.0 }
 0x187   : > { %v1963_v37 = vadd.f32 %v11254_v26, %v1915_v4  ;;  %v8333_v57 = vadd.f32 %v8332_v28, %v8331_v54  ;;  %8890 = vmatprep.mubr.msk.bf16.mxu1 %vm9882_vm4, %v13476_v16  ;;  %v3995_v8 = vrot.slane %v3993_v23, 1  ;;  %v5010_v42 = vrot.slane %v3997_v56, 5  ;;  %v8393_v4 = vpop.f32.mrf.mxu1 }
 0x188   : > { %v8334_v61 = vpop.f32.mrf.mxu0  ;;  %v5011_v33 = vrot.slane %v3993_v23, 6  ;;  %v11378_v17 = vsel %vm4700_vm6, %v5355_v7, %v5356_v2  ;;  %v11386_v45 = vadd.f32 %v8393_v4, %v8392_v47  ;;  %v3392_v23 = vsel %vm698_vm0, %v3388_v48, %v3391_v46  ;;  %v13519_v48 = vld [vmem:[#allocation2_spill] sm:$0xff] }
 0x189   : > { %13517 = vst [vmem:[#allocation31_spill] sm:$0xff] %v11378_v17  ;;  %v1979_v43 = vmax.f32 %v1963_v37, 0.0  ;;  %v1920_v13 = vadd.f32 %v8333_v57, %v11124_v1  ;;  %v11382_v54 = vsel %vm698_vm0, %v3992_v62, %v3995_v8  ;;  %v8395_v25 = vpop.f32.mrf.mxu1 }
 0x18a   : > { %v8335_v28 = vpop.f32.mrf.mxu0  ;;  %v5012_v5 = vor.u32 %v5011_v33, %v5010_v42  ;;  %v13520_v42 = vshll.u32 %v13519_v48, 16  ;;  %v3999_v33 = vor.u32 %v3997_v56, %v3995_v8 }
 0x18b   : > { %v11384_v55 = vpack.c.bf16 %v1979_v43, %v1978_v50  ;;  %v8336_v49 = vadd.f32 %v8335_v28, %v8334_v61  ;;  %v1964_v1 = vadd.f32 %v11254_v26, %v1920_v13  ;;  %v8396_v47 = vpop.f32.mrf.mxu1 }
 0x18c   : > { %v8337_v7 = vpop.f32.mrf.mxu0  ;;  %8927 = vmatmul.mubr.msk.bf16.gmra.mxu0 %vm3124_vm5, %v3392_v23  ;;  %v11391_v63 = vsel %vm4351_vm2, %v5009_v19, %v5012_v5  ;;  %v3398_v19 = vrot.slane %v13520_v42, 1  ;;  %v11404_v43 = vadd.f32 %v8396_v47, %v8395_v25  ;;  %v13521_v23 = vshrl.u32 %v10933_v53, 16 }
 0x18d   : > { %13518 = vst [vmem:[#allocation32_spill] sm:$0xff] %v11391_v63  ;;  %v1923_v62 = vadd.f32 %v8336_v49, %v11144_v38  ;;  %8930 = vmatprep.mubr.msk.bf16.mxu0 %vm9882_vm4, %v13476_v16  ;;  %v4000_v37 = vshll.u32 %v11384_v55, 16  ;;  %v4004_v57 = vshrl.u32 %v11384_v55, 16  ;;  %v5358_v50 = vrot.slane %v11384_v55, 6  ;;  %v8398_v28 = vpop.f32.mrf.mxu1 }
 0x18e   : > { %8891 = vmatmul.mubr.msk.bf16.gmra.mxu1 %vm3124_vm5, %v10880_v36  ;;  %v8338_v61 = vpop.f32.mrf.mxu0  ;;  %v3395_v17 = vor.u32 %v13521_v23, %v3391_v46  ;;  %v1980_v8 = vmax.f32 %v1964_v1, 0.0 }
 0x18f   : > { %v1965_v38 = vadd.f32 %v11254_v26, %v1923_v62  ;;  %v8339_v13 = vadd.f32 %v8338_v61, %v8337_v7  ;;  %8894 = vmatprep.mubr.msk.bf16.mxu1 %vm9882_vm4, %v13476_v16  ;;  %v4002_v4 = vrot.slane %v4000_v37, 1  ;;  %v5014_v63 = vrot.slane %v4004_v57, 5  ;;  %v8399_v62 = vpop.f32.mrf.mxu1 }
 0x190   : > { %v8340_v49 = vpop.f32.mrf.mxu0  ;;  %v5015_v15 = vrot.slane %v4000_v37, 6  ;;  %v11412_v56 = vsel %vm4700_vm6, %v5356_v2, %v5358_v50  ;;  %v11420_v34 = vadd.f32 %v8399_v62, %v8398_v28  ;;  %v3399_v37 = vsel %vm698_vm0, %v3395_v17, %v3398_v19 }
 0x191   : > { %13522 = vst [vmem:[#allocation33_spill] sm:$0xff] %v11412_v56  ;;  %v1981_v25 = vmax.f32 %v1965_v38, 0.0  ;;  %v1928_v47 = vadd.f32 %v8339_v13, %v11159_v51  ;;  %v11416_v7 = vsel %vm698_vm0, %v3999_v33, %v4002_v4  ;;  %v8401_v23 = vpop.f32.mrf.mxu1  ;;  %v4006_v13 = vor.u32 %v4004_v57, %v4002_v4 }
 0x192   : > { %v8341_v61 = vpop.f32.mrf.mxu0  ;;  %v5016_v42 = vor.u32 %v5015_v15, %v5014_v63 }
 0x193   : > { %v11418_v36 = vpack.c.bf16 %v1981_v25, %v1980_v8  ;;  %v8342_v46 = vadd.f32 %v8341_v61, %v8340_v49  ;;  %v1966_v51 = vadd.f32 %v11254_v26, %v1928_v47  ;;  %v8402_v38 = vpop.f32.mrf.mxu1 }
 0x194   : > { %v8343_v2 = vpop.f32.mrf.mxu0  ;;  %8931 = vmatmul.mubr.msk.bf16.gmra.mxu0 %vm3124_vm5, %v3399_v37  ;;  %v11425_v1 = vsel %vm4351_vm2, %v5012_v5, %v5016_v42  ;;  %v11436_v28 = vadd.f32 %v8402_v38, %v8401_v23  ;;  %v13525_v38 = vshrl.u32 %v13519_v48, 16 }
 0x195   : > { %13523 = vst [vmem:[#allocation34_spill] sm:$0xff] %v11425_v1  ;;  %v1931_v33 = vadd.f32 %v8342_v46, %v11178_v3  ;;  %8934 = vmatprep.mubr.msk.bf16.mxu0 %vm9882_vm4, %v13476_v16  ;;  %v4007_v15 = vshll.u32 %v11418_v36, 16  ;;  %v4011_v63 = vshrl.u32 %v11418_v36, 16  ;;  %v5360_v5 = vrot.slane %v11418_v36, 6  ;;  %v8404_v25 = vpop.f32.mrf.mxu1 }
 0x196   : > { %8895 = vmatmul.mubr.msk.bf16.gmra.mxu1 %vm3124_vm5, %v10906_v40  ;;  %v8344_v17 = vpop.f32.mrf.mxu0  ;;  %v1982_v37 = vmax.f32 %v1966_v51, 0.0 }
 0x197   : > { %v1967_v49 = vadd.f32 %v11254_v26, %v1931_v33  ;;  %v8345_v3 = vadd.f32 %v8344_v17, %v8343_v2  ;;  %8898 = vmatprep.mubr.msk.bf16.mxu1 %vm9882_vm4, %v13476_v16  ;;  %v4009_v8 = vrot.slane %v4007_v15, 1  ;;  %v5018_v62 = vrot.slane %v4011_v63, 5  ;;  %v8405_v33 = vpop.f32.mrf.mxu1 }
 0x198   : > { %v8346_v47 = vpop.f32.mrf.mxu0  ;;  %v5019_v61 = vrot.slane %v4007_v15, 6  ;;  %v11442_v46 = vsel %vm4700_vm6, %v5358_v50, %v5360_v5  ;;  %v3402_v17 = vor.u32 %v13525_v38, %v3398_v19  ;;  %v11452_v40 = vadd.f32 %v8405_v33, %v8404_v25 }
 0x199   : > { %13524 = vst [vmem:[#allocation35_spill] sm:$0xff] %v11442_v46  ;;  %v1983_v57 = vmax.f32 %v1967_v49, 0.0  ;;  %v1936_v4 = vadd.f32 %v8345_v3, %v11192_v21  ;;  %v11446_v23 = vsel %vm698_vm0, %v4006_v13, %v4009_v8  ;;  %v8407_v50 = vpop.f32.mrf.mxu1 }
 0x19a   : > { %v8347_v2 = vpop.f32.mrf.mxu0  ;;  %v5020_v56 = vor.u32 %v5019_v61, %v5018_v62 }
 0x19b   : > { %v11450_v1 = vpack.c.bf16 %v1983_v57, %v1982_v37  ;;  %v8348_v15 = vadd.f32 %v8347_v2, %v8346_v47  ;;  %v1968_v51 = vadd.f32 %v11254_v26, %v1936_v4  ;;  %v8408_v3 = vpop.f32.mrf.mxu1  ;;  %v4013_v47 = vor.u32 %v4011_v63, %v4009_v8 }
 0x19c   : > { %v8349_v46 = vpop.f32.mrf.mxu0  ;;  %8935 = vmatmul.mubr.msk.bf16.gmra.mxu0 %vm3124_vm5, %v3402_v17  ;;  %v11456_v21 = vsel %vm4351_vm2, %v5016_v42, %v5020_v56  ;;  %v11467_v62 = vadd.f32 %v8408_v3, %v8407_v50 }
 0x19d   : > { %13526 = vst [vmem:[#allocation36_spill] sm:$0xff] %v11456_v21  ;;  %v1939_v13 = vadd.f32 %v8348_v15, %v11207_v11  ;;  %8974 = vmatprep.mubr.msk.bf16.mxu0 %vm9882_vm4, %v13476_v16  ;;  %v4014_v19 = vshll.u32 %v11450_v1, 16  ;;  %v4018_v49 = vshrl.u32 %v11450_v1, 16  ;;  %v5362_v42 = vrot.slane %v11450_v1, 6  ;;  %v8410_v57 = vpop.f32.mrf.mxu1  ;;  %v9810_v15 = vld [vmem:[%s13404_s2 + $0x68] sm:$0xff]  }
 0x19e   : > { %8899 = vmatmul.mubr.msk.bf16.gmra.mxu1 %vm3124_vm5, %v10933_v53  ;;  %v8350_v25 = vpop.f32.mrf.mxu0  ;;  %v1984_v17 = vmax.f32 %v1968_v51, 0.0 }
 0x19f   : > { %v1969_v61 = vadd.f32 %v11254_v26, %v1939_v13  ;;  %v8351_v11 = vadd.f32 %v8350_v25, %v8349_v46  ;;  %8902 = vmatprep.mubr.msk.bf16.mxu1 %vm9882_vm4, %v13476_v16  ;;  %v4016_v37 = vrot.slane %v4014_v19, 1  ;;  %v5022_v33 = vrot.slane %v4018_v49, 5  ;;  %v8411_v50 = vpop.f32.mrf.mxu1 }
 0x1a0   : > { %v8352_v4 = vpop.f32.mrf.mxu0  ;;  %v5023_v2 = vrot.slane %v4014_v19, 6  ;;  %v11473_v38 = vsel %vm4700_vm6, %v5360_v5, %v5362_v42  ;;  %v11484_v19 = vadd.f32 %v8411_v50, %v8410_v57 }
 0x1a1   : > { %13527 = vst [vmem:[#allocation37_spill] sm:$0xff] %v11473_v38  ;;  %v1985_v63 = vmax.f32 %v1969_v61, 0.0  ;;  %v1944_v8 = vadd.f32 %v8351_v11, %v11225_v0  ;;  %v11480_v46 = vsel %vm698_vm0, %v4013_v47, %v4016_v37  ;;  %v8413_v38 = vpop.f32.mrf.mxu1  ;;  %v9811_v11 = vld [vmem:[%s13404_s2 + $0x60] sm:$0xff]  }
 0x1a2   : > { %v8353_v13 = vpop.f32.mrf.mxu0  ;;  %v5024_v3 = vor.u32 %v5023_v2, %v5022_v33  ;;  %13528 = vst [vmem:[#allocation38_spill] sm:$0xff] %v11484_v19 }
 0x1a3   : > { %v11482_v25 = vpack.c.bf16 %v1985_v63, %v1984_v17  ;;  %v8354_v5 = vadd.f32 %v8353_v13, %v8352_v4  ;;  %v1970_v61 = vadd.f32 %v11254_v26, %v1944_v8 }
 0x1a4   : > { %v8355_v51 = vpop.f32.mrf.mxu0  ;;  %8975 = vmatmul.mubr.msk.bf16.vlgmr.msra.gmra.mxu0 %vm3124_vm5, %v11324_v18  ;;  %v11489_v0 = vsel %vm4351_vm2, %v5020_v56, %v5024_v3  ;;  %v8414_v18 = vpop.f32.mrf.mxu1 }
 0x1a5   : > { %13529 = vst [vmem:[#allocation39_spill] sm:$0xff] %v11489_v0  ;;  %v1947_v47 = vadd.f32 %v8354_v5, %v11244_v6  ;;  %8978 = vmatprep.mubr.msk.bf16.mxu0 %vm9882_vm4, %v13476_v16  ;;  %9035 = vmatpush3.bf16.msra.mxu0 %v9810_v15  ;;  %v4021_v57 = vshll.u32 %v11482_v25, 16  ;;  %v4025_v4 = vshrl.u32 %v11482_v25, 16  ;;  %v4020_v6 = vor.u32 %v4018_v49, %v4016_v37 }
 0x1a6   : > { %8903 = vmatmul.mubr.msk.bf16.gmra.mxu1 %vm3124_vm5, %v13519_v48  ;;  %v8356_v56 = vpop.f32.mrf.mxu0  ;;  %9036 = vmatprep.subr.bf16.mxu0 %v13476_v16  ;;  %v5364_v33 = vrot.slane %v11482_v25, 6  ;;  %v11504_v2 = vadd.f32 %v8414_v18, %v8413_v38  ;;  %v8416_v15 = vpop.f32.mrf.mxu1  ;;  %v1986_v21 = vmax.f32 %v1970_v61, 0.0 }
 0x1a7   : > { %v1971_v17 = vadd.f32 %v11254_v26, %v1947_v47  ;;  %v8357_v63 = vadd.f32 %v8356_v56, %v8355_v51  ;;  %8942 = vmatprep.mubr.msk.bf16.mxu1 %vm9882_vm4, %v13476_v16  ;;  %v4023_v8 = vrot.slane %v4021_v57, 1  ;;  %v5026_v13 = vrot.slane %v4025_v4, 5 }
 0x1a8   : > { %v8358_v50 = vpop.f32.mrf.mxu0  ;;  %v5027_v5 = vrot.slane %v4021_v57, 6  ;;  %v11510_v0 = vsel %vm4700_vm6, %v5362_v42, %v5364_v33  ;;  %v8417_v51 = vpop.f32.mrf.mxu1  ;;  %v9809_v42 = vld [vmem:[%s13404_s2 + $0x58] sm:$0xff]  }
 0x1a9   : > { %13530 = vst [vmem:[#allocation40_spill] sm:$0xff] %v11510_v0  ;;  %v1987_v49 = vmax.f32 %v1971_v17, 0.0  ;;  %v1952_v37 = vadd.f32 %v8357_v63, %v11271_v41  ;;  %9037 = vmatpush3.bf16.msra.mxu0 %v9811_v11  ;;  %v11514_v38 = vsel %vm698_vm0, %v4020_v6, %v4023_v8  ;;  %v11519_v48 = vadd.f32 %v8417_v51, %v8416_v15 }
 0x1aa   : > { %v8359_v47 = vpop.f32.mrf.mxu0  ;;  %9098 = vmatprep.subr.bf16.mxu0 %v13476_v16  ;;  %v5028_v18 = vor.u32 %v5027_v5, %v5026_v13  ;;  %v8419_v61 = vpop.f32.mrf.mxu1 }
 0x1ab   : > { %v11517_v56 = vpack.c.bf16 %v1987_v49, %v1986_v21  ;;  %13531 = vst [vmem:[#allocation41_spill] sm:$0xff] %v11519_v48  ;;  %v8360_v57 = vadd.f32 %v8359_v47, %v8358_v50  ;;  %v1972_v6 = vadd.f32 %v11254_v26, %v1952_v37  ;;  %v9812_v49 = vld [vmem:[%s13404_s2 + $0x50] sm:$0xff]  }
 0x1ac   : > { %v8441_v41 = vpop.f32.mrf.mxu0  ;;  %8979 = vmatmul.mubr.msk.bf16.gmra.mxu0 %vm3124_vm5, %v11352_v20  ;;  %v11527_v11 = vsel %vm4351_vm2, %v5024_v3, %v5028_v18  ;;  %v8420_v15 = vpop.f32.mrf.mxu1  ;;  %v4027_v20 = vor.u32 %v4025_v4, %v4023_v8 }
 0x1ad   : > { %13532 = vst [vmem:[#allocation42_spill] sm:$0xff] %v11527_v11  ;;  %v1955_v21 = vadd.f32 %v8360_v57, %v11291_v31  ;;  %8982 = vmatprep.mubr.msk.bf16.mxu0 %vm9882_vm4, %v13476_v16  ;;  %v4028_v17 = vshll.u32 %v11517_v56, 16  ;;  %v13448_v63 = vshrl.u32 %v11517_v56, 16  ;;  %v5366_v3 = vrot.slane %v11517_v56, 6 }
 0x1ae   : > { %8943 = vmatmul.mubr.msk.bf16.vlgmr.msra.gmra.mxu1 %vm3124_vm5, %v11091_v58  ;;  %v8442_v50 = vpop.f32.mrf.mxu0  ;;  %v11538_v13 = vadd.f32 %v8420_v15, %v8419_v61  ;;  %v8422_v58 = vpop.f32.mrf.mxu1  ;;  %v1988_v57 = vmax.f32 %v1972_v6, 0.0 }
 0x1af   : > { %v1973_v5 = vadd.f32 %v11254_v26, %v1955_v21  ;;  %v8443_v31 = vadd.f32 %v8442_v50, %v8441_v41  ;;  %8946 = vmatprep.mubr.msk.bf16.mxu1 %vm9882_vm4, %v13476_v16  ;;  %9003 = vmatpush3.bf16.msra.mxu1 %v9809_v42  ;;  %v11546_v37 = vrot.slane %v4028_v17, 1  ;;  %v5030_v4 = vrot.slane %v13448_v63, 5 }
 0x1b0   : > { %v11548_v51 = vpop.f32.mrf.mxu0  ;;  %9004 = vmatprep.subr.bf16.mxu1 %v13476_v16  ;;  %v5031_v8 = vrot.slane %v4028_v17, 6  ;;  %v11554_v47 = vsel %vm4700_vm6, %v5364_v33, %v5366_v3  ;;  %v8423_v21 = vpop.f32.mrf.mxu1 }
 0x1b1   : > { %13533 = vst [vmem:[#allocation43_spill] sm:$0xff] %v11554_v47  ;;  %v1989_v42 = vmax.f32 %v1973_v5, 0.0  ;;  %v11557_v61 = vadd.f32 %v8443_v31, %v11309_v22  ;;  %v11561_v41 = vsel %vm698_vm0, %v4027_v20, %v11546_v37  ;;  %v11565_v11 = vadd.f32 %v8423_v21, %v8422_v58 }
 0x1b2   : > { %v11563_v15 = vpop.f32.mrf.mxu0  ;;  %v5032_v50 = vor.u32 %v5031_v8, %v5030_v4  ;;  %v11567_v17 = vpop.f32.mrf.mxu1 }
 0x1b3   : > { %v1997_v0 = vpack.c.bf16 %v1989_v42, %v1988_v57  ;;  %9005 = vmatpush3.bf16.msra.mxu1 %v9812_v49 }
 0x1b4   : > { %v8447_v33 = vpop.f32.mrf.mxu0  ;;  %8983 = vmatmul.mubr.msk.bf16.gmra.mxu0 %vm3124_vm5, %v11384_v55  ;;  %9066 = vmatprep.subr.bf16.mxu1 %v13476_v16  ;;  %v11573_v22 = vsel %vm4351_vm2, %v5028_v18, %v5032_v50  ;;  %v11577_v31 = vpop.f32.mrf.mxu1 }
 0x1b5   : > { %13534 = vst [vmem:[#allocation44_spill] sm:$0xff] %v11573_v22  ;;  %8986 = vmatprep.mubr.msk.bf16.mxu0 %vm9882_vm4, %v13476_v16  ;;  %v5035_v6 = vshrl.u32 %v1997_v0, 16  ;;  %v5038_v20 = vshll.u32 %v1997_v0, 16  ;;  %v5368_v5 = vrot.slane %v1997_v0, 6 }
 0x1b6   : > { %8947 = vmatmul.mubr.msk.bf16.gmra.mxu1 %vm3124_vm5, %v11134_v32  ;;  %v8448_v49 = vpop.f32.mrf.mxu0  ;;  %v11583_v18 = vpop.f32.mrf.mxu1 }
 0x1b7   : > { %v8449_v58 = vadd.f32 %v8448_v49, %v8447_v33  ;;  %8950 = vmatprep.mubr.msk.bf16.mxu1 %vm9882_vm4, %v13476_v16  ;;  %v5037_v55 = vrot.slane %v5035_v6, 5  ;;  %v5040_v4 = vrot.slane %v5038_v20, 6  ;;  %v11588_v57 = vsel %vm4700_vm6, %v5366_v3, %v5368_v5 }
 0x1b8   : > { %v11585_v8 = vpop.f32.mrf.mxu0  ;;  %13535 = vst [vmem:[#allocation45_spill] sm:$0xff] %v11588_v57  ;;  %v11593_v21 = vpop.f32.mrf.mxu1 }
 0x1b9   : > { %v11591_v0 = vadd.f32 %v8449_v58, %v11342_v27  ;;  %v5041_v42 = vor.u32 %v5040_v4, %v5037_v55 }
 0x1ba   : > { %v11595_v32 = vpop.f32.mrf.mxu0  ;;  %v11600_v6 = vpop.f32.mrf.mxu1 }
 0x1bb   : > { %v11598_v33 = vsel %vm4351_vm2, %v5032_v50, %v5041_v42 }
 0x1bc   : > { %13536 = vst [vmem:[#allocation46_spill] sm:$0xff] %v11598_v33  ;;  %v8453_v20 = vpop.f32.mrf.mxu0  ;;  %8987 = vmatmul.mubr.msk.bf16.gmra.mxu0 %vm3124_vm5, %v11418_v36  ;;  %v11606_v3 = vpop.f32.mrf.mxu1 }
 0x1bd   : > { %8990 = vmatprep.mubr.msk.bf16.mxu0 %vm9882_vm4, %v13476_v16 }
 0x1be   : > { %8951 = vmatmul.mubr.msk.bf16.gmra.mxu1 %vm3124_vm5, %v11172_v39  ;;  %v8454_v27 = vpop.f32.mrf.mxu0  ;;  %v11612_v50 = vpop.f32.mrf.mxu1 }
 0x1bf   : > { %v8455_v5 = vadd.f32 %v8454_v27, %v8453_v20  ;;  %8954 = vmatprep.mubr.msk.bf16.mxu1 %vm9882_vm4, %v13476_v16 }
 0x1c0   : > { %v11614_v49 = vpop.f32.mrf.mxu0  ;;  %v11619_v36 = vpop.f32.mrf.mxu1 }
 0x1c1   : > { %v11617_v58 = vadd.f32 %v8455_v5, %v11370_v9 }
 0x1c2   : > { %v11621_v55 = vpop.f32.mrf.mxu0  ;;  %v11623_v4 = vpop.f32.mrf.mxu1 }
 0x1c4   : > { %v8459_v42 = vpop.f32.mrf.mxu0  ;;  %8991 = vmatmul.mubr.msk.bf16.gmra.mxu0 %vm3124_vm5, %v11450_v1  ;;  %v11629_v39 = vpop.f32.mrf.mxu1 }
 0x1c5   : > { %8994 = vmatprep.mubr.msk.bf16.mxu0 %vm9882_vm4, %v13476_v16 }
 0x1c6   : > { %8955 = vmatmul.mubr.msk.bf16.gmra.mxu1 %vm3124_vm5, %v11201_v52  ;;  %v8460_v9 = vpop.f32.mrf.mxu0  ;;  %v11635_v27 = vpop.f32.mrf.mxu1 }
 0x1c7   : > { %v8461_v20 = vadd.f32 %v8460_v9, %v8459_v42  ;;  %8958 = vmatprep.mubr.msk.bf16.mxu1 %vm9882_vm4, %v13476_v16 }
 0x1c8   : > { %v11637_v5 = vpop.f32.mrf.mxu0  ;;  %v11642_v1 = vpop.f32.mrf.mxu1 }
 0x1c9   : > { %v11640_v63 = vadd.f32 %v8461_v20, %v11404_v43 }
 0x1ca   : > { %v11644_v57 = vpop.f32.mrf.mxu0  ;;  %v11646_v47 = vpop.f32.mrf.mxu1 }
 0x1cc   : > { %v8465_v33 = vpop.f32.mrf.mxu0  ;;  %8995 = vmatmul.mubr.msk.bf16.gmra.mxu0 %vm3124_vm5, %v11482_v25  ;;  %v11652_v52 = vpop.f32.mrf.mxu1 }
 0x1cd   : > { %8998 = vmatprep.mubr.msk.bf16.mxu0 %vm9882_vm4, %v13476_v16 }
 0x1ce   : > { %8959 = vmatmul.mubr.msk.bf16.gmra.mxu1 %vm3124_vm5, %v11240_v14  ;;  %v8466_v43 = vpop.f32.mrf.mxu0  ;;  %v11658_v9 = vpop.f32.mrf.mxu1 }
 0x1cf   : > { %v8467_v42 = vadd.f32 %v8466_v43, %v8465_v33  ;;  %8962 = vmatprep.mubr.msk.bf16.mxu1 %vm9882_vm4, %v13476_v16 }
 0x1d0   : > { %v11660_v20 = vpop.f32.mrf.mxu0  ;;  %v11665_v25 = vpop.f32.mrf.mxu1 }
 0x1d1   : > { %v11663_v22 = vadd.f32 %v8467_v42, %v11436_v28 }
 0x1d2   : > { %v11667_v53 = vpop.f32.mrf.mxu0  ;;  %v11669_v10 = vpop.f32.mrf.mxu1 }
 0x1d4   : > { %v8471_v12 = vpop.f32.mrf.mxu0  ;;  %8999 = vmatmul.mubr.msk.bf16.gmra.mxu0 %vm3124_vm5, %v11517_v56  ;;  %v11675_v14 = vpop.f32.mrf.mxu1 }
 0x1d5   : > { %9038 = vmatprep.mubr.msk.bf16.mxu0 %vm9882_vm4, %v13476_v16 }
 0x1d6   : > { %8963 = vmatmul.mubr.msk.bf16.gmra.mxu1 %vm3124_vm5, %v11288_v29  ;;  %v8472_v28 = vpop.f32.mrf.mxu0  ;;  %v11681_v43 = vpop.f32.mrf.mxu1 }
 0x1d7   : > { %v8473_v33 = vadd.f32 %v8472_v28, %v8471_v12  ;;  %8966 = vmatprep.mubr.msk.bf16.mxu1 %vm9882_vm4, %v13476_v16  ;;  %v13541_v28 = vshrl.u32 %v11242_v59, 16 }
 0x1d8   : > { %v11683_v42 = vpop.f32.mrf.mxu0  ;;  %v11691_v48 = vpop.f32.mrf.mxu1 }
 0x1d9   : > { %13537 = vst [vmem:[#allocation47_spill] sm:$0xff] %v11683_v42  ;;  %v11686_v30 = vadd.f32 %v8473_v33, %v11467_v62  ;;  %v3584_v42 = vor.u32 %v13541_v28, %v11276_v35  ;;  %v9815_v62 = vld [vmem:[%s13404_s2 + $0x80] sm:$0xff]  }
 0x1da   : > { %v11693_v19 = vpop.f32.mrf.mxu0  ;;  %v11695_v29 = vpop.f32.mrf.mxu1 }
 0x1db   : > { %13538 = vst [vmem:[#allocation48_spill] sm:$0xff] %v11686_v30  ;;  %13539 = vst [vmem:[#allocation49_spill] sm:$0xff] %v11693_v19 }
 0x1dc   : > { %13540 = vst [vmem:[#allocation50_spill] sm:$0xff] %v11695_v29  ;;  %v8477_v12 = vpop.f32.mrf.mxu0  ;;  %9039 = vmatmul.mubr.msk.bf16.vlgmr.msra.gmra.mxu0 %vm3124_vm5, %v11382_v54  ;;  %v11707_v33 = vpop.f32.mrf.mxu1 }
 0x1dd   : > { %9042 = vmatprep.mubr.msk.bf16.mxu0 %vm9882_vm4, %v13476_v16  ;;  %9099 = vmatpush3.bf16.msra.mxu0 %v9814_v44  ;;  %13542 = vst [vmem:[#allocation51_spill] sm:$0xff] %v11707_v33 }
 0x1de   : > { %8967 = vmatmul.mubr.msk.bf16.gmra.mxu1 %vm3124_vm5, %v3584_v42  ;;  %v8478_v30 = vpop.f32.mrf.mxu0  ;;  %9100 = vmatprep.subr.bf16.mxu0 %v13476_v16  ;;  %v11713_v59 = vpop.f32.mrf.mxu1 }
 0x1df   : > { %v8479_v54 = vadd.f32 %v8478_v30, %v8477_v12  ;;  %9006 = vmatprep.mubr.msk.bf16.mxu1 %vm9882_vm4, %v13476_v16  ;;  %13543 = vst [vmem:[#allocation52_spill] sm:$0xff] %v11713_v59 }
 0x1e0   : > { %v11715_v35 = vpop.f32.mrf.mxu0  ;;  %v11720_v28 = vpop.f32.mrf.mxu1 }
 0x1e1   : > { %13544 = vst [vmem:[#allocation53_spill] sm:$0xff] %v11715_v35  ;;  %v11718_v44 = vadd.f32 %v8479_v54, %v11504_v2  ;;  %9101 = vmatpush3.bf16.msra.mxu0 %v9815_v62  ;;  %13546 = vst [vmem:[#allocation55_spill] sm:$0xff] %v11720_v28  ;;  %v8446_v35 = vadd.f32 %v11563_v15, %v11548_v51 }
 0x1e2   : > { %v11722_v33 = vpop.f32.mrf.mxu0  ;;  %9162 = vmatprep.subr.bf16.mxu0 %v13476_v16  ;;  %v11725_v42 = vpop.f32.mrf.mxu1 }
 0x1e3   : > { %13545 = vst [vmem:[#allocation54_spill] sm:$0xff] %v11718_v44  ;;  %13547 = vst [vmem:[#allocation56_spill] sm:$0xff] %v11722_v33 }
 0x1e4   : > { %13548 = vst [vmem:[#allocation57_spill] sm:$0xff] %v11725_v42  ;;  %v8483_v30 = vpop.f32.mrf.mxu0  ;;  %9043 = vmatmul.mubr.msk.bf16.gmra.mxu0 %vm3124_vm5, %v11416_v7  ;;  %v11731_v12 = vpop.f32.mrf.mxu1  ;;  %v8507_v7 = vadd.f32 %v11577_v31, %v11567_v17  ;;  %v8510_v17 = vadd.f32 %v11593_v21, %v11583_v18 }
 0x1e5   : > { %9046 = vmatprep.mubr.msk.bf16.mxu0 %vm9882_vm4, %v13476_v16  ;;  %13549 = vst [vmem:[#allocation58_spill] sm:$0xff] %v11731_v12 }
 0x1e6   : > { %v8484_v2 = vpop.f32.mrf.mxu0  ;;  %v11733_v62 = vpop.f32.mrf.mxu1 }
 0x1e7   : > { %v8485_v54 = vadd.f32 %v8484_v2, %v8483_v30  ;;  %13550 = vst [vmem:[#allocation59_spill] sm:$0xff] %v11733_v62  ;;  %v2711_v2 = vadd.f32 %v8507_v7, %v11557_v61 }
 0x1e8   : > { %v8486_v44 = vpop.f32.mrf.mxu0  ;;  %v11738_v42 = vpop.f32.mrf.mxu1 }
 0x1e9   : > { %v2512_v33 = vadd.f32 %v8485_v54, %v11538_v13  ;;  %13551 = vst [vmem:[#allocation60_spill] sm:$0xff] %v11738_v42  ;;  %v2459_v13 = vadd.f32 %v8446_v35, %v11326_v24  ;;  %v8513_v35 = vadd.f32 %v11606_v3, %v11600_v6  ;;  %v8516_v6 = vadd.f32 %v11619_v36, %v11612_v50 }
 0x1ea   : > { %v8487_v28 = vpop.f32.mrf.mxu0  ;;  %v8547_v29 = vpop.f32.mrf.mxu1 }
 0x1eb   : > { %v8488_v59 = vadd.f32 %v8487_v28, %v8486_v44  ;;  %v2712_v24 = vadd.f32 %v8510_v17, %v2459_v13 }
 0x1ec   : > { %v8569_v19 = vpop.f32.mrf.mxu0  ;;  %9047 = vmatmul.mubr.msk.bf16.gmra.mxu0 %vm3124_vm5, %v11446_v23  ;;  %v8548_v51 = vpop.f32.mrf.mxu1 }
 0x1ed   : > { %v2515_v30 = vadd.f32 %v8488_v59, %v11565_v11  ;;  %9050 = vmatprep.mubr.msk.bf16.mxu0 %vm9882_vm4, %v13476_v16  ;;  %v8549_v31 = vadd.f32 %v8548_v51, %v8547_v29  ;;  %v8452_v11 = vadd.f32 %v11595_v32, %v11585_v8  ;;  %v2713_v29 = vadd.f32 %v8513_v35, %v11591_v0  ;;  %v9813_v0 = vld [vmem:[%s13404_s2 + $0x78] sm:$0xff]  }
 0x1ee   : > { %v8570_v15 = vpop.f32.mrf.mxu0  ;;  %v8550_v28 = vpop.f32.mrf.mxu1  ;;  %v8519_v51 = vadd.f32 %v11629_v39, %v11623_v4 }
 0x1ef   : > { %v8571_v44 = vadd.f32 %v8570_v15, %v8569_v19  ;;  %v11751_v42 = vadd.f32 %v8549_v31, %v2512_v33  ;;  %v2467_v8 = vadd.f32 %v8452_v11, %v11354_v60  ;;  %v8458_v15 = vadd.f32 %v11621_v55, %v11614_v49 }
 0x1f0   : > { %v8572_v54 = vpop.f32.mrf.mxu0  ;;  %v8551_v59 = vpop.f32.mrf.mxu1  ;;  %v2715_v55 = vadd.f32 %v8519_v51, %v11617_v58  ;;  %v8525_v58 = vadd.f32 %v11652_v52, %v11646_v47 }
 0x1f1   : > { %v2977_v23 = vadd.f32 %v8571_v44, %v2711_v2  ;;  %v8552_v61 = vadd.f32 %v8551_v59, %v8550_v28  ;;  %v2714_v2 = vadd.f32 %v8516_v6, %v2467_v8  ;;  %v2475_v31 = vadd.f32 %v8458_v15, %v11386_v45  ;;  %v9816_v28 = vld [vmem:[%s13404_s2 + $0x70] sm:$0xff]  }
 0x1f2   : > { %v8573_v62 = vpop.f32.mrf.mxu0  ;;  %v8464_v59 = vadd.f32 %v11644_v57, %v11637_v5  ;;  %v2717_v57 = vadd.f32 %v8525_v58, %v11640_v63  ;;  %v8528_v63 = vadd.f32 %v11665_v25, %v11658_v9 }
 0x1f3   : > { %v8574_v7 = vadd.f32 %v8573_v62, %v8572_v54  ;;  %v11759_v19 = vadd.f32 %v8552_v61, %v2515_v30  ;;  %v2993_v18 = vadd.f32 %v11254_v26, %v2977_v23  ;;  %v8522_v54 = vadd.f32 %v11642_v1, %v11635_v27 }
 0x1f4   : > { %v8575_v12 = vpop.f32.mrf.mxu0  ;;  %9051 = vmatmul.mubr.msk.bf16.gmra.mxu0 %vm3124_vm5, %v11480_v46  ;;  %v2483_v5 = vadd.f32 %v8464_v59, %v11420_v34 }
 0x1f5   : > { %v2978_v21 = vadd.f32 %v8574_v7, %v2712_v24  ;;  %9054 = vmatprep.mubr.msk.bf16.mxu0 %vm9882_vm4, %v13476_v16  ;;  %v3009_v62 = vmax.f32 %v2993_v18, 0.0 }
 0x1f6   : > { %v8576_v32 = vpop.f32.mrf.mxu0 }
 0x1f7   : > { %v2994_v3 = vadd.f32 %v11254_v26, %v2978_v21  ;;  %v8577_v33 = vadd.f32 %v8576_v32, %v8575_v12  ;;  %v2716_v32 = vadd.f32 %v8522_v54, %v2475_v31  ;;  %v8531_v31 = vadd.f32 %v11675_v14, %v11669_v10 }
 0x1f8   : > { %v8578_v46 = vpop.f32.mrf.mxu0 }
 0x1f9   : > { %v3010_v30 = vmax.f32 %v2994_v3, 0.0  ;;  %v2979_v13 = vadd.f32 %v8577_v33, %v2713_v29  ;;  %v11820_v33 = vld [vmem:[%s13406_s4] ss:$0 sm:$0xff] }
 0x1fa   : > { %v8579_v60 = vpop.f32.mrf.mxu0 }
 0x1fb   : > { %v11776_v50 = vpack.c.bf16 %v3010_v30, %v3009_v62  ;;  %v8580_v36 = vadd.f32 %v8579_v60, %v8578_v46  ;;  %v2995_v39 = vadd.f32 %v11254_v26, %v2979_v13 }
 0x1fc   : > { %v8581_v12 = vpop.f32.mrf.mxu0  ;;  %9055 = vmatmul.mubr.msk.bf16.gmra.mxu0 %vm3124_vm5, %v11514_v38 }
 0x1fd   : > { %v4169_v17 = vshrl.u32 %v11776_v50, 16  ;;  %v4171_v4 = vshll.u32 %v11776_v50, 16  ;;  %v2980_v49 = vadd.f32 %v8580_v36, %v2714_v2  ;;  %9007 = vmatmul.mubr.msk.bf16.vlgmr.msra.gmra.mxu1 %vm3124_vm5, %v11776_v50  ;;  %9058 = vmatprep.mubr.msk.bf16.mxu0 %vm9882_vm4, %v13476_v16  ;;  %v11789_v44 = vpop.f32.mrf.mxu1  ;;  %v3011_v7 = vmax.f32 %v2995_v39, 0.0 }
 0x1fe   : > { %v8582_v38 = vpop.f32.mrf.mxu0  ;;  %9067 = vmatpush3.bf16.msra.mxu1 %v9813_v0  ;;  %9010 = vmatprep.mubr.msk.bf16.mxu1 %vm9882_vm4, %v13476_v16  ;;  %v5512_v51 = vrot.slane %v11776_v50, 6 }
 0x1ff   : > { %v2996_v23 = vadd.f32 %v11254_v26, %v2980_v49  ;;  %v8583_v11 = vadd.f32 %v8582_v38, %v8581_v12  ;;  %9068 = vmatprep.subr.bf16.mxu1 %v13476_v16  ;;  %v11800_v45 = vrot.slane %v4169_v17, 5  ;;  %v8848_v24 = vpop.f32.mrf.mxu1  ;;  %v5178_v61 = vrot.slane %v4171_v4, 6 }
 0x200   : > { %v8584_v35 = vpop.f32.mrf.mxu0  ;;  %v4173_v1 = vrot.slane %v4171_v4, 1  ;;  %v8470_v12 = vadd.f32 %v11667_v53, %v11660_v20  ;;  %v13552_v53 = vshrl.u32 %v11517_v56, 16 }
 0x201   : > { %v3012_v18 = vmax.f32 %v2996_v23, 0.0  ;;  %v2981_v21 = vadd.f32 %v8583_v11, %v2715_v55  ;;  %v11806_v27 = vpop.f32.mrf.mxu1  ;;  %v5179_v8 = vor.u32 %v5178_v61, %v11800_v45  ;;  %v2718_v23 = vadd.f32 %v8528_v63, %v2483_v5  ;;  %v13556_v63 = vld [vmem:[#allocation51_spill] sm:$0xff] }
 0x202   : > { %v8585_v26 = vpop.f32.mrf.mxu0  ;;  %9069 = vmatpush3.bf16.msra.mxu1 %v9816_v28  ;;  %v4174_v13 = vor.u32 %v4173_v1, %v4169_v17  ;;  %v4034_v20 = vor.u32 %v13552_v53, %v11546_v37  ;;  %v2491_v58 = vadd.f32 %v8470_v12, %v11452_v40  ;;  %v2719_v37 = vadd.f32 %v8531_v31, %v11663_v22  ;;  %v13557_v12 = vld [vmem:[#allocation38_spill] sm:$0xff] }
 0x203   : > { %v11809_v29 = vpack.c.bf16 %v3012_v18, %v3011_v7  ;;  %v8586_v47 = vadd.f32 %v8585_v26, %v8584_v35  ;;  %9130 = vmatprep.subr.bf16.mxu1 %v13476_v16  ;;  %v8849_v52 = vpop.f32.mrf.mxu1  ;;  %v2997_v46 = vadd.f32 %v11820_v33, %v2981_v21  ;;  %v8534_v61 = vadd.f32 %v11691_v48, %v11681_v43 }
 0x204   : > { %v8587_v6 = vpop.f32.mrf.mxu0  ;;  %9059 = vmatmul.mubr.msk.bf16.gmra.mxu0 %vm3124_vm5, %v11561_v41 }
 0x205   : > { %v4175_v3 = vshll.u32 %v11809_v29, 16  ;;  %v2982_v62 = vadd.f32 %v8586_v47, %v2716_v32  ;;  %9011 = vmatmul.mubr.msk.bf16.gmra.mxu1 %vm3124_vm5, %v11809_v29  ;;  %9062 = vmatprep.mubr.msk.bf16.mxu0 %vm9882_vm4, %v13476_v16  ;;  %v4179_v34 = vshrl.u32 %v11809_v29, 16  ;;  %v11830_v41 = vpop.f32.mrf.mxu1  ;;  %v5513_v15 = vrot.slane %v11809_v29, 6  ;;  %v13553_v47 = vld [vmem:[#allocation47_spill] sm:$0xff] }
 0x206   : > { %v8588_v30 = vpop.f32.mrf.mxu0  ;;  %9014 = vmatprep.mubr.msk.bf16.mxu1 %vm9882_vm4, %v13476_v16  ;;  %v3013_v49 = vmax.f32 %v2997_v46, 0.0 }
 0x207   : > { %v2998_v60 = vadd.f32 %v11820_v33, %v2982_v62  ;;  %v8589_v0 = vadd.f32 %v8588_v30, %v8587_v6  ;;  %v4177_v2 = vrot.slane %v4175_v3, 1  ;;  %v5180_v36 = vrot.slane %v4179_v34, 5  ;;  %v8852_v9 = vpop.f32.mrf.mxu1 }
 0x208   : > { %v8590_v25 = vpop.f32.mrf.mxu0  ;;  %v5181_v4 = vrot.slane %v4175_v3, 6  ;;  %v11840_v39 = vsel %vm4700_vm6, %v5512_v51, %v5513_v15 }
 0x209   : > { %v3014_v17 = vmax.f32 %v2998_v60, 0.0  ;;  %v2983_v55 = vadd.f32 %v8589_v0, %v2717_v57  ;;  %v11843_v50 = vsel %vm698_vm0, %v4174_v13, %v4177_v2  ;;  %v11847_v38 = vpop.f32.mrf.mxu1  ;;  %v4181_v21 = vor.u32 %v4179_v34, %v4177_v2  ;;  %v13554_v57 = vld [vmem:[#allocation49_spill] sm:$0xff]  ;;  %v13555_v34 = vld [vmem:[#allocation50_spill] sm:$0xff]  ;;  %v9818_v60 = vld [vmem:[%s13404_s2 + $0xa8] sm:$0xff]  }
 0x20a   : > { %v8591_v28 = vpop.f32.mrf.mxu0  ;;  %v5182_v54 = vor.u32 %v5181_v4, %v5180_v36  ;;  %v8476_v22 = vadd.f32 %v13554_v57, %v13553_v47  ;;  %v8537_v30 = vadd.f32 %v13556_v63, %v13555_v34  ;;  %v2720_v2 = vadd.f32 %v8534_v61, %v2491_v58 }
 0x20b   : > { %v11852_v11 = vpack.c.bf16 %v3014_v17, %v3013_v49  ;;  %v8592_v45 = vadd.f32 %v8591_v28, %v8590_v25  ;;  %v8853_v59 = vpop.f32.mrf.mxu1  ;;  %v2999_v14 = vadd.f32 %v11820_v33, %v2983_v55  ;;  %v13558_v49 = vld [vmem:[#allocation14_spill] sm:$0xff] }
 0x20c   : > { %v8593_v24 = vpop.f32.mrf.mxu0  ;;  %9063 = vmatmul.mubr.msk.bf16.gmra.mxu0 %vm3124_vm5, %v4034_v20  ;;  %v11857_v10 = vsel %vm4351_vm2, %v5179_v8, %v5182_v54  ;;  %v2499_v9 = vadd.f32 %v8476_v22, %v13557_v12  ;;  %v13559_v20 = vld [vmem:[#allocation48_spill] sm:$0xff] }
 0x20d   : > { %v2984_v35 = vadd.f32 %v8592_v45, %v2718_v23  ;;  %9015 = vmatmul.mubr.msk.bf16.gmra.mxu1 %vm3124_vm5, %v11852_v11  ;;  %9102 = vmatprep.mubr.msk.bf16.mxu0 %vm9882_vm4, %v13476_v16  ;;  %v4182_v56 = vshll.u32 %v11852_v11, 16  ;;  %v4186_v40 = vshrl.u32 %v11852_v11, 16  ;;  %v11869_v7 = vpop.f32.mrf.mxu1  ;;  %v5515_v26 = vrot.slane %v11852_v11, 6  ;;  %v13560_v11 = vld [vmem:[#allocation52_spill] sm:$0xff]  ;;  %v13561_v45 = vld [vmem:[#allocation55_spill] sm:$0xff] }
 0x20e   : > { %v8594_v18 = vpop.f32.mrf.mxu0  ;;  %9018 = vmatprep.mubr.msk.bf16.mxu1 %vm9882_vm4, %v13476_v16  ;;  %v3015_v6 = vmax.f32 %v2999_v14, 0.0  ;;  %v2721_v23 = vadd.f32 %v8537_v30, %v13559_v20  ;;  %v8540_v58 = vadd.f32 %v13561_v45, %v13560_v11  ;;  %v9819_v14 = vld [vmem:[%s13404_s2 + $0xa0] sm:$0xff]   ;;  %v13567_v12 = vld [vmem:[#allocation16_spill] sm:$0xff]  ;;  %v13569_v20 = vld [vmem:[#allocation59_spill] sm:$0xff] }
 0x20f   : > { %v3000_v1 = vadd.f32 %v11820_v33, %v2984_v35  ;;  %v8595_v8 = vadd.f32 %v8594_v18, %v8593_v24  ;;  %v4184_v32 = vrot.slane %v4182_v56, 1  ;;  %v5184_v29 = vrot.slane %v4186_v40, 5  ;;  %v8856_v5 = vpop.f32.mrf.mxu1 }
 0x210   : > { %v8596_v52 = vpop.f32.mrf.mxu0  ;;  %v5185_v48 = vrot.slane %v4182_v56, 6  ;;  %v11878_v43 = vsel %vm4700_vm6, %v5513_v15, %v5515_v26  ;;  %v2722_v30 = vadd.f32 %v8540_v58, %v2499_v9 }
 0x211   : > { %v3016_v3 = vmax.f32 %v3000_v1, 0.0  ;;  %v2985_v46 = vadd.f32 %v8595_v8, %v2719_v37  ;;  %v11881_v62 = vsel %vm698_vm0, %v4181_v21, %v4184_v32  ;;  %v11885_v13 = vpop.f32.mrf.mxu1  ;;  %v4188_v24 = vor.u32 %v4186_v40, %v4184_v32  ;;  %v13562_v21 = vld [vmem:[#allocation53_spill] sm:$0xff]  ;;  %v13563_v1 = vld [vmem:[#allocation56_spill] sm:$0xff] }
 0x212   : > { %v8597_v51 = vpop.f32.mrf.mxu0  ;;  %v5186_v0 = vor.u32 %v5185_v48, %v5184_v29  ;;  %v8482_v8 = vadd.f32 %v13563_v1, %v13562_v21  ;;  %v13564_v48 = vld [vmem:[#allocation57_spill] sm:$0xff] }
 0x213   : > { %v11890_v15 = vpack.c.bf16 %v3016_v3, %v3015_v6  ;;  %v8598_v36 = vadd.f32 %v8597_v51, %v8596_v52  ;;  %v8857_v25 = vpop.f32.mrf.mxu1  ;;  %v3001_v55 = vadd.f32 %v11820_v33, %v2985_v46  ;;  %v13565_v6 = vld [vmem:[#allocation58_spill] sm:$0xff] }
 0x214   : > { %v8599_v4 = vpop.f32.mrf.mxu0  ;;  %9103 = vmatmul.mubr.msk.bf16.vlgmr.msra.gmra.mxu0 %vm3124_vm5, %v13558_v49  ;;  %v11896_v17 = vsel %vm4351_vm2, %v5182_v54, %v5186_v0  ;;  %v8543_v3 = vadd.f32 %v13565_v6, %v13564_v48 }
 0x215   : > { %v2986_v31 = vadd.f32 %v8598_v36, %v2720_v2  ;;  %9019 = vmatmul.mubr.msk.bf16.gmra.mxu1 %vm3124_vm5, %v11890_v15  ;;  %9106 = vmatprep.mubr.msk.bf16.mxu0 %vm9882_vm4, %v13476_v16  ;;  %v4189_v28 = vshll.u32 %v11890_v15, 16  ;;  %v4193_v53 = vshrl.u32 %v11890_v15, 16  ;;  %v11908_v54 = vpop.f32.mrf.mxu1  ;;  %v5517_v35 = vrot.slane %v11890_v15, 6 }
 0x216   : > { %v8600_v59 = vpop.f32.mrf.mxu0  ;;  %9022 = vmatprep.mubr.msk.bf16.mxu1 %vm9882_vm4, %v13476_v16  ;;  %9163 = vmatpush3.bf16.msra.mxu0 %v9818_v60  ;;  %v3017_v57 = vmax.f32 %v3001_v55, 0.0 }
 0x217   : > { %v3002_v56 = vadd.f32 %v11820_v33, %v2986_v31  ;;  %v8601_v37 = vadd.f32 %v8600_v59, %v8599_v4  ;;  %v4191_v61 = vrot.slane %v4189_v28, 1  ;;  %9164 = vmatprep.subr.bf16.mxu0 %v13476_v16  ;;  %v5188_v18 = vrot.slane %v4193_v53, 5  ;;  %v8860_v29 = vpop.f32.mrf.mxu1  ;;  %v13568_v31 = vld [vmem:[#allocation54_spill] sm:$0xff] }
 0x218   : > { %v8602_v47 = vpop.f32.mrf.mxu0  ;;  %v5189_v40 = vrot.slane %v4189_v28, 6  ;;  %v11921_v32 = vsel %vm4700_vm6, %v5515_v26, %v5517_v35  ;;  %v13566_v26 = vld [vmem:[#allocation41_spill] sm:$0xff]  ;;  %v2723_v28 = vadd.f32 %v8543_v3, %v13568_v31 }
 0x219   : > { %v3018_v22 = vmax.f32 %v3002_v56, 0.0  ;;  %v2987_v5 = vadd.f32 %v8601_v37, %v2721_v23  ;;  %v11924_v52 = vsel %vm698_vm0, %v4188_v24, %v4191_v61  ;;  %v11928_v46 = vpop.f32.mrf.mxu1  ;;  %v2507_v2 = vadd.f32 %v8482_v8, %v13566_v26  ;;  %v13570_v23 = vld [vmem:[#allocation60_spill] sm:$0xff] }
 0x21a   : > { %v8603_v34 = vpop.f32.mrf.mxu0  ;;  %9165 = vmatpush3.bf16.msra.mxu0 %v9819_v14  ;;  %v5190_v63 = vor.u32 %v5189_v40, %v5188_v18  ;;  %v8546_v11 = vadd.f32 %v13570_v23, %v13569_v20  ;;  %v4195_v58 = vor.u32 %v4193_v53, %v4191_v61 }
 0x21b   : > { %v11930_v51 = vpack.c.bf16 %v3018_v22, %v3017_v57  ;;  %v8604_v60 = vadd.f32 %v8603_v34, %v8602_v47  ;;  %9226 = vmatprep.subr.bf16.mxu0 %v13476_v16  ;;  %v8861_v15 = vpop.f32.mrf.mxu1  ;;  %v3003_v4 = vadd.f32 %v11820_v33, %v2987_v5 }
 0x21c   : > { %v8605_v36 = vpop.f32.mrf.mxu0  ;;  %9107 = vmatmul.mubr.msk.bf16.gmra.mxu0 %vm3124_vm5, %v13567_v12  ;;  %v11937_v25 = vsel %vm4351_vm2, %v5186_v0, %v5190_v63  ;;  %v2724_v5 = vadd.f32 %v8546_v11, %v2507_v2 }
 0x21d   : > { %v2988_v49 = vadd.f32 %v8604_v60, %v2722_v30  ;;  %9023 = vmatmul.mubr.msk.bf16.gmra.mxu1 %vm3124_vm5, %v11930_v51  ;;  %9110 = vmatprep.mubr.msk.bf16.mxu0 %vm9882_vm4, %v13476_v16  ;;  %v4196_v9 = vshll.u32 %v11930_v51, 16  ;;  %v4200_v55 = vshrl.u32 %v11930_v51, 16  ;;  %v11949_v0 = vpop.f32.mrf.mxu1  ;;  %v5519_v59 = vrot.slane %v11930_v51, 6  ;;  %v13571_v30 = vld [vmem:[#allocation18_spill] sm:$0xff] }
 0x21e   : > { %v8606_v45 = vpop.f32.mrf.mxu0  ;;  %9026 = vmatprep.mubr.msk.bf16.mxu1 %vm9882_vm4, %v13476_v16  ;;  %v3019_v29 = vmax.f32 %v3003_v4, 0.0 }
 0x21f   : > { %v3004_v24 = vadd.f32 %v11820_v33, %v2988_v49  ;;  %v8607_v14 = vadd.f32 %v8606_v45, %v8605_v36  ;;  %v4198_v56 = vrot.slane %v4196_v9, 1  ;;  %v5192_v37 = vrot.slane %v4200_v55, 5  ;;  %v8864_v18 = vpop.f32.mrf.mxu1 }
 0x220   : > { %v8608_v21 = vpop.f32.mrf.mxu0  ;;  %v5193_v1 = vrot.slane %v4196_v9, 6  ;;  %v11956_v8 = vsel %vm4700_vm6, %v5517_v35, %v5519_v59 }
 0x221   : > { %v3020_v47 = vmax.f32 %v3004_v24, 0.0  ;;  %v2989_v40 = vadd.f32 %v8607_v14, %v2723_v28  ;;  %v11959_v57 = vsel %vm698_vm0, %v4195_v58, %v4198_v56  ;;  %v11961_v53 = vpop.f32.mrf.mxu1  ;;  %v4202_v12 = vor.u32 %v4200_v55, %v4198_v56 }
 0x222   : > { %v8609_v61 = vpop.f32.mrf.mxu0  ;;  %v5194_v22 = vor.u32 %v5193_v1, %v5192_v37 }
 0x223   : > { %v3030_v48 = vpack.c.bf16 %v3020_v47, %v3019_v29  ;;  %v8610_v6 = vadd.f32 %v8609_v61, %v8608_v21  ;;  %v8865_v3 = vpop.f32.mrf.mxu1  ;;  %v3005_v51 = vadd.f32 %v11820_v33, %v2989_v40  ;;  %v13572_v47 = vld [vmem:[#allocation20_spill] sm:$0xff] }
 0x224   : > { %v8611_v34 = vpop.f32.mrf.mxu0  ;;  %9111 = vmatmul.mubr.msk.bf16.gmra.mxu0 %vm3124_vm5, %v13571_v30  ;;  %v11966_v35 = vsel %vm4351_vm2, %v5190_v63, %v5194_v22 }
 0x225   : > { %v2990_v60 = vadd.f32 %v8610_v6, %v2724_v5  ;;  %9027 = vmatmul.mubr.msk.bf16.gmra.mxu1 %vm3124_vm5, %v3030_v48  ;;  %9114 = vmatprep.mubr.msk.bf16.mxu0 %vm9882_vm4, %v13476_v16  ;;  %v4203_v26 = vshll.u32 %v3030_v48, 16  ;;  %v4207_v2 = vshrl.u32 %v3030_v48, 16  ;;  %v11972_v15 = vpop.f32.mrf.mxu1  ;;  %v5521_v4 = vrot.slane %v3030_v48, 6 }
 0x226   : > { %v8612_v36 = vpop.f32.mrf.mxu0  ;;  %9030 = vmatprep.mubr.msk.bf16.mxu1 %vm9882_vm4, %v13476_v16  ;;  %v3021_v45 = vmax.f32 %v3005_v51, 0.0 }
 0x227   : > { %v3006_v63 = vadd.f32 %v11820_v33, %v2990_v60  ;;  %v8613_v49 = vadd.f32 %v8612_v36, %v8611_v34  ;;  %v4205_v9 = vrot.slane %v4203_v26, 1  ;;  %v5196_v31 = vrot.slane %v4207_v2, 5  ;;  %v8868_v28 = vpop.f32.mrf.mxu1 }
 0x228   : > { %v8614_v20 = vpop.f32.mrf.mxu0  ;;  %v5197_v23 = vrot.slane %v4203_v26, 6  ;;  %v11978_v11 = vsel %vm4700_vm6, %v5519_v59, %v5521_v4 }
 0x229   : > { %v3022_v58 = vmax.f32 %v3006_v63, 0.0  ;;  %v2991_v24 = vadd.f32 %v8613_v49, %v11751_v42  ;;  %v11982_v14 = vsel %vm698_vm0, %v4202_v12, %v4205_v9  ;;  %v11984_v55 = vpop.f32.mrf.mxu1 }
 0x22a   : > { %v8615_v56 = vpop.f32.mrf.mxu0  ;;  %v5198_v37 = vor.u32 %v5197_v23, %v5196_v31  ;;  %v9817_v31 = vld [vmem:[%s13404_s2 + $0x98] sm:$0xff]  }
 0x22b   : > { %v11986_v18 = vpack.c.bf16 %v3022_v58, %v3021_v45  ;;  %v8616_v21 = vadd.f32 %v8615_v56, %v8614_v20  ;;  %v8869_v1 = vpop.f32.mrf.mxu1  ;;  %v3007_v42 = vadd.f32 %v11820_v33, %v2991_v24  ;;  %v13573_v45 = vld [vmem:[#allocation21_spill] sm:$0xff] }
 0x22c   : > { %v3470_v29 = vpop.f32.mrf.mxu0  ;;  %9115 = vmatmul.mubr.msk.bf16.gmra.mxu0 %vm3124_vm5, %v13572_v47  ;;  %v11991_v59 = vsel %vm4351_vm2, %v5194_v22, %v5198_v37  ;;  %v4209_v22 = vor.u32 %v4207_v2, %v4205_v9 }
 0x22d   : > { %v2992_v40 = vadd.f32 %v8616_v21, %v11759_v19  ;;  %9031 = vmatmul.mubr.msk.bf16.gmra.mxu1 %vm3124_vm5, %v11986_v18  ;;  %9118 = vmatprep.mubr.msk.bf16.mxu0 %vm9882_vm4, %v13476_v16  ;;  %v4210_v61 = vshll.u32 %v11986_v18, 16  ;;  %v4214_v5 = vshrl.u32 %v11986_v18, 16  ;;  %v5523_v3 = vrot.slane %v11986_v18, 6  ;;  %v13581_v18 = vld [vmem:[#allocation19_spill] sm:$0xff] }
 0x22e   : > { %v12001_v48 = vpop.f32.mrf.mxu1  ;;  %v8912_v6 = vpop.f32.mrf.mxu0  ;;  %9070 = vmatprep.mubr.msk.bf16.mxu1 %vm9882_vm4, %v13476_v16  ;;  %v3023_v12 = vmax.f32 %v3007_v42, 0.0 }
 0x22f   : > { %v3008_v19 = vadd.f32 %v11820_v33, %v2992_v40  ;;  %v12007_v34 = vrot.slane %v4210_v61, 1  ;;  %v5200_v30 = vrot.slane %v4214_v5, 5  ;;  %v5201_v51 = vrot.slane %v4210_v61, 6 }
 0x230   : > { %v8872_v60 = vpop.f32.mrf.mxu1  ;;  %v3473_v26 = vpop.f32.mrf.mxu0  ;;  %v12012_v36 = vsel %vm4700_vm6, %v5521_v4, %v5523_v3 }
 0x231   : > { %v3024_v63 = vmax.f32 %v3008_v19, 0.0  ;;  %v12016_v2 = vsel %vm698_vm0, %v4209_v22, %v12007_v34  ;;  %v5202_v49 = vor.u32 %v5201_v51, %v5200_v30 }
 0x232   : > { %v3231_v9 = vpop.f32.mrf.mxu1  ;;  %v8913_v33 = vpop.f32.mrf.mxu0 }
 0x233   : > { %v3032_v28 = vpack.c.bf16 %v3024_v63, %v3023_v12  ;;  %v12022_v20 = vsel %vm4351_vm2, %v5198_v37, %v5202_v49  ;;  %v9820_v37 = vld [vmem:[%s13404_s2 + $0x90] sm:$0xff]  }
 0x234   : > { %v8873_v23 = vpop.f32.mrf.mxu1  ;;  %v3478_v4 = vpop.f32.mrf.mxu0  ;;  %9119 = vmatmul.mubr.msk.bf16.gmra.mxu0 %vm3124_vm5, %v13573_v45  ;;  %v13574_v9 = vld [vmem:[#allocation4_spill] sm:$0xff] }
 0x235   : > { %9071 = vmatmul.mubr.msk.bf16.vlgmr.msra.gmra.mxu1 %vm3124_vm5, %v11843_v50  ;;  %9122 = vmatprep.mubr.msk.bf16.mxu0 %vm9882_vm4, %v13476_v16  ;;  %v5205_v58 = vshrl.u32 %v3032_v28, 16  ;;  %v5208_v24 = vshll.u32 %v3032_v28, 16  ;;  %v5525_v56 = vrot.slane %v3032_v28, 6 }
 0x236   : > { %v3301_v21 = vpop.f32.mrf.mxu1  ;;  %v8916_v1 = vpop.f32.mrf.mxu0  ;;  %9131 = vmatpush3.bf16.msra.mxu1 %v9817_v31  ;;  %9074 = vmatprep.mubr.msk.bf16.mxu1 %vm9882_vm4, %v13476_v16 }
 0x237   : > { %v3302_v47 = vadd.f32 %v3301_v21, %v11789_v44  ;;  %9132 = vmatprep.subr.bf16.mxu1 %v13476_v16  ;;  %v5207_v50 = vrot.slane %v5205_v58, 5  ;;  %v5210_v42 = vrot.slane %v5208_v24, 6  ;;  %v12038_v40 = vsel %vm4700_vm6, %v5523_v3, %v5525_v56  ;;  %v13575_v56 = vld [vmem:[#allocation5_spill] sm:$0xff]  ;;  %v13576_v21 = vld [vmem:[#allocation12_spill] sm:$0xff] }
 0x238   : > { %v8880_v61 = vpop.f32.mrf.mxu1  ;;  %v3481_v6 = vpop.f32.mrf.mxu0 }
 0x239   : > { %v12040_v22 = vadd.f32 %v3470_v29, %v3302_v47  ;;  %v5211_v19 = vor.u32 %v5210_v42, %v5207_v50  ;;  %v13577_v50 = vld [vmem:[#allocation11_spill] sm:$0xff] }
 0x23a   : > { %v3304_v30 = vpop.f32.mrf.mxu1  ;;  %v8917_v51 = vpop.f32.mrf.mxu0  ;;  %9133 = vmatpush3.bf16.msra.mxu1 %v9820_v37  ;;  %v4701_v42 = vrot.slane %v13577_v50, 6 }
 0x23b   : > { %v3305_v60 = vadd.f32 %v3304_v30, %v11806_v27  ;;  %9194 = vmatprep.subr.bf16.mxu1 %v13476_v16  ;;  %v12045_v44 = vsel %vm4351_vm2, %v5202_v49, %v5211_v19 }
 0x23c   : > { %v8881_v12 = vpop.f32.mrf.mxu1  ;;  %v3486_v63 = vpop.f32.mrf.mxu0  ;;  %9123 = vmatmul.mubr.msk.bf16.gmra.mxu0 %vm3124_vm5, %v13574_v9 }
 0x23d   : > { %9075 = vmatmul.mubr.msk.bf16.gmra.mxu1 %vm3124_vm5, %v11881_v62  ;;  %9126 = vmatprep.mubr.msk.bf16.mxu0 %vm9882_vm4, %v13476_v16  ;;  %v12053_v29 = vadd.f32 %v3473_v26, %v3305_v60 }
 0x23e   : > { %v3309_v3 = vpop.f32.mrf.mxu1  ;;  %v8920_v27 = vpop.f32.mrf.mxu0  ;;  %9078 = vmatprep.mubr.msk.bf16.mxu1 %vm9882_vm4, %v13476_v16 }
 0x23f   : > { %v3310_v49 = vadd.f32 %v3309_v3, %v11830_v41  ;;  %v13578_v27 = vld [vmem:[#allocation13_spill] sm:$0xff] }
 0x240   : > { %v8884_v33 = vpop.f32.mrf.mxu1  ;;  %v3489_v31 = vpop.f32.mrf.mxu0 }
 0x241   : > { %v12058_v28 = vadd.f32 %v3478_v4, %v3310_v49  ;;  %v4704_v49 = vrot.slane %v13578_v27, 6 }
 0x242   : > { %v3312_v23 = vpop.f32.mrf.mxu1  ;;  %v8921_v45 = vpop.f32.mrf.mxu0 }
 0x243   : > { %v3313_v62 = vadd.f32 %v3312_v23, %v11847_v38  ;;  %v4702_v38 = vrot.slane %v13576_v21, 6  ;;  %v13579_v21 = vld [vmem:[#allocation15_spill] sm:$0xff] }
 0x244   : > { %v8885_v58 = vpop.f32.mrf.mxu1  ;;  %v3494_v24 = vpop.f32.mrf.mxu0  ;;  %9127 = vmatmul.mubr.msk.bf16.gmra.mxu0 %vm3124_vm5, %v13575_v56 }
 0x245   : > { %9079 = vmatmul.mubr.msk.bf16.gmra.mxu1 %vm3124_vm5, %v11924_v52  ;;  %9166 = vmatprep.mubr.msk.bf16.mxu0 %vm9882_vm4, %v13476_v16  ;;  %v12067_v41 = vadd.f32 %v3481_v6, %v3313_v62  ;;  %v9822_v6 = vld [vmem:[%s13404_s2 + $0xc8] sm:$0xff]   ;;  %v4703_v51 = vsel %vm4700_vm6, %v4701_v42, %v4702_v38  ;;  %v4705_v58 = vsel %vm4700_vm6, %v4702_v38, %v4704_v49  ;;  %v4706_v38 = vrot.slane %v13579_v21, 6 }
 0x246   : > { %v3317_v26 = vpop.f32.mrf.mxu1  ;;  %v8924_v4 = vpop.f32.mrf.mxu0  ;;  %9082 = vmatprep.mubr.msk.bf16.mxu1 %vm9882_vm4, %v13476_v16 }
 0x247   : > { %v3318_v1 = vadd.f32 %v3317_v26, %v11869_v7 }
 0x248   : > { %v8888_v37 = vpop.f32.mrf.mxu1  ;;  %v3497_v47 = vpop.f32.mrf.mxu0 }
 0x249   : > { %v12074_v61 = vadd.f32 %v3486_v63, %v3318_v1 }
 0x24a   : > { %v3320_v52 = vpop.f32.mrf.mxu1  ;;  %v8925_v19 = vpop.f32.mrf.mxu0 }
 0x24b   : > { %v3321_v30 = vadd.f32 %v3320_v52, %v11885_v13  ;;  %v9823_v13 = vld [vmem:[%s13404_s2 + $0xc0] sm:$0xff]  }
 0x24c   : > { %v8889_v60 = vpop.f32.mrf.mxu1  ;;  %v3502_v12 = vpop.f32.mrf.mxu0  ;;  %9167 = vmatmul.mubr.msk.bf16.vlgmr.msra.gmra.mxu0 %vm3124_vm5, %v4703_v51 }
 0x24d   : > { %9083 = vmatmul.mubr.msk.bf16.gmra.mxu1 %vm3124_vm5, %v11959_v57  ;;  %9170 = vmatprep.mubr.msk.bf16.mxu0 %vm9882_vm4, %v13476_v16  ;;  %v12086_v7 = vadd.f32 %v3489_v31, %v3321_v30  ;;  %v13580_v60 = vld [vmem:[#allocation17_spill] sm:$0xff] }
 0x24e   : > { %v3325_v63 = vpop.f32.mrf.mxu1  ;;  %v8928_v9 = vpop.f32.mrf.mxu0  ;;  %9086 = vmatprep.mubr.msk.bf16.mxu1 %vm9882_vm4, %v13476_v16  ;;  %9227 = vmatpush3.bf16.msra.mxu0 %v9822_v6 }
 0x24f   : > { %v3326_v3 = vadd.f32 %v3325_v63, %v11908_v54  ;;  %9228 = vmatprep.subr.bf16.mxu0 %v13476_v16 }
 0x250   : > { %v8892_v57 = vpop.f32.mrf.mxu1  ;;  %v3505_v33 = vpop.f32.mrf.mxu0 }
 0x251   : > { %v12096_v31 = vadd.f32 %v3494_v24, %v3326_v3  ;;  %v4216_v57 = vor.u32 %v4214_v5, %v12007_v34  ;;  %v4710_v5 = vrot.slane %v13581_v18, 6 }
 0x252   : > { %v3328_v23 = vpop.f32.mrf.mxu1  ;;  %v8929_v45 = vpop.f32.mrf.mxu0  ;;  %9229 = vmatpush3.bf16.msra.mxu0 %v9823_v13 }
 0x253   : > { %v3329_v62 = vadd.f32 %v3328_v23, %v11928_v46  ;;  %9290 = vmatprep.subr.bf16.mxu0 %v13476_v16 }
 0x254   : > { %v8893_v56 = vpop.f32.mrf.mxu1  ;;  %v3510_v26 = vpop.f32.mrf.mxu0  ;;  %9171 = vmatmul.mubr.msk.bf16.gmra.mxu0 %vm3124_vm5, %v4705_v58 }
 0x255   : > { %9087 = vmatmul.mubr.msk.bf16.gmra.mxu1 %vm3124_vm5, %v11982_v14  ;;  %9174 = vmatprep.mubr.msk.bf16.mxu0 %vm9882_vm4, %v13476_v16  ;;  %v12106_v54 = vadd.f32 %v3497_v47, %v3329_v62  ;;  %v4707_v47 = vsel %vm4700_vm6, %v4704_v49, %v4706_v38 }
 0x256   : > { %v3333_v24 = vpop.f32.mrf.mxu1  ;;  %v8932_v4 = vpop.f32.mrf.mxu0  ;;  %9090 = vmatprep.mubr.msk.bf16.mxu1 %vm9882_vm4, %v13476_v16 }
 0x257   : > { %v3334_v46 = vadd.f32 %v3333_v24, %v11949_v0  ;;  %v9821_v4 = vld [vmem:[%s13404_s2 + $0xb8] sm:$0xff]  }
 0x258   : > { %v8896_v1 = vpop.f32.mrf.mxu1  ;;  %v3513_v37 = vpop.f32.mrf.mxu0 }
 0x259   : > { %v12112_v50 = vadd.f32 %v3502_v12, %v3334_v46  ;;  %v4708_v12 = vrot.slane %v13580_v60, 6  ;;  %v13582_v1 = vld [vmem:[#allocation7_spill] sm:$0xff] }
 0x25a   : > { %v3336_v42 = vpop.f32.mrf.mxu1  ;;  %v8933_v14 = vpop.f32.mrf.mxu0 }
 0x25b   : > { %v3337_v52 = vadd.f32 %v3336_v42, %v11961_v53  ;;  %v4709_v49 = vsel %vm4700_vm6, %v4706_v38, %v4708_v12  ;;  %v4711_v46 = vsel %vm4700_vm6, %v4708_v12, %v4710_v5  ;;  %v9824_v42 = vld [vmem:[%s13404_s2 + $0xb0] sm:$0xff]  }
 0x25c   : > { %v8897_v19 = vpop.f32.mrf.mxu1  ;;  %v3518_v6 = vpop.f32.mrf.mxu0  ;;  %9175 = vmatmul.mubr.msk.bf16.gmra.mxu0 %vm3124_vm5, %v4707_v47 }
 0x25d   : > { %9091 = vmatmul.mubr.msk.bf16.gmra.mxu1 %vm3124_vm5, %v12016_v2  ;;  %9178 = vmatprep.mubr.msk.bf16.mxu0 %vm9882_vm4, %v13476_v16  ;;  %v12121_v0 = vadd.f32 %v3505_v33, %v3337_v52  ;;  %v13583_v52 = vld [vmem:[#allocation2_spill] sm:$0xff] }
 0x25e   : > { %v3341_v30 = vpop.f32.mrf.mxu1  ;;  %v8936_v51 = vpop.f32.mrf.mxu0  ;;  %9094 = vmatprep.mubr.msk.bf16.mxu1 %vm9882_vm4, %v13476_v16  ;;  %v4712_v47 = vrot.slane %v13583_v52, 6 }
 0x25f   : > { %v3342_v53 = vadd.f32 %v3341_v30, %v11972_v15 }
 0x260   : > { %v8900_v63 = vpop.f32.mrf.mxu1  ;;  %v3521_v9 = vpop.f32.mrf.mxu0  ;;  %v4713_v12 = vsel %vm4700_vm6, %v4710_v5, %v4712_v47 }
 0x261   : > { %v12127_v13 = vadd.f32 %v3510_v26, %v3342_v53 }
 0x262   : > { %v3344_v3 = vpop.f32.mrf.mxu1  ;;  %v8937_v2 = vpop.f32.mrf.mxu0 }
 0x263   : > { %v3345_v27 = vadd.f32 %v3344_v3, %v11984_v55 }
 0x264   : > { %v8901_v33 = vpop.f32.mrf.mxu1  ;;  %v3786_v23 = vpop.f32.mrf.mxu0  ;;  %9179 = vmatmul.mubr.msk.bf16.gmra.mxu0 %vm3124_vm5, %v4709_v49  ;;  %v13585_v49 = vld [vmem:[#allocation3_spill] sm:$0xff] }
 0x265   : > { %9095 = vmatmul.mubr.msk.bf16.gmra.mxu1 %vm3124_vm5, %v4216_v57  ;;  %9182 = vmatprep.mubr.msk.bf16.mxu0 %vm9882_vm4, %v13476_v16  ;;  %v12138_v15 = vadd.f32 %v3513_v37, %v3345_v27  ;;  %v4714_v57 = vrot.slane %v13585_v49, 6  ;;  %v13589_v49 = vld [vmem:[#allocation34_spill] sm:$0xff] }
 0x266   : > { %v3349_v45 = vpop.f32.mrf.mxu1  ;;  %v8976_v62 = vpop.f32.mrf.mxu0  ;;  %9134 = vmatprep.mubr.msk.bf16.mxu1 %vm9882_vm4, %v13476_v16 }
 0x267   : > { %v3350_v55 = vadd.f32 %v3349_v45, %v12001_v48  ;;  %v4715_v5 = vsel %vm4700_vm6, %v4712_v47, %v4714_v57  ;;  %v13587_v47 = vld [vmem:[#allocation32_spill] sm:$0xff]  ;;  %v13590_v57 = vld [vmem:[#allocation26_spill] sm:$0xff] }
 0x268   : > { %v8904_v34 = vpop.f32.mrf.mxu1  ;;  %v3789_v58 = vpop.f32.mrf.mxu0 }
 0x269   : > { %v12144_v56 = vadd.f32 %v3518_v6, %v3350_v55 }
 0x26a   : > { %v3352_v26 = vpop.f32.mrf.mxu1  ;;  %v8977_v24 = vpop.f32.mrf.mxu0 }
 0x26b   : > { %v13586_v26 = vld [vmem:[#allocation22_spill] sm:$0xff] }
 0x26c   : > { %v8905_v21 = vpop.f32.mrf.mxu1  ;;  %v3794_v38 = vpop.f32.mrf.mxu0  ;;  %9183 = vmatmul.mubr.msk.bf16.gmra.mxu0 %vm3124_vm5, %v4711_v46 }
 0x26d   : > { %9135 = vmatmul.mubr.msk.bf16.vlgmr.msra.gmra.mxu1 %vm3124_vm5, %v13582_v1  ;;  %9186 = vmatprep.mubr.msk.bf16.mxu0 %vm9882_vm4, %v13476_v16 }
 0x26e   : > { %v3652_v48 = vpop.f32.mrf.mxu1  ;;  %v8980_v37 = vpop.f32.mrf.mxu0  ;;  %9195 = vmatpush3.bf16.msra.mxu1 %v9821_v4  ;;  %9138 = vmatprep.mubr.msk.bf16.mxu1 %vm9882_vm4, %v13476_v16 }
 0x26f   : > { %v3706_v14 = vadd.f32 %v3652_v48, %v12040_v22  ;;  %9196 = vmatprep.subr.bf16.mxu1 %v13476_v16  ;;  %v13584_v22 = vld [vmem:[#allocation9_spill] sm:$0xff]  ;;  %v9826_v37 = vld [vmem:[%s13404_s2 + $0xe8] sm:$0xff]  }
 0x270   : > { %v8944_v19 = vpop.f32.mrf.mxu1  ;;  %v3797_v6 = vpop.f32.mrf.mxu0 }
 0x271   : > { %v12163_v30 = vadd.f32 %v3786_v23, %v3706_v14  ;;  %v13588_v19 = vld [vmem:[#allocation24_spill] sm:$0xff] }
 0x272   : > { %v3655_v51 = vpop.f32.mrf.mxu1  ;;  %v8981_v53 = vpop.f32.mrf.mxu0  ;;  %9197 = vmatpush3.bf16.msra.mxu1 %v9824_v42 }
 0x273   : > { %v3707_v60 = vadd.f32 %v3655_v51, %v12053_v29  ;;  %9258 = vmatprep.subr.bf16.mxu1 %v13476_v16 }
 0x274   : > { %v8945_v63 = vpop.f32.mrf.mxu1  ;;  %v3802_v9 = vpop.f32.mrf.mxu0  ;;  %9187 = vmatmul.mubr.msk.bf16.gmra.mxu0 %vm3124_vm5, %v4713_v12 }
 0x275   : > { %9139 = vmatmul.mubr.msk.bf16.gmra.mxu1 %vm3124_vm5, %v13584_v22  ;;  %9190 = vmatprep.mubr.msk.bf16.mxu0 %vm9882_vm4, %v13476_v16  ;;  %v12173_v3 = vadd.f32 %v3789_v58, %v3707_v60 }
 0x276   : > { %v3660_v2 = vpop.f32.mrf.mxu1  ;;  %v8984_v27 = vpop.f32.mrf.mxu0  ;;  %9142 = vmatprep.mubr.msk.bf16.mxu1 %vm9882_vm4, %v13476_v16 }
 0x277   : > { %v3708_v29 = vadd.f32 %v3660_v2, %v12058_v28 }
 0x278   : > { %v8948_v33 = vpop.f32.mrf.mxu1  ;;  %v3805_v23 = vpop.f32.mrf.mxu0 }
 0x279   : > { %v12179_v45 = vadd.f32 %v3794_v38, %v3708_v29 }
 0x27a   : > { %v3663_v62 = vpop.f32.mrf.mxu1  ;;  %v8985_v55 = vpop.f32.mrf.mxu0 }
 0x27b   : > { %v3709_v18 = vadd.f32 %v3663_v62, %v12067_v41 }
 0x27c   : > { %v8949_v34 = vpop.f32.mrf.mxu1  ;;  %v3810_v58 = vpop.f32.mrf.mxu0  ;;  %9191 = vmatmul.mubr.msk.bf16.gmra.mxu0 %vm3124_vm5, %v4715_v5 }
 0x27d   : > { %9143 = vmatmul.mubr.msk.bf16.gmra.mxu1 %vm3124_vm5, %v13586_v26  ;;  %9230 = vmatprep.mubr.msk.bf16.mxu0 %vm9882_vm4, %v13476_v16  ;;  %v12188_v28 = vadd.f32 %v3797_v6, %v3709_v18 }
 0x27e   : > { %v3668_v24 = vpop.f32.mrf.mxu1  ;;  %v8988_v4 = vpop.f32.mrf.mxu0  ;;  %9146 = vmatprep.mubr.msk.bf16.mxu1 %vm9882_vm4, %v13476_v16 }
 0x27f   : > { %v3710_v41 = vadd.f32 %v3668_v24, %v12074_v61  ;;  %v13591_v4 = vld [vmem:[#allocation36_spill] sm:$0xff] }
 0x280   : > { %v8952_v46 = vpop.f32.mrf.mxu1  ;;  %v3813_v21 = vpop.f32.mrf.mxu0 }
 0x281   : > { %v12193_v38 = vadd.f32 %v3802_v9, %v3710_v41  ;;  %v13592_v41 = vld [vmem:[#allocation28_spill] sm:$0xff] }
 0x282   : > { %v3671_v1 = vpop.f32.mrf.mxu1  ;;  %v8989_v48 = vpop.f32.mrf.mxu0 }
 0x283   : > { %v3711_v42 = vadd.f32 %v3671_v1, %v12086_v7  ;;  %v9827_v7 = vld [vmem:[%s13404_s2 + $0xe0] sm:$0xff]  }
 0x284   : > { %v8953_v14 = vpop.f32.mrf.mxu1  ;;  %v3818_v52 = vpop.f32.mrf.mxu0  ;;  %9231 = vmatmul.mubr.msk.bf16.vlgmr.msra.gmra.mxu0 %vm3124_vm5, %v13587_v47 }
 0x285   : > { %9147 = vmatmul.mubr.msk.bf16.gmra.mxu1 %vm3124_vm5, %v13588_v19  ;;  %9234 = vmatprep.mubr.msk.bf16.mxu0 %vm9882_vm4, %v13476_v16  ;;  %v12205_v61 = vadd.f32 %v3805_v23, %v3711_v42 }
 0x286   : > { %v3676_v6 = vpop.f32.mrf.mxu1  ;;  %v8992_v51 = vpop.f32.mrf.mxu0  ;;  %9150 = vmatprep.mubr.msk.bf16.mxu1 %vm9882_vm4, %v13476_v16  ;;  %9291 = vmatpush3.bf16.msra.mxu0 %v9826_v37 }
 0x287   : > { %v3712_v53 = vadd.f32 %v3676_v6, %v12096_v31  ;;  %9292 = vmatprep.subr.bf16.mxu0 %v13476_v16  ;;  %v13593_v6 = vld [vmem:[#allocation39_spill] sm:$0xff]  ;;  %v13594_v51 = vld [vmem:[#allocation30_spill] sm:$0xff] }
 0x288   : > { %v8956_v60 = vpop.f32.mrf.mxu1  ;;  %v3821_v12 = vpop.f32.mrf.mxu0 }
 0x289   : > { %v12214_v63 = vadd.f32 %v3810_v58, %v3712_v53 }
 0x28a   : > { %v3679_v9 = vpop.f32.mrf.mxu1  ;;  %v8993_v22 = vpop.f32.mrf.mxu0  ;;  %9293 = vmatpush3.bf16.msra.mxu0 %v9827_v7 }
 0x28b   : > { %v3713_v2 = vadd.f32 %v3679_v9, %v12106_v54  ;;  %9354 = vmatprep.subr.bf16.mxu0 %v13476_v16 }
 0x28c   : > { %v8957_v27 = vpop.f32.mrf.mxu1  ;;  %v3826_v29 = vpop.f32.mrf.mxu0  ;;  %9235 = vmatmul.mubr.msk.bf16.gmra.mxu0 %vm3124_vm5, %v13589_v49 }
 0x28d   : > { %9151 = vmatmul.mubr.msk.bf16.gmra.mxu1 %vm3124_vm5, %v13590_v57  ;;  %9238 = vmatprep.mubr.msk.bf16.mxu0 %vm9882_vm4, %v13476_v16  ;;  %v12224_v31 = vadd.f32 %v3813_v21, %v3713_v2  ;;  %v9825_v27 = vld [vmem:[%s13404_s2 + $0xd8] sm:$0xff]   ;;  %v13595_v57 = vld [vmem:[#allocation42_spill] sm:$0xff] }
 0x28e   : > { %v3684_v33 = vpop.f32.mrf.mxu1  ;;  %v8996_v23 = vpop.f32.mrf.mxu0  ;;  %9154 = vmatprep.mubr.msk.bf16.mxu1 %vm9882_vm4, %v13476_v16 }
 0x28f   : > { %v3714_v54 = vadd.f32 %v3684_v33, %v12112_v50  ;;  %v13596_v33 = vld [vmem:[#allocation6_spill] sm:$0xff]  ;;  %v9828_v23 = vld [vmem:[%s13404_s2 + $0xd0] sm:$0xff]  }
 0x290   : > { %v8960_v62 = vpop.f32.mrf.mxu1  ;;  %v3829_v55 = vpop.f32.mrf.mxu0 }
 0x291   : > { %v12229_v18 = vadd.f32 %v3818_v52, %v3714_v54 }
 0x292   : > { %v3687_v5 = vpop.f32.mrf.mxu1  ;;  %v8997_v34 = vpop.f32.mrf.mxu0 }
 0x293   : > { %v3715_v58 = vadd.f32 %v3687_v5, %v12121_v0  ;;  %v13597_v5 = vld [vmem:[#allocation44_spill] sm:$0xff] }
 0x294   : > { %v8961_v26 = vpop.f32.mrf.mxu1  ;;  %v3834_v24 = vpop.f32.mrf.mxu0  ;;  %9239 = vmatmul.mubr.msk.bf16.gmra.mxu0 %vm3124_vm5, %v13591_v4  ;;  %v13598_v34 = vld [vmem:[#allocation8_spill] sm:$0xff] }
 0x295   : > { %9155 = vmatmul.mubr.msk.bf16.gmra.mxu1 %vm3124_vm5, %v13592_v41  ;;  %9242 = vmatprep.mubr.msk.bf16.mxu0 %vm9882_vm4, %v13476_v16  ;;  %v12238_v50 = vadd.f32 %v3821_v12, %v3715_v58  ;;  %v13599_v41 = vld [vmem:[#allocation46_spill] sm:$0xff] }
 0x296   : > { %v3692_v46 = vpop.f32.mrf.mxu1  ;;  %v9000_v21 = vpop.f32.mrf.mxu0  ;;  %9158 = vmatprep.mubr.msk.bf16.mxu1 %vm9882_vm4, %v13476_v16 }
 0x297   : > { %v3716_v0 = vadd.f32 %v3692_v46, %v12127_v13  ;;  %v13600_v46 = vld [vmem:[#allocation10_spill] sm:$0xff] }
 0x298   : > { %v8964_v1 = vpop.f32.mrf.mxu1  ;;  %v3837_v48 = vpop.f32.mrf.mxu0 }
 0x299   : > { %v12243_v37 = vadd.f32 %v3826_v29, %v3716_v0 }
 0x29a   : > { %v3695_v42 = vpop.f32.mrf.mxu1  ;;  %v9001_v14 = vpop.f32.mrf.mxu0 }
 0x29b   : > { %v3717_v52 = vadd.f32 %v3695_v42, %v12138_v15  ;;  %v13601_v42 = vld [vmem:[#allocation31_spill] sm:$0xff] }
 0x29c   : > { %v8965_v47 = vpop.f32.mrf.mxu1  ;;  %v4102_v19 = vpop.f32.mrf.mxu0  ;;  %9243 = vmatmul.mubr.msk.bf16.gmra.mxu0 %vm3124_vm5, %v13593_v6 }
 0x29d   : > { %9159 = vmatmul.mubr.msk.bf16.gmra.mxu1 %vm3124_vm5, %v13594_v51  ;;  %9246 = vmatprep.mubr.msk.bf16.mxu0 %vm9882_vm4, %v13476_v16  ;;  %v12252_v13 = vadd.f32 %v3829_v55, %v3717_v52  ;;  %v13602_v52 = vld [vmem:[#allocation23_spill] sm:$0xff] }
 0x29e   : > { %v3700_v7 = vpop.f32.mrf.mxu1  ;;  %v9040_v53 = vpop.f32.mrf.mxu0  ;;  %9198 = vmatprep.mubr.msk.bf16.mxu1 %vm9882_vm4, %v13476_v16 }
 0x29f   : > { %v3718_v15 = vadd.f32 %v3700_v7, %v12144_v56 }
 0x2a0   : > { %v8968_v60 = vpop.f32.mrf.mxu1  ;;  %v4105_v12 = vpop.f32.mrf.mxu0 }
 0x2a1   : > { %v12257_v9 = vadd.f32 %v3834_v24, %v3718_v15 }
 0x2a2   : > { %v3703_v22 = vpop.f32.mrf.mxu1  ;;  %v9041_v2 = vpop.f32.mrf.mxu0 }
 0x2a4   : > { %v8969_v29 = vpop.f32.mrf.mxu1  ;;  %v4110_v49 = vpop.f32.mrf.mxu0  ;;  %9247 = vmatmul.mubr.msk.bf16.gmra.mxu0 %vm3124_vm5, %v13595_v57 }
 0x2a5   : > { %9199 = vmatmul.mubr.msk.bf16.vlgmr.msra.gmra.mxu1 %vm3124_vm5, %v13596_v33  ;;  %9250 = vmatprep.mubr.msk.bf16.mxu0 %vm9882_vm4, %v13476_v16  ;;  %v13603_v29 = vld [vmem:[#allocation33_spill] sm:$0xff] }
 0x2a6   : > { %v9044_v56 = vpop.f32.mrf.mxu0  ;;  %9259 = vmatpush3.bf16.msra.mxu1 %v9825_v27  ;;  %9202 = vmatprep.mubr.msk.bf16.mxu1 %vm9882_vm4, %v13476_v16  ;;  %v13604_v33 = vld [vmem:[#allocation25_spill] sm:$0xff] }
 0x2a7   : > { %9260 = vmatprep.subr.bf16.mxu1 %v13476_v16 }
 0x2a8   : > { %v4113_v54 = vpop.f32.mrf.mxu0 }
 0x2aa   : > { %v9045_v62 = vpop.f32.mrf.mxu0  ;;  %9261 = vmatpush3.bf16.msra.mxu1 %v9828_v23 }
 0x2ab   : > { %9322 = vmatprep.subr.bf16.mxu1 %v13476_v16 }
 0x2ac   : > { %v4118_v55 = vpop.f32.mrf.mxu0  ;;  %9251 = vmatmul.mubr.msk.bf16.gmra.mxu0 %vm3124_vm5, %v13597_v5 }
 0x2ad   : > { %9203 = vmatmul.mubr.msk.bf16.gmra.mxu1 %vm3124_vm5, %v13598_v34  ;;  %9254 = vmatprep.mubr.msk.bf16.mxu0 %vm9882_vm4, %v13476_v16 }
 0x2ae   : > { %v9048_v58 = vpop.f32.mrf.mxu0  ;;  %9206 = vmatprep.mubr.msk.bf16.mxu1 %vm9882_vm4, %v13476_v16 }
 0x2b0   : > { %v4121_v26 = vpop.f32.mrf.mxu0 }
 0x2b2   : > { %v9049_v24 = vpop.f32.mrf.mxu0 }
 0x2b4   : > { %v12283_v4 = vpop.f32.mrf.mxu0  ;;  %9255 = vmatmul.mubr.msk.bf16.gmra.mxu0 %vm3124_vm5, %v13599_v41  ;;  %v13605_v41 = vld [vmem:[#allocation35_spill] sm:$0xff] }
 0x2b5   : > { %9207 = vmatmul.mubr.msk.bf16.gmra.mxu1 %vm3124_vm5, %v13600_v46  ;;  %9294 = vmatprep.mubr.msk.bf16.mxu0 %vm9882_vm4, %v13476_v16 }
 0x2b6   : > { %v9052_v21 = vpop.f32.mrf.mxu0  ;;  %9210 = vmatprep.mubr.msk.bf16.mxu1 %vm9882_vm4, %v13476_v16 }
 0x2b7   : > { %v13606_v21 = vld [vmem:[#allocation27_spill] sm:$0xff] }
 0x2b8   : > { %v12293_v0 = vpop.f32.mrf.mxu0 }
 0x2ba   : > { %v9053_v1 = vpop.f32.mrf.mxu0 }
 0x2bc   : > { %v12295_v48 = vpop.f32.mrf.mxu0  ;;  %9295 = vmatmul.mubr.msk.bf16.vlgmr.msra.gmra.mxu0 %vm3124_vm5, %v13601_v42 }
 0x2bd   : > { %v3920_v14 = vpop.f32.mrf.mxu1  ;;  %9211 = vmatmul.mubr.msk.bf16.gmra.mxu1 %vm3124_vm5, %v13602_v52  ;;  %9298 = vmatprep.mubr.msk.bf16.mxu0 %vm9882_vm4, %v13476_v16 }
 0x2be   : > { %v3974_v47 = vadd.f32 %v3920_v14, %v12163_v30  ;;  %v9056_v6 = vpop.f32.mrf.mxu0  ;;  %9214 = vmatprep.mubr.msk.bf16.mxu1 %vm9882_vm4, %v13476_v16 }
 0x2bf   : > { %v9008_v51 = vpop.f32.mrf.mxu1 }
 0x2c0   : > { %v12306_v7 = vpop.f32.mrf.mxu0  ;;  %v12308_v53 = vadd.f32 %v4102_v19, %v3974_v47 }
 0x2c1   : > { %v3923_v15 = vpop.f32.mrf.mxu1 }
 0x2c2   : > { %v3975_v60 = vadd.f32 %v3923_v15, %v12173_v3  ;;  %v9057_v22 = vpop.f32.mrf.mxu0  ;;  %v13607_v15 = vld [vmem:[#allocation37_spill] sm:$0xff] }
 0x2c3   : > { %v9009_v2 = vpop.f32.mrf.mxu1  ;;  %v13608_v22 = vld [vmem:[#allocation29_spill] sm:$0xff] }
 0x2c4   : > { %v12311_v27 = vpop.f32.mrf.mxu0  ;;  %9299 = vmatmul.mubr.msk.bf16.gmra.mxu0 %vm3124_vm5, %v13603_v29  ;;  %v12315_v30 = vadd.f32 %v4105_v12, %v3975_v60 }
 0x2c5   : > { %v3928_v57 = vpop.f32.mrf.mxu1  ;;  %9215 = vmatmul.mubr.msk.bf16.gmra.mxu1 %vm3124_vm5, %v13604_v33  ;;  %9302 = vmatprep.mubr.msk.bf16.mxu0 %vm9882_vm4, %v13476_v16 }
 0x2c6   : > { %v3976_v19 = vadd.f32 %v3928_v57, %v12179_v45  ;;  %v9060_v56 = vpop.f32.mrf.mxu0  ;;  %9218 = vmatprep.mubr.msk.bf16.mxu1 %vm9882_vm4, %v13476_v16 }
 0x2c7   : > { %v9012_v3 = vpop.f32.mrf.mxu1  ;;  %v9829_v56 = vld [vmem:[%s13404_s2 + $0xf8] sm:$0xff]  }
 0x2c8   : > { %v12324_v23 = vpop.f32.mrf.mxu0  ;;  %v12326_v62 = vadd.f32 %v4110_v49, %v3976_v19 }
 0x2c9   : > { %v3931_v12 = vpop.f32.mrf.mxu1 }
 0x2ca   : > { %v3977_v5 = vadd.f32 %v3931_v12, %v12188_v28  ;;  %v9061_v34 = vpop.f32.mrf.mxu0  ;;  %v13609_v12 = vld [vmem:[#allocation40_spill] sm:$0xff] }
 0x2cb   : > { %v9013_v58 = vpop.f32.mrf.mxu1 }
 0x2cc   : > { %v12329_v24 = vpop.f32.mrf.mxu0  ;;  %9303 = vmatmul.mubr.msk.bf16.gmra.mxu0 %vm3124_vm5, %v13605_v41  ;;  %v12333_v45 = vadd.f32 %v4113_v54, %v3977_v5  ;;  %v9830_v58 = vld [vmem:[%s13404_s2 + $0xf0] sm:$0xff]  }
 0x2cd   : > { %v3936_v46 = vpop.f32.mrf.mxu1  ;;  %9219 = vmatmul.mubr.msk.bf16.gmra.mxu1 %vm3124_vm5, %v13606_v21  ;;  %9306 = vmatprep.mubr.msk.bf16.mxu0 %vm9882_vm4, %v13476_v16 }
 0x2ce   : > { %v3978_v49 = vadd.f32 %v3936_v46, %v12193_v38  ;;  %v9064_v1 = vpop.f32.mrf.mxu0  ;;  %9222 = vmatprep.mubr.msk.bf16.mxu1 %vm9882_vm4, %v13476_v16 }
 0x2cf   : > { %v9016_v28 = vpop.f32.mrf.mxu1 }
 0x2d0   : > { %v4153_v42 = vpop.f32.mrf.mxu0  ;;  %v12342_v14 = vadd.f32 %v4118_v55, %v3978_v49  ;;  %v13610_v28 = vld [vmem:[#allocation43_spill] sm:$0xff] }
 0x2d1   : > { %v3939_v52 = vpop.f32.mrf.mxu1 }
 0x2d2   : > { %v3979_v54 = vadd.f32 %v3939_v52, %v12205_v61  ;;  %v9065_v47 = vpop.f32.mrf.mxu0 }
 0x2d3   : > { %v9017_v6 = vpop.f32.mrf.mxu1 }
 0x2d4   : > { %v12345_v51 = vpop.f32.mrf.mxu0  ;;  %9307 = vmatmul.mubr.msk.bf16.gmra.mxu0 %vm3124_vm5, %v13607_v15  ;;  %v12349_v60 = vadd.f32 %v4121_v26, %v3979_v54 }
 0x2d5   : > { %v3944_v38 = vpop.f32.mrf.mxu1  ;;  %9223 = vmatmul.mubr.msk.bf16.gmra.mxu1 %vm3124_vm5, %v13608_v22  ;;  %9310 = vmatprep.mubr.msk.bf16.mxu0 %vm9882_vm4, %v13476_v16 }
 0x2d6   : > { %v3980_v55 = vadd.f32 %v3944_v38, %v12214_v63  ;;  %v9104_v2 = vpop.f32.mrf.mxu0  ;;  %9262 = vmatprep.mubr.msk.bf16.mxu1 %vm9882_vm4, %v13476_v16 }
 0x2d7   : > { %v9020_v61 = vpop.f32.mrf.mxu1 }
 0x2d8   : > { %v12358_v29 = vpop.f32.mrf.mxu0  ;;  %v12361_v57 = vadd.f32 %v12283_v4, %v3980_v55  ;;  %v13611_v55 = vld [vmem:[#allocation45_spill] sm:$0xff] }
 0x2d9   : > { %v3947_v26 = vpop.f32.mrf.mxu1 }
 0x2da   : > { %v3981_v33 = vadd.f32 %v3947_v26, %v12224_v31  ;;  %v9105_v19 = vpop.f32.mrf.mxu0 }
 0x2db   : > { %v9021_v3 = vpop.f32.mrf.mxu1 }
 0x2dc   : > { %v12367_v63 = vpop.f32.mrf.mxu0  ;;  %9311 = vmatmul.mubr.msk.bf16.gmra.mxu0 %vm3124_vm5, %v13609_v12  ;;  %v12372_v5 = vadd.f32 %v12293_v0, %v3981_v33 }
 0x2dd   : > { %v3952_v34 = vpop.f32.mrf.mxu1  ;;  %9263 = vmatmul.mubr.msk.bf16.vlgmr.msra.gmra.mxu1 %vm3124_vm5, %v11857_v10  ;;  %9314 = vmatprep.mubr.msk.bf16.mxu0 %vm9882_vm4, %v13476_v16 }
 0x2de   : > { %v3982_v31 = vadd.f32 %v3952_v34, %v12229_v18  ;;  %v9108_v4 = vpop.f32.mrf.mxu0  ;;  %9323 = vmatpush3.bf16.msra.mxu1 %v9829_v56  ;;  %9266 = vmatprep.mubr.msk.bf16.mxu1 %vm9882_vm4, %v13476_v16 }
 0x2df   : > { %v9024_v0 = vpop.f32.mrf.mxu1  ;;  %9324 = vmatprep.subr.bf16.mxu1 %v13476_v16 }
 0x2e0   : > { %v12385_v41 = vpop.f32.mrf.mxu0  ;;  %v12388_v10 = vadd.f32 %v12295_v48, %v3982_v31 }
 0x2e1   : > { %v3955_v46 = vpop.f32.mrf.mxu1 }
 0x2e2   : > { %v3983_v18 = vadd.f32 %v3955_v46, %v12238_v50  ;;  %v9109_v21 = vpop.f32.mrf.mxu0  ;;  %9325 = vmatpush3.bf16.msra.mxu1 %v9830_v58 }
 0x2e3   : > { %v9025_v49 = vpop.f32.mrf.mxu1  ;;  %9410 = vmatprep.subr.bf16.mxu1 %v13476_v16 }
 0x2e4   : > { %v12392_v1 = vpop.f32.mrf.mxu0  ;;  %9315 = vmatmul.mubr.msk.bf16.gmra.mxu0 %vm3124_vm5, %v13610_v28  ;;  %v12397_v42 = vadd.f32 %v12306_v7, %v3983_v18 }
 0x2e5   : > { %v3960_v52 = vpop.f32.mrf.mxu1  ;;  %9267 = vmatmul.mubr.msk.bf16.gmra.mxu1 %vm3124_vm5, %v11896_v17  ;;  %9318 = vmatprep.mubr.msk.bf16.mxu0 %vm9882_vm4, %v13476_v16 }
 0x2e6   : > { %v3984_v50 = vadd.f32 %v3960_v52, %v12243_v37  ;;  %v9112_v48 = vpop.f32.mrf.mxu0  ;;  %9270 = vmatprep.mubr.msk.bf16.mxu1 %vm9882_vm4, %v13476_v16 }
 0x2e7   : > { %v9028_v54 = vpop.f32.mrf.mxu1 }
 0x2e8   : > { %v12406_v47 = vpop.f32.mrf.mxu0  ;;  %v12409_v6 = vadd.f32 %v12311_v27, %v3984_v50 }
 0x2e9   : > { %v3963_v7 = vpop.f32.mrf.mxu1 }
 0x2ea   : > { %v3985_v15 = vadd.f32 %v3963_v7, %v12252_v13  ;;  %v9113_v38 = vpop.f32.mrf.mxu0 }
 0x2eb   : > { %v9029_v17 = vpop.f32.mrf.mxu1 }
 0x2ec   : > { %v12412_v22 = vpop.f32.mrf.mxu0  ;;  %9319 = vmatmul.mubr.msk.bf16.gmra.mxu0 %vm3124_vm5, %v13611_v55  ;;  %v12417_v37 = vadd.f32 %v12324_v23, %v3985_v15 }
 0x2ed   : > { %v3968_v2 = vpop.f32.mrf.mxu1  ;;  %9271 = vmatmul.mubr.msk.bf16.gmra.mxu1 %vm3124_vm5, %v11937_v25  ;;  %9362 = vmatprep.mubr.msk.bf16.mxu0 %vm9882_vm4, %v13476_v16 }
 0x2ee   : > { %v3986_v27 = vadd.f32 %v3968_v2, %v12257_v9  ;;  %v9116_v13 = vpop.f32.mrf.mxu0  ;;  %9274 = vmatprep.mubr.msk.bf16.mxu1 %vm9882_vm4, %v13476_v16 }
 0x2ef   : > { %v9032_v61 = vpop.f32.mrf.mxu1 }
 0x2f0   : > { %v4482_v26 = vpop.f32.mrf.mxu0  ;;  %v12427_v33 = vadd.f32 %v12329_v24, %v3986_v27 }
 0x2f1   : > { %v3971_v23 = vpop.f32.mrf.mxu1 }
 0x2f2   : > { %v9117_v19 = vpop.f32.mrf.mxu0 }
 0x2f3   : > { %v9033_v56 = vpop.f32.mrf.mxu1 }
 0x2f4   : > { %v12429_v3 = vpop.f32.mrf.mxu0 }
 0x2f5   : > { %v4284_v25 = vpop.f32.mrf.mxu1  ;;  %9275 = vmatmul.mubr.msk.bf16.gmra.mxu1 %vm3124_vm5, %v11966_v35 }
 0x2f6   : > { %v4338_v9 = vadd.f32 %v4284_v25, %v12308_v53  ;;  %v9120_v12 = vpop.f32.mrf.mxu0  ;;  %9278 = vmatprep.mubr.msk.bf16.mxu1 %vm9882_vm4, %v13476_v16 }
 0x2f7   : > { %v9072_v34 = vpop.f32.mrf.mxu1 }
 0x2f8   : > { %v12436_v31 = vpop.f32.mrf.mxu0  ;;  %v12439_v24 = vadd.f32 %v12345_v51, %v4338_v9 }
 0x2f9   : > { %v4287_v4 = vpop.f32.mrf.mxu1 }
 0x2fa   : > { %v4339_v58 = vadd.f32 %v4287_v4, %v12315_v30  ;;  %v9121_v0 = vpop.f32.mrf.mxu0 }
 0x2fb   : > { %v9073_v46 = vpop.f32.mrf.mxu1 }
 0x2fc   : > { %v12442_v18 = vpop.f32.mrf.mxu0  ;;  %v12445_v35 = vadd.f32 %v12358_v29, %v4339_v58 }
 0x2fd   : > { %v4292_v53 = vpop.f32.mrf.mxu1  ;;  %9279 = vmatmul.mubr.msk.bf16.gmra.mxu1 %vm3124_vm5, %v11991_v59 }
 0x2fe   : > { %v4340_v21 = vadd.f32 %v4292_v53, %v12326_v62  ;;  %v9124_v49 = vpop.f32.mrf.mxu0  ;;  %9282 = vmatprep.mubr.msk.bf16.mxu1 %vm9882_vm4, %v13476_v16 }
 0x2ff   : > { %v9076_v51 = vpop.f32.mrf.mxu1 }
 0x300   : > { %v12452_v28 = vpop.f32.mrf.mxu0  ;;  %v12455_v30 = vadd.f32 %v12367_v63, %v4340_v21 }
 0x301   : > { %v4295_v52 = vpop.f32.mrf.mxu1 }
 0x302   : > { %v4341_v29 = vadd.f32 %v4295_v52, %v12333_v45  ;;  %v9125_v50 = vpop.f32.mrf.mxu0 }
 0x303   : > { %v9077_v48 = vpop.f32.mrf.mxu1 }
 0x304   : > { %v12458_v54 = vpop.f32.mrf.mxu0  ;;  %v12461_v59 = vadd.f32 %v12385_v41, %v4341_v29 }
 0x305   : > { %v4300_v62 = vpop.f32.mrf.mxu1  ;;  %9283 = vmatmul.mubr.msk.bf16.gmra.mxu1 %vm3124_vm5, %v12022_v20 }
 0x306   : > { %v4342_v7 = vadd.f32 %v4300_v62, %v12342_v14  ;;  %v9128_v15 = vpop.f32.mrf.mxu0  ;;  %9286 = vmatprep.mubr.msk.bf16.mxu1 %vm9882_vm4, %v13476_v16 }
 0x307   : > { %v9080_v63 = vpop.f32.mrf.mxu1 }
 0x308   : > { %v4506_v38 = vpop.f32.mrf.mxu0  ;;  %v12469_v45 = vadd.f32 %v12392_v1, %v4342_v7 }
 0x309   : > { %v4303_v17 = vpop.f32.mrf.mxu1 }
 0x30a   : > { %v4343_v55 = vadd.f32 %v4303_v17, %v12349_v60  ;;  %v9129_v41 = vpop.f32.mrf.mxu0 }
 0x30b   : > { %v9081_v2 = vpop.f32.mrf.mxu1 }
 0x30c   : > { %v12472_v27 = vpop.f32.mrf.mxu0  ;;  %v12475_v20 = vadd.f32 %v12406_v47, %v4343_v55 }
 0x30d   : > { %v4308_v14 = vpop.f32.mrf.mxu1  ;;  %9287 = vmatmul.mubr.msk.bf16.gmra.mxu1 %vm3124_vm5, %v12045_v44 }
 0x30e   : > { %v4344_v13 = vadd.f32 %v4308_v14, %v12361_v57  ;;  %v9168_v61 = vpop.f32.mrf.mxu0  ;;  %9326 = vmatprep.mubr.msk.bf16.mxu1 %vm9882_vm4, %v13476_v16 }
 0x30f   : > { %v9084_v1 = vpop.f32.mrf.mxu1 }
 0x310   : > { %v4786_v23 = vpop.f32.mrf.mxu0  ;;  %v12483_v60 = vadd.f32 %v12412_v22, %v4344_v13 }
 0x311   : > { %v4311_v19 = vpop.f32.mrf.mxu1 }
 0x312   : > { %v4345_v56 = vadd.f32 %v4311_v19, %v12372_v5  ;;  %v9169_v47 = vpop.f32.mrf.mxu0 }
 0x313   : > { %v9085_v25 = vpop.f32.mrf.mxu1 }
 0x314   : > { %v12486_v9 = vpop.f32.mrf.mxu0  ;;  %v12488_v12 = vadd.f32 %v4482_v26, %v4345_v56 }
 0x315   : > { %v4316_v44 = vpop.f32.mrf.mxu1  ;;  %9327 = vmatmul.mubr.msk.bf16.vlgmr.msra.gmra.mxu1 %vm3124_vm5, %v11840_v39 }
 0x316   : > { %v4346_v57 = vadd.f32 %v4316_v44, %v12388_v10  ;;  %v9172_v34 = vpop.f32.mrf.mxu0  ;;  %9330 = vmatprep.mubr.msk.bf16.mxu1 %vm9882_vm4, %v13476_v16 }
 0x317   : > { %v9088_v22 = vpop.f32.mrf.mxu1 }
 0x318   : > { %v12495_v4 = vpop.f32.mrf.mxu0  ;;  %v12498_v5 = vadd.f32 %v12429_v3, %v4346_v57 }
 0x319   : > { %v4319_v58 = vpop.f32.mrf.mxu1 }
 0x31a   : > { %v4347_v26 = vadd.f32 %v4319_v58, %v12397_v42  ;;  %v9173_v0 = vpop.f32.mrf.mxu0 }
 0x31b   : > { %v9089_v46 = vpop.f32.mrf.mxu1 }
 0x31c   : > { %v12501_v53 = vpop.f32.mrf.mxu0  ;;  %v12504_v39 = vadd.f32 %v12436_v31, %v4347_v26 }
 0x31d   : > { %v4324_v10 = vpop.f32.mrf.mxu1  ;;  %9331 = vmatmul.mubr.msk.bf16.gmra.mxu1 %vm3124_vm5, %v11878_v43 }
 0x31e   : > { %v4348_v21 = vadd.f32 %v4324_v10, %v12409_v6  ;;  %v9176_v49 = vpop.f32.mrf.mxu0  ;;  %9334 = vmatprep.mubr.msk.bf16.mxu1 %vm9882_vm4, %v13476_v16 }
 0x31f   : > { %v9092_v3 = vpop.f32.mrf.mxu1 }
 0x320   : > { %v12511_v51 = vpop.f32.mrf.mxu0  ;;  %v12514_v42 = vadd.f32 %v12442_v18, %v4348_v21 }
 0x321   : > { %v4327_v52 = vpop.f32.mrf.mxu1 }
 0x322   : > { %v4349_v31 = vadd.f32 %v4327_v52, %v12417_v37  ;;  %v9177_v29 = vpop.f32.mrf.mxu0 }
 0x323   : > { %v9093_v50 = vpop.f32.mrf.mxu1 }
 0x324   : > { %v12517_v48 = vpop.f32.mrf.mxu0  ;;  %v12520_v43 = vadd.f32 %v12452_v28, %v4349_v31 }
 0x325   : > { %v4332_v6 = vpop.f32.mrf.mxu1  ;;  %9335 = vmatmul.mubr.msk.bf16.gmra.mxu1 %vm3124_vm5, %v11921_v32 }
 0x326   : > { %v4350_v62 = vadd.f32 %v4332_v6, %v12427_v33  ;;  %v9180_v7 = vpop.f32.mrf.mxu0  ;;  %9338 = vmatprep.mubr.msk.bf16.mxu1 %vm9882_vm4, %v13476_v16 }
 0x327   : > { %v9096_v18 = vpop.f32.mrf.mxu1 }
 0x328   : > { %v12527_v15 = vpop.f32.mrf.mxu0  ;;  %v12530_v37 = vadd.f32 %v12458_v54, %v4350_v62 }
 0x329   : > { %v4335_v63 = vpop.f32.mrf.mxu1 }
 0x32a   : > { %v9181_v38 = vpop.f32.mrf.mxu0 }
 0x32b   : > { %v9097_v28 = vpop.f32.mrf.mxu1 }
 0x32c   : > { %v12532_v17 = vpop.f32.mrf.mxu0 }
 0x32d   : > { %v4625_v55 = vpop.f32.mrf.mxu1  ;;  %9339 = vmatmul.mubr.msk.bf16.gmra.mxu1 %vm3124_vm5, %v11956_v8 }
 0x32e   : > { %v4679_v32 = vadd.f32 %v4625_v55, %v12439_v24  ;;  %v9184_v33 = vpop.f32.mrf.mxu0  ;;  %9342 = vmatprep.mubr.msk.bf16.mxu1 %vm9882_vm4, %v13476_v16 }
 0x32f   : > { %v9136_v41 = vpop.f32.mrf.mxu1 }
 0x330   : > { %v12539_v2 = vpop.f32.mrf.mxu0  ;;  %v12542_v54 = vadd.f32 %v12472_v27, %v4679_v32 }
 0x331   : > { %v4628_v14 = vpop.f32.mrf.mxu1 }
 0x332   : > { %v4680_v13 = vadd.f32 %v4628_v14, %v12445_v35  ;;  %v9185_v61 = vpop.f32.mrf.mxu0  ;;  %v9831_v35 = vld [vmem:[%s13405_s3 + $0x38] sm:$0xff]  }
 0x333   : > { %v9137_v1 = vpop.f32.mrf.mxu1  ;;  %9355 = vmatpush3.bf16.msra.mxu0 %v9831_v35 }
 0x334   : > { %v12545_v19 = vpop.f32.mrf.mxu0  ;;  %v12547_v8 = vadd.f32 %v4786_v23, %v4680_v13  ;;  %9356 = vmatprep.subr.bf16.mxu0 %v13476_v16 }
 0x335   : > { %v4633_v24 = vpop.f32.mrf.mxu1  ;;  %9343 = vmatmul.mubr.msk.bf16.gmra.mxu1 %vm3124_vm5, %v11978_v11 }
 0x336   : > { %v4681_v56 = vadd.f32 %v4633_v24, %v12455_v30  ;;  %v9188_v47 = vpop.f32.mrf.mxu0  ;;  %9346 = vmatprep.mubr.msk.bf16.mxu1 %vm9882_vm4, %v13476_v16 }
 0x337   : > { %v9140_v27 = vpop.f32.mrf.mxu1 }
 0x338   : > { %v12557_v25 = vpop.f32.mrf.mxu0  ;;  %v12560_v23 = vadd.f32 %v12486_v9, %v4681_v56 }
 0x339   : > { %v4636_v44 = vpop.f32.mrf.mxu1 }
 0x33a   : > { %v4682_v11 = vadd.f32 %v4636_v44, %v12461_v59  ;;  %v9189_v57 = vpop.f32.mrf.mxu0 }
 0x33b   : > { %v9141_v30 = vpop.f32.mrf.mxu1 }
 0x33c   : > { %v12564_v34 = vpop.f32.mrf.mxu0  ;;  %v12567_v22 = vadd.f32 %v12495_v4, %v4682_v11 }
 0x33d   : > { %v4641_v58 = vpop.f32.mrf.mxu1  ;;  %9347 = vmatmul.mubr.msk.bf16.gmra.mxu1 %vm3124_vm5, %v12012_v36 }
 0x33e   : > { %v4683_v9 = vadd.f32 %v4641_v58, %v12469_v45  ;;  %v9192_v26 = vpop.f32.mrf.mxu0  ;;  %9350 = vmatprep.mubr.msk.bf16.mxu1 %vm9882_vm4, %v13476_v16 }
 0x33f   : > { %v9144_v59 = vpop.f32.mrf.mxu1 }
 0x340   : > { %v4834_v0 = vpop.f32.mrf.mxu0  ;;  %v12575_v46 = vadd.f32 %v12501_v53, %v4683_v9  ;;  %v9832_v53 = vld [vmem:[%s13405_s3 + $0x30] sm:$0xff]  }
 0x341   : > { %v4644_v10 = vpop.f32.mrf.mxu1  ;;  %9357 = vmatpush3.bf16.msra.mxu0 %v9832_v53  ;;  %v9837_v53 = vld [vmem:[%s13405_s3 + $0x48] sm:$0xff]  }
 0x342   : > { %v4684_v21 = vadd.f32 %v4644_v10, %v12475_v20  ;;  %v9193_v4 = vpop.f32.mrf.mxu0  ;;  %9358 = vmatprep.subr.bf16.mxu0 %v13476_v16 }
 0x343   : > { %v9145_v49 = vpop.f32.mrf.mxu1 }
 0x344   : > { %v12578_v3 = vpop.f32.mrf.mxu0  ;;  %v12581_v36 = vadd.f32 %v12511_v51, %v4684_v21 }
 0x345   : > { %v4649_v45 = vpop.f32.mrf.mxu1  ;;  %9351 = vmatmul.mubr.msk.bf16.gmra.mxu1 %vm3124_vm5, %v12038_v40  ;;  %vm7081_vm5 = vcmask 256000  }
 0x346   : > { %v4685_v52 = vadd.f32 %v4649_v45, %v12483_v60  ;;  %v9232_v31 = vpop.f32.mrf.mxu0  ;;  %9418 = vmatprep.mubr.msk.bf16.mxu1 %vm9882_vm4, %v13476_v16  ;;  %v9835_v45 = vld [vmem:[%s13405_s3 + $0x20] sm:$0xff]  }
 0x347   : > { %v9148_v20 = vpop.f32.mrf.mxu1 }
 0x348   : > { %v12591_v29 = vpop.f32.mrf.mxu0  ;;  %v12594_v51 = vadd.f32 %v12517_v48, %v4685_v52 }
 0x349   : > { %v4652_v50 = vpop.f32.mrf.mxu1 }
 0x34a   : > { %v4686_v40 = vadd.f32 %v4652_v50, %v12488_v12  ;;  %v9233_v60 = vpop.f32.mrf.mxu0 }
 0x34b   : > { %v9149_v6 = vpop.f32.mrf.mxu1 }
 0x34c   : > { %v12598_v62 = vpop.f32.mrf.mxu0  ;;  %v12601_v7 = vadd.f32 %v12527_v15, %v4686_v40  ;;  %v9833_v15 = vld [vmem:[%s13405_s3 + $0x28] sm:$0xff]   ;;  %v9838_v6 = vld [vmem:[%s13405_s3 + $0x40] sm:$0xff]  }
 0x34d   : > { %v4657_v18 = vpop.f32.mrf.mxu1  ;;  %9359 = vmatpush3.bf16.msra.mxu0 %v9833_v15 }
 0x34e   : > { %v4687_v63 = vadd.f32 %v4657_v18, %v12498_v5  ;;  %v9236_v38 = vpop.f32.mrf.mxu0  ;;  %9360 = vmatprep.subr.bf16.mxu0 %v13476_v16 }
 0x34f   : > { %v9152_v28 = vpop.f32.mrf.mxu1 }
 0x350   : > { %v12604_v48 = vpop.f32.mrf.mxu0  ;;  %v12607_v55 = vadd.f32 %v12532_v17, %v4687_v63 }
 0x351   : > { %v4660_v32 = vpop.f32.mrf.mxu1  ;;  %9361 = vmatpush3.bf16.msra.mxu0 %v9835_v45 }
 0x352   : > { %v4688_v12 = vadd.f32 %v4660_v32, %v12504_v39  ;;  %v9237_v33 = vpop.f32.mrf.mxu0  ;;  %9382 = vmatprep.subr.bf16.mxu0 %v13476_v16 }
 0x353   : > { %v9153_v41 = vpop.f32.mrf.mxu1 }
 0x354   : > { %v12613_v14 = vpop.f32.mrf.mxu0  ;;  %v12616_v5 = vadd.f32 %v12539_v2, %v4688_v12 }
 0x355   : > { %v4665_v13 = vpop.f32.mrf.mxu1 }
 0x356   : > { %v4689_v61 = vadd.f32 %v4665_v13, %v12514_v42  ;;  %v9240_v17 = vpop.f32.mrf.mxu0 }
 0x357   : > { %v9156_v1 = vpop.f32.mrf.mxu1 }
 0x358   : > { %v12620_v39 = vpop.f32.mrf.mxu0  ;;  %v12623_v24 = vadd.f32 %v12545_v19, %v4689_v61 }
 0x359   : > { %v4668_v56 = vpop.f32.mrf.mxu1 }
 0x35a   : > { %v4690_v47 = vadd.f32 %v4668_v56, %v12520_v43  ;;  %v9241_v27 = vpop.f32.mrf.mxu0  ;;  %v9834_v43 = vld [vmem:[%s13405_s3 + $0x58] sm:$0xff]  }
 0x35b   : > { %v9157_v35 = vpop.f32.mrf.mxu1  ;;  %9411 = vmatpush3.bf16.msra.mxu1 %v9834_v43 }
 0x35c   : > { %v12626_v2 = vpop.f32.mrf.mxu0  ;;  %v12629_v44 = vadd.f32 %v12557_v25, %v4690_v47  ;;  %9412 = vmatprep.subr.bf16.mxu1 %v13476_v16 }
 0x35d   : > { %v4673_v42 = vpop.f32.mrf.mxu1 }
 0x35e   : > { %v4691_v11 = vadd.f32 %v4673_v42, %v12530_v37  ;;  %v9244_v57 = vpop.f32.mrf.mxu0 }
 0x35f   : > { %v9160_v30 = vpop.f32.mrf.mxu1 }
 0x360   : > { %v12632_v58 = vpop.f32.mrf.mxu0  ;;  %v12635_v19 = vadd.f32 %v12564_v34, %v4691_v11  ;;  %v9836_v34 = vld [vmem:[%s13405_s3 + $0x50] sm:$0xff]  }
 0x361   : > { %v4676_v9 = vpop.f32.mrf.mxu1  ;;  %9413 = vmatpush3.bf16.msra.mxu1 %v9836_v34 }
 0x362   : > { %v9245_v26 = vpop.f32.mrf.mxu0  ;;  %9414 = vmatprep.subr.bf16.mxu1 %v13476_v16 }
 0x363   : > { %v9161_v59 = vpop.f32.mrf.mxu1 }
 0x364   : > { %v12640_v0 = vpop.f32.mrf.mxu0 }
 0x365   : > { %v4940_v25 = vpop.f32.mrf.mxu1  ;;  %9415 = vmatpush3.bf16.msra.mxu1 %v9837_v53 }
 0x366   : > { %v4994_v37 = vadd.f32 %v4940_v25, %v12542_v54  ;;  %v9248_v10 = vpop.f32.mrf.mxu0  ;;  %9416 = vmatprep.subr.bf16.mxu1 %v13476_v16 }
 0x367   : > { %v9200_v21 = vpop.f32.mrf.mxu1 }
 0x368   : > { %v12647_v4 = vpop.f32.mrf.mxu0  ;;  %v12650_v49 = vadd.f32 %v12578_v3, %v4994_v37 }
 0x369   : > { %v4943_v52 = vpop.f32.mrf.mxu1  ;;  %9417 = vmatpush3.bf16.msra.mxu1 %v9838_v6 }
 0x36a   : > { %v4995_v54 = vadd.f32 %v4943_v52, %v12547_v8  ;;  %v9249_v31 = vpop.f32.mrf.mxu0  ;;  %9466 = vmatprep.subr.bf16.mxu1 %v13476_v16 }
 0x36b   : > { %v9201_v20 = vpop.f32.mrf.mxu1 }
 0x36c   : > { %v5150_v3 = vpop.f32.mrf.mxu0  ;;  %v12662_v50 = vadd.f32 %v12591_v29, %v4995_v54 }
 0x36d   : > { %v4948_v40 = vpop.f32.mrf.mxu1 }
 0x36e   : > { %v4996_v60 = vadd.f32 %v4948_v40, %v12560_v23  ;;  %v9252_v8 = vpop.f32.mrf.mxu0 }
 0x36f   : > { %v9204_v18 = vpop.f32.mrf.mxu1 }
 0x370   : > { %v5153_v63 = vpop.f32.mrf.mxu0  ;;  %v12670_v38 = vadd.f32 %v12598_v62, %v4996_v60 }
 0x371   : > { %v4951_v28 = vpop.f32.mrf.mxu1 }
 0x372   : > { %v4997_v29 = vadd.f32 %v4951_v28, %v12567_v22  ;;  %v9253_v32 = vpop.f32.mrf.mxu0 }
 0x373   : > { %v9205_v12 = vpop.f32.mrf.mxu1 }
 0x374   : > { %v5158_v33 = vpop.f32.mrf.mxu0  ;;  %v12675_v23 = vadd.f32 %v12604_v48, %v4997_v29 }
 0x375   : > { %v4956_v41 = vpop.f32.mrf.mxu1 }
 0x376   : > { %v4998_v15 = vadd.f32 %v4956_v41, %v12575_v46  ;;  %v9256_v13 = vpop.f32.mrf.mxu0 }
 0x377   : > { %v9208_v61 = vpop.f32.mrf.mxu1 }
 0x378   : > { %v5161_v17 = vpop.f32.mrf.mxu0  ;;  %v12679_v62 = vadd.f32 %v12613_v14, %v4998_v15 }
 0x379   : > { %v4959_v1 = vpop.f32.mrf.mxu1 }
 0x37a   : > { %v4999_v56 = vadd.f32 %v4959_v1, %v12581_v36  ;;  %v9257_v47 = vpop.f32.mrf.mxu0 }
 0x37b   : > { %v9209_v22 = vpop.f32.mrf.mxu1 }
 0x37c   : > { %v5437_v27 = vpop.f32.mrf.mxu0  ;;  %v12683_v35 = vadd.f32 %v12620_v39, %v4999_v56 }
 0x37d   : > { %v4964_v48 = vpop.f32.mrf.mxu1 }
 0x37e   : > { %v5000_v42 = vadd.f32 %v4964_v48, %v12594_v51  ;;  %v9296_v11 = vpop.f32.mrf.mxu0 }
 0x37f   : > { %v9212_v46 = vpop.f32.mrf.mxu1 }
 0x380   : > { %v5440_v57 = vpop.f32.mrf.mxu0  ;;  %v12687_v30 = vadd.f32 %v12626_v2, %v5000_v42 }
 0x381   : > { %v4967_v14 = vpop.f32.mrf.mxu1 }
 0x382   : > { %v5001_v9 = vadd.f32 %v4967_v14, %v12601_v7  ;;  %v9297_v26 = vpop.f32.mrf.mxu0 }
 0x383   : > { %v9213_v36 = vpop.f32.mrf.mxu1 }
 0x384   : > { %v5445_v43 = vpop.f32.mrf.mxu0  ;;  %v12691_v59 = vadd.f32 %v12632_v58, %v5001_v9 }
 0x385   : > { %v4972_v39 = vpop.f32.mrf.mxu1 }
 0x386   : > { %v5002_v25 = vadd.f32 %v4972_v39, %v12607_v55  ;;  %v9300_v37 = vpop.f32.mrf.mxu0 }
 0x387   : > { %v9216_v51 = vpop.f32.mrf.mxu1 }
 0x388   : > { %v5448_v10 = vpop.f32.mrf.mxu0  ;;  %v12695_v34 = vadd.f32 %v12640_v0, %v5002_v25 }
 0x389   : > { %v4975_v2 = vpop.f32.mrf.mxu1 }
 0x38a   : > { %v5003_v21 = vadd.f32 %v4975_v2, %v12616_v5  ;;  %v9301_v45 = vpop.f32.mrf.mxu0 }
 0x38b   : > { %v9217_v7 = vpop.f32.mrf.mxu1 }
 0x38c   : > { %v5453_v52 = vpop.f32.mrf.mxu0  ;;  %v12699_v54 = vadd.f32 %v12647_v4, %v5003_v21 }
 0x38d   : > { %v4980_v58 = vpop.f32.mrf.mxu1 }
 0x38e   : > { %v5004_v31 = vadd.f32 %v4980_v58, %v12623_v24  ;;  %v9304_v53 = vpop.f32.mrf.mxu0 }
 0x38f   : > { %v9220_v55 = vpop.f32.mrf.mxu1 }
 0x390   : > { %v5456_v20 = vpop.f32.mrf.mxu0  ;;  %v12702_v40 = vadd.f32 %v5150_v3, %v5004_v31 }
 0x391   : > { %v4983_v60 = vpop.f32.mrf.mxu1 }
 0x392   : > { %v5005_v0 = vadd.f32 %v4983_v60, %v12629_v44  ;;  %v9305_v8 = vpop.f32.mrf.mxu0 }
 0x393   : > { %v9221_v6 = vpop.f32.mrf.mxu1 }
 0x394   : > { %v5461_v5 = vpop.f32.mrf.mxu0  ;;  %v12705_v18 = vadd.f32 %v5153_v63, %v5005_v0 }
 0x395   : > { %v4988_v28 = vpop.f32.mrf.mxu1 }
 0x396   : > { %v5006_v4 = vadd.f32 %v4988_v28, %v12635_v19  ;;  %v9308_v29 = vpop.f32.mrf.mxu0 }
 0x397   : > { %v9224_v32 = vpop.f32.mrf.mxu1 }
 0x398   : > { %v5464_v12 = vpop.f32.mrf.mxu0  ;;  %v12708_v24 = vadd.f32 %v5158_v33, %v5006_v4 }
 0x399   : > { %v4991_v41 = vpop.f32.mrf.mxu1 }
 0x39a   : > { %v9309_v15 = vpop.f32.mrf.mxu0 }
 0x39b   : > { %v9225_v3 = vpop.f32.mrf.mxu1 }
 0x39c   : > { %v5469_v13 = vpop.f32.mrf.mxu0 }
 0x39d   : > { %v5280_v61 = vpop.f32.mrf.mxu1 }
 0x39e   : > { %v5334_v44 = vadd.f32 %v5280_v61, %v12650_v49  ;;  %v9312_v17 = vpop.f32.mrf.mxu0 }
 0x39f   : > { %v9264_v1 = vpop.f32.mrf.mxu1 }
 0x3a0   : > { %v5472_v56 = vpop.f32.mrf.mxu0  ;;  %v5491_v63 = vadd.f32 %v5437_v27, %v5334_v44 }
 0x3a1   : > { %v5283_v47 = vpop.f32.mrf.mxu1 }
 0x3a2   : > { %v5335_v22 = vadd.f32 %v5283_v47, %v12662_v50  ;;  %v9313_v19 = vpop.f32.mrf.mxu0 }
 0x3a3   : > { %v9265_v48 = vpop.f32.mrf.mxu1 }
 0x3a4   : > { %v5477_v42 = vpop.f32.mrf.mxu0  ;;  %v5492_v11 = vadd.f32 %v5440_v57, %v5335_v22 }
 0x3a5   : > { %v5288_v33 = vpop.f32.mrf.mxu1 }
 0x3a6   : > { %v5336_v46 = vadd.f32 %v5288_v33, %v12670_v38  ;;  %v9316_v14 = vpop.f32.mrf.mxu0 }
 0x3a7   : > { %v9268_v9 = vpop.f32.mrf.mxu1 }
 0x3a8   : > { %v5480_v26 = vpop.f32.mrf.mxu0  ;;  %v5493_v36 = vadd.f32 %v5445_v43, %v5336_v46 }
 0x3a9   : > { %v5291_v39 = vpop.f32.mrf.mxu1 }
 0x3aa   : > { %v5337_v49 = vadd.f32 %v5291_v39, %v12675_v23  ;;  %v9317_v25 = vpop.f32.mrf.mxu0 }
 0x3ab   : > { %v9269_v37 = vpop.f32.mrf.mxu1 }
 0x3ac   : > { %v5485_v27 = vpop.f32.mrf.mxu0  ;;  %v5494_v51 = vadd.f32 %v5448_v10, %v5337_v49 }
 0x3ad   : > { %v5296_v2 = vpop.f32.mrf.mxu1 }
 0x3ae   : > { %v5338_v50 = vadd.f32 %v5296_v2, %v12679_v62  ;;  %v9320_v21 = vpop.f32.mrf.mxu0 }
 0x3af   : > { %v9272_v45 = vpop.f32.mrf.mxu1 }
 0x3b0   : > { %v5488_v57 = vpop.f32.mrf.mxu0  ;;  %v12715_v7 = vadd.f32 %v5453_v52, %v5338_v50 }
 0x3b1   : > { %v5299_v38 = vpop.f32.mrf.mxu1 }
 0x3b2   : > { %v5339_v58 = vadd.f32 %v5299_v38, %v12683_v35  ;;  %v9321_v31 = vpop.f32.mrf.mxu0 }
 0x3b3   : > { %v9273_v43 = vpop.f32.mrf.mxu1 }
 0x3b4   : > { %v12718_v53 = vadd.f32 %v5456_v20, %v5339_v58 }
 0x3b5   : > { %v5304_v23 = vpop.f32.mrf.mxu1 }
 0x3b6   : > { %v5340_v55 = vadd.f32 %v5304_v23, %v12687_v30 }
 0x3b7   : > { %v9276_v60 = vpop.f32.mrf.mxu1 }
 0x3b8   : > { %v12721_v10 = vadd.f32 %v5461_v5, %v5340_v55 }
 0x3b9   : > { %v5307_v0 = vpop.f32.mrf.mxu1 }
 0x3ba   : > { %v5341_v62 = vadd.f32 %v5307_v0, %v12691_v59 }
 0x3bb   : > { %v9277_v8 = vpop.f32.mrf.mxu1 }
 0x3bc   : > { %v12724_v6 = vadd.f32 %v5464_v12, %v5341_v62 }
 0x3bd   : > { %v5312_v52 = vpop.f32.mrf.mxu1 }
 0x3be   : > { %v5342_v28 = vadd.f32 %v5312_v52, %v12695_v34 }
 0x3bf   : > { %v9280_v35 = vpop.f32.mrf.mxu1 }
 0x3c0   : > { %v12727_v4 = vadd.f32 %v5469_v13, %v5342_v28 }
 0x3c1   : > { %v5315_v20 = vpop.f32.mrf.mxu1 }
 0x3c2   : > { %v5343_v29 = vadd.f32 %v5315_v20, %v12699_v54  ;;  %v9842_v20 = vld [vmem:[%s13405_s3 + $0x98] sm:$0xff]  }
 0x3c3   : > { %v9281_v32 = vpop.f32.mrf.mxu1 }
 0x3c4   : > { %v12730_v30 = vadd.f32 %v5472_v56, %v5343_v29 }
 0x3c5   : > { %v5320_v5 = vpop.f32.mrf.mxu1 }
 0x3c6   : > { %v5344_v41 = vadd.f32 %v5320_v5, %v12702_v40  ;;  %v12744_v40 = vld [vmem:[%s13407_s5] ss:$0 sm:$0xff] }
 0x3c7   : > { %v9284_v15 = vpop.f32.mrf.mxu1 }
 0x3c8   : > { %v12733_v59 = vadd.f32 %v5477_v42, %v5344_v41 }
 0x3c9   : > { %v5323_v12 = vpop.f32.mrf.mxu1 }
 0x3ca   : > { %v5345_v3 = vadd.f32 %v5323_v12, %v12705_v18 }
 0x3cb   : > { %v9285_v61 = vpop.f32.mrf.mxu1 }
 0x3cc   : > { %v12736_v34 = vadd.f32 %v5480_v26, %v5345_v3  ;;  %v9839_v61 = vld [vmem:[%s13405_s3 + $0x18] sm:$0xff]  }
 0x3cd   : > { %v5328_v13 = vpop.f32.mrf.mxu1 }
 0x3ce   : > { %v5346_v44 = vadd.f32 %v5328_v13, %v12708_v24 }
 0x3cf   : > { %v9288_v17 = vpop.f32.mrf.mxu1 }
 0x3d0   : > { %v12739_v54 = vadd.f32 %v5485_v27, %v5346_v44 }
 0x3d1   : > { %v5331_v1 = vpop.f32.mrf.mxu1 }
 0x3d3   : > { %v9289_v56 = vpop.f32.mrf.mxu1 }
 0x3d5   : > { %v5594_v47 = vpop.f32.mrf.mxu1 }
 0x3d6   : > { %v5648_v22 = vadd.f32 %v5594_v47, %v5491_v63 }
 0x3d7   : > { %v9328_v19 = vpop.f32.mrf.mxu1 }
 0x3d8   : > { %v5668_v48 = vadd.f32 %v12744_v40, %v5648_v22 }
 0x3d9   : > { %v5597_v18 = vpop.f32.mrf.mxu1 }
 0x3da   : > { %v5649_v42 = vadd.f32 %v5597_v18, %v5492_v11  ;;  %v5681_v14 = vmax.f32 %v5668_v48, 0.0 }
 0x3db   : > { %v9329_v33 = vpop.f32.mrf.mxu1 }
 0x3dc   : > { %v5669_v24 = vadd.f32 %v12744_v40, %v5649_v42  ;;  %v9843_v42 = vld [vmem:[%s13405_s3 + $0x90] sm:$0xff]  }
 0x3dd   : > { %v5602_v46 = vpop.f32.mrf.mxu1 }
 0x3de   : > { %v5682_v9 = vmax.f32 %v5669_v24, 0.0  ;;  %v5650_v26 = vadd.f32 %v5602_v46, %v5493_v36 }
 0x3df   : > { %v9332_v39 = vpop.f32.mrf.mxu1 }
 0x3e0   : > { %v12748_v49 = vpack.c.bf16 %v5682_v9, %v5681_v14  ;;  %v5670_v27 = vadd.f32 %v12744_v40, %v5650_v26  ;;  %v9840_v26 = vld [vmem:[%s13405_s3 + $0x10] sm:$0xff]  }
 0x3e1   : > { %v5605_v63 = vpop.f32.mrf.mxu1 }
 0x3e2   : > { %v5782_v25 = vshrl.u32 %v12748_v49, 16  ;;  %v5784_v37 = vshll.u32 %v12748_v49, 16  ;;  %v5651_v2 = vadd.f32 %v5605_v63, %v5494_v51  ;;  %v5683_v36 = vmax.f32 %v5670_v27, 0.0 }
 0x3e3   : > { %v9333_v50 = vpop.f32.mrf.mxu1  ;;  %v6046_v51 = vrot.slane %v12748_v49, 1  ;;  %v6328_v41 = vrot.slane %v12748_v49, 6 }
 0x3e4   : > { %v5671_v11 = vadd.f32 %v12744_v40, %v5651_v2  ;;  %v6177_v21 = vrot.slane %v5782_v25, 5  ;;  %v6178_v45 = vrot.slane %v5784_v37, 6  ;;  %v6462_v38 = vrot.slane %v5782_v25, 6 }
 0x3e5   : > { %v5610_v57 = vpop.f32.mrf.mxu1  ;;  %v6463_v58 = vrot.slane %v5784_v37, 7  ;;  %v5786_v60 = vrot.slane %v5784_v37, 1 }
 0x3e6   : > { %v5684_v31 = vmax.f32 %v5671_v11, 0.0  ;;  %v5652_v43 = vadd.f32 %v5610_v57, %v12715_v7  ;;  %v6179_v23 = vor.u32 %v6178_v45, %v6177_v21 }
 0x3e7   : > { %v9336_v55 = vpop.f32.mrf.mxu1  ;;  %v6464_v0 = vor.u32 %v6463_v58, %v6462_v38  ;;  %v5787_v32 = vor.u32 %v5786_v60, %v5782_v25  ;;  %v9845_v38 = vld [vmem:[%s13405_s3 + $0x88] sm:$0xff]  }
 0x3e8   : > { %v12755_v62 = vpack.c.bf16 %v5684_v31, %v5683_v36  ;;  %v5672_v52 = vadd.f32 %v12744_v40, %v5652_v43 }
 0x3e9   : > { %v5613_v8 = vpop.f32.mrf.mxu1 }
 0x3ea   : > { %v5653_v28 = vadd.f32 %v5613_v8, %v12718_v53  ;;  %v6047_v35 = vrot.slane %v12755_v62, 1  ;;  %v5789_v7 = vshll.u32 %v12755_v62, 16  ;;  %v5793_v5 = vshrl.u32 %v12755_v62, 16 }
 0x3eb   : > { %v9337_v29 = vpop.f32.mrf.mxu1  ;;  %v6329_v15 = vrot.slane %v12755_v62, 6  ;;  %v5685_v22 = vmax.f32 %v5672_v52, 0.0  ;;  %v6609_v39 = vrot.slane %v12755_v62, 3  ;;  %v6894_v63 = vrot.slane %v12755_v62, 4 }
 0x3ec   : > { %v5673_v12 = vadd.f32 %v12744_v40, %v5653_v28  ;;  %v6048_v53 = vsel %vm6045_vm8, %v6046_v51, %v6047_v35  ;;  %v5791_v3 = vrot.slane %v5789_v7, 1  ;;  %v6181_v13 = vrot.slane %v5789_v7, 6 }
 0x3ed   : > { %v5618_v44 = vpop.f32.mrf.mxu1  ;;  %9419 = vmatmul.mubr.msk.bf16.vlgmr.msra.gmra.mxu1 %vm5844_vm7, %v6048_v53  ;;  %v12775_v17 = vsel %vm4700_vm6, %v6328_v41, %v6329_v15  ;;  %v6180_v1 = vrot.slane %v5793_v5, 5  ;;  %v6465_v56 = vrot.slane %v5793_v5, 6  ;;  %v6466_v47 = vrot.slane %v5789_v7, 7  ;;  %v9846_v41 = vld [vmem:[%s13405_s3 + $0x80] sm:$0xff]  }
 0x3ee   : > { %v5686_v19 = vmax.f32 %v5673_v12, 0.0  ;;  %v5654_v18 = vadd.f32 %v5618_v44, %v12721_v10  ;;  %v5792_v48 = vsel %vm698_vm0, %v5787_v32, %v5791_v3  ;;  %9422 = vmatprep.mubr.msk.bf16.mxu1 %vm9882_vm4, %v13476_v16  ;;  %9467 = vmatpush3.bf16.msra.mxu1 %v9842_v20  ;;  %v6743_v10 = vrot.slane %v5793_v5, 3 }
 0x3ef   : > { %v9340_v33 = vpop.f32.mrf.mxu1  ;;  %9363 = vmatmul.mubr.msk.bf16.vlgmr.msra.gmra.mxu0 %vm5844_vm7, %v5792_v48  ;;  %9468 = vmatprep.subr.bf16.mxu1 %v13476_v16  ;;  %v12786_v24 = vor.u32 %v6181_v13, %v6180_v1  ;;  %v12788_v46 = vor.u32 %v6466_v47, %v6465_v56  ;;  %v6744_v14 = vrot.slane %v5789_v7, 4  ;;  %v5795_v37 = vor.u32 %v5793_v5, %v5791_v3  ;;  %v9844_v13 = vld [vmem:[%s13405_s3] sm:$0xff]  }
 0x3f0   : > { %v12790_v9 = vpack.c.bf16 %v5686_v19, %v5685_v22  ;;  %9383 = vmatpush3.bf16.msra.mxu0 %v9839_v61  ;;  %9366 = vmatprep.mubr.msk.bf16.mxu0 %vm9882_vm4, %v13476_v16  ;;  %v5674_v11 = vadd.f32 %v12744_v40, %v5654_v18 }
 0x3f1   : > { %v5621_v25 = vpop.f32.mrf.mxu1  ;;  %9384 = vmatprep.subr.bf16.mxu0 %v13476_v16  ;;  %v12802_v27 = vsel %vm4351_vm2, %v6179_v23, %v12786_v24  ;;  %v12806_v2 = vsel %vm6461_vm9, %v6464_v0, %v12788_v46  ;;  %v12808_v50 = vor.u32 %v6744_v14, %v6743_v10  ;;  %v9841_v0 = vld [vmem:[%s13405_s3 + $0x8] sm:$0xff]  }
 0x3f2   : > { %v5655_v21 = vadd.f32 %v5621_v25, %v12724_v6  ;;  %v6049_v45 = vrot.slane %v12790_v9, 1  ;;  %v12814_v57 = vshll.u32 %v12790_v9, 16  ;;  %9469 = vmatpush3.bf16.msra.mxu1 %v9843_v42  ;;  %v12820_v36 = vshrl.u32 %v12790_v9, 16 }
 0x3f3   : > { %v9341_v58 = vpop.f32.mrf.mxu1  ;;  %9470 = vmatprep.subr.bf16.mxu1 %v13476_v16  ;;  %v6331_v31 = vrot.slane %v12790_v9, 6  ;;  %v6610_v6 = vrot.slane %v12790_v9, 3  ;;  %v6895_v43 = vrot.slane %v12790_v9, 4  ;;  %v5687_v20 = vmax.f32 %v5674_v11, 0.0 }
 0x3f4   : > { %v5675_v23 = vadd.f32 %v12744_v40, %v5655_v21  ;;  %v6050_v55 = vsel %vm6045_vm8, %v6047_v35, %v6049_v45  ;;  %v5799_v60 = vrot.slane %v12814_v57, 1  ;;  %9385 = vmatpush3.bf16.msra.mxu0 %v9840_v26  ;;  %v6185_v8 = vrot.slane %v12814_v57, 6 }
 0x3f5   : > { %v5626_v51 = vpop.f32.mrf.mxu1  ;;  %9423 = vmatmul.mubr.msk.bf16.gmra.mxu1 %vm5844_vm7, %v6050_v55  ;;  %9386 = vmatprep.subr.bf16.mxu0 %v13476_v16  ;;  %v12836_v52 = vsel %vm4700_vm6, %v6329_v15, %v6331_v31  ;;  %v12839_v28 = vsel %vm6608_vm10, %v6609_v39, %v6610_v6  ;;  %v6184_v35 = vrot.slane %v12820_v36, 5  ;;  %v12843_v7 = vsel %vm6893_vm11, %v6894_v63, %v6895_v43 }
 0x3f6   : > { %v5688_v29 = vmax.f32 %v5675_v23, 0.0  ;;  %v5656_v32 = vadd.f32 %v5626_v51, %v12727_v4  ;;  %v5800_v5 = vsel %vm698_vm0, %v5795_v37, %v5799_v60  ;;  %9426 = vmatprep.mubr.msk.bf16.mxu1 %vm9882_vm4, %v13476_v16  ;;  %9471 = vmatpush3.bf16.msra.mxu1 %v9845_v38  ;;  %v6469_v53 = vrot.slane %v12820_v36, 6 }
 0x3f7   : > { %v9344_v15 = vpop.f32.mrf.mxu1  ;;  %9367 = vmatmul.mubr.msk.bf16.gmra.mxu0 %vm5844_vm7, %v5800_v5  ;;  %9472 = vmatprep.subr.bf16.mxu1 %v13476_v16  ;;  %v6186_v12 = vor.u32 %v6185_v8, %v6184_v35  ;;  %v6470_v4 = vrot.slane %v12814_v57, 7  ;;  %v5803_v61 = vor.u32 %v12820_v36, %v5799_v60  ;;  %v6746_v22 = vrot.slane %v12820_v36, 3 }
 0x3f8   : > { %v12856_v3 = vpack.c.bf16 %v5688_v29, %v5687_v20  ;;  %9370 = vmatprep.mubr.msk.bf16.mxu0 %vm9882_vm4, %v13476_v16  ;;  %9387 = vmatpush3.bf16.msra.mxu0 %v9841_v0  ;;  %v5676_v44 = vadd.f32 %v12744_v40, %v5656_v32  ;;  %v6747_v42 = vrot.slane %v12814_v57, 4 }
 0x3f9   : > { %v5629_v1 = vpop.f32.mrf.mxu1  ;;  %9388 = vmatprep.subr.bf16.mxu0 %v13476_v16  ;;  %v12868_v56 = vsel %vm4351_vm2, %v12786_v24, %v6186_v12  ;;  %v12870_v47 = vor.u32 %v6470_v4, %v6469_v53 }
 0x3fa   : > { %v5657_v19 = vadd.f32 %v5629_v1, %v12730_v30  ;;  %v6051_v18 = vrot.slane %v12856_v3, 1  ;;  %v12876_v48 = vshll.u32 %v12856_v3, 16  ;;  %9473 = vmatpush3.bf16.msra.mxu1 %v9846_v41  ;;  %v12880_v10 = vshrl.u32 %v12856_v3, 16 }
 0x3fb   : > { %v9345_v33 = vpop.f32.mrf.mxu1  ;;  %v6333_v24 = vrot.slane %v12856_v3, 6  ;;  %9522 = vmatprep.subr.bf16.mxu1 %v13476_v16  ;;  %v6612_v14 = vrot.slane %v12856_v3, 3  ;;  %v6897_v30 = vrot.slane %v12856_v3, 4  ;;  %v5689_v38 = vmax.f32 %v5676_v44, 0.0 }
 0x3fc   : > { %v5677_v26 = vadd.f32 %v12744_v40, %v5657_v19  ;;  %v6052_v39 = vsel %vm6045_vm8, %v6049_v45, %v6051_v18  ;;  %v5807_v63 = vrot.slane %v12876_v48, 1  ;;  %9389 = vmatpush3.bf16.msra.mxu0 %v9844_v13  ;;  %v6189_v25 = vrot.slane %v12876_v48, 6 }
 0x3fd   : > { %v5634_v37 = vpop.f32.mrf.mxu1  ;;  %9427 = vmatmul.mubr.msk.bf16.gmra.mxu1 %vm5844_vm7, %v6052_v39  ;;  %9438 = vmatprep.subr.bf16.mxu0 %v13476_v16  ;;  %v12893_v11 = vsel %vm4700_vm6, %v6331_v31, %v6333_v24  ;;  %v12896_v21 = vsel %vm6608_vm10, %v6610_v6, %v6612_v14  ;;  %v6188_v57 = vrot.slane %v12880_v10, 5  ;;  %v12900_v45 = vsel %vm6893_vm11, %v6895_v43, %v6897_v30 }
 0x3fe   : > { %v5690_v58 = vmax.f32 %v5677_v26, 0.0  ;;  %v5658_v36 = vadd.f32 %v5634_v37, %v12733_v59  ;;  %v5808_v23 = vsel %vm698_vm0, %v5803_v61, %v5807_v63  ;;  %9430 = vmatprep.mubr.msk.bf16.mxu1 %vm9882_vm4, %v13476_v16  ;;  %v12910_v55 = vsel %vm6461_vm9, %v12788_v46, %v12870_v47 }
 0x3ff   : > { %v9348_v31 = vpop.f32.mrf.mxu1  ;;  %9371 = vmatmul.mubr.msk.bf16.gmra.mxu0 %vm5844_vm7, %v5808_v23  ;;  %v6190_v6 = vor.u32 %v6189_v25, %v6188_v57  ;;  %v6473_v43 = vrot.slane %v12880_v10, 6  ;;  %v6474_v60 = vrot.slane %v12876_v48, 7  ;;  %v5811_v8 = vor.u32 %v12880_v10, %v5807_v63 }
 0x400   : > { %v12914_v0 = vpack.c.bf16 %v5690_v58, %v5689_v38  ;;  %v5678_v59 = vadd.f32 %v12744_v40, %v5658_v36  ;;  %9374 = vmatprep.mubr.msk.bf16.mxu0 %vm9882_vm4, %v13476_v16  ;;  %v6748_v51 = vor.u32 %v6747_v42, %v6746_v22  ;;  %v6750_v29 = vrot.slane %v12880_v10, 3 }
 0x401   : > { %v5637_v35 = vpop.f32.mrf.mxu1  ;;  %v12921_v20 = vsel %vm4351_vm2, %v6186_v12, %v6190_v6  ;;  %v6475_v46 = vor.u32 %v6474_v60, %v6473_v43  ;;  %v6751_v32 = vrot.slane %v12876_v48, 4 }
 0x402   : > { %v5691_v5 = vmax.f32 %v5678_v59, 0.0  ;;  %v5659_v41 = vadd.f32 %v5637_v35, %v12736_v34  ;;  %v6053_v15 = vrot.slane %v12914_v0, 1  ;;  %v12928_v53 = vshll.u32 %v12914_v0, 16 }
 0x403   : > { %v9349_v4 = vpop.f32.mrf.mxu1  ;;  %v5817_v61 = vshrl.u32 %v12914_v0, 16  ;;  %v6335_v13 = vrot.slane %v12914_v0, 6  ;;  %v6614_v12 = vrot.slane %v12914_v0, 3  ;;  %v6899_v44 = vrot.slane %v12914_v0, 4 }
 0x404   : > { %v5679_v1 = vadd.f32 %v12744_v40, %v5659_v41  ;;  %v6054_v22 = vsel %vm6045_vm8, %v6051_v18, %v6053_v15  ;;  %v5815_v34 = vrot.slane %v12928_v53, 1  ;;  %v6193_v19 = vrot.slane %v12928_v53, 6  ;;  %vm7094_vm8 = vmand %vm7081_vm5, %vm4351_vm2 }
 0x405   : > { %v5642_v48 = vpop.f32.mrf.mxu1  ;;  %9431 = vmatmul.mubr.msk.bf16.gmra.mxu1 %vm5844_vm7, %v6054_v22  ;;  %v12940_v42 = vsel %vm4700_vm6, %v6333_v24, %v6335_v13  ;;  %v12943_v33 = vsel %vm6608_vm10, %v6612_v14, %v6614_v12  ;;  %v6192_v10 = vrot.slane %v5817_v61, 5  ;;  %v12946_v26 = vsel %vm6893_vm11, %v6897_v30, %v6899_v44 }
 0x406   : > { %v5692_v39 = vmax.f32 %v5679_v1, 0.0  ;;  %v5660_v18 = vadd.f32 %v5642_v48, %v12739_v54  ;;  %v5816_v63 = vsel %vm698_vm0, %v5811_v8, %v5815_v34  ;;  %9434 = vmatprep.mubr.msk.bf16.mxu1 %vm9882_vm4, %v13476_v16  ;;  %v5819_v25 = vor.u32 %v5817_v61, %v5815_v34 }
 0x407   : > { %v9352_v37 = vpop.f32.mrf.mxu1  ;;  %9375 = vmatmul.mubr.msk.bf16.gmra.mxu0 %vm5844_vm7, %v5816_v63  ;;  %v6194_v24 = vor.u32 %v6193_v19, %v6192_v10  ;;  %v12955_v14 = vsel %vm6461_vm9, %v12870_v47, %v6475_v46  ;;  %v6477_v57 = vrot.slane %v5817_v61, 6  ;;  %v6478_v30 = vrot.slane %v12928_v53, 7 }
 0x408   : > { %v5699_v38 = vpack.c.bf16 %v5692_v39, %v5691_v5  ;;  %v5680_v54 = vadd.f32 %v12744_v40, %v5660_v18  ;;  %9378 = vmatprep.mubr.msk.bf16.mxu0 %vm9882_vm4, %v13476_v16  ;;  %v12963_v58 = vsel %vm6742_vm12, %v12808_v50, %v6748_v51  ;;  %v6752_v36 = vor.u32 %v6751_v32, %v6750_v29 }
 0x409   : > { %v5645_v23 = vpop.f32.mrf.mxu1  ;;  %v12966_v31 = vsel %vm4351_vm2, %v6190_v6, %v6194_v24  ;;  %v6479_v47 = vor.u32 %v6478_v30, %v6477_v57  ;;  %v6754_v43 = vrot.slane %v5817_v61, 3  ;;  %v6755_v60 = vrot.slane %v12928_v53, 4 }
 0x40a   : > { %v5693_v59 = vmax.f32 %v5680_v54, 0.0  ;;  %v6337_v8 = vrot.slane %v5699_v38, 6  ;;  %v6616_v35 = vrot.slane %v5699_v38, 3  ;;  %v6197_v40 = vshrl.u32 %v5699_v38, 16  ;;  %v9850_v54 = vld [vmem:[%s13405_s3 + $0xd8] sm:$0xff]  }
 0x40b   : > { %v9353_v5 = vpop.f32.mrf.mxu1  ;;  %v6200_v41 = vshll.u32 %v5699_v38, 16  ;;  %v6901_v4 = vrot.slane %v5699_v38, 4  ;;  %v12970_v1 = vsel %vm6461_vm9, %v6475_v46, %v6479_v47  ;;  %v12973_v50 = vsel %vm6742_vm12, %v6748_v51, %v6752_v36 }
 0x40c   : > { %v5700_v29 = vpack.c.bf16 %v5693_v59, %v5693_v59  ;;  %v12976_v6 = vsel %vm4700_vm6, %v6335_v13, %v6337_v8  ;;  %v12979_v32 = vsel %vm6608_vm10, %v6614_v12, %v6616_v35  ;;  %v6199_v53 = vrot.slane %v6197_v40, 5  ;;  %v9853_v59 = vld [vmem:[%s13405_s3 + $0xc8] sm:$0xff]   ;;  %v9854_v8 = vld [vmem:[%s13405_s3 + $0xc0] sm:$0xff]  }
 0x40d   : > { %9435 = vmatmul.mubr.msk.bf16.gmra.mxu1 %vm5844_vm7, %v6053_v15  ;;  %v6202_v61 = vrot.slane %v6200_v41, 6  ;;  %v12983_v22 = vsel %vm6893_vm11, %v6899_v44, %v6901_v4  ;;  %v6481_v34 = vrot.slane %v6197_v40, 6  ;;  %v6482_v46 = vrot.slane %v6200_v41, 7 }
 0x40e   : > { %v6763_v19 = vshrl.u32 %v5700_v29, 16  ;;  %v6766_v48 = vshll.u32 %v5700_v29, 16  ;;  %9474 = vmatprep.mubr.msk.bf16.mxu1 %vm9882_vm4, %v13476_v16  ;;  %v6618_v51 = vrot.slane %v5700_v29, 3  ;;  %v6903_v13 = vrot.slane %v5700_v29, 4 }
 0x40f   : > { %9379 = vmatmul.mubr.msk.bf16.gmra.mxu0 %vm5844_vm7, %v5819_v25  ;;  %v6203_v12 = vor.u32 %v6202_v61, %v6199_v53  ;;  %v6483_v10 = vor.u32 %v6482_v46, %v6481_v34  ;;  %v6756_v39 = vor.u32 %v6755_v60, %v6754_v43  ;;  %v6758_v18 = vrot.slane %v6197_v40, 3  ;;  %v9847_v60 = vld [vmem:[%s13405_s3 + $0x78] sm:$0xff]  }
 0x410   : > { %v6765_v15 = vrot.slane %v6763_v19, 3  ;;  %v6768_v63 = vrot.slane %v6766_v48, 4  ;;  %9390 = vmatprep.mubr.msk.bf16.mxu0 %vm9882_vm4, %v13476_v16  ;;  %v12991_v44 = vsel %vm6608_vm10, %v6616_v35, %v6618_v51  ;;  %v12994_v37 = vsel %vm6893_vm11, %v6901_v4, %v6903_v13 }
 0x411   : > { %v12997_v57 = vsel %vm4351_vm2, %v6194_v24, %v6203_v12  ;;  %v13000_v25 = vsel %vm6461_vm9, %v6479_v47, %v6483_v10  ;;  %v13003_v30 = vsel %vm6742_vm12, %v6752_v36, %v6756_v39  ;;  %v6759_v38 = vrot.slane %v6200_v41, 4  ;;  %v9851_v47 = vld [vmem:[%s13405_s3 + $0xd0] sm:$0xff]  }
 0x412   : > { %v6769_v23 = vor.u32 %v6768_v63, %v6765_v15  ;;  %vm7075_vm0 = vcmask 257027   ;;  %vm7106_vm2 = vcmask 257026   ;;  %vm7112_vm10 = vcmask 254976  }
 0x413   : > { %v6760_v43 = vor.u32 %v6759_v38, %v6758_v18 }
 0x415   : > { %9475 = vmatmul.mubr.msk.bf16.vlgmr.msra.gmra.mxu1 %vm5844_vm7, %v12775_v17  ;;  %v13014_v24 = vsel %vm6742_vm12, %v6756_v39, %v6760_v43  ;;  %v13017_v36 = vsel %vm6742_vm12, %v6760_v43, %v6769_v23  ;;  %v9848_v17 = vld [vmem:[%s13405_s3 + $0x70] sm:$0xff]   ;;  %vm7125_vm12 = vmand %vm7112_vm10, %vm6461_vm9  ;;  %vm7142_vm9 = vcmask 257025  }
 0x416   : > { %9478 = vmatprep.mubr.msk.bf16.mxu1 %vm9882_vm4, %v13476_v16  ;;  %9523 = vmatpush3.bf16.msra.mxu1 %v9850_v54 }
 0x417   : > { %9391 = vmatmul.mubr.msk.bf16.vlgmr.msra.gmra.mxu0 %vm5844_vm7, %v12748_v49  ;;  %9524 = vmatprep.subr.bf16.mxu1 %v13476_v16  ;;  %v9849_v49 = vld [vmem:[%s13405_s3 + $0x68] sm:$0xff]  }
 0x418   : > { %9439 = vmatpush3.bf16.msra.mxu0 %v9847_v60  ;;  %9394 = vmatprep.mubr.msk.bf16.mxu0 %vm9882_vm4, %v13476_v16 }
 0x419   : > { %9440 = vmatprep.subr.bf16.mxu0 %v13476_v16 }
 0x41a   : > { %9525 = vmatpush3.bf16.msra.mxu1 %v9851_v47 }
 0x41b   : > { %9526 = vmatprep.subr.bf16.mxu1 %v13476_v16 }
 0x41c   : > { %9441 = vmatpush3.bf16.msra.mxu0 %v9848_v17 }
 0x41d   : > { %9479 = vmatmul.mubr.msk.bf16.gmra.mxu1 %vm5844_vm7, %v12836_v52  ;;  %9442 = vmatprep.subr.bf16.mxu0 %v13476_v16  ;;  %v9852_v52 = vld [vmem:[%s13405_s3 + $0x60] sm:$0xff]  }
 0x41e   : > { %9482 = vmatprep.mubr.msk.bf16.mxu1 %vm9882_vm4, %v13476_v16  ;;  %9527 = vmatpush3.bf16.msra.mxu1 %v9853_v59 }
 0x41f   : > { %9395 = vmatmul.mubr.msk.bf16.gmra.mxu0 %vm5844_vm7, %v12755_v62  ;;  %9528 = vmatprep.subr.bf16.mxu1 %v13476_v16  ;;  %v9858_v62 = vld [vmem:[%s13405_s3 + $0x118] sm:$0xff]  }
 0x420   : > { %9398 = vmatprep.mubr.msk.bf16.mxu0 %vm9882_vm4, %v13476_v16  ;;  %9443 = vmatpush3.bf16.msra.mxu0 %v9849_v49 }
 0x421   : > { %9444 = vmatprep.subr.bf16.mxu0 %v13476_v16 }
 0x422   : > { %9529 = vmatpush3.bf16.msra.mxu1 %v9854_v8 }
 0x423   : > { %9578 = vmatprep.subr.bf16.mxu1 %v13476_v16 }
 0x424   : > { %9445 = vmatpush3.bf16.msra.mxu0 %v9852_v52 }
 0x425   : > { %9483 = vmatmul.mubr.msk.bf16.gmra.mxu1 %vm5844_vm7, %v12893_v11  ;;  %9494 = vmatprep.subr.bf16.mxu0 %v13476_v16  ;;  %v9861_v11 = vld [vmem:[%s13405_s3 + $0x108] sm:$0xff]  }
 0x426   : > { %9486 = vmatprep.mubr.msk.bf16.mxu1 %vm9882_vm4, %v13476_v16 }
 0x427   : > { %9399 = vmatmul.mubr.msk.bf16.gmra.mxu0 %vm5844_vm7, %v12790_v9  ;;  %v9855_v9 = vld [vmem:[%s13405_s3 + $0xb8] sm:$0xff]  }
 0x428   : > { %9402 = vmatprep.mubr.msk.bf16.mxu0 %vm9882_vm4, %v13476_v16 }
 0x42d   : > { %9487 = vmatmul.mubr.msk.bf16.gmra.mxu1 %vm5844_vm7, %v12940_v42 }
 0x42e   : > { %9490 = vmatprep.mubr.msk.bf16.mxu1 %vm9882_vm4, %v13476_v16 }
 0x42f   : > { %9403 = vmatmul.mubr.msk.bf16.gmra.mxu0 %vm5844_vm7, %v12856_v3  ;;  %v9859_v3 = vld [vmem:[%s13405_s3 + $0x110] sm:$0xff]  }
 0x430   : > { %9406 = vmatprep.mubr.msk.bf16.mxu0 %vm9882_vm4, %v13476_v16 }
 0x435   : > { %9491 = vmatmul.mubr.msk.bf16.gmra.mxu1 %vm5844_vm7, %v12976_v6 }
 0x436   : > { %9530 = vmatprep.mubr.msk.bf16.mxu1 %vm9882_vm4, %v13476_v16 }
 0x437   : > { %9407 = vmatmul.mubr.msk.bf16.gmra.mxu0 %vm5844_vm7, %v12914_v0  ;;  %v9862_v0 = vld [vmem:[%s13405_s3 + $0x100] sm:$0xff]  }
 0x438   : > { %9446 = vmatprep.mubr.msk.bf16.mxu0 %vm9882_vm4, %v13476_v16 }
 0x43d   : > { %9531 = vmatmul.mubr.msk.bf16.vlgmr.msra.gmra.mxu1 %vm5844_vm7, %v12839_v28  ;;  %v9856_v28 = vld [vmem:[%s13405_s3 + $0xb0] sm:$0xff]  }
 0x43e   : > { %9534 = vmatprep.mubr.msk.bf16.mxu1 %vm9882_vm4, %v13476_v16  ;;  %9579 = vmatpush3.bf16.msra.mxu1 %v9858_v62 }
 0x43f   : > { %9447 = vmatmul.mubr.msk.bf16.vlgmr.msra.gmra.mxu0 %vm5844_vm7, %v12802_v27  ;;  %9580 = vmatprep.subr.bf16.mxu1 %v13476_v16  ;;  %v9857_v27 = vld [vmem:[%s13405_s3 + $0xa8] sm:$0xff]  }
 0x440   : > { %9495 = vmatpush3.bf16.msra.mxu0 %v9855_v9  ;;  %9450 = vmatprep.mubr.msk.bf16.mxu0 %vm9882_vm4, %v13476_v16 }
 0x441   : > { %9496 = vmatprep.subr.bf16.mxu0 %v13476_v16 }
 0x442   : > { %9581 = vmatpush3.bf16.msra.mxu1 %v9859_v3 }
 0x443   : > { %9582 = vmatprep.subr.bf16.mxu1 %v13476_v16 }
 0x444   : > { %9497 = vmatpush3.bf16.msra.mxu0 %v9856_v28 }
 0x445   : > { %9535 = vmatmul.mubr.msk.bf16.gmra.mxu1 %vm5844_vm7, %v12896_v21  ;;  %9498 = vmatprep.subr.bf16.mxu0 %v13476_v16  ;;  %v9860_v21 = vld [vmem:[%s13405_s3 + $0xa0] sm:$0xff]  }
 0x446   : > { %9538 = vmatprep.mubr.msk.bf16.mxu1 %vm9882_vm4, %v13476_v16  ;;  %9583 = vmatpush3.bf16.msra.mxu1 %v9861_v11 }
 0x447   : > { %9451 = vmatmul.mubr.msk.bf16.gmra.mxu0 %vm5844_vm7, %v12868_v56  ;;  %9584 = vmatprep.subr.bf16.mxu1 %v13476_v16  ;;  %v9863_v56 = vld [vmem:[%s13405_s3 + $0xf8] sm:$0xff]  }
 0x448   : > { %9454 = vmatprep.mubr.msk.bf16.mxu0 %vm9882_vm4, %v13476_v16  ;;  %9499 = vmatpush3.bf16.msra.mxu0 %v9857_v27 }
 0x449   : > { %9500 = vmatprep.subr.bf16.mxu0 %v13476_v16 }
 0x44a   : > { %9585 = vmatpush3.bf16.msra.mxu1 %v9862_v0 }
 0x44c   : > { %9501 = vmatpush3.bf16.msra.mxu0 %v9860_v21 }
 0x44d   : > { %9539 = vmatmul.mubr.msk.bf16.gmra.mxu1 %vm5844_vm7, %v12943_v33  ;;  %9550 = vmatprep.subr.bf16.mxu0 %v13476_v16 }
 0x44e   : > { %9542 = vmatprep.mubr.msk.bf16.mxu1 %vm9882_vm4, %v13476_v16 }
 0x44f   : > { %9455 = vmatmul.mubr.msk.bf16.gmra.mxu0 %vm5844_vm7, %v12921_v20  ;;  %v9864_v20 = vld [vmem:[%s13405_s3 + $0xf0] sm:$0xff]  }
 0x450   : > { %9458 = vmatprep.mubr.msk.bf16.mxu0 %vm9882_vm4, %v13476_v16 }
 0x455   : > { %9543 = vmatmul.mubr.msk.bf16.gmra.mxu1 %vm5844_vm7, %v12979_v32 }
 0x456   : > { %9546 = vmatprep.mubr.msk.bf16.mxu1 %vm9882_vm4, %v13476_v16 }
 0x457   : > { %9459 = vmatmul.mubr.msk.bf16.gmra.mxu0 %vm5844_vm7, %v12966_v31 }
 0x458   : > { %9462 = vmatprep.mubr.msk.bf16.mxu0 %vm9882_vm4, %v13476_v16 }
 0x45d   : > { %9547 = vmatmul.mubr.msk.bf16.gmra.mxu1 %vm5844_vm7, %v12991_v44 }
 0x45e   : > { %9586 = vmatprep.mubr.msk.bf16.mxu1 %vm9882_vm4, %v13476_v16 }
 0x45f   : > { %9463 = vmatmul.mubr.msk.bf16.gmra.mxu0 %vm5844_vm7, %v12997_v57 }
 0x460   : > { %9502 = vmatprep.mubr.msk.bf16.mxu0 %vm9882_vm4, %v13476_v16 }
 0x465   : > { %9587 = vmatmul.mubr.msk.bf16.vlgmr.msra.gmra.mxu1 %vm5844_vm7, %v12843_v7  ;;  %v9865_v7 = vld [vmem:[%s13405_s3 + $0xe8] sm:$0xff]  }
 0x466   : > { %9590 = vmatprep.mubr.msk.bf16.mxu1 %vm9882_vm4, %v13476_v16 }
 0x467   : > { %9503 = vmatmul.mubr.msk.bf16.vlgmr.msra.gmra.mxu0 %vm5844_vm7, %v12806_v2  ;;  %v9866_v2 = vld [vmem:[%s13405_s3 + $0xe0] sm:$0xff]  }
 0x468   : > { %9551 = vmatpush3.bf16.msra.mxu0 %v9863_v56  ;;  %9506 = vmatprep.mubr.msk.bf16.mxu0 %vm9882_vm4, %v13476_v16 }
 0x469   : > { %9552 = vmatprep.subr.bf16.mxu0 %v13476_v16 }
 0x46c   : > { %9553 = vmatpush3.bf16.msra.mxu0 %v9864_v20 }
 0x46d   : > { %9591 = vmatmul.mubr.msk.bf16.gmra.mxu1 %vm5844_vm7, %v12900_v45  ;;  %9554 = vmatprep.subr.bf16.mxu0 %v13476_v16 }
 0x46e   : > { %9594 = vmatprep.mubr.msk.bf16.mxu1 %vm9882_vm4, %v13476_v16 }
 0x46f   : > { %9507 = vmatmul.mubr.msk.bf16.gmra.mxu0 %vm5844_vm7, %v12910_v55 }
 0x470   : > { %9510 = vmatprep.mubr.msk.bf16.mxu0 %vm9882_vm4, %v13476_v16  ;;  %9555 = vmatpush3.bf16.msra.mxu0 %v9865_v7 }
 0x471   : > { %9556 = vmatprep.subr.bf16.mxu0 %v13476_v16 }
 0x474   : > { %9557 = vmatpush3.bf16.msra.mxu0 %v9866_v2 }
 0x475   : > { %9595 = vmatmul.mubr.msk.bf16.gmra.mxu1 %vm5844_vm7, %v12946_v26 }
 0x476   : > { %9598 = vmatprep.mubr.msk.bf16.mxu1 %vm9882_vm4, %v13476_v16 }
 0x477   : > { %9511 = vmatmul.mubr.msk.bf16.gmra.mxu0 %vm5844_vm7, %v12955_v14 }
 0x478   : > { %9514 = vmatprep.mubr.msk.bf16.mxu0 %vm9882_vm4, %v13476_v16 }
 0x47d   : > { %9599 = vmatmul.mubr.msk.bf16.gmra.mxu1 %vm5844_vm7, %v12983_v22 }
 0x47e   : > { %9602 = vmatprep.mubr.msk.bf16.mxu1 %vm9882_vm4, %v13476_v16 }
 0x47f   : > { %9515 = vmatmul.mubr.msk.bf16.gmra.mxu0 %vm5844_vm7, %v12970_v1 }
 0x480   : > { %9518 = vmatprep.mubr.msk.bf16.mxu0 %vm9882_vm4, %v13476_v16 }
 0x485   : > { %9603 = vmatmul.mubr.msk.bf16.gmra.mxu1 %vm5844_vm7, %v12994_v37 }
 0x487   : > { %9519 = vmatmul.mubr.msk.bf16.gmra.mxu0 %vm5844_vm7, %v13000_v25 }
 0x488   : > { %9558 = vmatprep.mubr.msk.bf16.mxu0 %vm9882_vm4, %v13476_v16 }
 0x48f   : > { %9559 = vmatmul.mubr.msk.bf16.vlgmr.msra.gmra.mxu0 %vm5844_vm7, %v12963_v58 }
 0x490   : > { %9562 = vmatprep.mubr.msk.bf16.mxu0 %vm9882_vm4, %v13476_v16 }
 0x497   : > { %9563 = vmatmul.mubr.msk.bf16.gmra.mxu0 %vm5844_vm7, %v12973_v50 }
 0x498   : > { %9566 = vmatprep.mubr.msk.bf16.mxu0 %vm9882_vm4, %v13476_v16 }
 0x49f   : > { %9567 = vmatmul.mubr.msk.bf16.gmra.mxu0 %vm5844_vm7, %v13003_v30 }
 0x4a0   : > { %9570 = vmatprep.mubr.msk.bf16.mxu0 %vm9882_vm4, %v13476_v16 }
 0x4a7   : > { %9571 = vmatmul.mubr.msk.bf16.gmra.mxu0 %vm5844_vm7, %v13014_v24 }
 0x4a8   : > { %9574 = vmatprep.mubr.msk.bf16.mxu0 %vm9882_vm4, %v13476_v16  ;;  %vm7077_vm4 = vmand %vm7075_vm0, %vm7076_vm1 }
 0x4ad   : > { %v6128_v45 = vpop.f32.mrf.mxu1 }
 0x4af   : > { %v5894_v55 = vpop.f32.mrf.mxu0  ;;  %v9420_v42 = vpop.f32.mrf.mxu1  ;;  %9575 = vmatmul.mubr.msk.bf16.gmra.mxu0 %vm5844_vm7, %v13017_v36  ;;  %vm13347_vm7 = vmor %vm4700_vm6, %vm7067_vm3  ;;  %vm7107_vm6 = vsmask.f32 7946 }
 0x4b0   : > { %vm7108_vm11 = vmand %vm7106_vm2, %vm7107_vm6 }
 0x4b1   : > { %v9364_v33 = vpop.f32.mrf.mxu0  ;;  %v6131_v26 = vpop.f32.mrf.mxu1 }
 0x4b3   : > { %v5897_v14 = vpop.f32.mrf.mxu0  ;;  %v9421_v58 = vpop.f32.mrf.mxu1 }
 0x4b5   : > { %v9365_v31 = vpop.f32.mrf.mxu0  ;;  %v6136_v35 = vpop.f32.mrf.mxu1 }
 0x4b7   : > { %v5902_v40 = vpop.f32.mrf.mxu0  ;;  %v9424_v5 = vpop.f32.mrf.mxu1 }
 0x4b9   : > { %v9368_v41 = vpop.f32.mrf.mxu0  ;;  %v6139_v4 = vpop.f32.mrf.mxu1 }
 0x4bb   : > { %v5905_v1 = vpop.f32.mrf.mxu0  ;;  %v9425_v50 = vpop.f32.mrf.mxu1 }
 0x4bd   : > { %v9369_v29 = vpop.f32.mrf.mxu0  ;;  %v6144_v16 = vpop.f32.mrf.mxu1 }
 0x4bf   : > { %v5910_v6 = vpop.f32.mrf.mxu0  ;;  %v9428_v32 = vpop.f32.mrf.mxu1 }
 0x4c1   : > { %v9372_v53 = vpop.f32.mrf.mxu0  ;;  %v6147_v61 = vpop.f32.mrf.mxu1 }
 0x4c3   : > { %v5913_v22 = vpop.f32.mrf.mxu0  ;;  %v9429_v34 = vpop.f32.mrf.mxu1 }
 0x4c5   : > { %v9373_v46 = vpop.f32.mrf.mxu0  ;;  %v6152_v19 = vpop.f32.mrf.mxu1 }
 0x4c7   : > { %v5918_v48 = vpop.f32.mrf.mxu0  ;;  %v9432_v51 = vpop.f32.mrf.mxu1 }
 0x4c9   : > { %v9376_v13 = vpop.f32.mrf.mxu0  ;;  %v6155_v12 = vpop.f32.mrf.mxu1 }
 0x4cb   : > { %v5921_v10 = vpop.f32.mrf.mxu0  ;;  %v9433_v39 = vpop.f32.mrf.mxu1 }
 0x4cd   : > { %v9377_v18 = vpop.f32.mrf.mxu0  ;;  %v6160_v15 = vpop.f32.mrf.mxu1 }
 0x4cf   : > { %v5926_v63 = vpop.f32.mrf.mxu0  ;;  %v9436_v44 = vpop.f32.mrf.mxu1 }
 0x4d1   : > { %v9380_v37 = vpop.f32.mrf.mxu0  ;;  %v13225_v57 = vpop.f32.mrf.mxu1 }
 0x4d3   : > { %v5929_v25 = vpop.f32.mrf.mxu0  ;;  %v9437_v30 = vpop.f32.mrf.mxu1 }
 0x4d5   : > { %v9381_v38 = vpop.f32.mrf.mxu0  ;;  %v13227_v54 = vpop.f32.mrf.mxu1 }
 0x4d7   : > { %v6001_v23 = vpop.f32.mrf.mxu0  ;;  %v9476_v43 = vpop.f32.mrf.mxu1 }
 0x4d8   : > { %v6002_v60 = vadd.f32 %v6001_v23, %v5894_v55 }
 0x4d9   : > { %v9392_v24 = vpop.f32.mrf.mxu0  ;;  %v13229_v36 = vpop.f32.mrf.mxu1 }
 0x4da   : > { %v6167_v47 = vadd.f32 %v6128_v45, %v6002_v60 }
 0x4db   : > { %v6004_v17 = vpop.f32.mrf.mxu0  ;;  %v9477_v59 = vpop.f32.mrf.mxu1 }
 0x4dc   : > { %v6005_v49 = vadd.f32 %v6004_v17, %v5897_v14 }
 0x4dd   : > { %v9393_v8 = vpop.f32.mrf.mxu0  ;;  %v13231_v52 = vpop.f32.mrf.mxu1 }
 0x4de   : > { %v6168_v62 = vadd.f32 %v6131_v26, %v6005_v49 }
 0x4df   : > { %v6009_v9 = vpop.f32.mrf.mxu0  ;;  %v9480_v3 = vpop.f32.mrf.mxu1 }
 0x4e0   : > { %v6010_v28 = vadd.f32 %v6009_v9, %v5902_v40 }
 0x4e1   : > { %v9396_v11 = vpop.f32.mrf.mxu0  ;;  %v13233_v27 = vpop.f32.mrf.mxu1 }
 0x4e2   : > { %v6169_v0 = vadd.f32 %v6136_v35, %v6010_v28 }
 0x4e3   : > { %v6012_v21 = vpop.f32.mrf.mxu0  ;;  %v9481_v56 = vpop.f32.mrf.mxu1 }
 0x4e4   : > { %v6013_v20 = vadd.f32 %v6012_v21, %v5905_v1 }
 0x4e5   : > { %v9397_v7 = vpop.f32.mrf.mxu0  ;;  %v13235_v2 = vpop.f32.mrf.mxu1 }
 0x4e6   : > { %v6170_v45 = vadd.f32 %v6139_v4, %v6013_v20 }
 0x4e7   : > { %v6017_v55 = vpop.f32.mrf.mxu0  ;;  %v9484_v42 = vpop.f32.mrf.mxu1 }
 0x4e8   : > { %v6018_v33 = vadd.f32 %v6017_v55, %v5910_v6 }
 0x4e9   : > { %v9400_v14 = vpop.f32.mrf.mxu0  ;;  %v13237_v58 = vpop.f32.mrf.mxu1 }
 0x4ea   : > { %v6171_v26 = vadd.f32 %v6144_v16, %v6018_v33 }
 0x4eb   : > { %v6020_v31 = vpop.f32.mrf.mxu0  ;;  %v9485_v40 = vpop.f32.mrf.mxu1 }
 0x4ec   : > { %v6021_v5 = vadd.f32 %v6020_v31, %v5913_v22 }
 0x4ed   : > { %v9401_v41 = vpop.f32.mrf.mxu0  ;;  %v13239_v50 = vpop.f32.mrf.mxu1 }
 0x4ee   : > { %v6172_v35 = vadd.f32 %v6147_v61, %v6021_v5 }
 0x4ef   : > { %v6025_v29 = vpop.f32.mrf.mxu0  ;;  %v9488_v1 = vpop.f32.mrf.mxu1 }
 0x4f0   : > { %v6026_v32 = vadd.f32 %v6025_v29, %v5918_v48 }
 0x4f1   : > { %v9404_v53 = vpop.f32.mrf.mxu0  ;;  %v13241_v34 = vpop.f32.mrf.mxu1 }
 0x4f2   : > { %v6173_v4 = vadd.f32 %v6152_v19, %v6026_v32 }
 0x4f3   : > { %v6028_v46 = vpop.f32.mrf.mxu0  ;;  %v9489_v6 = vpop.f32.mrf.mxu1 }
 0x4f4   : > { %v6029_v51 = vadd.f32 %v6028_v46, %v5921_v10 }
 0x4f5   : > { %v9405_v13 = vpop.f32.mrf.mxu0  ;;  %v13243_v39 = vpop.f32.mrf.mxu1 }
 0x4f6   : > { %v6174_v16 = vadd.f32 %v6155_v12, %v6029_v51 }
 0x4f7   : > { %v6033_v18 = vpop.f32.mrf.mxu0  ;;  %v9492_v22 = vpop.f32.mrf.mxu1 }
 0x4f8   : > { %v6034_v44 = vadd.f32 %v6033_v18, %v5926_v63 }
 0x4f9   : > { %v9408_v37 = vpop.f32.mrf.mxu0  ;;  %v13245_v30 = vpop.f32.mrf.mxu1 }
 0x4fa   : > { %v6175_v61 = vadd.f32 %v6160_v15, %v6034_v44 }
 0x4fb   : > { %v6036_v38 = vpop.f32.mrf.mxu0  ;;  %v9493_v48 = vpop.f32.mrf.mxu1 }
 0x4fc   : > { %v6037_v23 = vadd.f32 %v6036_v38, %v5929_v25 }
 0x4fd   : > { %v9409_v43 = vpop.f32.mrf.mxu0  ;;  %v13247_v60 = vpop.f32.mrf.mxu1 }
 0x4fe   : > { %v6176_v19 = vadd.f32 %v13225_v57, %v6037_v23 }
 0x4ff   : > { %v6278_v10 = vpop.f32.mrf.mxu0  ;;  %v9532_v24 = vpop.f32.mrf.mxu1 }
 0x500   : > { %v6317_v17 = vadd.f32 %v6278_v10, %v6167_v47 }
 0x501   : > { %v9448_v59 = vpop.f32.mrf.mxu0  ;;  %v13250_v12 = vpop.f32.mrf.mxu1 }
 0x502   : > { %v6451_v63 = vadd.f32 %v13227_v54, %v6317_v17 }
 0x503   : > { %v6281_v49 = vpop.f32.mrf.mxu0  ;;  %v9533_v8 = vpop.f32.mrf.mxu1 }
 0x504   : > { %v6318_v9 = vadd.f32 %v6281_v49, %v6168_v62 }
 0x505   : > { %v9449_v15 = vpop.f32.mrf.mxu0  ;;  %v13253_v3 = vpop.f32.mrf.mxu1 }
 0x506   : > { %v6452_v25 = vadd.f32 %v13229_v36, %v6318_v9 }
 0x507   : > { %v6286_v28 = vpop.f32.mrf.mxu0  ;;  %v9536_v11 = vpop.f32.mrf.mxu1 }
 0x508   : > { %v6319_v21 = vadd.f32 %v6286_v28, %v6169_v0 }
 0x509   : > { %v9452_v57 = vpop.f32.mrf.mxu0  ;;  %v13256_v56 = vpop.f32.mrf.mxu1 }
 0x50a   : > { %v6453_v47 = vadd.f32 %v13231_v52, %v6319_v21 }
 0x50b   : > { %v6289_v20 = vpop.f32.mrf.mxu0  ;;  %v9537_v7 = vpop.f32.mrf.mxu1 }
 0x50c   : > { %v6320_v55 = vadd.f32 %v6289_v20, %v6170_v45 }
 0x50d   : > { %v9453_v54 = vpop.f32.mrf.mxu0  ;;  %v13259_v42 = vpop.f32.mrf.mxu1 }
 0x50e   : > { %v6454_v62 = vadd.f32 %v13233_v27, %v6320_v55 }
 0x50f   : > { %v6294_v33 = vpop.f32.mrf.mxu0  ;;  %v9540_v14 = vpop.f32.mrf.mxu1 }
 0x510   : > { %v6321_v31 = vadd.f32 %v6294_v33, %v6171_v26 }
 0x511   : > { %v9456_v36 = vpop.f32.mrf.mxu0  ;;  %v13262_v40 = vpop.f32.mrf.mxu1 }
 0x512   : > { %v6455_v0 = vadd.f32 %v13235_v2, %v6321_v31 }
 0x513   : > { %v6297_v5 = vpop.f32.mrf.mxu0  ;;  %v9541_v41 = vpop.f32.mrf.mxu1 }
 0x514   : > { %v6322_v29 = vadd.f32 %v6297_v5, %v6172_v35 }
 0x515   : > { %v9457_v52 = vpop.f32.mrf.mxu0  ;;  %v13265_v1 = vpop.f32.mrf.mxu1 }
 0x516   : > { %v6456_v45 = vadd.f32 %v13237_v58, %v6322_v29 }
 0x517   : > { %v6302_v32 = vpop.f32.mrf.mxu0  ;;  %v9544_v53 = vpop.f32.mrf.mxu1 }
 0x518   : > { %v6323_v46 = vadd.f32 %v6302_v32, %v6173_v4 }
 0x519   : > { %v9460_v27 = vpop.f32.mrf.mxu0  ;;  %v13268_v6 = vpop.f32.mrf.mxu1 }
 0x51a   : > { %v6457_v26 = vadd.f32 %v13239_v50, %v6323_v46 }
 0x51b   : > { %v6305_v51 = vpop.f32.mrf.mxu0  ;;  %v9545_v13 = vpop.f32.mrf.mxu1 }
 0x51c   : > { %v6324_v18 = vadd.f32 %v6305_v51, %v6174_v16 }
 0x51d   : > { %v9461_v2 = vpop.f32.mrf.mxu0  ;;  %v13271_v22 = vpop.f32.mrf.mxu1 }
 0x51e   : > { %v6458_v35 = vadd.f32 %v13241_v34, %v6324_v18 }
 0x51f   : > { %v6310_v44 = vpop.f32.mrf.mxu0  ;;  %v9548_v37 = vpop.f32.mrf.mxu1 }
 0x520   : > { %v6325_v38 = vadd.f32 %v6310_v44, %v6175_v61 }
 0x521   : > { %v9464_v58 = vpop.f32.mrf.mxu0  ;;  %v13274_v48 = vpop.f32.mrf.mxu1 }
 0x522   : > { %v6459_v4 = vadd.f32 %v13243_v39, %v6325_v38 }
 0x523   : > { %v6313_v23 = vpop.f32.mrf.mxu0  ;;  %v9549_v43 = vpop.f32.mrf.mxu1 }
 0x524   : > { %v6326_v10 = vadd.f32 %v6313_v23, %v6176_v19 }
 0x525   : > { %v9465_v50 = vpop.f32.mrf.mxu0  ;;  %v13277_v24 = vpop.f32.mrf.mxu1 }
 0x526   : > { %v6460_v16 = vadd.f32 %v13245_v30, %v6326_v10 }
 0x527   : > { %v6558_v17 = vpop.f32.mrf.mxu0  ;;  %v9588_v59 = vpop.f32.mrf.mxu1 }
 0x528   : > { %v6597_v49 = vadd.f32 %v6558_v17, %v6451_v63 }
 0x529   : > { %v9504_v34 = vpop.f32.mrf.mxu0  ;;  %v13280_v8 = vpop.f32.mrf.mxu1 }
 0x52a   : > { %v6732_v61 = vadd.f32 %v13247_v60, %v6597_v49 }
 0x52b   : > { %v6561_v9 = vpop.f32.mrf.mxu0  ;;  %v9589_v15 = vpop.f32.mrf.mxu1 }
 0x52c   : > { %v6598_v28 = vadd.f32 %v6561_v9, %v6452_v25 }
 0x52d   : > { %v9505_v39 = vpop.f32.mrf.mxu0  ;;  %v13283_v11 = vpop.f32.mrf.mxu1 }
 0x52e   : > { %v6733_v19 = vadd.f32 %v13250_v12, %v6598_v28  ;;  %v7058_v28 = vld [vmem:[%s13332_s14] sm:$0xf] }
 0x52f   : > { %v6566_v21 = vpop.f32.mrf.mxu0  ;;  %v9592_v57 = vpop.f32.mrf.mxu1 }
 0x530   : > { %v6599_v20 = vadd.f32 %v6566_v21, %v6453_v47 }
 0x531   : > { %v9508_v30 = vpop.f32.mrf.mxu0  ;;  %v13286_v7 = vpop.f32.mrf.mxu1 }
 0x532   : > { %v6734_v63 = vadd.f32 %v13253_v3, %v6599_v20 }
 0x533   : > { %v6569_v55 = vpop.f32.mrf.mxu0  ;;  %v9593_v54 = vpop.f32.mrf.mxu1 }
 0x534   : > { %v6600_v33 = vadd.f32 %v6569_v55, %v6454_v62 }
 0x535   : > { %v9509_v60 = vpop.f32.mrf.mxu0  ;;  %v13289_v14 = vpop.f32.mrf.mxu1 }
 0x536   : > { %v13292_v25 = vadd.f32 %v13256_v56, %v6600_v33 }
 0x537   : > { %v6574_v31 = vpop.f32.mrf.mxu0  ;;  %v9596_v36 = vpop.f32.mrf.mxu1 }
 0x538   : > { %v6601_v12 = vadd.f32 %v6574_v31, %v6455_v0 }
 0x539   : > { %v9512_v5 = vpop.f32.mrf.mxu0  ;;  %v13294_v41 = vpop.f32.mrf.mxu1 }
 0x53a   : > { %v13297_v47 = vadd.f32 %v13259_v42, %v6601_v12 }
 0x53b   : > { %v6577_v29 = vpop.f32.mrf.mxu0  ;;  %v9597_v3 = vpop.f32.mrf.mxu1 }
 0x53c   : > { %v6602_v52 = vadd.f32 %v6577_v29, %v6456_v45 }
 0x53d   : > { %v9513_v32 = vpop.f32.mrf.mxu0  ;;  %v13299_v62 = vpop.f32.mrf.mxu1 }
 0x53e   : > { %v13302_v53 = vadd.f32 %v13262_v40, %v6602_v52 }
 0x53f   : > { %v6582_v56 = vpop.f32.mrf.mxu0  ;;  %v9600_v46 = vpop.f32.mrf.mxu1 }
 0x540   : > { %v6603_v27 = vadd.f32 %v6582_v56, %v6457_v26 }
 0x541   : > { %v9516_v51 = vpop.f32.mrf.mxu0  ;;  %v13304_v0 = vpop.f32.mrf.mxu1 }
 0x542   : > { %v13307_v13 = vadd.f32 %v13265_v1, %v6603_v27 }
 0x543   : > { %v6585_v42 = vpop.f32.mrf.mxu0  ;;  %v9601_v18 = vpop.f32.mrf.mxu1 }
 0x544   : > { %v6604_v2 = vadd.f32 %v6585_v42, %v6458_v35 }
 0x545   : > { %v9517_v45 = vpop.f32.mrf.mxu0  ;;  %v13309_v44 = vpop.f32.mrf.mxu1 }
 0x546   : > { %v13312_v37 = vadd.f32 %v13268_v6, %v6604_v2 }
 0x547   : > { %v6590_v40 = vpop.f32.mrf.mxu0  ;;  %v9604_v38 = vpop.f32.mrf.mxu1 }
 0x548   : > { %v6605_v58 = vadd.f32 %v6590_v40, %v6459_v4  ;;  %v13326_v4 = vld [vmem:[%s13408_s6] ss:$0 sm:$0xff] }
 0x549   : > { %v9520_v26 = vpop.f32.mrf.mxu0  ;;  %v13314_v23 = vpop.f32.mrf.mxu1 }
 0x54a   : > { %v13317_v43 = vadd.f32 %v13271_v22, %v6605_v58 }
 0x54b   : > { %v6593_v1 = vpop.f32.mrf.mxu0  ;;  %v9605_v10 = vpop.f32.mrf.mxu1 }
 0x54c   : > { %v6606_v50 = vadd.f32 %v6593_v1, %v6460_v16 }
 0x54d   : > { %v9521_v35 = vpop.f32.mrf.mxu0 }
 0x54e   : > { %v13320_v17 = vadd.f32 %v13274_v48, %v6606_v50 }
 0x54f   : > { %v6844_v59 = vpop.f32.mrf.mxu0 }
 0x550   : > { %v6883_v6 = vadd.f32 %v6844_v59, %v6732_v61 }
 0x551   : > { %v9560_v49 = vpop.f32.mrf.mxu0 }
 0x552   : > { %v7017_v34 = vadd.f32 %v13277_v24, %v6883_v6 }
 0x553   : > { %v6847_v22 = vpop.f32.mrf.mxu0 }
 0x554   : > { %v7034_v48 = vadd.f32 %v13326_v4, %v7017_v34  ;;  %v6884_v16 = vadd.f32 %v6847_v22, %v6733_v19 }
 0x555   : > { %v9561_v61 = vpop.f32.mrf.mxu0 }
 0x556   : > { %v7044_v9 = vmax.f32 %v7034_v48, 0.0  ;;  %v7018_v15 = vadd.f32 %v13280_v8, %v6884_v16 }
 0x557   : > { %v6852_v24 = vpop.f32.mrf.mxu0 }
 0x558   : > { %v7054_v39 = vpack.c.bf16 %v7044_v9, %v7044_v9  ;;  %v7035_v21 = vadd.f32 %v13326_v4, %v7018_v15  ;;  %v6885_v57 = vadd.f32 %v6852_v24, %v6734_v63 }
 0x559   : > { %v9564_v20 = vpop.f32.mrf.mxu0 }
 0x55a   : > { %v7059_v30 = vsel %vm7057_vm15, %v7054_v39, %v7058_v28  ;;  %v7045_v55 = vmax.f32 %v7035_v21, 0.0  ;;  %v7019_v54 = vadd.f32 %v13283_v11, %v6885_v57  ;;  %v7126_v28 = vld [vmem:[%s13332_s14 + $0x10] sm:$0x3]  ;;  %vm7161_vm15 = vsmask.f32 256 }
 0x55b   : > { %7060 = vst [vmem:[%s13332_s14] sm:$0xf] %v7059_v30  ;;  %v6855_v33 = vpop.f32.mrf.mxu0  ;;  %vm7162_vm1 = vmand %vm7148_vm14, %vm7161_vm15 }
 0x55c   : > { %v8030_v60 = vpack.c.bf16 %v7045_v55, %v7045_v55  ;;  %v7036_v19 = vadd.f32 %v13326_v4, %v7019_v54  ;;  %v6886_v31 = vadd.f32 %v6855_v33, %v13292_v25 }
 0x55d   : > { %v9565_v8 = vpop.f32.mrf.mxu0 }
 0x55e   : > { %v7069_v36 = vrot.slane %v8030_v60, 6  ;;  %v7046_v12 = vmax.f32 %v7036_v19, 0.0  ;;  %v7020_v63 = vadd.f32 %v13286_v7, %v6886_v31 }
 0x55f   : > { %v6860_v5 = vpop.f32.mrf.mxu0 }
 0x560   : > { %v8031_v11 = vpack.c.bf16 %v7046_v12, %v7046_v12  ;;  %v7037_v29 = vadd.f32 %v13326_v4, %v7020_v63  ;;  %v6887_v25 = vadd.f32 %v6860_v5, %v13297_v47  ;;  %v7070_v32 = vrot.slane %v7069_v36, 4  ;;  %v7095_v47 = vld [vmem:[%s13332_s14 + $0x8] sm:$0x7] }
 0x561   : > { %v9568_v52 = vpop.f32.mrf.mxu0 }
 0x562   : > { %v7078_v7 = vld [vmem:[%s13332_s14] sm:$0x8]  ;;  %v7071_v56 = vrot.slane %v8031_v11, 6  ;;  %7092 = vst.msk [vmem:[%s13332_s14 + $0x4] sm:$0x8] %vm7075_vm0, %v8031_v11  ;;  %v7047_v46 = vmax.f32 %v7037_v29, 0.0  ;;  %v7021_v27 = vadd.f32 %v13289_v14, %v6887_v25  ;;  %vm7144_vm0 = vmand %vm7142_vm9, %vm7143_vm13 }
 0x563   : > { %v7079_v51 = vsel %vm7077_vm4, %v7069_v36, %v7078_v7  ;;  %v6863_v42 = vpop.f32.mrf.mxu0 }
 0x564   : > { %7080 = vst [vmem:[%s13332_s14] sm:$0x8] %v7079_v51  ;;  %v7072_v18 = vsel %vm13347_vm7, %v7070_v32, %v7071_v56  ;;  %v8033_v2 = vpack.c.bf16 %v7047_v46, %v7047_v46  ;;  %v7038_v45 = vadd.f32 %v13326_v4, %v7021_v27  ;;  %v6888_v40 = vadd.f32 %v6863_v42, %v13302_v53 }
 0x565   : > { %7082 = vst.msk [vmem:[%s13332_s14 + $0x4] sm:$0x7] %vm7081_vm5, %v7072_v18  ;;  %v9569_v38 = vpop.f32.mrf.mxu0 }
 0x566   : > { %v7096_v58 = vsel %vm7094_vm8, %v8033_v2, %v7095_v47  ;;  %v7048_v14 = vmax.f32 %v7038_v45, 0.0  ;;  %v7022_v26 = vadd.f32 %v13294_v41, %v6888_v40 }
 0x567   : > { %7097 = vst [vmem:[%s13332_s14 + $0x8] sm:$0x7] %v7096_v58  ;;  %v6868_v1 = vpop.f32.mrf.mxu0 }
 0x568   : > { %v8034_v10 = vpack.c.bf16 %v7048_v14, %v7048_v14  ;;  %v7039_v50 = vadd.f32 %v13326_v4, %v7022_v26  ;;  %v6889_v35 = vadd.f32 %v6868_v1, %v13307_v13 }
 0x569   : > { %v9572_v53 = vpop.f32.mrf.mxu0 }
 0x56a   : > { %v7102_v59 = vrot.slane %v8034_v10, 6  ;;  %v7049_v6 = vmax.f32 %v7039_v50, 0.0  ;;  %v7023_v49 = vadd.f32 %v13299_v62, %v6889_v35 }
 0x56b   : > { %v6871_v41 = vpop.f32.mrf.mxu0 }
 0x56c   : > { %v7103_v34 = vrot.slane %v7102_v59, 4  ;;  %v8035_v22 = vpack.c.bf16 %v7049_v6, %v7049_v6  ;;  %v7040_v48 = vadd.f32 %v13326_v4, %v7023_v49  ;;  %v6890_v13 = vadd.f32 %v6871_v41, %v13312_v37 }
 0x56d   : > { %v9573_v16 = vpop.f32.mrf.mxu0 }
 0x56e   : > { %v7109_v61 = vld [vmem:[%s13332_s14 + $0x8] sm:$0xc]  ;;  %7113 = vst.msk [vmem:[%s13332_s14 + $0xc] sm:$0x3] %vm7112_vm10, %v7103_v34  ;;  %v7050_v9 = vmax.f32 %v7040_v48, 0.0  ;;  %v7024_v62 = vadd.f32 %v13304_v0, %v6890_v13 }
 0x56f   : > { %7123 = vst.msk [vmem:[%s13332_s14 + $0xc] sm:$0xc] %vm7106_vm2, %v8035_v22  ;;  %v7110_v15 = vsel %vm7108_vm11, %v7102_v59, %v7109_v61  ;;  %v6876_v24 = vpop.f32.mrf.mxu0 }
 0x570   : > { %7111 = vst [vmem:[%s13332_s14 + $0x8] sm:$0xc] %v7110_v15  ;;  %v8036_v39 = vpack.c.bf16 %v7050_v9, %v7050_v9  ;;  %v7041_v21 = vadd.f32 %v13326_v4, %v7024_v62  ;;  %v6891_v37 = vadd.f32 %v6876_v24, %v13317_v43 }
 0x571   : > { %v9576_v57 = vpop.f32.mrf.mxu0 }
 0x572   : > { %v7127_v20 = vsel %vm7125_vm12, %v8036_v39, %v7126_v28  ;;  %v7051_v30 = vmax.f32 %v7041_v21, 0.0  ;;  %v7025_v55 = vadd.f32 %v13309_v44, %v6891_v37  ;;  %v8025_v31 = vrot.slane %v8036_v39, 10 }
 0x573   : > { %7128 = vst [vmem:[%s13332_s14 + $0x10] sm:$0x3] %v7127_v20  ;;  %v6879_v54 = vpop.f32.mrf.mxu0 }
 0x574   : > { %v8038_v33 = vpack.c.bf16 %v7051_v30, %v7051_v30  ;;  %v7042_v0 = vadd.f32 %v13326_v4, %v7025_v55  ;;  %v6892_v60 = vadd.f32 %v6879_v54, %v13320_v17 }
 0x575   : > { %v9577_v19 = vpop.f32.mrf.mxu0 }
 0x576   : > { %v7137_v43 = vrot.slane %v8038_v33, 6  ;;  %v7052_v8 = vmax.f32 %v7042_v0, 0.0  ;;  %v7026_v44 = vadd.f32 %v13314_v23, %v6892_v60  ;;  %v7163_v23 = vld [vmem:[%s13332_s14 + $0x18] sm:$0x1] }
 0x578   : > { %v7138_v36 = vsel %vm13347_vm7, %v8025_v31, %v7137_v43  ;;  %v7139_v12 = vrot.slane %v7137_v43, 4  ;;  %v8039_v17 = vpack.c.bf16 %v7052_v8, %v7052_v8  ;;  %v7043_v63 = vadd.f32 %v13326_v4, %v7026_v44 }
 0x57a   : > { %7149 = vst.msk [vmem:[%s13332_s14 + $0x14] sm:$0x1] %vm7148_vm14, %v7139_v12  ;;  %v7145_v5 = vld [vmem:[%s13332_s14 + $0x10] sm:$0xe]  ;;  %v7053_v11 = vmax.f32 %v7043_v63, 0.0 }
 0x57b   : > { %7159 = vst.msk [vmem:[%s13332_s14 + $0x14] sm:$0xe] %vm7142_vm9, %v8039_v17  ;;  %v7146_v29 = vsel %vm7144_vm0, %v7138_v36, %v7145_v5 }
 0x57c   : > { %7147 = vst [vmem:[%s13332_s14 + $0x10] sm:$0xe] %v7146_v29  ;;  %v8040_v25 = vpack.c.bf16 %v7053_v11, %v7053_v11 }
 0x57e   : > { %v7164_v52 = vsel %vm7162_vm1, %v8040_v25, %v7163_v23 }
 0x57f   : > { %7165 = vst [vmem:[%s13332_s14 + $0x18] sm:$0x1] %v7164_v52 }
 0x580 PF: > { %s17_s24 = sadd.s32 1, %s9879_s24  }
 0x581   : > { %p14_p4 = scmp.ge.s32.totalorder %s17_s24, 4  }
 0x583   :  { %16 = sbr.rel (!%p14_p4) target bundleno = 1 (0x1), region = 109 }

</bundles_post_ra>
